<compile_context>
chip_gen: v7x
topology: tpu7x:2x2x1
jax: 0.10.0
libtpu: 0.0.40
codegen_flags: <defaults>
</compile_context>

<pallas_src>
import functools

import jax
import jax.numpy as jnp
from jax import lax
from jax.experimental import pallas as pl
from jax.experimental.pallas import tpu as pltpu


def _rng(shift, n):
    """(dst_start, src_start, length) for a 0 / +-1 shifted interior copy."""
    if shift < 0:
        return 1, 0, n - 1
    if shift > 0:
        return 0, 1, n - 1
    return 0, 0, n


# ----------------------------------------------------------------------------
# Kernel 1 (per batch element): u1 = Pi(u), r = R(f - A1(u)), a2 = A2(u1),
# plus per-sample BatchNorm moment partials.  All convs are single matmuls on
# in-VMEM im2col operands.
# ----------------------------------------------------------------------------
def _mg_restrict_stage1_kernel(
        uph_ref, fph_ref, wa1_ref, wpi_ref, wr_ref, wa2_ref,      # inputs
        u1_ref, r_ref, a2_ref, mom_ref,                           # outputs
        uim_ref, tim_ref, a2im_ref,                               # VMEM scratch
        *, h2, w2, cu, cf, cu2, cf2):
    m2 = h2 * w2

    # ---------------------------------------------------------------- A1 / Pi
    # uim[2a+b, i, j, (3dy+dx)*cu + c] = u_pad[2i+a+dy, 2j+b+dx, c], built from
    # the unpadded u phases.  Only static halo strips are zeroed (positions the
    # scatter below never writes), so there is no full-scratch zero sweep.
    for a in range(2):
        for b in range(2):
            ph = 2 * a + b
            zr = 0 if a == 0 else h2 - 1
            zc = 0 if b == 0 else w2 - 1
            uim_ref[ph, zr:zr + 1, :, :] = jnp.zeros((1, w2, 9 * cu),
                                                     jnp.bfloat16)
            uim_ref[ph, :, zc:zc + 1, :] = jnp.zeros((h2, 1, 9 * cu),
                                                     jnp.bfloat16)
            for dy in range(3):
                ey = a + dy - 1                     # fine-grid row offset
                p, sy = ey % 2, ey // 2             # source phase, +-1 shift
                dr, sr, nr = _rng(sy, h2)
                for dx in range(3):
                    ex = b + dx - 1
                    q, sx = ex % 2, ex // 2
                    dc, sc, nc = _rng(sx, w2)
                    k = 3 * dy + dx
                    uim_ref[ph, dr:dr + nr, dc:dc + nc,
                            k * cu:(k + 1) * cu] = (
                        uph_ref[0, 2 * p + q, sr:sr + nr, sc:sc + nc, :])

    # A1 over all 4 output phases in one [4*m2, 9*cu] x [9*cu, cf] matmul;
    # Pi reuses the phase-(0,0) rows of the same im2col LHS.
    a1_all = jnp.dot(uim_ref[...].reshape(4 * m2, 9 * cu), wa1_ref[...],
                     preferred_element_type=jnp.float32)           # [4*m2, cf]
    u1 = jnp.dot(uim_ref[0].reshape(m2, 9 * cu), wpi_ref[...],
                 preferred_element_type=jnp.float32)               # [m2, cu2]
    u1_ref[...] = u1.reshape(1, h2, w2, cu2)

    # ------------------------------------------------------------------ A2(u1)
    # u1 is still live in VMEM -> no HBM round trip, no second conv kernel.
    a2im_ref[0:1, :, :] = jnp.zeros((1, w2, 9 * cu2), jnp.bfloat16)
    a2im_ref[h2 - 1:h2, :, :] = jnp.zeros((1, w2, 9 * cu2), jnp.bfloat16)
    a2im_ref[:, 0:1, :] = jnp.zeros((h2, 1, 9 * cu2), jnp.bfloat16)
    a2im_ref[:, w2 - 1:w2, :] = jnp.zeros((h2, 1, 9 * cu2), jnp.bfloat16)
    u1_bf = u1.reshape(h2, w2, cu2).astype(jnp.bfloat16)
    for dy in range(3):
        dr, sr, nr = _rng(dy - 1, h2)
        for dx in range(3):
            dc, sc, nc = _rng(dx - 1, w2)
            k = 3 * dy + dx
            a2im_ref[dr:dr + nr, dc:dc + nc, k * cu2:(k + 1) * cu2] = (
                u1_bf[sr:sr + nr, sc:sc + nc, :])
    a2 = jnp.dot(a2im_ref[...].reshape(m2, 9 * cu2), wa2_ref[...],
                 preferred_element_type=jnp.float32)               # [m2, cf2]
    a2_ref[...] = a2.reshape(1, h2, w2, cf2).astype(a2_ref.dtype)

    # ----------------------------------------------------- t = f - A1(u), R(t)
    # t never touches HBM: each t phase is scattered straight into the
    # stride-2 R im2col scratch.
    tim_ref[0:1, :, :] = jnp.zeros((1, w2, 9 * cf), jnp.bfloat16)
    tim_ref[:, 0:1, :] = jnp.zeros((h2, 1, 9 * cf), jnp.bfloat16)
    for a in range(2):
        for b in range(2):
            ph = 2 * a + b
            t_ab = (fph_ref[0, ph].astype(jnp.float32)
                    - a1_all[ph * m2:(ph + 1) * m2].reshape(h2, w2, cf))
            t_ab = t_ab.astype(jnp.bfloat16)
            # t phase (a,b) feeds R tap dy=1 when a==0, and taps dy in {0, 2}
            # (dy=0 with a -1 row shift) when a==1; columns are analogous.
            dys = ((1, 0),) if a == 0 else ((0, -1), (2, 0))
            dxs = ((1, 0),) if b == 0 else ((0, -1), (2, 0))
            for dy, sy in dys:
                dr, sr, nr = _rng(sy, h2)
                for dx, sx in dxs:
                    dc, sc, nc = _rng(sx, w2)
                    k = 3 * dy + dx
                    tim_ref[dr:dr + nr, dc:dc + nc, k * cf:(k + 1) * cf] = (
                        t_ab[sr:sr + nr, sc:sc + nc, :])
    r = jnp.dot(tim_ref[...].reshape(m2, 9 * cf), wr_ref[...],
                preferred_element_type=jnp.float32)                # [m2, cf2]
    r_ref[...] = r.reshape(1, h2, w2, cf2).astype(r_ref.dtype)

    # Per-sample BatchNorm moment partials (f32, reduced across batch in JAX).
    mom_ref[0, 0:1, :] = jnp.sum(r, axis=0, keepdims=True)
    mom_ref[0, 1:2, :] = jnp.sum(r * r, axis=0, keepdims=True)


# ----------------------------------------------------------------------------
# Kernel 2 (per batch element): f' = ReLU(r * scale + shift) + a2
# (pure elementwise finalize; all convs already happened in kernel 1)
# ----------------------------------------------------------------------------
def _mg_restrict_stage2_kernel(r_ref, a2_ref, scale_ref, shift_ref, fout_ref):
    bn = r_ref[...].astype(jnp.float32) * scale_ref[...] + shift_ref[...]
    fout_ref[...] = jnp.maximum(bn, 0.0) + a2_ref[...].astype(jnp.float32)


# ----------------------------------------------------------------------------
# JAX glue: phase decomposition + weight packing
# ----------------------------------------------------------------------------
def _phase_split(x_nhwc):
    """[N,H,W,C] -> [N,4,H/2,W/2,C]; phase 2a+b holds x[:, 2i+a, 2j+b, :]."""
    n, h, w, c = x_nhwc.shape
    x = x_nhwc.reshape(n, h // 2, 2, w // 2, 2, c).transpose(0, 2, 4, 1, 3, 5)
    return x.reshape(n, 4, h // 2, w // 2, c)


def _w_mat(w_oihw, dtype=jnp.bfloat16):
    """PyTorch OIHW 3x3 conv weight -> [9*C_in, C_out], row = (3*dy+dx)*Cin+c."""
    co, ci, kh, kw = w_oihw.shape
    return (jnp.transpose(w_oihw, (2, 3, 1, 0))
            .reshape(kh * kw * ci, co).astype(dtype))


# ----------------------------------------------------------------------------
# MgRestriction forward (Pallas path)
# ----------------------------------------------------------------------------
def mg_restriction_forward(u_nchw, f_nchw, params, eps=1e-5):
    u = jnp.transpose(u_nchw, (0, 2, 3, 1)).astype(jnp.float32)
    f = jnp.transpose(f_nchw, (0, 2, 3, 1)).astype(jnp.float32)
    n, h, w, cu = u.shape
    cf = f.shape[-1]
    cu2 = params["Pi"].shape[0]
    cf2 = params["R"].shape[0]
    assert h % 2 == 0 and w % 2 == 0 and h >= 4 and w >= 4
    h2, w2 = h // 2, w // 2
    m2 = h2 * w2

    # 1x-data phase decompositions; f is carried in bf16 (matmul operands are
    # bf16 anyway, accumulation stays f32) -> halves its HBM traffic.
    uph = _phase_split(u).astype(jnp.bfloat16)        # [N,4,h2,w2,Cu]
    fph = _phase_split(f).astype(jnp.bfloat16)        # [N,4,h2,w2,Cf]

    w_a1 = _w_mat(params["A1"])                       # [9*Cu , Cf ]
    w_pi = _w_mat(params["Pi"])                       # [9*Cu , Cu2]
    w_r = _w_mat(params["R"])                         # [9*Cf , Cf2]
    w_a2 = _w_mat(params["A2"])                       # [9*Cu2, Cf2]

    # VMEM limit from the actual footprint (double-buffered per-step blocks +
    # resident scratches) instead of a blanket 48 MiB -> headroom on v7x 64MiB.
    def lane_pad(c, dt_bytes):
        return ((c + 127) // 128) * 128 * dt_bytes
    block_bytes = (
        4 * h2 * w2 * (lane_pad(cu, 2) + lane_pad(cf, 2))            # uph, fph
        + 9 * cu * (lane_pad(cf, 2) + lane_pad(cu2, 2))              # w_a1, w_pi
        + 9 * cf * lane_pad(cf2, 2) + 9 * cu2 * lane_pad(cf2, 2)     # w_r, w_a2
        + h2 * w2 * (lane_pad(cu2, 4) + 2 * lane_pad(cf2, 2))        # u1, r, a2
        + 8 * lane_pad(cf2, 4))                                      # mom
    scratch_bytes = (4 * h2 * w2 * lane_pad(9 * cu, 2)
                     + h2 * w2 * lane_pad(9 * cf, 2)
                     + h2 * w2 * lane_pad(9 * cu2, 2))
    vmem_limit = int(min(56 << 20,
                         max(8 << 20, 4 * block_bytes + 2 * scratch_bytes)))

    # Batch axis is "parallel" so v7x can shard it across both TensorCores;
    # keep the batch a multiple of 2 there for load balance.
    cparams = pltpu.CompilerParams(
        dimension_semantics=("parallel",),
        vmem_limit_bytes=vmem_limit)

    # ---- kernel 1: u1, r, a2, BN moment partials (grid over batch) ---------
    flops1 = 2 * n * m2 * 9 * (4 * cu * cf + cu * cu2 + cf * cf2 + cu2 * cf2)
    bytes1 = int(uph.size * 2 + fph.size * 2
                 + (w_a1.size + w_pi.size + w_r.size + w_a2.size) * 2
                 + n * m2 * cu2 * 4 + 2 * n * m2 * cf2 * 2 + n * 2 * cf2 * 4)

    kernel1 = functools.partial(_mg_restrict_stage1_kernel,
                                h2=h2, w2=w2, cu=cu, cf=cf, cu2=cu2, cf2=cf2)
    u1, r, a2, mom = pl.pallas_call(
        kernel1,
        grid=(n,),
        in_specs=[
            pl.BlockSpec((1, 4, h2, w2, cu), lambda i: (i, 0, 0, 0, 0)),
            pl.BlockSpec((1, 4, h2, w2, cf), lambda i: (i, 0, 0, 0, 0)),
            pl.BlockSpec((9 * cu, cf), lambda i: (0, 0)),     # resident weights
            pl.BlockSpec((9 * cu, cu2), lambda i: (0, 0)),
            pl.BlockSpec((9 * cf, cf2), lambda i: (0, 0)),
            pl.BlockSpec((9 * cu2, cf2), lambda i: (0, 0)),
        ],
        out_specs=(
            pl.BlockSpec((1, h2, w2, cu2), lambda i: (i, 0, 0, 0)),
            pl.BlockSpec((1, h2, w2, cf2), lambda i: (i, 0, 0, 0)),
            pl.BlockSpec((1, h2, w2, cf2), lambda i: (i, 0, 0, 0)),
            pl.BlockSpec((1, 2, cf2), lambda i: (i, 0, 0)),
        ),
        out_shape=(
            jax.ShapeDtypeStruct((n, h2, w2, cu2), jnp.float32),   # u1 (returned)
            jax.ShapeDtypeStruct((n, h2, w2, cf2), jnp.bfloat16),  # r  (bf16 carry)
            jax.ShapeDtypeStruct((n, h2, w2, cf2), jnp.bfloat16),  # a2 (bf16 carry)
            jax.ShapeDtypeStruct((n, 2, cf2), jnp.float32),        # BN moments
        ),
        scratch_shapes=[
            pltpu.VMEM((4, h2, w2, 9 * cu), jnp.bfloat16),    # A1/Pi im2col
            pltpu.VMEM((h2, w2, 9 * cf), jnp.bfloat16),       # R     im2col
            pltpu.VMEM((h2, w2, 9 * cu2), jnp.bfloat16),      # A2    im2col
        ],
        compiler_params=cparams,
        cost_estimate=pl.CostEstimate(flops=flops1, transcendentals=0,
                                      bytes_accessed=bytes1),
    )(uph, fph, w_a1, w_pi, w_r, w_a2)

    # ---- BatchNorm2d training-mode statistics (tiny cross-batch reduction) --
    count = n * m2
    sums = jnp.sum(mom, axis=0)                        # [2, Cf2]
    mean = sums[0] / count
    # E[x^2] - E[x]^2 in f32 (fine for zero-ish-mean conv activations);
    # clamped at 0 so rounding can never produce a negative variance.
    var = jnp.maximum(sums[1] / count - mean * mean, 0.0)
    inv = params["gamma"].astype(jnp.float32) * lax.rsqrt(var + eps)
    scale = inv.reshape(1, cf2)
    shift = (params["beta"].astype(jnp.float32) - mean * inv).reshape(1, cf2)
    # TODO(synk): BatchNorm2d running_mean/var buffer updates are not modelled;
    # the forward output only depends on the batch statistics.

    # ---- kernel 2: f' = ReLU(BN(r)) + a2 (elementwise) ----------------------
    flops2 = 4 * n * m2 * cf2
    bytes2 = int(2 * n * m2 * cf2 * 2 + n * m2 * cf2 * 4 + 4 * cf2 * 4)
    f_new = pl.pallas_call(
        _mg_restrict_stage2_kernel,
        grid=(n,),
        in_specs=[
            pl.BlockSpec((1, h2, w2, cf2), lambda i: (i, 0, 0, 0)),
            pl.BlockSpec((1, h2, w2, cf2), lambda i: (i, 0, 0, 0)),
            pl.BlockSpec((1, cf2), lambda i: (0, 0)),
            pl.BlockSpec((1, cf2), lambda i: (0, 0)),
        ],
        out_specs=pl.BlockSpec((1, h2, w2, cf2), lambda i: (i, 0, 0, 0)),
        out_shape=jax.ShapeDtypeStruct((n, h2, w2, cf2), jnp.float32),
        compiler_params=cparams,
        cost_estimate=pl.CostEstimate(flops=flops2, transcendentals=0,
                                      bytes_accessed=bytes2),
    )(r, a2, scale, shift)

    return (jnp.transpose(u1, (0, 3, 1, 2)),
            jnp.transpose(f_new, (0, 3, 1, 2)))


# ----------------------------------------------------------------------------
# Pure-JAX reference (lax.conv) used only as an in-script correctness check
# ----------------------------------------------------------------------------
def _conv_ref(x_nchw, w_oihw, stride):
    return lax.conv_general_dilated(
        x_nchw, w_oihw, window_strides=(stride, stride),
        padding=((1, 1), (1, 1)),
        dimension_numbers=("NCHW", "OIHW", "NCHW"))


def mg_restriction_ref(u, f, params, eps=1e-5):
    u1 = _conv_ref(u, params["Pi"], 2)
    t = f - _conv_ref(u, params["A1"], 1)
    r = _conv_ref(t, params["R"], 2)
    mean = jnp.mean(r, axis=(0, 2, 3), keepdims=True)
    var = jnp.mean(jnp.square(r - mean), axis=(0, 2, 3), keepdims=True)
    bn = ((r - mean) / jnp.sqrt(var + eps)
          * params["gamma"].reshape(1, -1, 1, 1)
          + params["beta"].reshape(1, -1, 1, 1))
    return u1, jnp.maximum(bn, 0.0) + _conv_ref(u1, params["A2"], 1)


# ----------------------------------------------------------------------------
if __name__ == "__main__":
    N, Cu, Cf, H, W = 2, 8, 8, 16, 16
    Cu2, Cf2 = 16, 16

    key = jax.random.PRNGKey(0)
    ks = jax.random.split(key, 8)
    u = jax.random.normal(ks[0], (N, Cu, H, W), jnp.float32)
    f = jax.random.normal(ks[1], (N, Cf, H, W), jnp.float32)

    params = {
        "A1": 0.1 * jax.random.normal(ks[2], (Cf, Cu, 3, 3), jnp.float32),
        "A2": 0.1 * jax.random.normal(ks[3], (Cf2, Cu2, 3, 3), jnp.float32),
        "Pi": 0.1 * jax.random.normal(ks[4], (Cu2, Cu, 3, 3), jnp.float32),
        "R": 0.1 * jax.random.normal(ks[5], (Cf2, Cf, 3, 3), jnp.float32),
        "gamma": 1.0 + 0.1 * jax.random.normal(ks[6], (Cf2,), jnp.float32),
        "beta": 0.1 * jax.random.normal(ks[7], (Cf2,), jnp.float32),
    }

    u1_p, f_p = jax.jit(mg_restriction_forward)(u, f, params)
    jax.block_until_ready((u1_p, f_p))

    # Sanity check against a pure-JAX f32 lax.conv reference.  Tolerances
    # account for bf16 matmul operands and the bf16 inter-kernel carry of
    # r / a2 (perf-review item); accumulation and BN statistics are f32.
    u1_r, f_r = mg_restriction_ref(u, f, params)
    err_u1 = float(jnp.max(jnp.abs(u1_p - u1_r)))
    err_f = float(jnp.max(jnp.abs(f_p - f_r)))
    mean_f = float(jnp.mean(jnp.abs(f_p - f_r)))
    assert err_u1 < 5e-2, ("u1 mismatch", err_u1)
    assert err_f < 1e-1 and mean_f < 2e-2, ("f mismatch", err_f, mean_f)

    print("KERNEL_OK")
</pallas_src>

<mosaic_0001>
module attributes {stable_mosaic.version = 11 : i64} {
  func.func @_mg_restrict_stage1_kernel(%arg0: i32, %arg1: memref<1x4x8x8x8xbf16, #tpu.memory_space<vmem>>, %arg2: memref<1x4x8x8x8xbf16, #tpu.memory_space<vmem>>, %arg3: memref<72x8xbf16, #tpu.memory_space<vmem>>, %arg4: memref<72x16xbf16, #tpu.memory_space<vmem>>, %arg5: memref<72x16xbf16, #tpu.memory_space<vmem>>, %arg6: memref<144x16xbf16, #tpu.memory_space<vmem>>, %arg7: memref<1x8x8x16xf32, #tpu.memory_space<vmem>>, %arg8: memref<1x8x8x16xbf16, #tpu.memory_space<vmem>>, %arg9: memref<1x8x8x16xbf16, #tpu.memory_space<vmem>>, %arg10: memref<1x2x16xf32, #tpu.memory_space<vmem>>, %arg11: memref<4x8x8x72xbf16, #tpu.memory_space<vmem>>, %arg12: memref<8x8x72xbf16, #tpu.memory_space<vmem>>, %arg13: memref<8x8x144xbf16, #tpu.memory_space<vmem>>) attributes {dimension_semantics = [#tpu.dimension_semantics<parallel>], iteration_bounds = array<i64: 2>, scalar_prefetch = 0 : i64, scratch_operands = 3 : i64, tpu.core_type = #tpu.core_type<tc>, window_params = [{transform_indices = @transform_0, window_bounds = array<i64: 1, 4, 8, 8, 8>}, {transform_indices = @transform_1, window_bounds = array<i64: 1, 4, 8, 8, 8>}, {pipeline_mode = #tpu.pipeline_mode<synchronous>, transform_indices = @transform_2, window_bounds = array<i64: 72, 8>}, {pipeline_mode = #tpu.pipeline_mode<synchronous>, transform_indices = @transform_3, window_bounds = array<i64: 72, 16>}, {pipeline_mode = #tpu.pipeline_mode<synchronous>, transform_indices = @transform_4, window_bounds = array<i64: 72, 16>}, {pipeline_mode = #tpu.pipeline_mode<synchronous>, transform_indices = @transform_5, window_bounds = array<i64: 144, 16>}, {transform_indices = @transform_6, window_bounds = array<i64: 1, 8, 8, 16>}, {transform_indices = @transform_7, window_bounds = array<i64: 1, 8, 8, 16>}, {transform_indices = @transform_8, window_bounds = array<i64: 1, 8, 8, 16>}, {transform_indices = @transform_9, window_bounds = array<i64: 1, 2, 16>}]} {
    %cst = arith.constant 0.000000e+00 : bf16
    %0 = vector.broadcast %cst : bf16 to vector<1x8x72xbf16>
    %c0 = arith.constant 0 : index
    %c0_0 = arith.constant 0 : index
    %c0_1 = arith.constant 0 : index
    %c0_2 = arith.constant 0 : index
    %1 = vector.load %arg11[%c0, %c0_0, %c0_1, %c0_2] : memref<4x8x8x72xbf16, #tpu.memory_space<vmem>>, vector<1x1x8x72xbf16>
    %2 = vector.shape_cast %1 : vector<1x1x8x72xbf16> to vector<1x8x72xbf16>
    %3 = vector.shape_cast %0 : vector<1x8x72xbf16> to vector<1x1x8x72xbf16>
    tpu.vector_store %arg11[%c0, %c0_0, %c0_1, %c0_2], %3 {strides = array<i32>} : memref<4x8x8x72xbf16, #tpu.memory_space<vmem>>, vector<1x1x8x72xbf16>,
    %cst_3 = arith.constant 0.000000e+00 : bf16
    %4 = vector.broadcast %cst_3 : bf16 to vector<8x1x72xbf16>
    %c0_4 = arith.constant 0 : index
    %c0_5 = arith.constant 0 : index
    %c0_6 = arith.constant 0 : index
    %c0_7 = arith.constant 0 : index
    %5 = vector.load %arg11[%c0_4, %c0_5, %c0_6, %c0_7] : memref<4x8x8x72xbf16, #tpu.memory_space<vmem>>, vector<1x8x1x72xbf16>
    %6 = vector.shape_cast %5 : vector<1x8x1x72xbf16> to vector<8x1x72xbf16>
    %7 = vector.shape_cast %4 : vector<8x1x72xbf16> to vector<1x8x1x72xbf16>
    tpu.vector_store %arg11[%c0_4, %c0_5, %c0_6, %c0_7], %7 {strides = array<i32>} : memref<4x8x8x72xbf16, #tpu.memory_space<vmem>>, vector<1x8x1x72xbf16>,
    %c0_8 = arith.constant 0 : index
    %c3 = arith.constant 3 : index
    %c0_9 = arith.constant 0 : index
    %c0_10 = arith.constant 0 : index
    %c0_11 = arith.constant 0 : index
    %8 = vector.load %arg1[%c0_8, %c3, %c0_9, %c0_10, %c0_11] : memref<1x4x8x8x8xbf16, #tpu.memory_space<vmem>>, vector<1x1x7x7x8xbf16>
    %9 = vector.shape_cast %8 : vector<1x1x7x7x8xbf16> to vector<7x7x8xbf16>
    %c0_12 = arith.constant 0 : index
    %c1 = arith.constant 1 : index
    %c1_13 = arith.constant 1 : index
    %c0_14 = arith.constant 0 : index
    %10 = vector.load %arg11[%c0_12, %c1, %c1_13, %c0_14] : memref<4x8x8x72xbf16, #tpu.memory_space<vmem>>, vector<1x7x7x8xbf16>
    %11 = vector.shape_cast %10 : vector<1x7x7x8xbf16> to vector<7x7x8xbf16>
    %12 = vector.shape_cast %9 : vector<7x7x8xbf16> to vector<1x7x7x8xbf16>
    tpu.vector_store %arg11[%c0_12, %c1, %c1_13, %c0_14], %12 {strides = array<i32>} : memref<4x8x8x72xbf16, #tpu.memory_space<vmem>>, vector<1x7x7x8xbf16>,
    %c0_15 = arith.constant 0 : index
    %c2 = arith.constant 2 : index
    %c0_16 = arith.constant 0 : index
    %c0_17 = arith.constant 0 : index
    %c0_18 = arith.constant 0 : index
    %13 = vector.load %arg1[%c0_15, %c2, %c0_16, %c0_17, %c0_18] : memref<1x4x8x8x8xbf16, #tpu.memory_space<vmem>>, vector<1x1x7x8x8xbf16>
    %14 = vector.shape_cast %13 : vector<1x1x7x8x8xbf16> to vector<7x8x8xbf16>
    %c0_19 = arith.constant 0 : index
    %c1_20 = arith.constant 1 : index
    %c0_21 = arith.constant 0 : index
    %c8 = arith.constant 8 : index
    %15 = vector.load %arg11[%c0_19, %c1_20, %c0_21, %c8] : memref<4x8x8x72xbf16, #tpu.memory_space<vmem>>, vector<1x7x8x8xbf16>
    %16 = vector.shape_cast %15 : vector<1x7x8x8xbf16> to vector<7x8x8xbf16>
    %17 = vector.shape_cast %14 : vector<7x8x8xbf16> to vector<1x7x8x8xbf16>
    tpu.vector_store %arg11[%c0_19, %c1_20, %c0_21, %c8], %17 {strides = array<i32>} : memref<4x8x8x72xbf16, #tpu.memory_space<vmem>>, vector<1x7x8x8xbf16>,
    %c0_22 = arith.constant 0 : index
    %c3_23 = arith.constant 3 : index
    %c0_24 = arith.constant 0 : index
    %c0_25 = arith.constant 0 : index
    %c0_26 = arith.constant 0 : index
    %18 = vector.load %arg1[%c0_22, %c3_23, %c0_24, %c0_25, %c0_26] : memref<1x4x8x8x8xbf16, #tpu.memory_space<vmem>>, vector<1x1x7x8x8xbf16>
    %19 = vector.shape_cast %18 : vector<1x1x7x8x8xbf16> to vector<7x8x8xbf16>
    %c0_27 = arith.constant 0 : index
    %c1_28 = arith.constant 1 : index
    %c0_29 = arith.constant 0 : index
    %c16 = arith.constant 16 : index
    %20 = vector.load %arg11[%c0_27, %c1_28, %c0_29, %c16] : memref<4x8x8x72xbf16, #tpu.memory_space<vmem>>, vector<1x7x8x8xbf16>
    %21 = vector.shape_cast %20 : vector<1x7x8x8xbf16> to vector<7x8x8xbf16>
    %22 = vector.shape_cast %19 : vector<7x8x8xbf16> to vector<1x7x8x8xbf16>
    tpu.vector_store %arg11[%c0_27, %c1_28, %c0_29, %c16], %22 {strides = array<i32>} : memref<4x8x8x72xbf16, #tpu.memory_space<vmem>>, vector<1x7x8x8xbf16>,
    %c0_30 = arith.constant 0 : index
    %c1_31 = arith.constant 1 : index
    %c0_32 = arith.constant 0 : index
    %c0_33 = arith.constant 0 : index
    %c0_34 = arith.constant 0 : index
    %23 = vector.load %arg1[%c0_30, %c1_31, %c0_32, %c0_33, %c0_34] : memref<1x4x8x8x8xbf16, #tpu.memory_space<vmem>>, vector<1x1x8x7x8xbf16>
    %24 = vector.shape_cast %23 : vector<1x1x8x7x8xbf16> to vector<8x7x8xbf16>
    %c0_35 = arith.constant 0 : index
    %c0_36 = arith.constant 0 : index
    %c1_37 = arith.constant 1 : index
    %c24 = arith.constant 24 : index
    %25 = vector.load %arg11[%c0_35, %c0_36, %c1_37, %c24] : memref<4x8x8x72xbf16, #tpu.memory_space<vmem>>, vector<1x8x7x8xbf16>
    %26 = vector.shape_cast %25 : vector<1x8x7x8xbf16> to vector<8x7x8xbf16>
    %27 = vector.shape_cast %24 : vector<8x7x8xbf16> to vector<1x8x7x8xbf16>
    tpu.vector_store %arg11[%c0_35, %c0_36, %c1_37, %c24], %27 {strides = array<i32>} : memref<4x8x8x72xbf16, #tpu.memory_space<vmem>>, vector<1x8x7x8xbf16>,
    %c0_38 = arith.constant 0 : index
    %c0_39 = arith.constant 0 : index
    %c0_40 = arith.constant 0 : index
    %c0_41 = arith.constant 0 : index
    %c0_42 = arith.constant 0 : index
    %28 = vector.load %arg1[%c0_38, %c0_39, %c0_40, %c0_41, %c0_42] : memref<1x4x8x8x8xbf16, #tpu.memory_space<vmem>>, vector<1x1x8x8x8xbf16>
    %29 = vector.shape_cast %28 : vector<1x1x8x8x8xbf16> to vector<8x8x8xbf16>
    %c0_43 = arith.constant 0 : index
    %c0_44 = arith.constant 0 : index
    %c0_45 = arith.constant 0 : index
    %c32 = arith.constant 32 : index
    %30 = vector.load %arg11[%c0_43, %c0_44, %c0_45, %c32] : memref<4x8x8x72xbf16, #tpu.memory_space<vmem>>, vector<1x8x8x8xbf16>
    %31 = vector.shape_cast %30 : vector<1x8x8x8xbf16> to vector<8x8x8xbf16>
    %32 = vector.shape_cast %29 : vector<8x8x8xbf16> to vector<1x8x8x8xbf16>
    tpu.vector_store %arg11[%c0_43, %c0_44, %c0_45, %c32], %32 {strides = array<i32>} : memref<4x8x8x72xbf16, #tpu.memory_space<vmem>>, vector<1x8x8x8xbf16>,
    %c0_46 = arith.constant 0 : index
    %c1_47 = arith.constant 1 : index
    %c0_48 = arith.constant 0 : index
    %c0_49 = arith.constant 0 : index
    %c0_50 = arith.constant 0 : index
    %33 = vector.load %arg1[%c0_46, %c1_47, %c0_48, %c0_49, %c0_50] : memref<1x4x8x8x8xbf16, #tpu.memory_space<vmem>>, vector<1x1x8x8x8xbf16>
    %34 = vector.shape_cast %33 : vector<1x1x8x8x8xbf16> to vector<8x8x8xbf16>
    %c0_51 = arith.constant 0 : index
    %c0_52 = arith.constant 0 : index
    %c0_53 = arith.constant 0 : index
    %c40 = arith.constant 40 : index
    %35 = vector.load %arg11[%c0_51, %c0_52, %c0_53, %c40] : memref<4x8x8x72xbf16, #tpu.memory_space<vmem>>, vector<1x8x8x8xbf16>
    %36 = vector.shape_cast %35 : vector<1x8x8x8xbf16> to vector<8x8x8xbf16>
    %37 = vector.shape_cast %34 : vector<8x8x8xbf16> to vector<1x8x8x8xbf16>
    tpu.vector_store %arg11[%c0_51, %c0_52, %c0_53, %c40], %37 {strides = array<i32>} : memref<4x8x8x72xbf16, #tpu.memory_space<vmem>>, vector<1x8x8x8xbf16>,
    %c0_54 = arith.constant 0 : index
    %c3_55 = arith.constant 3 : index
    %c0_56 = arith.constant 0 : index
    %c0_57 = arith.constant 0 : index
    %c0_58 = arith.constant 0 : index
    %38 = vector.load %arg1[%c0_54, %c3_55, %c0_56, %c0_57, %c0_58] : memref<1x4x8x8x8xbf16, #tpu.memory_space<vmem>>, vector<1x1x8x7x8xbf16>
    %39 = vector.shape_cast %38 : vector<1x1x8x7x8xbf16> to vector<8x7x8xbf16>
    %c0_59 = arith.constant 0 : index
    %c0_60 = arith.constant 0 : index
    %c1_61 = arith.constant 1 : index
    %c48 = arith.constant 48 : index
    %40 = vector.load %arg11[%c0_59, %c0_60, %c1_61, %c48] : memref<4x8x8x72xbf16, #tpu.memory_space<vmem>>, vector<1x8x7x8xbf16>
    %41 = vector.shape_cast %40 : vector<1x8x7x8xbf16> to vector<8x7x8xbf16>
    %42 = vector.shape_cast %39 : vector<8x7x8xbf16> to vector<1x8x7x8xbf16>
    tpu.vector_store %arg11[%c0_59, %c0_60, %c1_61, %c48], %42 {strides = array<i32>} : memref<4x8x8x72xbf16, #tpu.memory_space<vmem>>, vector<1x8x7x8xbf16>,
    %c0_62 = arith.constant 0 : index
    %c2_63 = arith.constant 2 : index
    %c0_64 = arith.constant 0 : index
    %c0_65 = arith.constant 0 : index
    %c0_66 = arith.constant 0 : index
    %43 = vector.load %arg1[%c0_62, %c2_63, %c0_64, %c0_65, %c0_66] : memref<1x4x8x8x8xbf16, #tpu.memory_space<vmem>>, vector<1x1x8x8x8xbf16>
    %44 = vector.shape_cast %43 : vector<1x1x8x8x8xbf16> to vector<8x8x8xbf16>
    %c0_67 = arith.constant 0 : index
    %c0_68 = arith.constant 0 : index
    %c0_69 = arith.constant 0 : index
    %c56 = arith.constant 56 : index
    %45 = vector.load %arg11[%c0_67, %c0_68, %c0_69, %c56] : memref<4x8x8x72xbf16, #tpu.memory_space<vmem>>, vector<1x8x8x8xbf16>
    %46 = vector.shape_cast %45 : vector<1x8x8x8xbf16> to vector<8x8x8xbf16>
    %47 = vector.shape_cast %44 : vector<8x8x8xbf16> to vector<1x8x8x8xbf16>
    tpu.vector_store %arg11[%c0_67, %c0_68, %c0_69, %c56], %47 {strides = array<i32>} : memref<4x8x8x72xbf16, #tpu.memory_space<vmem>>, vector<1x8x8x8xbf16>,
    %c0_70 = arith.constant 0 : index
    %c3_71 = arith.constant 3 : index
    %c0_72 = arith.constant 0 : index
    %c0_73 = arith.constant 0 : index
    %c0_74 = arith.constant 0 : index
    %48 = vector.load %arg1[%c0_70, %c3_71, %c0_72, %c0_73, %c0_74] : memref<1x4x8x8x8xbf16, #tpu.memory_space<vmem>>, vector<1x1x8x8x8xbf16>
    %49 = vector.shape_cast %48 : vector<1x1x8x8x8xbf16> to vector<8x8x8xbf16>
    %c0_75 = arith.constant 0 : index
    %c0_76 = arith.constant 0 : index
    %c0_77 = arith.constant 0 : index
    %c64 = arith.constant 64 : index
    %50 = vector.load %arg11[%c0_75, %c0_76, %c0_77, %c64] : memref<4x8x8x72xbf16, #tpu.memory_space<vmem>>, vector<1x8x8x8xbf16>
    %51 = vector.shape_cast %50 : vector<1x8x8x8xbf16> to vector<8x8x8xbf16>
    %52 = vector.shape_cast %49 : vector<8x8x8xbf16> to vector<1x8x8x8xbf16>
    tpu.vector_store %arg11[%c0_75, %c0_76, %c0_77, %c64], %52 {strides = array<i32>} : memref<4x8x8x72xbf16, #tpu.memory_space<vmem>>, vector<1x8x8x8xbf16>,
    %cst_78 = arith.constant 0.000000e+00 : bf16
    %53 = vector.broadcast %cst_78 : bf16 to vector<1x8x72xbf16>
    %c1_79 = arith.constant 1 : index
    %c0_80 = arith.constant 0 : index
    %c0_81 = arith.constant 0 : index
    %c0_82 = arith.constant 0 : index
    %54 = vector.load %arg11[%c1_79, %c0_80, %c0_81, %c0_82] : memref<4x8x8x72xbf16, #tpu.memory_space<vmem>>, vector<1x1x8x72xbf16>
    %55 = vector.shape_cast %54 : vector<1x1x8x72xbf16> to vector<1x8x72xbf16>
    %56 = vector.shape_cast %53 : vector<1x8x72xbf16> to vector<1x1x8x72xbf16>
    tpu.vector_store %arg11[%c1_79, %c0_80, %c0_81, %c0_82], %56 {strides = array<i32>} : memref<4x8x8x72xbf16, #tpu.memory_space<vmem>>, vector<1x1x8x72xbf16>,
    %cst_83 = arith.constant 0.000000e+00 : bf16
    %57 = vector.broadcast %cst_83 : bf16 to vector<8x1x72xbf16>
    %c1_84 = arith.constant 1 : index
    %c0_85 = arith.constant 0 : index
    %c7 = arith.constant 7 : index
    %c0_86 = arith.constant 0 : index
    %58 = vector.load %arg11[%c1_84, %c0_85, %c7, %c0_86] : memref<4x8x8x72xbf16, #tpu.memory_space<vmem>>, vector<1x8x1x72xbf16>
    %59 = vector.shape_cast %58 : vector<1x8x1x72xbf16> to vector<8x1x72xbf16>
    %60 = vector.shape_cast %57 : vector<8x1x72xbf16> to vector<1x8x1x72xbf16>
    tpu.vector_store %arg11[%c1_84, %c0_85, %c7, %c0_86], %60 {strides = array<i32>} : memref<4x8x8x72xbf16, #tpu.memory_space<vmem>>, vector<1x8x1x72xbf16>,
    %c0_87 = arith.constant 0 : index
    %c2_88 = arith.constant 2 : index
    %c0_89 = arith.constant 0 : index
    %c0_90 = arith.constant 0 : index
    %c0_91 = arith.constant 0 : index
    %61 = vector.load %arg1[%c0_87, %c2_88, %c0_89, %c0_90, %c0_91] : memref<1x4x8x8x8xbf16, #tpu.memory_space<vmem>>, vector<1x1x7x8x8xbf16>
    %62 = vector.shape_cast %61 : vector<1x1x7x8x8xbf16> to vector<7x8x8xbf16>
    %c1_92 = arith.constant 1 : index
    %c1_93 = arith.constant 1 : index
    %c0_94 = arith.constant 0 : index
    %c0_95 = arith.constant 0 : index
    %63 = vector.load %arg11[%c1_92, %c1_93, %c0_94, %c0_95] : memref<4x8x8x72xbf16, #tpu.memory_space<vmem>>, vector<1x7x8x8xbf16>
    %64 = vector.shape_cast %63 : vector<1x7x8x8xbf16> to vector<7x8x8xbf16>
    %65 = vector.shape_cast %62 : vector<7x8x8xbf16> to vector<1x7x8x8xbf16>
    tpu.vector_store %arg11[%c1_92, %c1_93, %c0_94, %c0_95], %65 {strides = array<i32>} : memref<4x8x8x72xbf16, #tpu.memory_space<vmem>>, vector<1x7x8x8xbf16>,
    %c0_96 = arith.constant 0 : index
    %c3_97 = arith.constant 3 : index
    %c0_98 = arith.constant 0 : index
    %c0_99 = arith.constant 0 : index
    %c0_100 = arith.constant 0 : index
    %66 = vector.load %arg1[%c0_96, %c3_97, %c0_98, %c0_99, %c0_100] : memref<1x4x8x8x8xbf16, #tpu.memory_space<vmem>>, vector<1x1x7x8x8xbf16>
    %67 = vector.shape_cast %66 : vector<1x1x7x8x8xbf16> to vector<7x8x8xbf16>
    %c1_101 = arith.constant 1 : index
    %c1_102 = arith.constant 1 : index
    %c0_103 = arith.constant 0 : index
    %c8_104 = arith.constant 8 : index
    %68 = vector.load %arg11[%c1_101, %c1_102, %c0_103, %c8_104] : memref<4x8x8x72xbf16, #tpu.memory_space<vmem>>, vector<1x7x8x8xbf16>
    %69 = vector.shape_cast %68 : vector<1x7x8x8xbf16> to vector<7x8x8xbf16>
    %70 = vector.shape_cast %67 : vector<7x8x8xbf16> to vector<1x7x8x8xbf16>
    tpu.vector_store %arg11[%c1_101, %c1_102, %c0_103, %c8_104], %70 {strides = array<i32>} : memref<4x8x8x72xbf16, #tpu.memory_space<vmem>>, vector<1x7x8x8xbf16>,
    %c0_105 = arith.constant 0 : index
    %c2_106 = arith.constant 2 : index
    %c0_107 = arith.constant 0 : index
    %c1_108 = arith.constant 1 : index
    %c0_109 = arith.constant 0 : index
    %71 = vector.load %arg1[%c0_105, %c2_106, %c0_107, %c1_108, %c0_109] : memref<1x4x8x8x8xbf16, #tpu.memory_space<vmem>>, vector<1x1x7x7x8xbf16>
    %72 = vector.shape_cast %71 : vector<1x1x7x7x8xbf16> to vector<7x7x8xbf16>
    %c1_110 = arith.constant 1 : index
    %c1_111 = arith.constant 1 : index
    %c0_112 = arith.constant 0 : index
    %c16_113 = arith.constant 16 : index
    %73 = vector.load %arg11[%c1_110, %c1_111, %c0_112, %c16_113] : memref<4x8x8x72xbf16, #tpu.memory_space<vmem>>, vector<1x7x7x8xbf16>
    %74 = vector.shape_cast %73 : vector<1x7x7x8xbf16> to vector<7x7x8xbf16>
    %75 = vector.shape_cast %72 : vector<7x7x8xbf16> to vector<1x7x7x8xbf16>
    tpu.vector_store %arg11[%c1_110, %c1_111, %c0_112, %c16_113], %75 {strides = array<i32>} : memref<4x8x8x72xbf16, #tpu.memory_space<vmem>>, vector<1x7x7x8xbf16>,
    %c0_114 = arith.constant 0 : index
    %c0_115 = arith.constant 0 : index
    %c0_116 = arith.constant 0 : index
    %c0_117 = arith.constant 0 : index
    %c0_118 = arith.constant 0 : index
    %76 = vector.load %arg1[%c0_114, %c0_115, %c0_116, %c0_117, %c0_118] : memref<1x4x8x8x8xbf16, #tpu.memory_space<vmem>>, vector<1x1x8x8x8xbf16>
    %77 = vector.shape_cast %76 : vector<1x1x8x8x8xbf16> to vector<8x8x8xbf16>
    %c1_119 = arith.constant 1 : index
    %c0_120 = arith.constant 0 : index
    %c0_121 = arith.constant 0 : index
    %c24_122 = arith.constant 24 : index
    %78 = vector.load %arg11[%c1_119, %c0_120, %c0_121, %c24_122] : memref<4x8x8x72xbf16, #tpu.memory_space<vmem>>, vector<1x8x8x8xbf16>
    %79 = vector.shape_cast %78 : vector<1x8x8x8xbf16> to vector<8x8x8xbf16>
    %80 = vector.shape_cast %77 : vector<8x8x8xbf16> to vector<1x8x8x8xbf16>
    tpu.vector_store %arg11[%c1_119, %c0_120, %c0_121, %c24_122], %80 {strides = array<i32>} : memref<4x8x8x72xbf16, #tpu.memory_space<vmem>>, vector<1x8x8x8xbf16>,
    %c0_123 = arith.constant 0 : index
    %c1_124 = arith.constant 1 : index
    %c0_125 = arith.constant 0 : index
    %c0_126 = arith.constant 0 : index
    %c0_127 = arith.constant 0 : index
    %81 = vector.load %arg1[%c0_123, %c1_124, %c0_125, %c0_126, %c0_127] : memref<1x4x8x8x8xbf16, #tpu.memory_space<vmem>>, vector<1x1x8x8x8xbf16>
    %82 = vector.shape_cast %81 : vector<1x1x8x8x8xbf16> to vector<8x8x8xbf16>
    %c1_128 = arith.constant 1 : index
    %c0_129 = arith.constant 0 : index
    %c0_130 = arith.constant 0 : index
    %c32_131 = arith.constant 32 : index
    %83 = vector.load %arg11[%c1_128, %c0_129, %c0_130, %c32_131] : memref<4x8x8x72xbf16, #tpu.memory_space<vmem>>, vector<1x8x8x8xbf16>
    %84 = vector.shape_cast %83 : vector<1x8x8x8xbf16> to vector<8x8x8xbf16>
    %85 = vector.shape_cast %82 : vector<8x8x8xbf16> to vector<1x8x8x8xbf16>
    tpu.vector_store %arg11[%c1_128, %c0_129, %c0_130, %c32_131], %85 {strides = array<i32>} : memref<4x8x8x72xbf16, #tpu.memory_space<vmem>>, vector<1x8x8x8xbf16>,
    %c0_132 = arith.constant 0 : index
    %c0_133 = arith.constant 0 : index
    %c0_134 = arith.constant 0 : index
    %c1_135 = arith.constant 1 : index
    %c0_136 = arith.constant 0 : index
    %86 = vector.load %arg1[%c0_132, %c0_133, %c0_134, %c1_135, %c0_136] : memref<1x4x8x8x8xbf16, #tpu.memory_space<vmem>>, vector<1x1x8x7x8xbf16>
    %87 = vector.shape_cast %86 : vector<1x1x8x7x8xbf16> to vector<8x7x8xbf16>
    %c1_137 = arith.constant 1 : index
    %c0_138 = arith.constant 0 : index
    %c0_139 = arith.constant 0 : index
    %c40_140 = arith.constant 40 : index
    %88 = vector.load %arg11[%c1_137, %c0_138, %c0_139, %c40_140] : memref<4x8x8x72xbf16, #tpu.memory_space<vmem>>, vector<1x8x7x8xbf16>
    %89 = vector.shape_cast %88 : vector<1x8x7x8xbf16> to vector<8x7x8xbf16>
    %90 = vector.shape_cast %87 : vector<8x7x8xbf16> to vector<1x8x7x8xbf16>
    tpu.vector_store %arg11[%c1_137, %c0_138, %c0_139, %c40_140], %90 {strides = array<i32>} : memref<4x8x8x72xbf16, #tpu.memory_space<vmem>>, vector<1x8x7x8xbf16>,
    %c0_141 = arith.constant 0 : index
    %c2_142 = arith.constant 2 : index
    %c0_143 = arith.constant 0 : index
    %c0_144 = arith.constant 0 : index
    %c0_145 = arith.constant 0 : index
    %91 = vector.load %arg1[%c0_141, %c2_142, %c0_143, %c0_144, %c0_145] : memref<1x4x8x8x8xbf16, #tpu.memory_space<vmem>>, vector<1x1x8x8x8xbf16>
    %92 = vector.shape_cast %91 : vector<1x1x8x8x8xbf16> to vector<8x8x8xbf16>
    %c1_146 = arith.constant 1 : index
    %c0_147 = arith.constant 0 : index
    %c0_148 = arith.constant 0 : index
    %c48_149 = arith.constant 48 : index
    %93 = vector.load %arg11[%c1_146, %c0_147, %c0_148, %c48_149] : memref<4x8x8x72xbf16, #tpu.memory_space<vmem>>, vector<1x8x8x8xbf16>
    %94 = vector.shape_cast %93 : vector<1x8x8x8xbf16> to vector<8x8x8xbf16>
    %95 = vector.shape_cast %92 : vector<8x8x8xbf16> to vector<1x8x8x8xbf16>
    tpu.vector_store %arg11[%c1_146, %c0_147, %c0_148, %c48_149], %95 {strides = array<i32>} : memref<4x8x8x72xbf16, #tpu.memory_space<vmem>>, vector<1x8x8x8xbf16>,
    %c0_150 = arith.constant 0 : index
    %c3_151 = arith.constant 3 : index
    %c0_152 = arith.constant 0 : index
    %c0_153 = arith.constant 0 : index
    %c0_154 = arith.constant 0 : index
    %96 = vector.load %arg1[%c0_150, %c3_151, %c0_152, %c0_153, %c0_154] : memref<1x4x8x8x8xbf16, #tpu.memory_space<vmem>>, vector<1x1x8x8x8xbf16>
    %97 = vector.shape_cast %96 : vector<1x1x8x8x8xbf16> to vector<8x8x8xbf16>
    %c1_155 = arith.constant 1 : index
    %c0_156 = arith.constant 0 : index
    %c0_157 = arith.constant 0 : index
    %c56_158 = arith.constant 56 : index
    %98 = vector.load %arg11[%c1_155, %c0_156, %c0_157, %c56_158] : memref<4x8x8x72xbf16, #tpu.memory_space<vmem>>, vector<1x8x8x8xbf16>
    %99 = vector.shape_cast %98 : vector<1x8x8x8xbf16> to vector<8x8x8xbf16>
    %100 = vector.shape_cast %97 : vector<8x8x8xbf16> to vector<1x8x8x8xbf16>
    tpu.vector_store %arg11[%c1_155, %c0_156, %c0_157, %c56_158], %100 {strides = array<i32>} : memref<4x8x8x72xbf16, #tpu.memory_space<vmem>>, vector<1x8x8x8xbf16>,
    %c0_159 = arith.constant 0 : index
    %c2_160 = arith.constant 2 : index
    %c0_161 = arith.constant 0 : index
    %c1_162 = arith.constant 1 : index
    %c0_163 = arith.constant 0 : index
    %101 = vector.load %arg1[%c0_159, %c2_160, %c0_161, %c1_162, %c0_163] : memref<1x4x8x8x8xbf16, #tpu.memory_space<vmem>>, vector<1x1x8x7x8xbf16>
    %102 = vector.shape_cast %101 : vector<1x1x8x7x8xbf16> to vector<8x7x8xbf16>
    %c1_164 = arith.constant 1 : index
    %c0_165 = arith.constant 0 : index
    %c0_166 = arith.constant 0 : index
    %c64_167 = arith.constant 64 : index
    %103 = vector.load %arg11[%c1_164, %c0_165, %c0_166, %c64_167] : memref<4x8x8x72xbf16, #tpu.memory_space<vmem>>, vector<1x8x7x8xbf16>
    %104 = vector.shape_cast %103 : vector<1x8x7x8xbf16> to vector<8x7x8xbf16>
    %105 = vector.shape_cast %102 : vector<8x7x8xbf16> to vector<1x8x7x8xbf16>
    tpu.vector_store %arg11[%c1_164, %c0_165, %c0_166, %c64_167], %105 {strides = array<i32>} : memref<4x8x8x72xbf16, #tpu.memory_space<vmem>>, vector<1x8x7x8xbf16>,
    %cst_168 = arith.constant 0.000000e+00 : bf16
    %106 = vector.broadcast %cst_168 : bf16 to vector<1x8x72xbf16>
    %c2_169 = arith.constant 2 : index
    %c7_170 = arith.constant 7 : index
    %c0_171 = arith.constant 0 : index
    %c0_172 = arith.constant 0 : index
    %107 = vector.load %arg11[%c2_169, %c7_170, %c0_171, %c0_172] : memref<4x8x8x72xbf16, #tpu.memory_space<vmem>>, vector<1x1x8x72xbf16>
    %108 = vector.shape_cast %107 : vector<1x1x8x72xbf16> to vector<1x8x72xbf16>
    %109 = vector.shape_cast %106 : vector<1x8x72xbf16> to vector<1x1x8x72xbf16>
    tpu.vector_store %arg11[%c2_169, %c7_170, %c0_171, %c0_172], %109 {strides = array<i32>} : memref<4x8x8x72xbf16, #tpu.memory_space<vmem>>, vector<1x1x8x72xbf16>,
    %cst_173 = arith.constant 0.000000e+00 : bf16
    %110 = vector.broadcast %cst_173 : bf16 to vector<8x1x72xbf16>
    %c2_174 = arith.constant 2 : index
    %c0_175 = arith.constant 0 : index
    %c0_176 = arith.constant 0 : index
    %c0_177 = arith.constant 0 : index
    %111 = vector.load %arg11[%c2_174, %c0_175, %c0_176, %c0_177] : memref<4x8x8x72xbf16, #tpu.memory_space<vmem>>, vector<1x8x1x72xbf16>
    %112 = vector.shape_cast %111 : vector<1x8x1x72xbf16> to vector<8x1x72xbf16>
    %113 = vector.shape_cast %110 : vector<8x1x72xbf16> to vector<1x8x1x72xbf16>
    tpu.vector_store %arg11[%c2_174, %c0_175, %c0_176, %c0_177], %113 {strides = array<i32>} : memref<4x8x8x72xbf16, #tpu.memory_space<vmem>>, vector<1x8x1x72xbf16>,
    %c0_178 = arith.constant 0 : index
    %c1_179 = arith.constant 1 : index
    %c0_180 = arith.constant 0 : index
    %c0_181 = arith.constant 0 : index
    %c0_182 = arith.constant 0 : index
    %114 = vector.load %arg1[%c0_178, %c1_179, %c0_180, %c0_181, %c0_182] : memref<1x4x8x8x8xbf16, #tpu.memory_space<vmem>>, vector<1x1x8x7x8xbf16>
    %115 = vector.shape_cast %114 : vector<1x1x8x7x8xbf16> to vector<8x7x8xbf16>
    %c2_183 = arith.constant 2 : index
    %c0_184 = arith.constant 0 : index
    %c1_185 = arith.constant 1 : index
    %c0_186 = arith.constant 0 : index
    %116 = vector.load %arg11[%c2_183, %c0_184, %c1_185, %c0_186] : memref<4x8x8x72xbf16, #tpu.memory_space<vmem>>, vector<1x8x7x8xbf16>
    %117 = vector.shape_cast %116 : vector<1x8x7x8xbf16> to vector<8x7x8xbf16>
    %118 = vector.shape_cast %115 : vector<8x7x8xbf16> to vector<1x8x7x8xbf16>
    tpu.vector_store %arg11[%c2_183, %c0_184, %c1_185, %c0_186], %118 {strides = array<i32>} : memref<4x8x8x72xbf16, #tpu.memory_space<vmem>>, vector<1x8x7x8xbf16>,
    %c0_187 = arith.constant 0 : index
    %c0_188 = arith.constant 0 : index
    %c0_189 = arith.constant 0 : index
    %c0_190 = arith.constant 0 : index
    %c0_191 = arith.constant 0 : index
    %119 = vector.load %arg1[%c0_187, %c0_188, %c0_189, %c0_190, %c0_191] : memref<1x4x8x8x8xbf16, #tpu.memory_space<vmem>>, vector<1x1x8x8x8xbf16>
    %120 = vector.shape_cast %119 : vector<1x1x8x8x8xbf16> to vector<8x8x8xbf16>
    %c2_192 = arith.constant 2 : index
    %c0_193 = arith.constant 0 : index
    %c0_194 = arith.constant 0 : index
    %c8_195 = arith.constant 8 : index
    %121 = vector.load %arg11[%c2_192, %c0_193, %c0_194, %c8_195] : memref<4x8x8x72xbf16, #tpu.memory_space<vmem>>, vector<1x8x8x8xbf16>
    %122 = vector.shape_cast %121 : vector<1x8x8x8xbf16> to vector<8x8x8xbf16>
    %123 = vector.shape_cast %120 : vector<8x8x8xbf16> to vector<1x8x8x8xbf16>
    tpu.vector_store %arg11[%c2_192, %c0_193, %c0_194, %c8_195], %123 {strides = array<i32>} : memref<4x8x8x72xbf16, #tpu.memory_space<vmem>>, vector<1x8x8x8xbf16>,
    %c0_196 = arith.constant 0 : index
    %c1_197 = arith.constant 1 : index
    %c0_198 = arith.constant 0 : index
    %c0_199 = arith.constant 0 : index
    %c0_200 = arith.constant 0 : index
    %124 = vector.load %arg1[%c0_196, %c1_197, %c0_198, %c0_199, %c0_200] : memref<1x4x8x8x8xbf16, #tpu.memory_space<vmem>>, vector<1x1x8x8x8xbf16>
    %125 = vector.shape_cast %124 : vector<1x1x8x8x8xbf16> to vector<8x8x8xbf16>
    %c2_201 = arith.constant 2 : index
    %c0_202 = arith.constant 0 : index
    %c0_203 = arith.constant 0 : index
    %c16_204 = arith.constant 16 : index
    %126 = vector.load %arg11[%c2_201, %c0_202, %c0_203, %c16_204] : memref<4x8x8x72xbf16, #tpu.memory_space<vmem>>, vector<1x8x8x8xbf16>
    %127 = vector.shape_cast %126 : vector<1x8x8x8xbf16> to vector<8x8x8xbf16>
    %128 = vector.shape_cast %125 : vector<8x8x8xbf16> to vector<1x8x8x8xbf16>
    tpu.vector_store %arg11[%c2_201, %c0_202, %c0_203, %c16_204], %128 {strides = array<i32>} : memref<4x8x8x72xbf16, #tpu.memory_space<vmem>>, vector<1x8x8x8xbf16>,
    %c0_205 = arith.constant 0 : index
    %c3_206 = arith.constant 3 : index
    %c0_207 = arith.constant 0 : index
    %c0_208 = arith.constant 0 : index
    %c0_209 = arith.constant 0 : index
    %129 = vector.load %arg1[%c0_205, %c3_206, %c0_207, %c0_208, %c0_209] : memref<1x4x8x8x8xbf16, #tpu.memory_space<vmem>>, vector<1x1x8x7x8xbf16>
    %130 = vector.shape_cast %129 : vector<1x1x8x7x8xbf16> to vector<8x7x8xbf16>
    %c2_210 = arith.constant 2 : index
    %c0_211 = arith.constant 0 : index
    %c1_212 = arith.constant 1 : index
    %c24_213 = arith.constant 24 : index
    %131 = vector.load %arg11[%c2_210, %c0_211, %c1_212, %c24_213] : memref<4x8x8x72xbf16, #tpu.memory_space<vmem>>, vector<1x8x7x8xbf16>
    %132 = vector.shape_cast %131 : vector<1x8x7x8xbf16> to vector<8x7x8xbf16>
    %133 = vector.shape_cast %130 : vector<8x7x8xbf16> to vector<1x8x7x8xbf16>
    tpu.vector_store %arg11[%c2_210, %c0_211, %c1_212, %c24_213], %133 {strides = array<i32>} : memref<4x8x8x72xbf16, #tpu.memory_space<vmem>>, vector<1x8x7x8xbf16>,
    %c0_214 = arith.constant 0 : index
    %c2_215 = arith.constant 2 : index
    %c0_216 = arith.constant 0 : index
    %c0_217 = arith.constant 0 : index
    %c0_218 = arith.constant 0 : index
    %134 = vector.load %arg1[%c0_214, %c2_215, %c0_216, %c0_217, %c0_218] : memref<1x4x8x8x8xbf16, #tpu.memory_space<vmem>>, vector<1x1x8x8x8xbf16>
    %135 = vector.shape_cast %134 : vector<1x1x8x8x8xbf16> to vector<8x8x8xbf16>
    %c2_219 = arith.constant 2 : index
    %c0_220 = arith.constant 0 : index
    %c0_221 = arith.constant 0 : index
    %c32_222 = arith.constant 32 : index
    %136 = vector.load %arg11[%c2_219, %c0_220, %c0_221, %c32_222] : memref<4x8x8x72xbf16, #tpu.memory_space<vmem>>, vector<1x8x8x8xbf16>
    %137 = vector.shape_cast %136 : vector<1x8x8x8xbf16> to vector<8x8x8xbf16>
    %138 = vector.shape_cast %135 : vector<8x8x8xbf16> to vector<1x8x8x8xbf16>
    tpu.vector_store %arg11[%c2_219, %c0_220, %c0_221, %c32_222], %138 {strides = array<i32>} : memref<4x8x8x72xbf16, #tpu.memory_space<vmem>>, vector<1x8x8x8xbf16>,
    %c0_223 = arith.constant 0 : index
    %c3_224 = arith.constant 3 : index
    %c0_225 = arith.constant 0 : index
    %c0_226 = arith.constant 0 : index
    %c0_227 = arith.constant 0 : index
    %139 = vector.load %arg1[%c0_223, %c3_224, %c0_225, %c0_226, %c0_227] : memref<1x4x8x8x8xbf16, #tpu.memory_space<vmem>>, vector<1x1x8x8x8xbf16>
    %140 = vector.shape_cast %139 : vector<1x1x8x8x8xbf16> to vector<8x8x8xbf16>
    %c2_228 = arith.constant 2 : index
    %c0_229 = arith.constant 0 : index
    %c0_230 = arith.constant 0 : index
    %c40_231 = arith.constant 40 : index
    %141 = vector.load %arg11[%c2_228, %c0_229, %c0_230, %c40_231] : memref<4x8x8x72xbf16, #tpu.memory_space<vmem>>, vector<1x8x8x8xbf16>
    %142 = vector.shape_cast %141 : vector<1x8x8x8xbf16> to vector<8x8x8xbf16>
    %143 = vector.shape_cast %140 : vector<8x8x8xbf16> to vector<1x8x8x8xbf16>
    tpu.vector_store %arg11[%c2_228, %c0_229, %c0_230, %c40_231], %143 {strides = array<i32>} : memref<4x8x8x72xbf16, #tpu.memory_space<vmem>>, vector<1x8x8x8xbf16>,
    %c0_232 = arith.constant 0 : index
    %c1_233 = arith.constant 1 : index
    %c1_234 = arith.constant 1 : index
    %c0_235 = arith.constant 0 : index
    %c0_236 = arith.constant 0 : index
    %144 = vector.load %arg1[%c0_232, %c1_233, %c1_234, %c0_235, %c0_236] : memref<1x4x8x8x8xbf16, #tpu.memory_space<vmem>>, vector<1x1x7x7x8xbf16>
    %145 = vector.shape_cast %144 : vector<1x1x7x7x8xbf16> to vector<7x7x8xbf16>
    %c2_237 = arith.constant 2 : index
    %c0_238 = arith.constant 0 : index
    %c1_239 = arith.constant 1 : index
    %c48_240 = arith.constant 48 : index
    %146 = vector.load %arg11[%c2_237, %c0_238, %c1_239, %c48_240] : memref<4x8x8x72xbf16, #tpu.memory_space<vmem>>, vector<1x7x7x8xbf16>
    %147 = vector.shape_cast %146 : vector<1x7x7x8xbf16> to vector<7x7x8xbf16>
    %148 = vector.shape_cast %145 : vector<7x7x8xbf16> to vector<1x7x7x8xbf16>
    tpu.vector_store %arg11[%c2_237, %c0_238, %c1_239, %c48_240], %148 {strides = array<i32>} : memref<4x8x8x72xbf16, #tpu.memory_space<vmem>>, vector<1x7x7x8xbf16>,
    %c0_241 = arith.constant 0 : index
    %c0_242 = arith.constant 0 : index
    %c1_243 = arith.constant 1 : index
    %c0_244 = arith.constant 0 : index
    %c0_245 = arith.constant 0 : index
    %149 = vector.load %arg1[%c0_241, %c0_242, %c1_243, %c0_244, %c0_245] : memref<1x4x8x8x8xbf16, #tpu.memory_space<vmem>>, vector<1x1x7x8x8xbf16>
    %150 = vector.shape_cast %149 : vector<1x1x7x8x8xbf16> to vector<7x8x8xbf16>
    %c2_246 = arith.constant 2 : index
    %c0_247 = arith.constant 0 : index
    %c0_248 = arith.constant 0 : index
    %c56_249 = arith.constant 56 : index
    %151 = vector.load %arg11[%c2_246, %c0_247, %c0_248, %c56_249] : memref<4x8x8x72xbf16, #tpu.memory_space<vmem>>, vector<1x7x8x8xbf16>
    %152 = vector.shape_cast %151 : vector<1x7x8x8xbf16> to vector<7x8x8xbf16>
    %153 = vector.shape_cast %150 : vector<7x8x8xbf16> to vector<1x7x8x8xbf16>
    tpu.vector_store %arg11[%c2_246, %c0_247, %c0_248, %c56_249], %153 {strides = array<i32>} : memref<4x8x8x72xbf16, #tpu.memory_space<vmem>>, vector<1x7x8x8xbf16>,
    %c0_250 = arith.constant 0 : index
    %c1_251 = arith.constant 1 : index
    %c1_252 = arith.constant 1 : index
    %c0_253 = arith.constant 0 : index
    %c0_254 = arith.constant 0 : index
    %154 = vector.load %arg1[%c0_250, %c1_251, %c1_252, %c0_253, %c0_254] : memref<1x4x8x8x8xbf16, #tpu.memory_space<vmem>>, vector<1x1x7x8x8xbf16>
    %155 = vector.shape_cast %154 : vector<1x1x7x8x8xbf16> to vector<7x8x8xbf16>
    %c2_255 = arith.constant 2 : index
    %c0_256 = arith.constant 0 : index
    %c0_257 = arith.constant 0 : index
    %c64_258 = arith.constant 64 : index
    %156 = vector.load %arg11[%c2_255, %c0_256, %c0_257, %c64_258] : memref<4x8x8x72xbf16, #tpu.memory_space<vmem>>, vector<1x7x8x8xbf16>
    %157 = vector.shape_cast %156 : vector<1x7x8x8xbf16> to vector<7x8x8xbf16>
    %158 = vector.shape_cast %155 : vector<7x8x8xbf16> to vector<1x7x8x8xbf16>
    tpu.vector_store %arg11[%c2_255, %c0_256, %c0_257, %c64_258], %158 {strides = array<i32>} : memref<4x8x8x72xbf16, #tpu.memory_space<vmem>>, vector<1x7x8x8xbf16>,
    %cst_259 = arith.constant 0.000000e+00 : bf16
    %159 = vector.broadcast %cst_259 : bf16 to vector<1x8x72xbf16>
    %c3_260 = arith.constant 3 : index
    %c7_261 = arith.constant 7 : index
    %c0_262 = arith.constant 0 : index
    %c0_263 = arith.constant 0 : index
    %160 = vector.load %arg11[%c3_260, %c7_261, %c0_262, %c0_263] : memref<4x8x8x72xbf16, #tpu.memory_space<vmem>>, vector<1x1x8x72xbf16>
    %161 = vector.shape_cast %160 : vector<1x1x8x72xbf16> to vector<1x8x72xbf16>
    %162 = vector.shape_cast %159 : vector<1x8x72xbf16> to vector<1x1x8x72xbf16>
    tpu.vector_store %arg11[%c3_260, %c7_261, %c0_262, %c0_263], %162 {strides = array<i32>} : memref<4x8x8x72xbf16, #tpu.memory_space<vmem>>, vector<1x1x8x72xbf16>,
    %cst_264 = arith.constant 0.000000e+00 : bf16
    %163 = vector.broadcast %cst_264 : bf16 to vector<8x1x72xbf16>
    %c3_265 = arith.constant 3 : index
    %c0_266 = arith.constant 0 : index
    %c7_267 = arith.constant 7 : index
    %c0_268 = arith.constant 0 : index
    %164 = vector.load %arg11[%c3_265, %c0_266, %c7_267, %c0_268] : memref<4x8x8x72xbf16, #tpu.memory_space<vmem>>, vector<1x8x1x72xbf16>
    %165 = vector.shape_cast %164 : vector<1x8x1x72xbf16> to vector<8x1x72xbf16>
    %166 = vector.shape_cast %163 : vector<8x1x72xbf16> to vector<1x8x1x72xbf16>
    tpu.vector_store %arg11[%c3_265, %c0_266, %c7_267, %c0_268], %166 {strides = array<i32>} : memref<4x8x8x72xbf16, #tpu.memory_space<vmem>>, vector<1x8x1x72xbf16>,
    %c0_269 = arith.constant 0 : index
    %c0_270 = arith.constant 0 : index
    %c0_271 = arith.constant 0 : index
    %c0_272 = arith.constant 0 : index
    %c0_273 = arith.constant 0 : index
    %167 = vector.load %arg1[%c0_269, %c0_270, %c0_271, %c0_272, %c0_273] : memref<1x4x8x8x8xbf16, #tpu.memory_space<vmem>>, vector<1x1x8x8x8xbf16>
    %168 = vector.shape_cast %167 : vector<1x1x8x8x8xbf16> to vector<8x8x8xbf16>
    %c3_274 = arith.constant 3 : index
    %c0_275 = arith.constant 0 : index
    %c0_276 = arith.constant 0 : index
    %c0_277 = arith.constant 0 : index
    %169 = vector.load %arg11[%c3_274, %c0_275, %c0_276, %c0_277] : memref<4x8x8x72xbf16, #tpu.memory_space<vmem>>, vector<1x8x8x8xbf16>
    %170 = vector.shape_cast %169 : vector<1x8x8x8xbf16> to vector<8x8x8xbf16>
    %171 = vector.shape_cast %168 : vector<8x8x8xbf16> to vector<1x8x8x8xbf16>
    tpu.vector_store %arg11[%c3_274, %c0_275, %c0_276, %c0_277], %171 {strides = array<i32>} : memref<4x8x8x72xbf16, #tpu.memory_space<vmem>>, vector<1x8x8x8xbf16>,
    %c0_278 = arith.constant 0 : index
    %c1_279 = arith.constant 1 : index
    %c0_280 = arith.constant 0 : index
    %c0_281 = arith.constant 0 : index
    %c0_282 = arith.constant 0 : index
    %172 = vector.load %arg1[%c0_278, %c1_279, %c0_280, %c0_281, %c0_282] : memref<1x4x8x8x8xbf16, #tpu.memory_space<vmem>>, vector<1x1x8x8x8xbf16>
    %173 = vector.shape_cast %172 : vector<1x1x8x8x8xbf16> to vector<8x8x8xbf16>
    %c3_283 = arith.constant 3 : index
    %c0_284 = arith.constant 0 : index
    %c0_285 = arith.constant 0 : index
    %c8_286 = arith.constant 8 : index
    %174 = vector.load %arg11[%c3_283, %c0_284, %c0_285, %c8_286] : memref<4x8x8x72xbf16, #tpu.memory_space<vmem>>, vector<1x8x8x8xbf16>
    %175 = vector.shape_cast %174 : vector<1x8x8x8xbf16> to vector<8x8x8xbf16>
    %176 = vector.shape_cast %173 : vector<8x8x8xbf16> to vector<1x8x8x8xbf16>
    tpu.vector_store %arg11[%c3_283, %c0_284, %c0_285, %c8_286], %176 {strides = array<i32>} : memref<4x8x8x72xbf16, #tpu.memory_space<vmem>>, vector<1x8x8x8xbf16>,
    %c0_287 = arith.constant 0 : index
    %c0_288 = arith.constant 0 : index
    %c0_289 = arith.constant 0 : index
    %c1_290 = arith.constant 1 : index
    %c0_291 = arith.constant 0 : index
    %177 = vector.load %arg1[%c0_287, %c0_288, %c0_289, %c1_290, %c0_291] : memref<1x4x8x8x8xbf16, #tpu.memory_space<vmem>>, vector<1x1x8x7x8xbf16>
    %178 = vector.shape_cast %177 : vector<1x1x8x7x8xbf16> to vector<8x7x8xbf16>
    %c3_292 = arith.constant 3 : index
    %c0_293 = arith.constant 0 : index
    %c0_294 = arith.constant 0 : index
    %c16_295 = arith.constant 16 : index
    %179 = vector.load %arg11[%c3_292, %c0_293, %c0_294, %c16_295] : memref<4x8x8x72xbf16, #tpu.memory_space<vmem>>, vector<1x8x7x8xbf16>
    %180 = vector.shape_cast %179 : vector<1x8x7x8xbf16> to vector<8x7x8xbf16>
    %181 = vector.shape_cast %178 : vector<8x7x8xbf16> to vector<1x8x7x8xbf16>
    tpu.vector_store %arg11[%c3_292, %c0_293, %c0_294, %c16_295], %181 {strides = array<i32>} : memref<4x8x8x72xbf16, #tpu.memory_space<vmem>>, vector<1x8x7x8xbf16>,
    %c0_296 = arith.constant 0 : index
    %c2_297 = arith.constant 2 : index
    %c0_298 = arith.constant 0 : index
    %c0_299 = arith.constant 0 : index
    %c0_300 = arith.constant 0 : index
    %182 = vector.load %arg1[%c0_296, %c2_297, %c0_298, %c0_299, %c0_300] : memref<1x4x8x8x8xbf16, #tpu.memory_space<vmem>>, vector<1x1x8x8x8xbf16>
    %183 = vector.shape_cast %182 : vector<1x1x8x8x8xbf16> to vector<8x8x8xbf16>
    %c3_301 = arith.constant 3 : index
    %c0_302 = arith.constant 0 : index
    %c0_303 = arith.constant 0 : index
    %c24_304 = arith.constant 24 : index
    %184 = vector.load %arg11[%c3_301, %c0_302, %c0_303, %c24_304] : memref<4x8x8x72xbf16, #tpu.memory_space<vmem>>, vector<1x8x8x8xbf16>
    %185 = vector.shape_cast %184 : vector<1x8x8x8xbf16> to vector<8x8x8xbf16>
    %186 = vector.shape_cast %183 : vector<8x8x8xbf16> to vector<1x8x8x8xbf16>
    tpu.vector_store %arg11[%c3_301, %c0_302, %c0_303, %c24_304], %186 {strides = array<i32>} : memref<4x8x8x72xbf16, #tpu.memory_space<vmem>>, vector<1x8x8x8xbf16>,
    %c0_305 = arith.constant 0 : index
    %c3_306 = arith.constant 3 : index
    %c0_307 = arith.constant 0 : index
    %c0_308 = arith.constant 0 : index
    %c0_309 = arith.constant 0 : index
    %187 = vector.load %arg1[%c0_305, %c3_306, %c0_307, %c0_308, %c0_309] : memref<1x4x8x8x8xbf16, #tpu.memory_space<vmem>>, vector<1x1x8x8x8xbf16>
    %188 = vector.shape_cast %187 : vector<1x1x8x8x8xbf16> to vector<8x8x8xbf16>
    %c3_310 = arith.constant 3 : index
    %c0_311 = arith.constant 0 : index
    %c0_312 = arith.constant 0 : index
    %c32_313 = arith.constant 32 : index
    %189 = vector.load %arg11[%c3_310, %c0_311, %c0_312, %c32_313] : memref<4x8x8x72xbf16, #tpu.memory_space<vmem>>, vector<1x8x8x8xbf16>
    %190 = vector.shape_cast %189 : vector<1x8x8x8xbf16> to vector<8x8x8xbf16>
    %191 = vector.shape_cast %188 : vector<8x8x8xbf16> to vector<1x8x8x8xbf16>
    tpu.vector_store %arg11[%c3_310, %c0_311, %c0_312, %c32_313], %191 {strides = array<i32>} : memref<4x8x8x72xbf16, #tpu.memory_space<vmem>>, vector<1x8x8x8xbf16>,
    %c0_314 = arith.constant 0 : index
    %c2_315 = arith.constant 2 : index
    %c0_316 = arith.constant 0 : index
    %c1_317 = arith.constant 1 : index
    %c0_318 = arith.constant 0 : index
    %192 = vector.load %arg1[%c0_314, %c2_315, %c0_316, %c1_317, %c0_318] : memref<1x4x8x8x8xbf16, #tpu.memory_space<vmem>>, vector<1x1x8x7x8xbf16>
    %193 = vector.shape_cast %192 : vector<1x1x8x7x8xbf16> to vector<8x7x8xbf16>
    %c3_319 = arith.constant 3 : index
    %c0_320 = arith.constant 0 : index
    %c0_321 = arith.constant 0 : index
    %c40_322 = arith.constant 40 : index
    %194 = vector.load %arg11[%c3_319, %c0_320, %c0_321, %c40_322] : memref<4x8x8x72xbf16, #tpu.memory_space<vmem>>, vector<1x8x7x8xbf16>
    %195 = vector.shape_cast %194 : vector<1x8x7x8xbf16> to vector<8x7x8xbf16>
    %196 = vector.shape_cast %193 : vector<8x7x8xbf16> to vector<1x8x7x8xbf16>
    tpu.vector_store %arg11[%c3_319, %c0_320, %c0_321, %c40_322], %196 {strides = array<i32>} : memref<4x8x8x72xbf16, #tpu.memory_space<vmem>>, vector<1x8x7x8xbf16>,
    %c0_323 = arith.constant 0 : index
    %c0_324 = arith.constant 0 : index
    %c1_325 = arith.constant 1 : index
    %c0_326 = arith.constant 0 : index
    %c0_327 = arith.constant 0 : index
    %197 = vector.load %arg1[%c0_323, %c0_324, %c1_325, %c0_326, %c0_327] : memref<1x4x8x8x8xbf16, #tpu.memory_space<vmem>>, vector<1x1x7x8x8xbf16>
    %198 = vector.shape_cast %197 : vector<1x1x7x8x8xbf16> to vector<7x8x8xbf16>
    %c3_328 = arith.constant 3 : index
    %c0_329 = arith.constant 0 : index
    %c0_330 = arith.constant 0 : index
    %c48_331 = arith.constant 48 : index
    %199 = vector.load %arg11[%c3_328, %c0_329, %c0_330, %c48_331] : memref<4x8x8x72xbf16, #tpu.memory_space<vmem>>, vector<1x7x8x8xbf16>
    %200 = vector.shape_cast %199 : vector<1x7x8x8xbf16> to vector<7x8x8xbf16>
    %201 = vector.shape_cast %198 : vector<7x8x8xbf16> to vector<1x7x8x8xbf16>
    tpu.vector_store %arg11[%c3_328, %c0_329, %c0_330, %c48_331], %201 {strides = array<i32>} : memref<4x8x8x72xbf16, #tpu.memory_space<vmem>>, vector<1x7x8x8xbf16>,
    %c0_332 = arith.constant 0 : index
    %c1_333 = arith.constant 1 : index
    %c1_334 = arith.constant 1 : index
    %c0_335 = arith.constant 0 : index
    %c0_336 = arith.constant 0 : index
    %202 = vector.load %arg1[%c0_332, %c1_333, %c1_334, %c0_335, %c0_336] : memref<1x4x8x8x8xbf16, #tpu.memory_space<vmem>>, vector<1x1x7x8x8xbf16>
    %203 = vector.shape_cast %202 : vector<1x1x7x8x8xbf16> to vector<7x8x8xbf16>
    %c3_337 = arith.constant 3 : index
    %c0_338 = arith.constant 0 : index
    %c0_339 = arith.constant 0 : index
    %c56_340 = arith.constant 56 : index
    %204 = vector.load %arg11[%c3_337, %c0_338, %c0_339, %c56_340] : memref<4x8x8x72xbf16, #tpu.memory_space<vmem>>, vector<1x7x8x8xbf16>
    %205 = vector.shape_cast %204 : vector<1x7x8x8xbf16> to vector<7x8x8xbf16>
    %206 = vector.shape_cast %203 : vector<7x8x8xbf16> to vector<1x7x8x8xbf16>
    tpu.vector_store %arg11[%c3_337, %c0_338, %c0_339, %c56_340], %206 {strides = array<i32>} : memref<4x8x8x72xbf16, #tpu.memory_space<vmem>>, vector<1x7x8x8xbf16>,
    %c0_341 = arith.constant 0 : index
    %c0_342 = arith.constant 0 : index
    %c1_343 = arith.constant 1 : index
    %c1_344 = arith.constant 1 : index
    %c0_345 = arith.constant 0 : index
    %207 = vector.load %arg1[%c0_341, %c0_342, %c1_343, %c1_344, %c0_345] : memref<1x4x8x8x8xbf16, #tpu.memory_space<vmem>>, vector<1x1x7x7x8xbf16>
    %208 = vector.shape_cast %207 : vector<1x1x7x7x8xbf16> to vector<7x7x8xbf16>
    %c3_346 = arith.constant 3 : index
    %c0_347 = arith.constant 0 : index
    %c0_348 = arith.constant 0 : index
    %c64_349 = arith.constant 64 : index
    %209 = vector.load %arg11[%c3_346, %c0_347, %c0_348, %c64_349] : memref<4x8x8x72xbf16, #tpu.memory_space<vmem>>, vector<1x7x7x8xbf16>
    %210 = vector.shape_cast %209 : vector<1x7x7x8xbf16> to vector<7x7x8xbf16>
    %211 = vector.shape_cast %208 : vector<7x7x8xbf16> to vector<1x7x7x8xbf16>
    tpu.vector_store %arg11[%c3_346, %c0_347, %c0_348, %c64_349], %211 {strides = array<i32>} : memref<4x8x8x72xbf16, #tpu.memory_space<vmem>>, vector<1x7x7x8xbf16>,
    %c0_350 = arith.constant 0 : index
    %c0_351 = arith.constant 0 : index
    %c0_352 = arith.constant 0 : index
    %c0_353 = arith.constant 0 : index
    %212 = vector.load %arg11[%c0_350, %c0_351, %c0_352, %c0_353] : memref<4x8x8x72xbf16, #tpu.memory_space<vmem>>, vector<4x8x8x72xbf16>
    %213 = vector.shape_cast %212 : vector<4x8x8x72xbf16> to vector<256x72xbf16>
    %c0_354 = arith.constant 0 : index
    %c0_355 = arith.constant 0 : index
    %214 = vector.load %arg3[%c0_354, %c0_355] : memref<72x8xbf16, #tpu.memory_space<vmem>>, vector<72x8xbf16>
    %cst_356 = arith.constant dense<0.000000e+00> : vector<256x8xf32>
    %215 = tpu.matmul %213, %214, %cst_356 {dimension_numbers = #tpu.dot_dimension_numbers<[1], [0], [0], [1], [0, 0, 1, 1], [], []>} : vector<256x72xbf16>, vector<72x8xbf16>, vector<256x8xf32> -> vector<256x8xf32>
    %c0_357 = arith.constant 0 : index
    %c0_358 = arith.constant 0 : index
    %c0_359 = arith.constant 0 : index
    %c0_360 = arith.constant 0 : index
    %216 = vector.load %arg11[%c0_357, %c0_358, %c0_359, %c0_360] : memref<4x8x8x72xbf16, #tpu.memory_space<vmem>>, vector<1x8x8x72xbf16>
    %217 = vector.shape_cast %216 : vector<1x8x8x72xbf16> to vector<8x8x72xbf16>
    %218 = vector.shape_cast %217 : vector<8x8x72xbf16> to vector<64x72xbf16>
    %c0_361 = arith.constant 0 : index
    %c0_362 = arith.constant 0 : index
    %219 = vector.load %arg4[%c0_361, %c0_362] : memref<72x16xbf16, #tpu.memory_space<vmem>>, vector<72x16xbf16>
    %cst_363 = arith.constant dense<0.000000e+00> : vector<64x16xf32>
    %220 = tpu.matmul %218, %219, %cst_363 {dimension_numbers = #tpu.dot_dimension_numbers<[1], [0], [0], [1], [0, 0, 1, 1], [], []>} : vector<64x72xbf16>, vector<72x16xbf16>, vector<64x16xf32> -> vector<64x16xf32>
    %221 = vector.shape_cast %220 : vector<64x16xf32> to vector<1x8x8x16xf32>
    %c0_364 = arith.constant 0 : index
    %c0_365 = arith.constant 0 : index
    %c0_366 = arith.constant 0 : index
    %c0_367 = arith.constant 0 : index
    %222 = vector.load %arg7[%c0_364, %c0_365, %c0_366, %c0_367] : memref<1x8x8x16xf32, #tpu.memory_space<vmem>>, vector<1x8x8x16xf32>
    tpu.vector_store %arg7[%c0_364, %c0_365, %c0_366, %c0_367], %221 {strides = array<i32>} : memref<1x8x8x16xf32, #tpu.memory_space<vmem>>, vector<1x8x8x16xf32>,
    %cst_368 = arith.constant 0.000000e+00 : bf16
    %223 = vector.broadcast %cst_368 : bf16 to vector<1x8x144xbf16>
    %c0_369 = arith.constant 0 : index
    %c0_370 = arith.constant 0 : index
    %c0_371 = arith.constant 0 : index
    %224 = vector.load %arg13[%c0_369, %c0_370, %c0_371] : memref<8x8x144xbf16, #tpu.memory_space<vmem>>, vector<1x8x144xbf16>
    tpu.vector_store %arg13[%c0_369, %c0_370, %c0_371], %223 {strides = array<i32>} : memref<8x8x144xbf16, #tpu.memory_space<vmem>>, vector<1x8x144xbf16>,
    %cst_372 = arith.constant 0.000000e+00 : bf16
    %225 = vector.broadcast %cst_372 : bf16 to vector<1x8x144xbf16>
    %c7_373 = arith.constant 7 : index
    %c0_374 = arith.constant 0 : index
    %c0_375 = arith.constant 0 : index
    %226 = vector.load %arg13[%c7_373, %c0_374, %c0_375] : memref<8x8x144xbf16, #tpu.memory_space<vmem>>, vector<1x8x144xbf16>
    tpu.vector_store %arg13[%c7_373, %c0_374, %c0_375], %225 {strides = array<i32>} : memref<8x8x144xbf16, #tpu.memory_space<vmem>>, vector<1x8x144xbf16>,
    %cst_376 = arith.constant 0.000000e+00 : bf16
    %227 = vector.broadcast %cst_376 : bf16 to vector<8x1x144xbf16>
    %c0_377 = arith.constant 0 : index
    %c0_378 = arith.constant 0 : index
    %c0_379 = arith.constant 0 : index
    %228 = vector.load %arg13[%c0_377, %c0_378, %c0_379] : memref<8x8x144xbf16, #tpu.memory_space<vmem>>, vector<8x1x144xbf16>
    tpu.vector_store %arg13[%c0_377, %c0_378, %c0_379], %227 {strides = array<i32>} : memref<8x8x144xbf16, #tpu.memory_space<vmem>>, vector<8x1x144xbf16>,
    %cst_380 = arith.constant 0.000000e+00 : bf16
    %229 = vector.broadcast %cst_380 : bf16 to vector<8x1x144xbf16>
    %c0_381 = arith.constant 0 : index
    %c7_382 = arith.constant 7 : index
    %c0_383 = arith.constant 0 : index
    %230 = vector.load %arg13[%c0_381, %c7_382, %c0_383] : memref<8x8x144xbf16, #tpu.memory_space<vmem>>, vector<8x1x144xbf16>
    tpu.vector_store %arg13[%c0_381, %c7_382, %c0_383], %229 {strides = array<i32>} : memref<8x8x144xbf16, #tpu.memory_space<vmem>>, vector<8x1x144xbf16>,
    %231 = vector.shape_cast %220 : vector<64x16xf32> to vector<8x8x16xf32>
    %232 = arith.truncf %231 : vector<8x8x16xf32> to vector<8x8x16xbf16>
    %233 = vector.extract_strided_slice %232 {offsets = [0, 0, 0], sizes = [7, 7, 16], strides = [1, 1, 1]} : vector<8x8x16xbf16> to vector<7x7x16xbf16>
    %c1_384 = arith.constant 1 : index
    %c1_385 = arith.constant 1 : index
    %c0_386 = arith.constant 0 : index
    %234 = vector.load %arg13[%c1_384, %c1_385, %c0_386] : memref<8x8x144xbf16, #tpu.memory_space<vmem>>, vector<7x7x16xbf16>
    tpu.vector_store %arg13[%c1_384, %c1_385, %c0_386], %233 {strides = array<i32>} : memref<8x8x144xbf16, #tpu.memory_space<vmem>>, vector<7x7x16xbf16>,
    %235 = vector.extract_strided_slice %232 {offsets = [0, 0, 0], sizes = [7, 8, 16], strides = [1, 1, 1]} : vector<8x8x16xbf16> to vector<7x8x16xbf16>
    %c1_387 = arith.constant 1 : index
    %c0_388 = arith.constant 0 : index
    %c16_389 = arith.constant 16 : index
    %236 = vector.load %arg13[%c1_387, %c0_388, %c16_389] : memref<8x8x144xbf16, #tpu.memory_space<vmem>>, vector<7x8x16xbf16>
    tpu.vector_store %arg13[%c1_387, %c0_388, %c16_389], %235 {strides = array<i32>} : memref<8x8x144xbf16, #tpu.memory_space<vmem>>, vector<7x8x16xbf16>,
    %237 = vector.extract_strided_slice %232 {offsets = [0, 1, 0], sizes = [7, 7, 16], strides = [1, 1, 1]} : vector<8x8x16xbf16> to vector<7x7x16xbf16>
    %c1_390 = arith.constant 1 : index
    %c0_391 = arith.constant 0 : index
    %c32_392 = arith.constant 32 : index
    %238 = vector.load %arg13[%c1_390, %c0_391, %c32_392] : memref<8x8x144xbf16, #tpu.memory_space<vmem>>, vector<7x7x16xbf16>
    tpu.vector_store %arg13[%c1_390, %c0_391, %c32_392], %237 {strides = array<i32>} : memref<8x8x144xbf16, #tpu.memory_space<vmem>>, vector<7x7x16xbf16>,
    %239 = vector.extract_strided_slice %232 {offsets = [0, 0, 0], sizes = [8, 7, 16], strides = [1, 1, 1]} : vector<8x8x16xbf16> to vector<8x7x16xbf16>
    %c0_393 = arith.constant 0 : index
    %c1_394 = arith.constant 1 : index
    %c48_395 = arith.constant 48 : index
    %240 = vector.load %arg13[%c0_393, %c1_394, %c48_395] : memref<8x8x144xbf16, #tpu.memory_space<vmem>>, vector<8x7x16xbf16>
    tpu.vector_store %arg13[%c0_393, %c1_394, %c48_395], %239 {strides = array<i32>} : memref<8x8x144xbf16, #tpu.memory_space<vmem>>, vector<8x7x16xbf16>,
    %c0_396 = arith.constant 0 : index
    %c0_397 = arith.constant 0 : index
    %c64_398 = arith.constant 64 : index
    %241 = vector.load %arg13[%c0_396, %c0_397, %c64_398] : memref<8x8x144xbf16, #tpu.memory_space<vmem>>, vector<8x8x16xbf16>
    tpu.vector_store %arg13[%c0_396, %c0_397, %c64_398], %232 {strides = array<i32>} : memref<8x8x144xbf16, #tpu.memory_space<vmem>>, vector<8x8x16xbf16>,
    %242 = vector.extract_strided_slice %232 {offsets = [0, 1, 0], sizes = [8, 7, 16], strides = [1, 1, 1]} : vector<8x8x16xbf16> to vector<8x7x16xbf16>
    %c0_399 = arith.constant 0 : index
    %c0_400 = arith.constant 0 : index
    %c80 = arith.constant 80 : index
    %243 = vector.load %arg13[%c0_399, %c0_400, %c80] : memref<8x8x144xbf16, #tpu.memory_space<vmem>>, vector<8x7x16xbf16>
    tpu.vector_store %arg13[%c0_399, %c0_400, %c80], %242 {strides = array<i32>} : memref<8x8x144xbf16, #tpu.memory_space<vmem>>, vector<8x7x16xbf16>,
    %244 = vector.extract_strided_slice %232 {offsets = [1, 0, 0], sizes = [7, 7, 16], strides = [1, 1, 1]} : vector<8x8x16xbf16> to vector<7x7x16xbf16>
    %c0_401 = arith.constant 0 : index
    %c1_402 = arith.constant 1 : index
    %c96 = arith.constant 96 : index
    %245 = vector.load %arg13[%c0_401, %c1_402, %c96] : memref<8x8x144xbf16, #tpu.memory_space<vmem>>, vector<7x7x16xbf16>
    tpu.vector_store %arg13[%c0_401, %c1_402, %c96], %244 {strides = array<i32>} : memref<8x8x144xbf16, #tpu.memory_space<vmem>>, vector<7x7x16xbf16>,
    %246 = vector.extract_strided_slice %232 {offsets = [1, 0, 0], sizes = [7, 8, 16], strides = [1, 1, 1]} : vector<8x8x16xbf16> to vector<7x8x16xbf16>
    %c0_403 = arith.constant 0 : index
    %c0_404 = arith.constant 0 : index
    %c112 = arith.constant 112 : index
    %247 = vector.load %arg13[%c0_403, %c0_404, %c112] : memref<8x8x144xbf16, #tpu.memory_space<vmem>>, vector<7x8x16xbf16>
    tpu.vector_store %arg13[%c0_403, %c0_404, %c112], %246 {strides = array<i32>} : memref<8x8x144xbf16, #tpu.memory_space<vmem>>, vector<7x8x16xbf16>,
    %248 = vector.extract_strided_slice %232 {offsets = [1, 1, 0], sizes = [7, 7, 16], strides = [1, 1, 1]} : vector<8x8x16xbf16> to vector<7x7x16xbf16>
    %c0_405 = arith.constant 0 : index
    %c0_406 = arith.constant 0 : index
    %c128 = arith.constant 128 : index
    %249 = vector.load %arg13[%c0_405, %c0_406, %c128] : memref<8x8x144xbf16, #tpu.memory_space<vmem>>, vector<7x7x16xbf16>
    tpu.vector_store %arg13[%c0_405, %c0_406, %c128], %248 {strides = array<i32>} : memref<8x8x144xbf16, #tpu.memory_space<vmem>>, vector<7x7x16xbf16>,
    %c0_407 = arith.constant 0 : index
    %c0_408 = arith.constant 0 : index
    %c0_409 = arith.constant 0 : index
    %250 = vector.load %arg13[%c0_407, %c0_408, %c0_409] : memref<8x8x144xbf16, #tpu.memory_space<vmem>>, vector<8x8x144xbf16>
    %251 = vector.shape_cast %250 : vector<8x8x144xbf16> to vector<64x144xbf16>
    %c0_410 = arith.constant 0 : index
    %c0_411 = arith.constant 0 : index
    %252 = vector.load %arg6[%c0_410, %c0_411] : memref<144x16xbf16, #tpu.memory_space<vmem>>, vector<144x16xbf16>
    %cst_412 = arith.constant dense<0.000000e+00> : vector<64x16xf32>
    %253 = tpu.matmul %251, %252, %cst_412 {dimension_numbers = #tpu.dot_dimension_numbers<[1], [0], [0], [1], [0, 0, 1, 1], [], []>} : vector<64x144xbf16>, vector<144x16xbf16>, vector<64x16xf32> -> vector<64x16xf32>
    %254 = vector.shape_cast %253 : vector<64x16xf32> to vector<1x8x8x16xf32>
    %255 = arith.truncf %254 : vector<1x8x8x16xf32> to vector<1x8x8x16xbf16>
    %c0_413 = arith.constant 0 : index
    %c0_414 = arith.constant 0 : index
    %c0_415 = arith.constant 0 : index
    %c0_416 = arith.constant 0 : index
    %256 = vector.load %arg9[%c0_413, %c0_414, %c0_415, %c0_416] : memref<1x8x8x16xbf16, #tpu.memory_space<vmem>>, vector<1x8x8x16xbf16>
    tpu.vector_store %arg9[%c0_413, %c0_414, %c0_415, %c0_416], %255 {strides = array<i32>} : memref<1x8x8x16xbf16, #tpu.memory_space<vmem>>, vector<1x8x8x16xbf16>,
    %cst_417 = arith.constant 0.000000e+00 : bf16
    %257 = vector.broadcast %cst_417 : bf16 to vector<1x8x72xbf16>
    %c0_418 = arith.constant 0 : index
    %c0_419 = arith.constant 0 : index
    %c0_420 = arith.constant 0 : index
    %258 = vector.load %arg12[%c0_418, %c0_419, %c0_420] : memref<8x8x72xbf16, #tpu.memory_space<vmem>>, vector<1x8x72xbf16>
    tpu.vector_store %arg12[%c0_418, %c0_419, %c0_420], %257 {strides = array<i32>} : memref<8x8x72xbf16, #tpu.memory_space<vmem>>, vector<1x8x72xbf16>,
    %cst_421 = arith.constant 0.000000e+00 : bf16
    %259 = vector.broadcast %cst_421 : bf16 to vector<8x1x72xbf16>
    %c0_422 = arith.constant 0 : index
    %c0_423 = arith.constant 0 : index
    %c0_424 = arith.constant 0 : index
    %260 = vector.load %arg12[%c0_422, %c0_423, %c0_424] : memref<8x8x72xbf16, #tpu.memory_space<vmem>>, vector<8x1x72xbf16>
    tpu.vector_store %arg12[%c0_422, %c0_423, %c0_424], %259 {strides = array<i32>} : memref<8x8x72xbf16, #tpu.memory_space<vmem>>, vector<8x1x72xbf16>,
    %c0_425 = arith.constant 0 : index
    %c0_426 = arith.constant 0 : index
    %c0_427 = arith.constant 0 : index
    %c0_428 = arith.constant 0 : index
    %c0_429 = arith.constant 0 : index
    %261 = vector.load %arg2[%c0_425, %c0_426, %c0_427, %c0_428, %c0_429] : memref<1x4x8x8x8xbf16, #tpu.memory_space<vmem>>, vector<1x1x8x8x8xbf16>
    %262 = vector.shape_cast %261 : vector<1x1x8x8x8xbf16> to vector<8x8x8xbf16>
    %263 = arith.extf %262 : vector<8x8x8xbf16> to vector<8x8x8xf32>
    %264 = vector.extract_strided_slice %215 {offsets = [0, 0], sizes = [64, 8], strides = [1, 1]} : vector<256x8xf32> to vector<64x8xf32>
    %265 = vector.shape_cast %264 : vector<64x8xf32> to vector<8x8x8xf32>
    %266 = arith.subf %263, %265 : vector<8x8x8xf32>
    %267 = arith.truncf %266 : vector<8x8x8xf32> to vector<8x8x8xbf16>
    %c0_430 = arith.constant 0 : index
    %c0_431 = arith.constant 0 : index
    %c32_432 = arith.constant 32 : index
    %268 = vector.load %arg12[%c0_430, %c0_431, %c32_432] : memref<8x8x72xbf16, #tpu.memory_space<vmem>>, vector<8x8x8xbf16>
    tpu.vector_store %arg12[%c0_430, %c0_431, %c32_432], %267 {strides = array<i32>} : memref<8x8x72xbf16, #tpu.memory_space<vmem>>, vector<8x8x8xbf16>,
    %c0_433 = arith.constant 0 : index
    %c1_434 = arith.constant 1 : index
    %c0_435 = arith.constant 0 : index
    %c0_436 = arith.constant 0 : index
    %c0_437 = arith.constant 0 : index
    %269 = vector.load %arg2[%c0_433, %c1_434, %c0_435, %c0_436, %c0_437] : memref<1x4x8x8x8xbf16, #tpu.memory_space<vmem>>, vector<1x1x8x8x8xbf16>
    %270 = vector.shape_cast %269 : vector<1x1x8x8x8xbf16> to vector<8x8x8xbf16>
    %271 = arith.extf %270 : vector<8x8x8xbf16> to vector<8x8x8xf32>
    %272 = vector.extract_strided_slice %215 {offsets = [64, 0], sizes = [64, 8], strides = [1, 1]} : vector<256x8xf32> to vector<64x8xf32>
    %273 = vector.shape_cast %272 : vector<64x8xf32> to vector<8x8x8xf32>
    %274 = arith.subf %271, %273 : vector<8x8x8xf32>
    %275 = arith.truncf %274 : vector<8x8x8xf32> to vector<8x8x8xbf16>
    %276 = vector.extract_strided_slice %275 {offsets = [0, 0, 0], sizes = [8, 7, 8], strides = [1, 1, 1]} : vector<8x8x8xbf16> to vector<8x7x8xbf16>
    %c0_438 = arith.constant 0 : index
    %c1_439 = arith.constant 1 : index
    %c24_440 = arith.constant 24 : index
    %277 = vector.load %arg12[%c0_438, %c1_439, %c24_440] : memref<8x8x72xbf16, #tpu.memory_space<vmem>>, vector<8x7x8xbf16>
    tpu.vector_store %arg12[%c0_438, %c1_439, %c24_440], %276 {strides = array<i32>} : memref<8x8x72xbf16, #tpu.memory_space<vmem>>, vector<8x7x8xbf16>,
    %c0_441 = arith.constant 0 : index
    %c0_442 = arith.constant 0 : index
    %c40_443 = arith.constant 40 : index
    %278 = vector.load %arg12[%c0_441, %c0_442, %c40_443] : memref<8x8x72xbf16, #tpu.memory_space<vmem>>, vector<8x8x8xbf16>
    tpu.vector_store %arg12[%c0_441, %c0_442, %c40_443], %275 {strides = array<i32>} : memref<8x8x72xbf16, #tpu.memory_space<vmem>>, vector<8x8x8xbf16>,
    %c0_444 = arith.constant 0 : index
    %c2_445 = arith.constant 2 : index
    %c0_446 = arith.constant 0 : index
    %c0_447 = arith.constant 0 : index
    %c0_448 = arith.constant 0 : index
    %279 = vector.load %arg2[%c0_444, %c2_445, %c0_446, %c0_447, %c0_448] : memref<1x4x8x8x8xbf16, #tpu.memory_space<vmem>>, vector<1x1x8x8x8xbf16>
    %280 = vector.shape_cast %279 : vector<1x1x8x8x8xbf16> to vector<8x8x8xbf16>
    %281 = arith.extf %280 : vector<8x8x8xbf16> to vector<8x8x8xf32>
    %282 = vector.extract_strided_slice %215 {offsets = [128, 0], sizes = [64, 8], strides = [1, 1]} : vector<256x8xf32> to vector<64x8xf32>
    %283 = vector.shape_cast %282 : vector<64x8xf32> to vector<8x8x8xf32>
    %284 = arith.subf %281, %283 : vector<8x8x8xf32>
    %285 = arith.truncf %284 : vector<8x8x8xf32> to vector<8x8x8xbf16>
    %286 = vector.extract_strided_slice %285 {offsets = [0, 0, 0], sizes = [7, 8, 8], strides = [1, 1, 1]} : vector<8x8x8xbf16> to vector<7x8x8xbf16>
    %c1_449 = arith.constant 1 : index
    %c0_450 = arith.constant 0 : index
    %c8_451 = arith.constant 8 : index
    %287 = vector.load %arg12[%c1_449, %c0_450, %c8_451] : memref<8x8x72xbf16, #tpu.memory_space<vmem>>, vector<7x8x8xbf16>
    tpu.vector_store %arg12[%c1_449, %c0_450, %c8_451], %286 {strides = array<i32>} : memref<8x8x72xbf16, #tpu.memory_space<vmem>>, vector<7x8x8xbf16>,
    %c0_452 = arith.constant 0 : index
    %c0_453 = arith.constant 0 : index
    %c56_454 = arith.constant 56 : index
    %288 = vector.load %arg12[%c0_452, %c0_453, %c56_454] : memref<8x8x72xbf16, #tpu.memory_space<vmem>>, vector<8x8x8xbf16>
    tpu.vector_store %arg12[%c0_452, %c0_453, %c56_454], %285 {strides = array<i32>} : memref<8x8x72xbf16, #tpu.memory_space<vmem>>, vector<8x8x8xbf16>,
    %c0_455 = arith.constant 0 : index
    %c3_456 = arith.constant 3 : index
    %c0_457 = arith.constant 0 : index
    %c0_458 = arith.constant 0 : index
    %c0_459 = arith.constant 0 : index
    %289 = vector.load %arg2[%c0_455, %c3_456, %c0_457, %c0_458, %c0_459] : memref<1x4x8x8x8xbf16, #tpu.memory_space<vmem>>, vector<1x1x8x8x8xbf16>
    %290 = vector.shape_cast %289 : vector<1x1x8x8x8xbf16> to vector<8x8x8xbf16>
    %291 = arith.extf %290 : vector<8x8x8xbf16> to vector<8x8x8xf32>
    %292 = vector.extract_strided_slice %215 {offsets = [192, 0], sizes = [64, 8], strides = [1, 1]} : vector<256x8xf32> to vector<64x8xf32>
    %293 = vector.shape_cast %292 : vector<64x8xf32> to vector<8x8x8xf32>
    %294 = arith.subf %291, %293 : vector<8x8x8xf32>
    %295 = arith.truncf %294 : vector<8x8x8xf32> to vector<8x8x8xbf16>
    %296 = vector.extract_strided_slice %295 {offsets = [0, 0, 0], sizes = [7, 7, 8], strides = [1, 1, 1]} : vector<8x8x8xbf16> to vector<7x7x8xbf16>
    %c1_460 = arith.constant 1 : index
    %c1_461 = arith.constant 1 : index
    %c0_462 = arith.constant 0 : index
    %297 = vector.load %arg12[%c1_460, %c1_461, %c0_462] : memref<8x8x72xbf16, #tpu.memory_space<vmem>>, vector<7x7x8xbf16>
    tpu.vector_store %arg12[%c1_460, %c1_461, %c0_462], %296 {strides = array<i32>} : memref<8x8x72xbf16, #tpu.memory_space<vmem>>, vector<7x7x8xbf16>,
    %298 = vector.extract_strided_slice %295 {offsets = [0, 0, 0], sizes = [7, 8, 8], strides = [1, 1, 1]} : vector<8x8x8xbf16> to vector<7x8x8xbf16>
    %c1_463 = arith.constant 1 : index
    %c0_464 = arith.constant 0 : index
    %c16_465 = arith.constant 16 : index
    %299 = vector.load %arg12[%c1_463, %c0_464, %c16_465] : memref<8x8x72xbf16, #tpu.memory_space<vmem>>, vector<7x8x8xbf16>
    tpu.vector_store %arg12[%c1_463, %c0_464, %c16_465], %298 {strides = array<i32>} : memref<8x8x72xbf16, #tpu.memory_space<vmem>>, vector<7x8x8xbf16>,
    %300 = vector.extract_strided_slice %295 {offsets = [0, 0, 0], sizes = [8, 7, 8], strides = [1, 1, 1]} : vector<8x8x8xbf16> to vector<8x7x8xbf16>
    %c0_466 = arith.constant 0 : index
    %c1_467 = arith.constant 1 : index
    %c48_468 = arith.constant 48 : index
    %301 = vector.load %arg12[%c0_466, %c1_467, %c48_468] : memref<8x8x72xbf16, #tpu.memory_space<vmem>>, vector<8x7x8xbf16>
    tpu.vector_store %arg12[%c0_466, %c1_467, %c48_468], %300 {strides = array<i32>} : memref<8x8x72xbf16, #tpu.memory_space<vmem>>, vector<8x7x8xbf16>,
    %c0_469 = arith.constant 0 : index
    %c0_470 = arith.constant 0 : index
    %c64_471 = arith.constant 64 : index
    %302 = vector.load %arg12[%c0_469, %c0_470, %c64_471] : memref<8x8x72xbf16, #tpu.memory_space<vmem>>, vector<8x8x8xbf16>
    tpu.vector_store %arg12[%c0_469, %c0_470, %c64_471], %295 {strides = array<i32>} : memref<8x8x72xbf16, #tpu.memory_space<vmem>>, vector<8x8x8xbf16>,
    %c0_472 = arith.constant 0 : index
    %c0_473 = arith.constant 0 : index
    %c0_474 = arith.constant 0 : index
    %303 = vector.load %arg12[%c0_472, %c0_473, %c0_474] : memref<8x8x72xbf16, #tpu.memory_space<vmem>>, vector<8x8x72xbf16>
    %304 = vector.shape_cast %303 : vector<8x8x72xbf16> to vector<64x72xbf16>
    %c0_475 = arith.constant 0 : index
    %c0_476 = arith.constant 0 : index
    %305 = vector.load %arg5[%c0_475, %c0_476] : memref<72x16xbf16, #tpu.memory_space<vmem>>, vector<72x16xbf16>
    %cst_477 = arith.constant dense<0.000000e+00> : vector<64x16xf32>
    %306 = tpu.matmul %304, %305, %cst_477 {dimension_numbers = #tpu.dot_dimension_numbers<[1], [0], [0], [1], [0, 0, 1, 1], [], []>} : vector<64x72xbf16>, vector<72x16xbf16>, vector<64x16xf32> -> vector<64x16xf32>
    %307 = vector.shape_cast %306 : vector<64x16xf32> to vector<1x8x8x16xf32>
    %308 = arith.truncf %307 : vector<1x8x8x16xf32> to vector<1x8x8x16xbf16>
    %c0_478 = arith.constant 0 : index
    %c0_479 = arith.constant 0 : index
    %c0_480 = arith.constant 0 : index
    %c0_481 = arith.constant 0 : index
    %309 = vector.load %arg8[%c0_478, %c0_479, %c0_480, %c0_481] : memref<1x8x8x16xbf16, #tpu.memory_space<vmem>>, vector<1x8x8x16xbf16>
    tpu.vector_store %arg8[%c0_478, %c0_479, %c0_480, %c0_481], %308 {strides = array<i32>} : memref<1x8x8x16xbf16, #tpu.memory_space<vmem>>, vector<1x8x8x16xbf16>,
    %cst_482 = arith.constant dense<0.000000e+00> : vector<16xf32>
    %310 = vector.multi_reduction <add>, %306, %cst_482 [0] : vector<64x16xf32> to vector<16xf32>
    %311 = vector.shape_cast %310 : vector<16xf32> to vector<1x16xf32>
    %c0_483 = arith.constant 0 : index
    %c0_484 = arith.constant 0 : index
    %c0_485 = arith.constant 0 : index
    %312 = vector.load %arg10[%c0_483, %c0_484, %c0_485] : memref<1x2x16xf32, #tpu.memory_space<vmem>>, vector<1x1x16xf32>
    %313 = vector.shape_cast %312 : vector<1x1x16xf32> to vector<1x16xf32>
    %314 = vector.shape_cast %311 : vector<1x16xf32> to vector<1x1x16xf32>
    tpu.vector_store %arg10[%c0_483, %c0_484, %c0_485], %314 {strides = array<i32>} : memref<1x2x16xf32, #tpu.memory_space<vmem>>, vector<1x1x16xf32>,
    %315 = arith.mulf %306, %306 : vector<64x16xf32>
    %cst_486 = arith.constant dense<0.000000e+00> : vector<16xf32>
    %316 = vector.multi_reduction <add>, %315, %cst_486 [0] : vector<64x16xf32> to vector<16xf32>
    %317 = vector.shape_cast %316 : vector<16xf32> to vector<1x16xf32>
    %c0_487 = arith.constant 0 : index
    %c1_488 = arith.constant 1 : index
    %c0_489 = arith.constant 0 : index
    %318 = vector.load %arg10[%c0_487, %c1_488, %c0_489] : memref<1x2x16xf32, #tpu.memory_space<vmem>>, vector<1x1x16xf32>
    %319 = vector.shape_cast %318 : vector<1x1x16xf32> to vector<1x16xf32>
    %320 = vector.shape_cast %317 : vector<1x16xf32> to vector<1x1x16xf32>
    tpu.vector_store %arg10[%c0_487, %c1_488, %c0_489], %320 {strides = array<i32>} : memref<1x2x16xf32, #tpu.memory_space<vmem>>, vector<1x1x16xf32>,
    return
  }
  func.func @transform_0(%arg0: i32) -> (i32, i32, i32, i32, i32) {
    %c0_i32 = arith.constant 0 : i32
    %c0_i32_0 = arith.constant 0 : i32
    %c0_i32_1 = arith.constant 0 : i32
    %c0_i32_2 = arith.constant 0 : i32
    %c0_i32_3 = arith.constant 0 : i32
    return %arg0, %c0_i32, %c0_i32_0, %c0_i32_1, %c0_i32_2 : i32, i32, i32, i32, i32
  }
  func.func @transform_1(%arg0: i32) -> (i32, i32, i32, i32, i32) {
    %c0_i32 = arith.constant 0 : i32
    %c0_i32_0 = arith.constant 0 : i32
    %c0_i32_1 = arith.constant 0 : i32
    %c0_i32_2 = arith.constant 0 : i32
    %c0_i32_3 = arith.constant 0 : i32
    return %arg0, %c0_i32, %c0_i32_0, %c0_i32_1, %c0_i32_2 : i32, i32, i32, i32, i32
  }
  func.func @transform_2(%arg0: i32) -> (i32, i32) {
    %c0_i32 = arith.constant 0 : i32
    %c0_i32_0 = arith.constant 0 : i32
    %c0_i32_1 = arith.constant 0 : i32
    return %c0_i32, %c0_i32_0 : i32, i32
  }
  func.func @transform_3(%arg0: i32) -> (i32, i32) {
    %c0_i32 = arith.constant 0 : i32
    %c0_i32_0 = arith.constant 0 : i32
    %c0_i32_1 = arith.constant 0 : i32
    return %c0_i32, %c0_i32_0 : i32, i32
  }
  func.func @transform_4(%arg0: i32) -> (i32, i32) {
    %c0_i32 = arith.constant 0 : i32
    %c0_i32_0 = arith.constant 0 : i32
    %c0_i32_1 = arith.constant 0 : i32
    return %c0_i32, %c0_i32_0 : i32, i32
  }
  func.func @transform_5(%arg0: i32) -> (i32, i32) {
    %c0_i32 = arith.constant 0 : i32
    %c0_i32_0 = arith.constant 0 : i32
    %c0_i32_1 = arith.constant 0 : i32
    return %c0_i32, %c0_i32_0 : i32, i32
  }
  func.func @transform_6(%arg0: i32) -> (i32, i32, i32, i32) {
    %c0_i32 = arith.constant 0 : i32
    %c0_i32_0 = arith.constant 0 : i32
    %c0_i32_1 = arith.constant 0 : i32
    %c0_i32_2 = arith.constant 0 : i32
    return %arg0, %c0_i32, %c0_i32_0, %c0_i32_1 : i32, i32, i32, i32
  }
  func.func @transform_7(%arg0: i32) -> (i32, i32, i32, i32) {
    %c0_i32 = arith.constant 0 : i32
    %c0_i32_0 = arith.constant 0 : i32
    %c0_i32_1 = arith.constant 0 : i32
    %c0_i32_2 = arith.constant 0 : i32
    return %arg0, %c0_i32, %c0_i32_0, %c0_i32_1 : i32, i32, i32, i32
  }
  func.func @transform_8(%arg0: i32) -> (i32, i32, i32, i32) {
    %c0_i32 = arith.constant 0 : i32
    %c0_i32_0 = arith.constant 0 : i32
    %c0_i32_1 = arith.constant 0 : i32
    %c0_i32_2 = arith.constant 0 : i32
    return %arg0, %c0_i32, %c0_i32_0, %c0_i32_1 : i32, i32, i32, i32
  }
  func.func @transform_9(%arg0: i32) -> (i32, i32, i32) {
    %c0_i32 = arith.constant 0 : i32
    %c0_i32_0 = arith.constant 0 : i32
    %c0_i32_1 = arith.constant 0 : i32
    return %arg0, %c0_i32, %c0_i32_0 : i32, i32, i32
  }
}

module attributes {stable_mosaic.version = 11 : i64} {
  func.func @_mg_restrict_stage2_kernel(%arg0: i32, %arg1: memref<1x8x8x16xbf16, #tpu.memory_space<vmem>>, %arg2: memref<1x8x8x16xbf16, #tpu.memory_space<vmem>>, %arg3: memref<1x16xf32, #tpu.memory_space<vmem>>, %arg4: memref<1x16xf32, #tpu.memory_space<vmem>>, %arg5: memref<1x8x8x16xf32, #tpu.memory_space<vmem>>) attributes {dimension_semantics = [#tpu.dimension_semantics<parallel>], iteration_bounds = array<i64: 2>, scalar_prefetch = 0 : i64, scratch_operands = 0 : i64, tpu.core_type = #tpu.core_type<tc>, window_params = [{transform_indices = @transform_0, window_bounds = array<i64: 1, 8, 8, 16>}, {transform_indices = @transform_1, window_bounds = array<i64: 1, 8, 8, 16>}, {pipeline_mode = #tpu.pipeline_mode<synchronous>, transform_indices = @transform_2, window_bounds = array<i64: 1, 16>}, {pipeline_mode = #tpu.pipeline_mode<synchronous>, transform_indices = @transform_3, window_bounds = array<i64: 1, 16>}, {transform_indices = @transform_4, window_bounds = array<i64: 1, 8, 8, 16>}]} {
    %c0 = arith.constant 0 : index
    %c0_0 = arith.constant 0 : index
    %c0_1 = arith.constant 0 : index
    %c0_2 = arith.constant 0 : index
    %0 = vector.load %arg1[%c0, %c0_0, %c0_1, %c0_2] : memref<1x8x8x16xbf16, #tpu.memory_space<vmem>>, vector<1x8x8x16xbf16>
    %1 = arith.extf %0 : vector<1x8x8x16xbf16> to vector<1x8x8x16xf32>
    %c0_3 = arith.constant 0 : index
    %c0_4 = arith.constant 0 : index
    %2 = vector.load %arg3[%c0_3, %c0_4] : memref<1x16xf32, #tpu.memory_space<vmem>>, vector<1x16xf32>
    %3 = vector.shape_cast %2 : vector<1x16xf32> to vector<1x1x1x16xf32>
    %4 = vector.broadcast %3 : vector<1x1x1x16xf32> to vector<1x8x8x16xf32>
    %5 = arith.mulf %1, %4 : vector<1x8x8x16xf32>
    %c0_5 = arith.constant 0 : index
    %c0_6 = arith.constant 0 : index
    %6 = vector.load %arg4[%c0_5, %c0_6] : memref<1x16xf32, #tpu.memory_space<vmem>>, vector<1x16xf32>
    %7 = vector.shape_cast %6 : vector<1x16xf32> to vector<1x1x1x16xf32>
    %8 = vector.broadcast %7 : vector<1x1x1x16xf32> to vector<1x8x8x16xf32>
    %9 = arith.addf %5, %8 : vector<1x8x8x16xf32>
    %cst = arith.constant 0.000000e+00 : f32
    %10 = vector.broadcast %cst : f32 to vector<1x8x8x16xf32>
    %11 = arith.maximumf %9, %10 : vector<1x8x8x16xf32>
    %c0_7 = arith.constant 0 : index
    %c0_8 = arith.constant 0 : index
    %c0_9 = arith.constant 0 : index
    %c0_10 = arith.constant 0 : index
    %12 = vector.load %arg2[%c0_7, %c0_8, %c0_9, %c0_10] : memref<1x8x8x16xbf16, #tpu.memory_space<vmem>>, vector<1x8x8x16xbf16>
    %13 = arith.extf %12 : vector<1x8x8x16xbf16> to vector<1x8x8x16xf32>
    %14 = arith.addf %11, %13 : vector<1x8x8x16xf32>
    %c0_11 = arith.constant 0 : index
    %c0_12 = arith.constant 0 : index
    %c0_13 = arith.constant 0 : index
    %c0_14 = arith.constant 0 : index
    %15 = vector.load %arg5[%c0_11, %c0_12, %c0_13, %c0_14] : memref<1x8x8x16xf32, #tpu.memory_space<vmem>>, vector<1x8x8x16xf32>
    tpu.vector_store %arg5[%c0_11, %c0_12, %c0_13, %c0_14], %14 {strides = array<i32>} : memref<1x8x8x16xf32, #tpu.memory_space<vmem>>, vector<1x8x8x16xf32>,
    return
  }
  func.func @transform_0(%arg0: i32) -> (i32, i32, i32, i32) {
    %c0_i32 = arith.constant 0 : i32
    %c0_i32_0 = arith.constant 0 : i32
    %c0_i32_1 = arith.constant 0 : i32
    %c0_i32_2 = arith.constant 0 : i32
    return %arg0, %c0_i32, %c0_i32_0, %c0_i32_1 : i32, i32, i32, i32
  }
  func.func @transform_1(%arg0: i32) -> (i32, i32, i32, i32) {
    %c0_i32 = arith.constant 0 : i32
    %c0_i32_0 = arith.constant 0 : i32
    %c0_i32_1 = arith.constant 0 : i32
    %c0_i32_2 = arith.constant 0 : i32
    return %arg0, %c0_i32, %c0_i32_0, %c0_i32_1 : i32, i32, i32, i32
  }
  func.func @transform_2(%arg0: i32) -> (i32, i32) {
    %c0_i32 = arith.constant 0 : i32
    %c0_i32_0 = arith.constant 0 : i32
    %c0_i32_1 = arith.constant 0 : i32
    return %c0_i32, %c0_i32_0 : i32, i32
  }
  func.func @transform_3(%arg0: i32) -> (i32, i32) {
    %c0_i32 = arith.constant 0 : i32
    %c0_i32_0 = arith.constant 0 : i32
    %c0_i32_1 = arith.constant 0 : i32
    return %c0_i32, %c0_i32_0 : i32, i32
  }
  func.func @transform_4(%arg0: i32) -> (i32, i32, i32, i32) {
    %c0_i32 = arith.constant 0 : i32
    %c0_i32_0 = arith.constant 0 : i32
    %c0_i32_1 = arith.constant 0 : i32
    %c0_i32_2 = arith.constant 0 : i32
    return %arg0, %c0_i32, %c0_i32_0, %c0_i32_1 : i32, i32, i32, i32
  }
}

</mosaic_0001>

<bundles_post_ra>
// kernel: mg_restriction_forward.3
= control target key start
LH: loop header
LB: loop body
LE: loop exit
PB: predicated region body
PF: predicated region fallthrough
CT: control target
= control target key end

     0   :  { %9 = vsyncpa [#allocation3], 0  ;;  %s705_s0 = inlined_call_operand.vmem [shape: bf16[2,8,8,16], index: 0, kind: input, shape index: {}]   ;;  %s706_s1 = inlined_call_operand.vmem [shape: bf16[2,8,8,16], index: 1, kind: input, shape index: {}]   ;;  %s707_s2 = inlined_call_operand.vmem [shape: f32[1,16], index: 2, kind: input, shape index: {}]   ;;  %s708_s3 = inlined_call_operand.vmem [shape: f32[1,16], index: 3, kind: input, shape index: {}]   ;;  %s709_s4 = inlined_call_operand.hbm [shape: f32[2,8,8,16], index: 4, kind: output, shape index: {}]  }
   0x1   :  { %11 = vsyncpa [#allocation3 + $0x1], 0  ;;  %s581_s15 = smov 0   ;;  %s583_s16 = smov 0  }
   0x2   :  { %s585_s17 = smov 0   ;;  %s587_s18 = smov 0  }
   0x3 LB: > { %s602_s19 = sadd.s32 4294967295, %s551_s18   ;;  %s391_s20 = sadd.s32 4294967294, %s551_s18   ;;  %s551_s18 = sphi %s587_s18, %s715_s18   ;;  %s547_s17 = sphi %s585_s17, %s714_s17   ;;  %s543_s16 = sphi %s583_s16, %s713_s16   ;;  %s539_s15 = sphi %s581_s15, %s712_s15  }
   0x4   : > { %s606_s21 = sadd.s32 1, %s551_s18   ;;  %s118_s22 = sadd.s32 1, %s547_s17 }
   0x5   : > { %s115_s23 = ssub.s32 %s551_s18, %s606_s21  ;;  %p128_p0 = scmp.ne.s32.totalorder %s547_s17, %s543_s16 }
   0x6   : > { %p116_p1 = scmp.eq.s32.totalorder %s115_s23, 0  ;;  %p129_p2 = scmp.eq.s32.totalorder %s602_s19, 1 }
   0x7   : > { %p134_p3 = scmp.ne.s32.totalorder %s543_s16, %s539_s15  ;;  %p135_p4 = scmp.eq.s32.totalorder %s391_s20, 1 }
   0x8   : > { %s617_s24 = scalar_select %p116_p1, %s547_s17, %s118_s22  }
   0x9   : > { %p619_p5 = por %p129_p2, %p128_p0  ;;  %p623_p6 = por %p135_p4, %p134_p3 }
   0xa   : > { %p394_p7 = scmp.ge.s32.totalorder %s551_s18, 1  ;;  %p175_p8 = scmp.lt.s32.totalorder %s551_s18, 3 }
   0xc   : > { %p176_p9 = pnand %p394_p7, %p175_p8 }
   0xd   : > { %p206_p10 = scmp.lt.s32.totalorder (!%p176_p9), %s602_s19, 1  ;;  %v400_v0 = vld [vmem:[%s707_s2] ss:$0 sm:$0xff] (!%p176_p9)  ;;  %vm294_vm0 = vcmask (!%p176_p9), 130048   ;;  %s203_s11 = sand.u32 (!%p176_p9), 1, %s543_s16  }
   0xe   : > { %179 = sbr.rel (%p176_p9) target bundleno = 58 (0x3a), region = 36  ;;  %v401_v11 = vld [vmem:[%s708_s3] ss:$0 sm:$0xff] (!%p176_p9)  ;;  %s395_s14 = sshll.u32 (!%p176_p9), %s203_s11, 6 }
   0xf   : > { %s205_s20 = scalar_lea.vmem (!%p176_p9), [#allocation2], %s395_s14  ;;  %s409_s23 = sshll.u32 (!%p176_p9), %s602_s19, 10 }
  0x10   : > { %s317_s22 = sshll.u32 (!%p176_p9), %s205_s20, 4  ;;  %s659_s29 = scalar_lea.hbm (!%p176_p9), %s709_s4, %s409_s23  ;;  %s653_s22 = int_to_ptr.vmem [resolvable:$true] %s317_s22 }
  0x11   : > { %s489_s30 = scalar_lea.vmem (!%p176_p9), %s653_s22, 1024 }
  0x12   : > { %p490_p11 = scmp.ne.s32.totalorder (!%p176_p9), %s653_s22, %s489_s30 }
  0x14   : > { %p491_p12 = pnand (!%p176_p9), %p490_p11, %p619_p5 }
  0x15   : > { %s207_s27 = scalar_select %p206_p10, %s602_s19, 1 }
  0x16   : > { %s664_s19 = scalar_lea.sflag [#allocation3], %s203_s11  ;;  %p492_p13 = pneg %p491_p12 }
  0x17   : > { %s407_s28 = sshll.u32 %s207_s27, 5 }
  0x18   : > { %s210_s5 = scalar_lea.vmem %s705_s0, %s407_s28  ;;  %s215_s8 = scalar_lea.vmem %s706_s1, %s407_s28 }
  0x19   : > { %v411_v1 = vld [vmem:[%s210_s5] sm:$0xff]   ;;  %v442_v3 = vld [vmem:[%s210_s5 + $0x8] sm:$0xff]   ;;  %v443_v9 = vld [vmem:[%s210_s5 + $0x10] sm:$0xff]  }
  0x1a   : > { %v427_v2 = vld [vmem:[%s215_s8] sm:$0xff]   ;;  %v412_v4 = vunpack.c.l.bf16 %v411_v1  ;;  %v413_v6 = vunpack.c.h.bf16 %v411_v1  ;;  %v445_v8 = vld [vmem:[%s215_s8 + $0x8] sm:$0xff]   ;;  %v446_v10 = vld [vmem:[%s215_s8 + $0x10] sm:$0xff]   ;;  %v416_v12 = vunpack.c.l.bf16 %v442_v3  ;;  %v417_v14 = vunpack.c.h.bf16 %v442_v3 }
  0x1b   : > { %v428_v5 = vunpack.c.l.bf16 %v427_v2  ;;  %v429_v7 = vunpack.c.h.bf16 %v427_v2  ;;  %v432_v13 = vunpack.c.l.bf16 %v445_v8  ;;  %v433_v15 = vunpack.c.h.bf16 %v445_v8  ;;  %v444_v16 = vld [vmem:[%s210_s5 + $0x18] sm:$0xff]   ;;  %s553_s5 = smov [#allocation2]  }
  0x1c   : > { %v239_v17 = vmul.f32 %v412_v4, %v400_v0  ;;  %v240_v18 = vmul.f32 %v413_v6, %v400_v0  ;;  %v420_v19 = vunpack.c.l.bf16 %v443_v9  ;;  %v436_v20 = vunpack.c.l.bf16 %v446_v10  ;;  %v447_v21 = vld [vmem:[%s215_s8 + $0x18] sm:$0xff]   ;;  %s493_s6 = sshll.u32 %s553_s5, 4  ;;  %s494_s6 = int_to_ptr.vmem [resolvable:$false] %s493_s6 }
  0x1d   : > { %v241_v22 = vmul.f32 %v416_v12, %v400_v0  ;;  %v242_v23 = vmul.f32 %v417_v14, %v400_v0  ;;  %v421_v24 = vunpack.c.h.bf16 %v443_v9  ;;  %v437_v25 = vunpack.c.h.bf16 %v446_v10  ;;  %s495_s7 = scalar_lea.vmem %s494_s6, 2048  ;;  %p496_p0 = scmp.lt.s32.totalorder %s653_s22, %s494_s6 }
  0x1e   : > { %v254_v26 = vadd.f32 %v401_v11, %v239_v17  ;;  %v255_v27 = vadd.f32 %v401_v11, %v240_v18  ;;  %v243_v28 = vmul.f32 %v420_v19, %v400_v0  ;;  %v424_v29 = vunpack.c.l.bf16 %v444_v16  ;;  %p497_p1 = scmp.lt.s32.totalorder %s495_s7, %s489_s30 }
  0x1f   : > { %v256_v30 = vadd.f32 %v401_v11, %v241_v22  ;;  %v257_v31 = vadd.f32 %v401_v11, %v242_v23  ;;  %v244_v32 = vmul.f32 %v421_v24, %v400_v0  ;;  %v440_v33 = vunpack.c.l.bf16 %v447_v21 }
  0x20   : > { %v262_v34 = vmax.f32 %v254_v26, 0.0  ;;  %v263_v35 = vmax.f32 %v255_v27, 0.0  ;;  %v258_v36 = vadd.f32 %v401_v11, %v243_v28  ;;  %v245_v37 = vmul.f32 %v424_v29, %v400_v0  ;;  %p498_p2 = por %p497_p1, %p496_p0 }
  0x21   : > { %v264_v38 = vmax.f32 %v256_v30, 0.0  ;;  %v265_v39 = vmax.f32 %v257_v31, 0.0  ;;  %v259_v40 = vadd.f32 %v401_v11, %v244_v32  ;;  %v425_v41 = vunpack.c.h.bf16 %v444_v16 }
  0x22   : > { %v286_v42 = vadd.f32 %v428_v5, %v262_v34  ;;  %v287_v43 = vadd.f32 %v429_v7, %v263_v35  ;;  %v266_v44 = vmax.f32 %v258_v36, 0.0  ;;  %v260_v45 = vadd.f32 %v401_v11, %v245_v37  ;;  %p499_p3 = pnand %p498_p2, %p492_p13 }
  0x23   : > { %v288_v46 = vadd.f32 %v432_v13, %v264_v38  ;;  %v289_v47 = vadd.f32 %v433_v15, %v265_v39  ;;  %v267_v48 = vmax.f32 %v259_v40, 0.0  ;;  %v246_v49 = vmul.f32 %v425_v41, %v400_v0 }
  0x24   : > { %295 = vst.msk [vmem:[%s205_s20] sm:$0xff] %vm294_vm0, %v286_v42  ;;  %296 = vst.msk [vmem:[%s205_s20 + $0x8] sm:$0xff] %vm294_vm0, %v287_v43  ;;  %v290_v50 = vadd.f32 %v436_v20, %v266_v44  ;;  %v268_v51 = vmax.f32 %v260_v45, 0.0  ;;  %v441_v54 = vunpack.c.h.bf16 %v447_v21 }
  0x25   : > { %297 = vst.msk [vmem:[%s205_s20 + $0x10] sm:$0xff] %vm294_vm0, %v288_v46  ;;  %298 = vst.msk [vmem:[%s205_s20 + $0x18] sm:$0xff] %vm294_vm0, %v289_v47  ;;  %v291_v52 = vadd.f32 %v437_v25, %v267_v48  ;;  %v261_v53 = vadd.f32 %v401_v11, %v246_v49 }
  0x26   : > { %299 = vst.msk [vmem:[%s205_s20 + $0x20] sm:$0xff] %vm294_vm0, %v290_v50  ;;  %v292_v55 = vadd.f32 %v440_v33, %v268_v51 }
  0x27   : > { %300 = vst.msk [vmem:[%s205_s20 + $0x28] sm:$0xff] %vm294_vm0, %v291_v52  ;;  %v269_v56 = vmax.f32 %v261_v53, 0.0 }
  0x28   : > { %301 = vst.msk [vmem:[%s205_s20 + $0x30] sm:$0xff] %vm294_vm0, %v292_v55 }
  0x29   : > { %v293_v57 = vadd.f32 %v441_v54, %v269_v56 }
  0x2b   : > { %302 = vst.msk [vmem:[%s205_s20 + $0x38] sm:$0xff] %vm294_vm0, %v293_v57 }
  0x2c   : > { %502 = shalt.err (!%p499_p3)
}
  0x2d   : > { %s503_s8 = scalar_lea.hbm %s659_s29, 1024  ;;  %s507_s11 = scalar_lea.hbm %s709_s4, 2048 }
  0x2e   : > { %p504_p4 = scmp.ne.s32.totalorder %s659_s29, %s503_s8  ;;  %p508_p9 = scmp.lt.u32.totalorder %s659_s29, %s709_s4 }
  0x2f   : > { %p509_p10 = scmp.lt.u32.totalorder %s507_s11, %s503_s8  ;;  %p511_p12 = scmp.lt.u32.totalorder %s503_s8, %s659_s29 }
  0x30   : > { %p505_p7 = pnand %p504_p4, %p619_p5 }
  0x31   : > { %p510_p11 = por %p509_p10, %p508_p9 }
  0x32   : > { %p506_p8 = pneg %p505_p7 }
  0x33   : > { %p512_p13 = por %p511_p12, %p510_p11 }
  0x35   : > { %p513_p0 = pnand %p512_p13, %p506_p8 }
  0x37   : > { %516 = shalt.err (!%p513_p0)
}
  0x38   : > { %s554_s14 = smov 128   ;;  %s555_s20 = smov 8  }
  0x39   : > { %448 = dma.vmem_to_hbm [thread:$0]  (%p619_p5), %s653_s22, 1024, %s659_s29, %s664_s19, %s554_s14, %s554_s14, %s555_s20  }
  0x3a PF: > { %p454_p1 = scmp.ge.s32.totalorder %s551_s18, 2  ;;  %s332_s23 = sand.u32 1, %s539_s15  }
  0x3b   : > { %s333_s27 = scalar_lea.sflag [#allocation3], %s332_s23 }
  0x3c   : > { %p451_p2 = pnand %p454_p1, %p623_p6 }
  0x3e   : > { %534 = dma.done.wait (!%p451_p2), %s333_s27, 1024  }
  0x3f   : > { %536 = vsyncadd (!%p451_p2), %s333_s27, 4294966272  ;;  %p14_p3 = scmp.ge.s32.totalorder %s606_s21, 4   ;;  %s712_s15 = smov %s543_s16 }
  0x40   : > { %s713_s16 = smov %s547_s17  ;;  %s714_s17 = smov %s617_s24 }
  0x41   : > { %s715_s18 = smov %s606_s21  ;;  %16 = sbr.rel (!%p14_p3) target bundleno = 3 (0x3), region = 74 }
  0x48   :  { %338 = vsyncpa [#allocation3], 1 }
  0x49   :  { %340 = vsyncpa [#allocation3 + $0x1], 1 }

// kernel: mg_restriction_forward.2
= control target key start
LH: loop header
LB: loop body
LE: loop exit
PB: predicated region body
PF: predicated region fallthrough
CT: control target
= control target key end

     0   :  { %s8207_s0 = inlined_call_operand.vmem [shape: bf16[2,4,8,8,8], index: 0, kind: input, shape index: {}]   ;;  %s8208_s1 = inlined_call_operand.vmem [shape: bf16[2,4,8,8,8], index: 1, kind: input, shape index: {}]   ;;  %s8209_s2 = inlined_call_operand.vmem [shape: bf16[72,8], index: 2, kind: input, shape index: {}]   ;;  %s8210_s3 = inlined_call_operand.vmem [shape: bf16[72,16], index: 3, kind: input, shape index: {}]   ;;  %s8211_s4 = inlined_call_operand.vmem [shape: bf16[72,16], index: 4, kind: input, shape index: {}]   ;;  %s8212_s5 = inlined_call_operand.vmem [shape: bf16[144,16], index: 5, kind: input, shape index: {}]   ;;  %s8213_s6 = inlined_call_operand.hbm [shape: f32[2,8,8,16], index: 6, kind: output, shape index: {0}]   ;;  %s8214_s7 = inlined_call_operand.vmem [shape: bf16[2,8,8,16], index: 7, kind: output, shape index: {1}]   ;;  %s8215_s8 = inlined_call_operand.vmem [shape: bf16[2,8,8,16], index: 8, kind: output, shape index: {2}]   ;;  %s8216_s9 = inlined_call_operand.vmem [shape: f32[2,2,16], index: 9, kind: output, shape index: {3}]  }
   0x1   :  { %8257 = sst [smem:[#allocation8_spill]] %s8207_s0 }
   0x2   :  { %8258 = sst [smem:[#allocation9_spill]] %s8208_s1 }
   0x3   :  { %15 = vsyncpa [#allocation6], 0 }
   0x4   :  { %17 = vsyncpa [#allocation6 + $0x1], 0  ;;  %s6132_s30 = smov 0   ;;  %s6134_s10 = smov 0  }
   0x5   :  { %s6136_s11 = smov 0   ;;  %s6138_s12 = smov 0  }
   0x6 LB: > { %s6153_s13 = sadd.s32 4294967295, %s6066_s12   ;;  %s5243_s14 = sadd.s32 4294967294, %s6066_s12   ;;  %s6066_s12 = sphi %s6138_s12, %s8464_s12   ;;  %s6062_s11 = sphi %s6136_s11, %s8463_s11   ;;  %s6058_s10 = sphi %s6134_s10, %s8462_s10   ;;  %s6054_s30 = sphi %s6132_s30, %s8461_s30  }
   0x7   : > { %s6157_s15 = sadd.s32 1, %s6066_s12   ;;  %s166_s16 = sadd.s32 1, %s6062_s11 }
   0x8   : > { %s163_s17 = ssub.s32 %s6066_s12, %s6157_s15  ;;  %p176_p0 = scmp.ne.s32.totalorder %s6062_s11, %s6058_s10 }
   0x9   : > { %p164_p1 = scmp.eq.s32.totalorder %s163_s17, 0  ;;  %p177_p2 = scmp.eq.s32.totalorder %s6153_s13, 1 }
   0xa   : > { %p182_p3 = scmp.ne.s32.totalorder %s6058_s10, %s6054_s30  ;;  %p183_p4 = scmp.eq.s32.totalorder %s5243_s14, 1 }
   0xb   : > { %s6168_s18 = scalar_select %p164_p1, %s6062_s11, %s166_s16  }
   0xc   : > { %p6170_p5 = por %p177_p2, %p176_p0  ;;  %p6174_p6 = por %p183_p4, %p182_p3 }
   0xd   : > { %p5246_p7 = scmp.ge.s32.totalorder %s6066_s12, 1  ;;  %p307_p8 = scmp.lt.s32.totalorder %s6066_s12, 3 }
   0xf   : > { %p308_p9 = pnand %p5246_p7, %p307_p8 }
  0x10   : > { %p362_p10 = scmp.lt.s32.totalorder (!%p308_p9), %s6153_s13, 1  ;;  %vm389_vm0 = vcmask (!%p308_p9), 581632   ;;  %vm8225_vm1 = vsmask.f32 (!%p308_p9), 256  ;;  %v8261_v0 = vmov (!%p308_p9), 0  ;;  %s8263_s0 = sld [smem:[#allocation8_spill]] (!%p308_p9) }
  0x11   : > { %311 = sbr.rel (%p308_p9) target bundleno = 1266 (0x4f2), region = 44  ;;  %vm6182_vm2 = vmand (!%p308_p9), %vm389_vm0, %vm8225_vm1  ;;  %v401_v1 = vld [vmem:[#allocation2 + $0xc] sm:$0x1] (!%p308_p9)  ;;  %v395_v3 = vld [vmem:[#allocation2 + $0x4] sm:$0x1] (!%p308_p9)  ;;  %s8218_s26 = smov (!%p308_p9), 8  }
  0x12   : > { %v8262_v0 = vsel (!%p308_p9), %vm6182_vm2, 4294967295, %v8261_v0  ;;  %v402_v2 = vsel (!%p308_p9), %vm6182_vm2, 0, %v401_v1  ;;  %v396_v4 = vsel (!%p308_p9), %vm6182_vm2, 0, %v395_v3  ;;  %v404_v5 = vld [vmem:[#allocation2 + $0x10] sm:$0x1] (!%p308_p9)  ;;  %vm387_vm3 = vcmask (!%p308_p9), 584704  }
  0x13   : > { %403 = vst [vmem:[#allocation2 + $0xc] sm:$0x1] (!%p308_p9), %v402_v2  ;;  %397 = vst [vmem:[#allocation2 + $0x4] sm:$0x1] (!%p308_p9), %v396_v4  ;;  %v405_v6 = vsel (!%p308_p9), %vm6182_vm2, 0, %v404_v5  ;;  %s8245_s27 = smov (!%p308_p9), 16  }
  0x14   : > { %v398_v7 = vld [vmem:[#allocation2 + $0x8] sm:$0x1] (!%p308_p9)  ;;  %406 = vst [vmem:[#allocation2 + $0x10] sm:$0x1] (!%p308_p9), %v405_v6  ;;  %v410_v9 = vld [vmem:[#allocation2 + $0x18] sm:$0x1] (!%p308_p9) }
  0x15   : > { %v399_v8 = vsel (!%p308_p9), %vm6182_vm2, 0, %v398_v7  ;;  %v407_v10 = vld [vmem:[#allocation2 + $0x14] sm:$0x1] (!%p308_p9)  ;;  %v411_v13 = vsel (!%p308_p9), %vm6182_vm2, 0, %v410_v9  ;;  %v6070_v25 = vmov (!%p308_p9), 0   ;;  %vm8230_vm4 = vcmask (!%p308_p9), 60416  }
  0x16   : > { %400 = vst [vmem:[#allocation2 + $0x8] sm:$0x1] (!%p308_p9), %v399_v8  ;;  %v408_v14 = vsel (!%p308_p9), %vm6182_vm2, 0, %v407_v10  ;;  %412 = vst [vmem:[#allocation2 + $0x18] sm:$0x1] (!%p308_p9), %v411_v13  ;;  %s8220_s28 = smov (!%p308_p9), 24  }
  0x17   : > { %409 = vst [vmem:[#allocation2 + $0x14] sm:$0x1] (!%p308_p9), %v408_v14  ;;  %388 = vst.msk [vmem:[#allocation2] sm:$0xf] (!%p308_p9), %vm387_vm3, %v6070_v25  ;;  %vm8224_vm5 = vsmask.f32 (!%p308_p9), 7938 }
  0x18   : > { %s6187_s21 = scalar_select %p362_p10, %s6153_s13, 1  ;;  %1018 = vst.msk [vmem:[#allocation2 + $0x20] sm:$0xf] %vm387_vm3, %v6070_v25  ;;  %1674 = vst.msk [vmem:[#allocation2 + $0x5c] sm:$0xf] %vm387_vm3, %v6070_v25  ;;  %vm1019_vm7 = vcmask 584707  }
  0x19   : > { %2285 = vst.msk [vmem:[#allocation2 + $0x7c] sm:$0xf] %vm387_vm3, %v6070_v25  ;;  %4172 = vst.msk [vmem:[#allocation3] sm:$0xf] %vm387_vm3, %v6070_v25  ;;  %s6072_s29 = smov 32   ;;  %s8243_s14 = smov 40  }
  0x1a   : > { %s8217_s22 = sshll.u32 %s6187_s21, 7  ;;  %vm6259_vm6 = vmand %vm8230_vm4, %vm8224_vm5  ;;  %vm8223_vm8 = vsmask.f32 7950  ;;  %s8249_s16 = smov 48   ;;  %vm8231_vm10 = vcmask 126016   ;;  %vm8226_vm11 = vcmask 191616  }
  0x1b   : > { %s6201_s25 = scalar_lea.vmem %s8263_s0, %s8217_s22  ;;  %vm6306_vm9 = vmand %vm1019_vm7, %vm8223_vm8  ;;  %vm8222_vm12 = vcmask 1043456   ;;  %vm3438_vm13 = vcmask 130052   ;;  %vm8227_vm15 = vcmask 257216   ;;  %s8270_s24 = smov 24   ;;  %vm8229_vm3 = vcmask 322816  }
  0x1c   : > { %v5266_v11 = vld [vmem:[%s6201_s25 + $0x48] sm:$0xf]  ;;  %v5264_v12 = vld [vmem:[%s6201_s25 + $0x40] sm:$0xf]  ;;  %v5267_v15 = vld [vmem:[%s6201_s25 + $0x4c] sm:$0xf] }
  0x1d   : > { %524 = vrot.lane.b32.xlu1 %v5266_v11, %s8218_s26  ;;  %520 = vrot.lane.b32.xlu0 %v5264_v12, %s8218_s26  ;;  %v5265_v16 = vld [vmem:[%s6201_s25 + $0x44] sm:$0xf]  ;;  %v5269_v17 = vld [vmem:[%s6201_s25 + $0x54] sm:$0xf]  ;;  %v8264_v11 = vmov 0  ;;  %vm3439_vm14 = vmor %vm3438_vm13, %vm8222_vm12  ;;  %vm8228_vm7 = vcmask 388416  }
  0x1e   : > { %v5268_v18 = vld [vmem:[%s6201_s25 + $0x50] sm:$0xf]  ;;  %v5271_v19 = vld [vmem:[%s6201_s25 + $0x60] sm:$0xf]  ;;  %v5270_v20 = vld [vmem:[%s6201_s25 + $0x58] sm:$0xf] }
  0x1f   : > { %v5273_v21 = vld [vmem:[%s6201_s25 + $0x68] sm:$0xf]  ;;  %v5272_v22 = vld [vmem:[%s6201_s25 + $0x64] sm:$0xf]  ;;  %v5278_v24 = vld [vmem:[%s6201_s25 + $0x20] sm:$0xf] }
  0x20   : > { %v5279_v23 = vld [vmem:[%s6201_s25 + $0x24] sm:$0xf]  ;;  %v602_v27 = vshrl.u32 %v5278_v24, 16  ;;  %v5281_v28 = vld [vmem:[%s6201_s25 + $0x2c] sm:$0xf]  ;;  %v605_v36 = vshll.u32 %v5278_v24, 16  ;;  %vm6480_vm0 = vmand %vm8227_vm15, %vm8224_vm5 }
  0x21   : > { %526 = vrot.lane.b32.xlu1 %v5267_v15, %s8218_s26  ;;  %522 = vrot.lane.b32.xlu0 %v5265_v16, %s8218_s26  ;;  %v609_v26 = vshrl.u32 %v5279_v23, 16  ;;  %v5275_v29 = vld [vmem:[%s6201_s25 + $0x70] sm:$0xf]  ;;  %v5274_v30 = vld [vmem:[%s6201_s25 + $0x6c] sm:$0xf]  ;;  %v612_v32 = vshll.u32 %v5279_v23, 16 }
  0x22   : > { %v5280_v31 = vld [vmem:[%s6201_s25 + $0x28] sm:$0xf]  ;;  %v623_v33 = vshrl.u32 %v5281_v28, 16  ;;  %v604_v35 = vrot.slane %v602_v27, 7  ;;  %v5283_v38 = vld [vmem:[%s6201_s25 + $0x34] sm:$0xf] }
  0x23   : > { %v611_v34 = vrot.slane %v609_v26, 7  ;;  %v616_v37 = vshrl.u32 %v5280_v31, 16  ;;  %v5277_v39 = vld [vmem:[%s6201_s25 + $0x78] sm:$0xf]  ;;  %v5276_v40 = vld [vmem:[%s6201_s25 + $0x74] sm:$0xf] }
  0x24   : > { %v5282_v41 = vld [vmem:[%s6201_s25 + $0x30] sm:$0xf]  ;;  %v625_v42 = vrot.slane %v623_v33, 7  ;;  %v626_v43 = vshll.u32 %v5281_v28, 16  ;;  %v619_v44 = vshll.u32 %v5280_v31, 16  ;;  %v637_v45 = vshrl.u32 %v5283_v38, 16 }
  0x25   : > { %530 = vrot.lane.b32.xlu1 %v5269_v17, %s8218_s26  ;;  %528 = vrot.lane.b32.xlu0 %v5268_v18, %s8218_s26  ;;  %v614_v46 = vor.u32 %v612_v32, %v611_v34  ;;  %v607_v47 = vor.u32 %v605_v36, %v604_v35  ;;  %v618_v48 = vrot.slane %v616_v37, 7  ;;  %v630_v49 = vshrl.u32 %v5282_v41, 16  ;;  %v5285_v50 = vld [vmem:[%s6201_s25 + $0x3c] sm:$0xf]  ;;  %v5284_v51 = vld [vmem:[%s6201_s25 + $0x38] sm:$0xf] }
  0x26   : > { %v639_v52 = vrot.slane %v637_v45, 7  ;;  %v640_v53 = vshll.u32 %v5283_v38, 16  ;;  %v651_v54 = vshrl.u32 %v5285_v50, 16  ;;  %v644_v55 = vshrl.u32 %v5284_v51, 16  ;;  %v5259_v60 = vld [vmem:[%s6201_s25 + $0x68] sm:$0xf] }
  0x27   : > { %v628_v56 = vor.u32 %v626_v43, %v625_v42  ;;  %v621_v57 = vor.u32 %v619_v44, %v618_v48  ;;  %v632_v58 = vrot.slane %v630_v49, 7  ;;  %v633_v59 = vshll.u32 %v5282_v41, 16  ;;  %v5257_v63 = vld [vmem:[%s6201_s25 + $0x60] sm:$0xf]  ;;  %v5260_v9 = vld [vmem:[%s6201_s25 + $0x6c] sm:$0xf] }
  0x28   : > { %v439_v61 = vshrl.u32 %v5259_v60, 16  ;;  %v442_v62 = vshll.u32 %v5259_v60, 16  ;;  %v654_v1 = vshll.u32 %v5285_v50, 16  ;;  %v647_v2 = vshll.u32 %v5284_v51, 16  ;;  %v490_v12 = vld [vmem:[#allocation2 + $0xc] sm:$0xf] }
  0x29   : > { %563 = vrot.lane.b32.xlu1 %v5271_v19, %s8245_s27  ;;  %532 = vrot.lane.b32.xlu0 %v5270_v20, %s8218_s26  ;;  %v425_v3 = vshrl.u32 %v5257_v63, 16  ;;  %v428_v4 = vshll.u32 %v5257_v63, 16  ;;  %v642_v5 = vor.u32 %v640_v53, %v639_v52  ;;  %v653_v6 = vrot.slane %v651_v54, 7  ;;  %v484_v17 = vld [vmem:[#allocation2 + $0x4] sm:$0xf]  ;;  %3440 = vst.msk [vmem:[#allocation4] sm:$0xff] %vm3439_vm14, %v6070_v25 }
  0x2a   : > { %v646_v7 = vrot.slane %v644_v55, 7  ;;  %v441_v8 = vrot.slane %v439_v61, 7  ;;  %v635_v10 = vor.u32 %v633_v59, %v632_v58  ;;  %v8265_v11 = vsel %vm6259_vm6, 4294967295, %v8264_v11  ;;  %v5258_v18 = vld [vmem:[%s6201_s25 + $0x64] sm:$0xf]  ;;  %3442 = vst.msk [vmem:[#allocation4 + $0x38] sm:$0xff] %vm3439_vm14, %v6070_v25 }
  0x2b   : > { %v427_v13 = vrot.slane %v425_v3, 7  ;;  %v446_v14 = vshrl.u32 %v5260_v9, 16  ;;  %v449_v15 = vshll.u32 %v5260_v9, 16  ;;  %v656_v23 = vor.u32 %v654_v1, %v653_v6  ;;  %v493_v27 = vld [vmem:[#allocation2 + $0x10] sm:$0xf]  ;;  %s8275_s17 = smov 8  }
  0x2c   : > { %v444_v16 = vor.u32 %v442_v62, %v441_v8  ;;  %v649_v24 = vor.u32 %v647_v2, %v646_v7  ;;  %v5262_v28 = vld [vmem:[%s6201_s25 + $0x74] sm:$0xf]  ;;  %v487_v32 = vld [vmem:[#allocation2 + $0x8] sm:$0xf]  ;;  %v413_v38 = vld [vmem:[#allocation2 + $0x1c] sm:$0x1] }
  0x2d   : > { %567 = vrot.lane.b32.xlu1 %v5273_v21, %s8245_s27  ;;  %565 = vrot.lane.b32.xlu0 %v5272_v22, %s8245_s27  ;;  %v430_v19 = vor.u32 %v428_v4, %v427_v13  ;;  %v448_v20 = vrot.slane %v446_v14, 7  ;;  %v432_v21 = vshrl.u32 %v5258_v18, 16  ;;  %v435_v22 = vshll.u32 %v5258_v18, 16  ;;  %v5263_v43 = vld [vmem:[%s6201_s25 + $0x78] sm:$0xf]  ;;  %s8240_s23 = sand.u32 1, %s6058_s10  }
  0x2e   : > { %v491_v26 = vsel %vm6259_vm6, %v444_v16, %v490_v12  ;;  %v460_v34 = vshrl.u32 %v5262_v28, 16  ;;  %v463_v35 = vshll.u32 %v5262_v28, 16  ;;  %v414_v42 = vsel %vm6182_vm2, 0, %v413_v38  ;;  %v499_v44 = vld [vmem:[#allocation2 + $0x18] sm:$0xf]  ;;  %s7189_s22 = sshll.u32 %s8240_s23, 6 }
  0x2f   : > { %492 = vst [vmem:[#allocation2 + $0xc] sm:$0xf] %v491_v26  ;;  %v451_v31 = vor.u32 %v449_v15, %v448_v20  ;;  %v434_v33 = vrot.slane %v432_v21, 7  ;;  %415 = vst [vmem:[#allocation2 + $0x1c] sm:$0x1] %v414_v42  ;;  %vm8233_vm1 = vcmask 585216  }
  0x30   : > { %v462_v41 = vrot.slane %v460_v34, 7  ;;  %v496_v50 = vld [vmem:[#allocation2 + $0x14] sm:$0xf]  ;;  %v392_v51 = vld [vmem:[#allocation2] sm:$0x1]  ;;  %s7208_s23 = scalar_lea.vmem [#allocation5], %s7189_s22 }
  0x31   : > { %571 = vrot.lane.b32.xlu1 %v5275_v29, %s8245_s27  ;;  %569 = vrot.lane.b32.xlu0 %v5274_v30, %s8245_s27  ;;  %v5261_v29 = vld [vmem:[%s6201_s25 + $0x70] sm:$0xf]  ;;  %v485_v30 = vsel %vm6259_vm6, %v430_v19, %v484_v17  ;;  %v708_v52 = vld [vmem:[%s6201_s25 + $0x4] sm:$0xf]  ;;  %v1028_v7 = vld [vmem:[#allocation2 + $0x28] sm:$0x8] }
  0x32   : > { %486 = vst [vmem:[#allocation2 + $0x4] sm:$0xf] %v485_v30  ;;  %v453_v36 = vshrl.u32 %v5261_v29, 16  ;;  %v456_v37 = vshll.u32 %v5261_v29, 16  ;;  %v465_v49 = vor.u32 %v463_v35, %v462_v41  ;;  %v707_v53 = vld [vmem:[%s6201_s25] sm:$0xf] }
  0x33   : > { %v5326_v60 = vld [vmem:[%s6201_s25 + $0x64] sm:$0xf]  ;;  %v5325_v61 = vld [vmem:[%s6201_s25 + $0x60] sm:$0xf]  ;;  %v709_v1 = vld [vmem:[%s6201_s25 + $0x8] sm:$0xf] }
  0x34   : > { %v455_v45 = vrot.slane %v453_v36, 7  ;;  %v5327_v2 = vld [vmem:[%s6201_s25 + $0x68] sm:$0xf]  ;;  %v5332_v3 = vld [vmem:[%s6201_s25 + $0x40] sm:$0xf]  ;;  %v1029_v16 = vsel %vm6306_vm9, 0, %v1028_v7 }
  0x35   : > { %575 = vrot.lane.b32.xlu1 %v5277_v39, %s8245_s27  ;;  %573 = vrot.lane.b32.xlu0 %v5276_v40, %s8245_s27  ;;  %v494_v39 = vsel %vm6259_vm6, %v451_v31, %v493_v27  ;;  %v437_v40 = vor.u32 %v435_v22, %v434_v33  ;;  %v5286_v4 = vld [vmem:[%s6201_s25 + $0x20] sm:$0xf]  ;;  %v1115_v6 = vshll.u32 %v5332_v3, 16  ;;  %v710_v8 = vld [vmem:[%s6201_s25 + $0xc] sm:$0xf]  ;;  %s8369_s1 = sld [smem:[#allocation9_spill]] }
  0x36   : > { %495 = vst [vmem:[#allocation2 + $0x10] sm:$0xf] %v494_v39  ;;  %v458_v54 = vor.u32 %v456_v37, %v455_v45  ;;  %v502_v62 = vld [vmem:[#allocation2 + $0x1c] sm:$0xf]  ;;  %v5319_v9 = vld [vmem:[%s6201_s25 + $0x44] sm:$0xf] }
  0x37   : > { %v488_v48 = vsel %vm6259_vm6, %v437_v40, %v487_v32  ;;  %v1025_v12 = vld [vmem:[#allocation2 + $0x24] sm:$0x8]  ;;  %v5318_v13 = vld [vmem:[%s6201_s25 + $0x40] sm:$0xf]  ;;  %v5288_v14 = vld [vmem:[%s6201_s25 + $0x28] sm:$0xf] }
  0x38   : > { %489 = vst [vmem:[#allocation2 + $0x8] sm:$0xf] %v488_v48  ;;  %v497_v58 = vsel %vm6259_vm6, %v458_v54, %v496_v50  ;;  %v5287_v15 = vld [vmem:[%s6201_s25 + $0x24] sm:$0xf]  ;;  %v1026_v17 = vsel %vm6306_vm9, 0, %v1025_v12  ;;  %v1117_v19 = vrot.slane %v1115_v6, 5 }
  0x39   : > { %659 = vrot.lane.b32.xlu1 %v614_v46, %s8220_s28  ;;  %657 = vrot.lane.b32.xlu0 %v607_v47, %s8220_s28  ;;  %v467_v46 = vshrl.u32 %v5263_v43, 16  ;;  %v470_v47 = vshll.u32 %v5263_v43, 16  ;;  %498 = vst [vmem:[#allocation2 + $0x14] sm:$0xf] %v497_v58  ;;  %v5334_v20 = vld [vmem:[%s6201_s25 + $0x48] sm:$0xf] }
  0x3a   : > { %1030 = vst [vmem:[#allocation2 + $0x28] sm:$0x8] %v1029_v16  ;;  %1027 = vst [vmem:[#allocation2 + $0x24] sm:$0x8] %v1026_v17  ;;  %v1031_v21 = vld [vmem:[#allocation2 + $0x2c] sm:$0x8] }
  0x3b   : > { %v469_v55 = vrot.slane %v467_v46, 7  ;;  %v5333_v22 = vld [vmem:[%s6201_s25 + $0x44] sm:$0xf]  ;;  %1056 = vst.msk [vmem:[#allocation2 + $0x28] sm:$0xf] %vm8230_vm4, %v5319_v9  ;;  %v1130_v26 = vshrl.u32 %v5334_v20, 16 }
  0x3c   : > { %1055 = vst.msk [vmem:[#allocation2 + $0x24] sm:$0xf] %vm8230_vm4, %v5318_v13  ;;  %v1133_v28 = vshll.u32 %v5334_v20, 16  ;;  %v1121_v29 = vshrl.u32 %v5333_v22, 16  ;;  %v1124_v30 = vshll.u32 %v5333_v22, 16  ;;  %s8383_s22 = smov 16  }
  0x3d   : > { %663 = vrot.lane.b32.xlu1 %v628_v56, %s8220_s28  ;;  %661 = vrot.lane.b32.xlu0 %v621_v57, %s8220_s28  ;;  %v393_v56 = vsel %vm6182_vm2, 0, %v392_v51  ;;  %v500_v57 = vsel %vm6259_vm6, %v465_v49, %v499_v44  ;;  %v472_v59 = vor.u32 %v470_v47, %v469_v55  ;;  %v5328_v31 = vld [vmem:[%s6201_s25 + $0x6c] sm:$0xf]  ;;  %v1034_v33 = vld [vmem:[#allocation2 + $0x30] sm:$0x8]  ;;  %v1132_v35 = vrot.slane %v1130_v26, 4 }
  0x3e   : > { %394 = vst [vmem:[#allocation2] sm:$0x1] %v393_v56  ;;  %501 = vst [vmem:[#allocation2 + $0x18] sm:$0xf] %v500_v57  ;;  %v5289_v32 = vld [vmem:[%s6201_s25 + $0x2c] sm:$0xf] }
  0x3f   : > { %v503_v63 = vsel %vm6259_vm6, %v472_v59, %v502_v62  ;;  %v5321_v34 = vld [vmem:[%s6201_s25 + $0x4c] sm:$0xf]  ;;  %v1035_v36 = vsel %vm6306_vm9, 0, %v1034_v33  ;;  %v1135_v38 = vrot.slane %v1133_v28, 5  ;;  %v1123_v39 = vrot.slane %v1121_v29, 4  ;;  %s8415_s0 = smov 112  }
  0x40   : > { %504 = vst [vmem:[#allocation2 + $0x1c] sm:$0xf] %v503_v63  ;;  %v1126_v40 = vrot.slane %v1124_v30, 5  ;;  %1036 = vst [vmem:[#allocation2 + $0x30] sm:$0x8] %v1035_v36  ;;  %v5948_v36 = vld [vmem:[%s8210_s3 + $0x8] sm:$0xff]  }
  0x41   : > { %667 = vrot.lane.b32.xlu1 %v642_v5, %s8220_s28  ;;  %665 = vrot.lane.b32.xlu0 %v635_v10, %s8220_s28  ;;  %v1112_v5 = vshrl.u32 %v5332_v3, 16  ;;  %v1037_v41 = vld [vmem:[#allocation2 + $0x34] sm:$0x8]  ;;  %v5329_v42 = vld [vmem:[%s6201_s25 + $0x70] sm:$0xf]  ;;  %v1136_v50 = vor.u32 %v1135_v38, %v1132_v35  ;;  %v5947_v35 = vld [vmem:[%s8209_s2 + $0x8] sm:$0xff]  }
  0x42   : > { %1058 = vst.msk [vmem:[#allocation2 + $0x30] sm:$0xf] %vm8230_vm4, %v5321_v34  ;;  %v1038_v43 = vsel %vm6306_vm9, 0, %v1037_v41  ;;  %v5322_v44 = vld [vmem:[%s6201_s25 + $0x50] sm:$0xf]  ;;  %v1127_v51 = vor.u32 %v1126_v40, %v1123_v39 }
  0x43   : > { %v1114_v18 = vrot.slane %v1112_v5, 4  ;;  %1039 = vst [vmem:[#allocation2 + $0x34] sm:$0x8] %v1038_v43  ;;  %v1043_v45 = vld [vmem:[#allocation2 + $0x3c] sm:$0x8]  ;;  %v1137_v58 = vrot.slane %v1136_v50, 4 }
  0x44   : > { %v5324_v46 = vld [vmem:[%s6201_s25 + $0x58] sm:$0xf]  ;;  %1059 = vst.msk [vmem:[#allocation2 + $0x34] sm:$0xf] %vm8230_vm4, %v5322_v44  ;;  %v1044_v47 = vsel %vm6306_vm9, 0, %v1043_v45  ;;  %v1128_v59 = vrot.slane %v1127_v51, 4 }
  0x45   : > { %671 = vrot.lane.b32.xlu1 %v656_v23, %s8220_s28  ;;  %669 = vrot.lane.b32.xlu0 %v649_v24, %s8220_s28  ;;  %v1032_v23 = vsel %vm6306_vm9, 0, %v1031_v21  ;;  %v5320_v24 = vld [vmem:[%s6201_s25 + $0x48] sm:$0xf]  ;;  %v1118_v27 = vor.u32 %v1117_v19, %v1114_v18  ;;  %v1040_v48 = vld [vmem:[#allocation2 + $0x38] sm:$0x8]  ;;  %v5949_v41 = vld [vmem:[%s8209_s2 + $0x10] sm:$0xff]  }
  0x46   : > { %1033 = vst [vmem:[#allocation2 + $0x2c] sm:$0x8] %v1032_v23  ;;  %v5323_v49 = vld [vmem:[%s6201_s25 + $0x54] sm:$0xf]  ;;  %1045 = vst [vmem:[#allocation2 + $0x3c] sm:$0x8] %v1044_v47 }
  0x47   : > { %1057 = vst.msk [vmem:[#allocation2 + $0x2c] sm:$0xf] %vm8230_vm4, %v5320_v24  ;;  %v1119_v37 = vrot.slane %v1118_v27, 4  ;;  %v5330_v54 = vld [vmem:[%s6201_s25 + $0x74] sm:$0xf]  ;;  %v5951_v50 = vld [vmem:[%s8209_s2 + $0x18] sm:$0xff]  }
  0x48   : > { %1061 = vst.msk [vmem:[#allocation2 + $0x3c] sm:$0xf] %vm8230_vm4, %v5324_v46  ;;  %v1022_v55 = vld [vmem:[#allocation2 + $0x20] sm:$0x8]  ;;  %v5295_v57 = vld [vmem:[%s6201_s25 + $0x64] sm:$0xf] }
  0x49   : > { %725 = vrot.lane.b32.xlu1 %v708_v52, %s6072_s29  ;;  %723 = vrot.lane.b32.xlu0 %v707_v53, %s6072_s29  ;;  %v1041_v52 = vsel %vm6306_vm9, 0, %v1040_v48  ;;  %v5331_v53 = vld [vmem:[%s6201_s25 + $0x78] sm:$0xf]  ;;  %v1023_v56 = vsel %vm6306_vm9, 0, %v1022_v55  ;;  %v1219_v62 = vld [vmem:[%s6201_s25] sm:$0xf] }
  0x4a   : > { %1042 = vst [vmem:[#allocation2 + $0x38] sm:$0x8] %v1041_v52  ;;  %1024 = vst [vmem:[#allocation2 + $0x20] sm:$0x8] %v1023_v56  ;;  %v821_v63 = vshrl.u32 %v5295_v57, 16  ;;  %v5952_v51 = vld [vmem:[%s8210_s3 + $0x18] sm:$0xff]  }
  0x4b   : > { %1060 = vst.msk [vmem:[#allocation2 + $0x38] sm:$0xf] %vm8230_vm4, %v5323_v49  ;;  %v711_v3 = vld [vmem:[%s6201_s25 + $0x10] sm:$0xf]  ;;  %v1222_v12 = vld [vmem:[%s6201_s25 + $0xc] sm:$0xf] }
  0x4c   : > { %v823_v6 = vrot.slane %v821_v63, 7  ;;  %v1221_v13 = vld [vmem:[%s6201_s25 + $0x8] sm:$0xf]  ;;  %v5297_v16 = vld [vmem:[%s6201_s25 + $0x6c] sm:$0xf] }
  0x4d   : > { %1078 = vrot.lane.b32.xlu1 %v5326_v60, %s8218_s26  ;;  %1076 = vrot.lane.b32.xlu0 %v5325_v61, %s8218_s26  ;;  %v5294_v60 = vld [vmem:[%s6201_s25 + $0x60] sm:$0xf]  ;;  %v1220_v61 = vld [vmem:[%s6201_s25 + $0x4] sm:$0xf]  ;;  %v835_v18 = vshrl.u32 %v5297_v16, 16  ;;  %v838_v23 = vshll.u32 %v5297_v16, 16 }
  0x4e   : > { %v817_v5 = vshll.u32 %v5294_v60, 16  ;;  %v5296_v17 = vld [vmem:[%s6201_s25 + $0x68] sm:$0xf]  ;;  %v714_v20 = vld [vmem:[%s6201_s25 + $0x1c] sm:$0xf] }
  0x4f   : > { %v828_v19 = vshrl.u32 %v5296_v17, 16  ;;  %v713_v21 = vld [vmem:[%s6201_s25 + $0x18] sm:$0xf]  ;;  %v837_v22 = vrot.slane %v835_v18, 7  ;;  %v831_v26 = vshll.u32 %v5296_v17, 16 }
  0x50   : > { %v5291_v27 = vld [vmem:[%s6201_s25 + $0x34] sm:$0xf]  ;;  %v5290_v28 = vld [vmem:[%s6201_s25 + $0x30] sm:$0xf]  ;;  %v5342_v33 = vld [vmem:[%s6201_s25 + $0x2c] sm:$0xf] }
  0x51   : > { %727 = vrot.lane.b32.xlu1 %v709_v1, %s6072_s29  ;;  %1080 = vrot.lane.b32.xlu0 %v5327_v2, %s8218_s26  ;;  %v814_v1 = vshrl.u32 %v5294_v60, 16  ;;  %v712_v2 = vld [vmem:[%s6201_s25 + $0x14] sm:$0xf]  ;;  %v830_v24 = vrot.slane %v828_v19, 7  ;;  %v840_v29 = vor.u32 %v838_v23, %v837_v22  ;;  %v5341_v34 = vld [vmem:[%s6201_s25 + $0x28] sm:$0xf] }
  0x52   : > { %v5292_v38 = vld [vmem:[%s6201_s25 + $0x38] sm:$0xf]  ;;  %v5336_v43 = vld [vmem:[%s6201_s25 + $0x50] sm:$0xf]  ;;  %v5335_v44 = vld [vmem:[%s6201_s25 + $0x4c] sm:$0xf] }
  0x53   : > { %v816_v7 = vrot.slane %v814_v1, 7  ;;  %v833_v30 = vor.u32 %v831_v26, %v830_v24  ;;  %v5303_v45 = vld [vmem:[%s6201_s25 + $0x44] sm:$0xf]  ;;  %v5302_v46 = vld [vmem:[%s6201_s25 + $0x40] sm:$0xf]  ;;  %v1148_v49 = vshrl.u32 %v5336_v43, 16 }
  0x54   : > { %v1151_v52 = vshll.u32 %v5336_v43, 16  ;;  %v1142_v55 = vshll.u32 %v5335_v44, 16  ;;  %v5305_v56 = vld [vmem:[%s6201_s25 + $0x4c] sm:$0xf]  ;;  %v5953_v63 = vld [vmem:[%s8209_s2 + $0x20] ss:$0 sps:$4 sm:$0xff]  }
  0x55   : > { %772 = vrot.lane.b32.xlu1 %v5286_v4, %s8243_s14  ;;  %729 = vrot.lane.b32.xlu0 %v710_v8, %s6072_s29  ;;  %v824_v4 = vshll.u32 %v5295_v57, 16  ;;  %v819_v9 = vor.u32 %v817_v5, %v816_v7  ;;  %v5304_v57 = vld [vmem:[%s6201_s25 + $0x48] sm:$0xf]  ;;  %v5313_v22 = vld [vmem:[%s6201_s25 + $0x6c] sm:$0xf] }
  0x56   : > { %v1153_v1 = vrot.slane %v1151_v52, 5  ;;  %v1144_v5 = vrot.slane %v1142_v55, 5  ;;  %v5312_v23 = vld [vmem:[%s6201_s25 + $0x68] sm:$0xf]  ;;  %v5299_v52 = vld [vmem:[%s6201_s25 + $0x74] sm:$0xf] }
  0x57   : > { %v826_v8 = vor.u32 %v824_v4, %v823_v6  ;;  %v5955_v4 = vld [vmem:[%s8210_s3 + $0x20] ss:$0 sps:$4 sm:$0xff]   ;;  %vm8234_vm13 = vsmask.f32 3328 }
  0x58   : > { %vm6552_vm14 = vmand %vm8226_vm11, %vm8234_vm13 }
  0x59   : > { %776 = vrot.lane.b32.xlu1 %v5288_v14, %s8243_s14  ;;  %774 = vrot.lane.b32.xlu0 %v5287_v15, %s8243_s14  ;;  %v5340_v14 = vld [vmem:[%s6201_s25 + $0x24] sm:$0xf]  ;;  %v5339_v15 = vld [vmem:[%s6201_s25 + $0x20] sm:$0xf] }
  0x5d   : > { %1082 = vrot.lane.b32.xlu1 %v5328_v31, %s8218_s26  ;;  %778 = vrot.lane.b32.xlu0 %v5289_v32, %s8243_s14  ;;  %v5945_v31 = vld [vmem:[%s8209_s2] sm:$0xff]  }
  0x5e   : > { %v5946_v32 = vld [vmem:[%s8210_s3] sm:$0xff]   ;;  %5801 = vmatprep.subr.bf16.mxu0 %v5945_v31 }
  0x5f   : > { %5843 = vmatprep.subr.bf16.mxu1 %v5946_v32  ;;  %5802 = vmatpush3.bf16.msra.mxu0 %v5945_v31 }
  0x60   : > { %5844 = vmatpush3.bf16.msra.mxu1 %v5946_v32  ;;  %5803 = vmatprep.subr.bf16.mxu0 %v5947_v35 }
  0x61   : > { %1174 = vrot.lane.b32.xlu1 %v1119_v37, %s8245_s27  ;;  %1084 = vrot.lane.b32.xlu0 %v5329_v42, %s8218_s26  ;;  %v5293_v37 = vld [vmem:[%s6201_s25 + $0x3c] sm:$0xf]  ;;  %v5950_v42 = vld [vmem:[%s8210_s3 + $0x10] sm:$0xff]  }
  0x62   : > { %5845 = vmatprep.subr.bf16.mxu1 %v5948_v36 }
  0x63   : > { %5804 = vmatpush3.bf16.msra.mxu0 %v5947_v35 }
  0x64   : > { %5846 = vmatpush3.bf16.msra.mxu1 %v5948_v36  ;;  %5805 = vmatprep.subr.bf16.mxu0 %v5949_v41  ;;  %v1316_v36 = vld [vmem:[%s6201_s25] sm:$0xf] }
  0x65   : > { %1088 = vrot.lane.b32.xlu1 %v5331_v53, %s8218_s26  ;;  %1086 = vrot.lane.b32.xlu0 %v5330_v54, %s8218_s26  ;;  %v1139_v53 = vshrl.u32 %v5335_v44, 16  ;;  %v5338_v54 = vld [vmem:[%s6201_s25 + $0x58] sm:$0xf]  ;;  %s8253_s26 = smov 64   ;;  %v683_v44 = vld [vmem:[#allocation2] sm:$0xf] }
  0x66   : > { %5847 = vmatprep.subr.bf16.mxu1 %v5950_v42 }
  0x67   : > { %5806 = vmatpush3.bf16.msra.mxu0 %v5949_v41  ;;  %v1325_v41 = vshrl.u32 %v1316_v36, 16 }
  0x68   : > { %5848 = vmatpush3.bf16.msra.mxu1 %v5950_v42  ;;  %5807 = vmatprep.subr.bf16.mxu0 %v5951_v50  ;;  %v1328_v42 = vshll.u32 %v1316_v36, 16 }
  0x69   : > { %1178 = vrot.lane.b32.xlu1 %v1137_v58, %s8245_s27  ;;  %1176 = vrot.lane.b32.xlu0 %v1128_v59, %s8245_s27  ;;  %v5337_v58 = vld [vmem:[%s6201_s25 + $0x54] sm:$0xf]  ;;  %v1327_v55 = vrot.slane %v1325_v41, 4 }
  0x6a   : > { %5849 = vmatprep.subr.bf16.mxu1 %v5952_v51  ;;  %v1157_v6 = vshrl.u32 %v5337_v58, 16  ;;  %v1160_v7 = vshll.u32 %v5337_v58, 16  ;;  %v1226_v58 = vld [vmem:[%s6201_s25 + $0x1c] sm:$0xf] }
  0x6b   : > { %5808 = vmatpush3.bf16.msra.mxu0 %v5951_v50 }
  0x6c   : > { %5850 = vmatpush3.bf16.msra.mxu1 %v5952_v51  ;;  %5889 = vmatprep.subr.msk.bf16.mxu0 %vm8222_vm12, %v5953_v63 }
  0x6d   : > { %1237 = vrot.lane.b32.xlu1 %v1220_v61, %s8220_s28  ;;  %1235 = vrot.lane.b32.xlu0 %v1219_v62, %s8220_s28  ;;  %v1150_v61 = vrot.slane %v1148_v49, 4  ;;  %v1166_v62 = vshrl.u32 %v5338_v54, 16 }
  0x6e   : > { %5890 = vmatprep.subr.msk.bf16.mxu1 %vm8222_vm12, %v5955_v4 }
  0x6f   : > { %v1154_v16 = vor.u32 %v1153_v1, %v1150_v61  ;;  %v1168_v17 = vrot.slane %v1166_v62, 4 }
  0x71   : > { %733 = vrot.lane.b32.xlu1 %v712_v2, %s6072_s29  ;;  %731 = vrot.lane.b32.xlu0 %v711_v3, %s6072_s29  ;;  %v1141_v2 = vrot.slane %v1139_v53, 4  ;;  %v1169_v3 = vshll.u32 %v5338_v54, 16 }
  0x73   : > { %v1145_v18 = vor.u32 %v1144_v5, %v1141_v2  ;;  %v1171_v19 = vrot.slane %v1169_v3, 5 }
  0x75   : > { %871 = vrot.lane.b32.xlu1 %v826_v8, %s8249_s16  ;;  %869 = vrot.lane.b32.xlu0 %v819_v9, %s8249_s16  ;;  %v5311_v8 = vld [vmem:[%s6201_s25 + $0x64] sm:$0xf]  ;;  %v5310_v9 = vld [vmem:[%s6201_s25 + $0x60] sm:$0xf] }
  0x79   : > { %1241 = vrot.lane.b32.xlu1 %v1222_v12, %s8220_s28  ;;  %1239 = vrot.lane.b32.xlu0 %v1221_v13, %s8220_s28  ;;  %s8241_s28 = smov 56   ;;  %v3122_v12 = vsel %vm8222_vm12, %v5953_v63, 0  ;;  %v3362_v13 = vsel %vm8222_vm12, %v5955_v4, 0  ;;  %vm893_vm12 = vcmask 454016  }
  0x7a   : > { %5810 = vmatpush3.bf16.msra.mxu0 %v3122_v12  ;;  %5852 = vmatpush3.bf16.msra.mxu1 %v3362_v13  ;;  %v852_v12 = vshll.u32 %v5299_v52, 16  ;;  %v1319_v13 = vld [vmem:[%s6201_s25 + $0xc] sm:$0xf]  ;;  %vm6607_vm8 = vmand %vm893_vm12, %vm8224_vm5  ;;  %vm8235_vm5 = vcmask 519616  }
  0x7b   : > { %4090 = vmatprep.subr.bf16.mxu1 %v6070_v25 }
  0x7d   : > { %1286 = vrot.lane.b32.xlu1 %v5340_v14, %s6072_s29  ;;  %1284 = vrot.lane.b32.xlu0 %v5339_v15, %s6072_s29 }
  0x81   : > { %737 = vrot.lane.b32.xlu1 %v714_v20, %s6072_s29  ;;  %735 = vrot.lane.b32.xlu0 %v713_v21, %s6072_s29  ;;  %v1159_v20 = vrot.slane %v1157_v6, 4  ;;  %v1162_v21 = vrot.slane %v1160_v7, 5  ;;  %v5344_v7 = vld [vmem:[%s6201_s25 + $0x34] sm:$0xf] }
  0x85   : > { %782 = vrot.lane.b32.xlu1 %v5291_v27, %s8243_s14  ;;  %780 = vrot.lane.b32.xlu0 %v5290_v28, %s8243_s14  ;;  %v1155_v27 = vrot.slane %v1154_v16, 4  ;;  %v1146_v28 = vrot.slane %v1145_v18, 4 }
  0x89   : > { %875 = vrot.lane.b32.xlu1 %v840_v29, %s8249_s16  ;;  %873 = vrot.lane.b32.xlu0 %v833_v30, %s8249_s16  ;;  %v1172_v29 = vor.u32 %v1171_v19, %v1168_v17  ;;  %v1163_v30 = vor.u32 %v1162_v21, %v1159_v20 }
  0x8b   : > { %v1164_v35 = vrot.slane %v1163_v30, 4 }
  0x8d   : > { %1290 = vrot.lane.b32.xlu1 %v5342_v33, %s6072_s29  ;;  %1288 = vrot.lane.b32.xlu0 %v5341_v34, %s6072_s29  ;;  %v1317_v33 = vld [vmem:[%s6201_s25 + $0x4] sm:$0xf]  ;;  %v1173_v34 = vrot.slane %v1172_v29, 4 }
  0x8f   : > { %v525_v39 = vpop.permute.xlu1 %524  ;;  %v521_v40 = vpop.permute.xlu0 %520 }
  0x90   : > { %544 = vst.msk [vmem:[#allocation2 + $0xc] sm:$0xf] %vm8231_vm10, %v525_v39  ;;  %542 = vst.msk [vmem:[#allocation2 + $0x4] sm:$0xf] %vm8231_vm10, %v521_v40  ;;  %v1334_v39 = vshrl.u32 %v1317_v33, 16  ;;  %v1337_v40 = vshll.u32 %v1317_v33, 16 }
  0x91   : > { %786 = vrot.lane.b32.xlu1 %v5293_v37, %s8243_s14  ;;  %784 = vrot.lane.b32.xlu0 %v5292_v38, %s8243_s14 }
  0x92   : > { %v1336_v50 = vrot.slane %v1334_v39, 4  ;;  %v1339_v51 = vrot.slane %v1337_v40, 5 }
  0x93   : > { %v527_v47 = vpop.permute.xlu1 %526  ;;  %v523_v48 = vpop.permute.xlu0 %522 }
  0x94   : > { %545 = vst.msk [vmem:[#allocation2 + $0x10] sm:$0xf] %vm8231_vm10, %v527_v47  ;;  %543 = vst.msk [vmem:[#allocation2 + $0x8] sm:$0xf] %vm8231_vm10, %v523_v48  ;;  %v1340_v5 = vor.u32 %v1339_v51, %v1336_v50  ;;  %v5346_v51 = vld [vmem:[%s6201_s25 + $0x3c] sm:$0xf] }
  0x95   : > { %937 = vrot.lane.b32.xlu1 %v5303_v45, %s8241_s28  ;;  %935 = vrot.lane.b32.xlu0 %v5302_v46, %s8241_s28  ;;  %v1224_v45 = vld [vmem:[%s6201_s25 + $0x14] sm:$0xf]  ;;  %v1223_v46 = vld [vmem:[%s6201_s25 + $0x10] sm:$0xf] }
  0x97   : > { %v531_v59 = vpop.permute.xlu1 %530  ;;  %v529_v60 = vpop.permute.xlu0 %528 }
  0x98   : > { %547 = vst.msk [vmem:[#allocation2 + $0x18] sm:$0xf] %vm8231_vm10, %v531_v59  ;;  %546 = vst.msk [vmem:[#allocation2 + $0x14] sm:$0xf] %vm8231_vm10, %v529_v60  ;;  %v1225_v59 = vld [vmem:[%s6201_s25 + $0x18] sm:$0xf] }
  0x99   : > { %941 = vrot.lane.b32.xlu1 %v5305_v56, %s8241_s28  ;;  %939 = vrot.lane.b32.xlu0 %v5304_v57, %s8241_s28  ;;  %v1330_v56 = vrot.slane %v1328_v42, 5  ;;  %v5298_v57 = vld [vmem:[%s6201_s25 + $0x70] sm:$0xf]  ;;  %v849_v60 = vshrl.u32 %v5299_v52, 16  ;;  %v5301_v42 = vld [vmem:[%s6201_s25 + $0x7c] sm:$0xf] }
  0x9a   : > { %v842_v2 = vshrl.u32 %v5298_v57, 16  ;;  %v845_v20 = vshll.u32 %v5298_v57, 16  ;;  %v5345_v52 = vld [vmem:[%s6201_s25 + $0x38] sm:$0xf] }
  0x9b   : > { %v564_v14 = vpop.permute.xlu1 %563  ;;  %v533_v15 = vpop.permute.xlu0 %532  ;;  %v1331_v6 = vor.u32 %v1330_v56, %v1327_v55  ;;  %v866_v55 = vshll.u32 %v5301_v42, 16 }
  0x9c   : > { %585 = vst.msk [vmem:[#allocation2 + $0x4] sm:$0xf] %vm8226_vm11, %v564_v14  ;;  %v1318_v14 = vld [vmem:[%s6201_s25 + $0x8] sm:$0xf]  ;;  %v844_v19 = vrot.slane %v842_v2, 7 }
  0x9d   : > { %548 = vst.msk [vmem:[#allocation2 + $0x1c] sm:$0xf] %vm8231_vm10, %v533_v15  ;;  %986 = vrot.lane.b32.xlu1 %v5311_v8, %s8253_s26  ;;  %984 = vrot.lane.b32.xlu0 %v5310_v9, %s8253_s26  ;;  %v5343_v8 = vld [vmem:[%s6201_s25 + $0x30] sm:$0xf]  ;;  %v851_v9 = vrot.slane %v849_v60, 7  ;;  %v1346_v29 = vshll.u32 %v1318_v14, 16 }
  0x9f   : > { %v568_v24 = vpop.permute.xlu1 %567  ;;  %v566_v26 = vpop.permute.xlu0 %565  ;;  %v854_v36 = vor.u32 %v852_v12, %v851_v9  ;;  %v1348_v41 = vrot.slane %v1346_v29, 5  ;;  %v5306_v9 = vld [vmem:[%s6201_s25 + $0x50] sm:$0xf] }
  0xa0   : > { %587 = vst.msk [vmem:[#allocation2 + $0xc] sm:$0xf] %vm8226_vm11, %v568_v24  ;;  %586 = vst.msk [vmem:[#allocation2 + $0x8] sm:$0xf] %vm8226_vm11, %v566_v26  ;;  %v1332_v24 = vrot.slane %v1331_v6, 4  ;;  %v1352_v26 = vshrl.u32 %v1319_v13, 16 }
  0xa1   : > { %990 = vrot.lane.b32.xlu1 %v5313_v22, %s8253_s26  ;;  %988 = vrot.lane.b32.xlu0 %v5312_v23, %s8253_s26  ;;  %v1341_v23 = vrot.slane %v1340_v5, 4  ;;  %v5347_v5 = vld [vmem:[%s6201_s25 + $0x40] sm:$0xf] }
  0xa3   : > { %v572_v31 = vpop.permute.xlu1 %571  ;;  %v570_v32 = vpop.permute.xlu0 %569  ;;  %v686_v48 = vld [vmem:[#allocation2 + $0x4] sm:$0xf] }
  0xa4   : > { %589 = vst.msk [vmem:[#allocation2 + $0x14] sm:$0xf] %vm8226_vm11, %v572_v31  ;;  %588 = vst.msk [vmem:[#allocation2 + $0x10] sm:$0xf] %vm8226_vm11, %v570_v32 }
  0xa5   : > { %1182 = vrot.lane.b32.xlu1 %v1155_v27, %s8245_s27  ;;  %1180 = vrot.lane.b32.xlu0 %v1146_v28, %s8245_s27  ;;  %v1355_v27 = vshll.u32 %v1319_v13, 16  ;;  %v1343_v28 = vshrl.u32 %v1318_v14, 16 }
  0xa7   : > { %v576_v37 = vpop.permute.xlu1 %575  ;;  %v574_v38 = vpop.permute.xlu0 %573  ;;  %v692_v62 = vld [vmem:[#allocation2 + $0xc] sm:$0xf]  ;;  %v689_v1 = vld [vmem:[#allocation2 + $0x8] sm:$0xf]  ;;  %v1357_v39 = vrot.slane %v1355_v27, 5  ;;  %v1345_v40 = vrot.slane %v1343_v28, 4 }
  0xa8   : > { %591 = vst.msk [vmem:[#allocation2 + $0x1c] sm:$0xf] %vm8226_vm11, %v576_v37  ;;  %590 = vst.msk [vmem:[#allocation2 + $0x18] sm:$0xf] %vm8226_vm11, %v574_v38  ;;  %v847_v37 = vor.u32 %v845_v20, %v844_v19  ;;  %v1354_v38 = vrot.slane %v1352_v26, 4  ;;  %vm8232_vm11 = vcmask 588800  }
  0xa9   : > { %1186 = vrot.lane.b32.xlu1 %v1173_v34, %s8245_s27  ;;  %1184 = vrot.lane.b32.xlu0 %v1164_v35, %s8245_s27  ;;  %v5309_v28 = vld [vmem:[%s6201_s25 + $0x5c] sm:$0xf] }
  0xab   : > { %v660_v47 = vpop.permute.xlu1 %659  ;;  %v658_v49 = vpop.permute.xlu0 %657  ;;  %v698_v16 = vld [vmem:[#allocation2 + $0x14] sm:$0xf]  ;;  %v695_v18 = vld [vmem:[#allocation2 + $0x10] sm:$0xf] }
  0xac   : > { %v687_v53 = vsel %vm6480_vm0, %v660_v47, %v686_v48  ;;  %v684_v54 = vsel %vm6480_vm0, %v658_v49, %v683_v44  ;;  %v5300_v44 = vld [vmem:[%s6201_s25 + $0x78] sm:$0xf]  ;;  %v1358_v47 = vor.u32 %v1357_v39, %v1354_v38  ;;  %v1349_v48 = vor.u32 %v1348_v41, %v1345_v40 }
  0xad   : > { %688 = vst [vmem:[#allocation2 + $0x4] sm:$0xf] %v687_v53  ;;  %685 = vst [vmem:[#allocation2] sm:$0xf] %v684_v54  ;;  %1245 = vrot.lane.b32.xlu1 %v1224_v45, %s8270_s24  ;;  %1243 = vrot.lane.b32.xlu0 %v1223_v46, %s8270_s24  ;;  %v863_v49 = vshrl.u32 %v5301_v42, 16  ;;  %v856_v50 = vshrl.u32 %v5300_v44, 16 }
  0xae   : > { %v859_v56 = vshll.u32 %v5300_v44, 16  ;;  %v1359_v57 = vrot.slane %v1358_v47, 4  ;;  %v1685_v44 = vld [vmem:[#allocation2 + $0x4c] sm:$0x1] }
  0xaf   : > { %v664_v61 = vpop.permute.xlu1 %663  ;;  %v662_v63 = vpop.permute.xlu0 %661  ;;  %v704_v31 = vld [vmem:[#allocation2 + $0x1c] sm:$0xf]  ;;  %v701_v33 = vld [vmem:[#allocation2 + $0x18] sm:$0xf]  ;;  %v858_v60 = vrot.slane %v856_v50, 7 }
  0xb0   : > { %v693_v3 = vsel %vm6480_vm0, %v664_v61, %v692_v62  ;;  %v690_v4 = vsel %vm6480_vm0, %v662_v63, %v689_v1 }
  0xb1   : > { %694 = vst [vmem:[#allocation2 + $0xc] sm:$0xf] %v693_v3  ;;  %691 = vst [vmem:[#allocation2 + $0x8] sm:$0xf] %v690_v4  ;;  %1249 = vrot.lane.b32.xlu1 %v1226_v58, %s8270_s24  ;;  %1247 = vrot.lane.b32.xlu0 %v1225_v59, %s8270_s24  ;;  %v1350_v58 = vrot.slane %v1349_v48, 4  ;;  %v865_v59 = vrot.slane %v863_v49, 7  ;;  %v861_v1 = vor.u32 %v859_v56, %v858_v60 }
  0xb2   : > { %v5348_v4 = vld [vmem:[%s6201_s25 + $0x44] sm:$0xf]  ;;  %v5374_v48 = vld [vmem:[%s6201_s25 + $0x2c] sm:$0xf]  ;;  %v5315_v49 = vld [vmem:[%s6201_s25 + $0x74] sm:$0xf] }
  0xb3   : > { %v668_v15 = vpop.permute.xlu1 %667  ;;  %v666_v17 = vpop.permute.xlu0 %665  ;;  %v868_v63 = vor.u32 %v866_v55, %v865_v59  ;;  %v1682_v55 = vld [vmem:[#allocation2 + $0x48] sm:$0x1] }
  0xb4   : > { %v699_v21 = vsel %vm6480_vm0, %v668_v15, %v698_v16  ;;  %v696_v22 = vsel %vm6480_vm0, %v666_v17, %v695_v18  ;;  %v5350_v15 = vld [vmem:[%s6201_s25 + $0x4c] sm:$0xf]  ;;  %v5349_v16 = vld [vmem:[%s6201_s25 + $0x48] sm:$0xf] }
  0xb5   : > { %700 = vst [vmem:[#allocation2 + $0x14] sm:$0xf] %v699_v21  ;;  %697 = vst [vmem:[#allocation2 + $0x10] sm:$0xf] %v696_v22  ;;  %1294 = vrot.lane.b32.xlu1 %v5344_v7, %s6072_s29  ;;  %1292 = vrot.lane.b32.xlu0 %v5343_v8, %s6072_s29  ;;  %v5307_v8 = vld [vmem:[%s6201_s25 + $0x54] sm:$0xf] }
  0xb6   : > { %v1679_v21 = vld [vmem:[#allocation2 + $0x44] sm:$0x1] }
  0xb7   : > { %v672_v30 = vpop.permute.xlu1 %671  ;;  %v670_v32 = vpop.permute.xlu0 %669  ;;  %v5356_v22 = vld [vmem:[%s6201_s25 + $0x64] sm:$0xf]  ;;  %v1680_v29 = vsel %vm6182_vm2, 0, %v1679_v21 }
  0xb8   : > { %v705_v34 = vsel %vm6480_vm0, %v672_v30, %v704_v31  ;;  %v702_v35 = vsel %vm6480_vm0, %v670_v32, %v701_v33  ;;  %v5372_v30 = vld [vmem:[%s6201_s25 + $0x24] sm:$0xf]  ;;  %v5308_v32 = vld [vmem:[%s6201_s25 + $0x58] sm:$0xf]  ;;  %1681 = vst [vmem:[#allocation2 + $0x44] sm:$0x1] %v1680_v29 }
  0xb9   : > { %706 = vst [vmem:[#allocation2 + $0x1c] sm:$0xf] %v705_v34  ;;  %703 = vst [vmem:[#allocation2 + $0x18] sm:$0xf] %v702_v35  ;;  %1398 = vrot.lane.b32.xlu1 %v1341_v23, %s8243_s14  ;;  %1396 = vrot.lane.b32.xlu0 %v1332_v24, %s8243_s14  ;;  %v5355_v23 = vld [vmem:[%s6201_s25 + $0x60] sm:$0xf] }
  0xba   : > { %v1676_v24 = vld [vmem:[#allocation2 + $0x40] sm:$0x1]  ;;  %v1716_v33 = vshrl.u32 %v5372_v30, 16  ;;  %v1719_v41 = vshll.u32 %v5372_v30, 16  ;;  %v1320_v29 = vld [vmem:[%s6201_s25 + $0x10] sm:$0xf] }
  0xbb   : > { %v726_v45 = vpop.permute.xlu1 %725  ;;  %v724_v46 = vpop.permute.xlu0 %723  ;;  %v1677_v31 = vsel %vm6182_vm2, 0, %v1676_v24  ;;  %v5371_v34 = vld [vmem:[%s6201_s25 + $0x20] sm:$0xf] }
  0xbc   : > { %749 = vst.msk [vmem:[#allocation2 + $0x4] sm:$0xf] %vm8229_vm3, %v726_v45  ;;  %748 = vst.msk [vmem:[#allocation2] sm:$0xf] %vm8229_vm3, %v724_v46  ;;  %v1718_v40 = vrot.slane %v1716_v33, 7  ;;  %v1712_v42 = vshll.u32 %v5371_v34, 16 }
  0xbd   : > { %879 = vrot.lane.b32.xlu1 %v854_v36, %s8249_s16  ;;  %877 = vrot.lane.b32.xlu0 %v847_v37, %s8249_s16  ;;  %1678 = vst [vmem:[#allocation2 + $0x40] sm:$0x1] %v1677_v31  ;;  %v1709_v37 = vshrl.u32 %v5371_v34, 16  ;;  %v1797_v31 = vld [vmem:[%s6201_s25 + $0x4] sm:$0xf] }
  0xbe   : > { %v1721_v50 = vor.u32 %v1719_v41, %v1718_v40  ;;  %v1798_v40 = vld [vmem:[%s6201_s25 + $0x8] sm:$0xf]  ;;  %v1323_v41 = vld [vmem:[%s6201_s25 + $0x1c] sm:$0xf] }
  0xbf   : > { %v1079_v53 = vpop.permute.xlu1 %1078  ;;  %v1077_v54 = vpop.permute.xlu0 %1076  ;;  %v1711_v47 = vrot.slane %v1709_v37, 7  ;;  %v1775_v59 = vld [vmem:[#allocation2 + $0x44] sm:$0xf]  ;;  %v1361_v37 = vshrl.u32 %v1320_v29, 16 }
  0xc0   : > { %1098 = vst.msk [vmem:[#allocation2 + $0x28] sm:$0xf] %vm8231_vm10, %v1079_v53  ;;  %1097 = vst.msk [vmem:[#allocation2 + $0x24] sm:$0xf] %vm8231_vm10, %v1077_v54  ;;  %v1686_v53 = vsel %vm6182_vm2, 0, %v1685_v44  ;;  %v1730_v54 = vshrl.u32 %v5374_v48, 16 }
  0xc1   : > { %1298 = vrot.lane.b32.xlu1 %v5346_v51, %s6072_s29  ;;  %1296 = vrot.lane.b32.xlu0 %v5345_v52, %s6072_s29  ;;  %v5314_v51 = vld [vmem:[%s6201_s25 + $0x70] sm:$0xf]  ;;  %v1714_v52 = vor.u32 %v1712_v42, %v1711_v47  ;;  %1687 = vst [vmem:[#allocation2 + $0x4c] sm:$0x1] %v1686_v53  ;;  %v1322_v42 = vld [vmem:[%s6201_s25 + $0x18] sm:$0xf] }
  0xc2   : > { %v1382_v53 = vshll.u32 %v1322_v42, 16 }
  0xc3   : > { %v728_v61 = vpop.permute.xlu1 %727  ;;  %v1081_v62 = vpop.permute.xlu0 %1080 }
  0xc4   : > { %750 = vst.msk [vmem:[#allocation2 + $0x8] sm:$0xf] %vm8229_vm3, %v728_v61  ;;  %v1772_v60 = vld [vmem:[#allocation2 + $0x40] sm:$0xf]  ;;  %v1732_v61 = vrot.slane %v1730_v54, 7 }
  0xc5   : > { %1099 = vst.msk [vmem:[#allocation2 + $0x2c] sm:$0xf] %vm8231_vm10, %v1081_v62  ;;  %1402 = vrot.lane.b32.xlu1 %v1359_v57, %s8243_s14  ;;  %1400 = vrot.lane.b32.xlu0 %v1350_v58, %s8243_s14  ;;  %v1733_v58 = vshll.u32 %v5374_v48, 16  ;;  %v1683_v62 = vsel %vm6182_vm2, 0, %v1682_v55  ;;  %v1363_v48 = vrot.slane %v1361_v37, 4 }
  0xc6   : > { %1684 = vst [vmem:[#allocation2 + $0x48] sm:$0x1] %v1683_v62  ;;  %v5380_v54 = vld [vmem:[%s6201_s25 + $0x24] sm:$0xf]  ;;  %v5379_v55 = vld [vmem:[%s6201_s25 + $0x20] sm:$0xf] }
  0xc7   : > { %v773_v2 = vpop.permute.xlu1 %772  ;;  %v730_v3 = vpop.permute.xlu0 %729  ;;  %v1198_v18 = vld [vmem:[#allocation2 + $0x24] sm:$0xf]  ;;  %v1201_v36 = vld [vmem:[#allocation2 + $0x28] sm:$0xf] }
  0xc8   : > { %797 = vst.msk [vmem:[#allocation2] sm:$0xf] %vm8228_vm7, %v773_v2  ;;  %v1773_v2 = vsel %vm6259_vm6, %v1714_v52, %v1772_v60  ;;  %v1379_v52 = vshrl.u32 %v1322_v42, 16  ;;  %v5365_v42 = vld [vmem:[%s6201_s25 + $0x48] sm:$0xf] }
  0xc9   : > { %751 = vst.msk [vmem:[#allocation2 + $0xc] sm:$0xf] %vm8229_vm3, %v730_v3  ;;  %883 = vrot.lane.b32.xlu1 %v868_v63, %s8249_s16  ;;  %881 = vrot.lane.b32.xlu0 %v861_v1, %s8249_s16  ;;  %v5358_v63 = vld [vmem:[%s6201_s25 + $0x6c] sm:$0xf]  ;;  %v1776_v1 = vsel %vm6259_vm6, %v1721_v50, %v1775_v59  ;;  %v5373_v3 = vld [vmem:[%s6201_s25 + $0x28] sm:$0xf] }
  0xca   : > { %1777 = vst [vmem:[#allocation2 + $0x44] sm:$0xf] %v1776_v1  ;;  %1774 = vst [vmem:[#allocation2 + $0x40] sm:$0xf] %v1773_v2  ;;  %v1388_v50 = vshrl.u32 %v1323_v41, 16  ;;  %v1381_v62 = vrot.slane %v1379_v52, 4 }
  0xcb   : > { %v777_v6 = vpop.permute.xlu1 %776  ;;  %v775_v7 = vpop.permute.xlu0 %774  ;;  %v5382_v1 = vld [vmem:[%s6201_s25 + $0x2c] sm:$0xf]  ;;  %v5381_v2 = vld [vmem:[%s6201_s25 + $0x28] sm:$0xf] }
  0xcc   : > { %799 = vst.msk [vmem:[#allocation2 + $0x8] sm:$0xf] %vm8228_vm7, %v777_v6  ;;  %798 = vst.msk [vmem:[#allocation2 + $0x4] sm:$0xf] %vm8228_vm7, %v775_v7  ;;  %v1204_v35 = vld [vmem:[#allocation2 + $0x2c] sm:$0xf] }
  0xcd   : > { %1464 = vrot.lane.b32.xlu1 %v5348_v4, %s8249_s16  ;;  %1462 = vrot.lane.b32.xlu0 %v5347_v5, %s8249_s16  ;;  %v5357_v4 = vld [vmem:[%s6201_s25 + $0x68] sm:$0xf]  ;;  %v1723_v5 = vshrl.u32 %v5373_v3, 16  ;;  %v1726_v6 = vshll.u32 %v5373_v3, 16  ;;  %v1390_v60 = vrot.slane %v1388_v50, 4 }
  0xcf   : > { %v1083_v12 = vpop.permute.xlu1 %1082  ;;  %v779_v13 = vpop.permute.xlu0 %778  ;;  %v895_v21 = vld [vmem:[#allocation2] sm:$0xf] }
  0xd0   : > { %1100 = vst.msk [vmem:[#allocation2 + $0x30] sm:$0xf] %vm8231_vm10, %v1083_v12  ;;  %v1725_v12 = vrot.slane %v1723_v5, 7 }
  0xd1   : > { %800 = vst.msk [vmem:[#allocation2 + $0xc] sm:$0xf] %vm8228_vm7, %v779_v13  ;;  %945 = vrot.lane.b32.xlu1 %v5307_v8, %s8241_s28  ;;  %943 = vrot.lane.b32.xlu0 %v5306_v9, %s8241_s28  ;;  %v1735_v9 = vor.u32 %v1733_v58, %v1732_v61 }
  0xd3   : > { %v1175_v17 = vpop.permute.xlu1 %1174  ;;  %v1085_v19 = vpop.permute.xlu0 %1084 }
  0xd4   : > { %v1199_v20 = vsel %vm6552_vm14, %v1175_v17, %v1198_v18  ;;  %1101 = vst.msk [vmem:[#allocation2 + $0x34] sm:$0xf] %vm8231_vm10, %v1085_v19  ;;  %v1781_v17 = vld [vmem:[#allocation2 + $0x4c] sm:$0xf]  ;;  %v1728_v18 = vor.u32 %v1726_v6, %v1725_v12 }
  0xd5   : > { %1200 = vst [vmem:[#allocation2 + $0x24] sm:$0xf] %v1199_v20  ;;  %1468 = vrot.lane.b32.xlu1 %v5350_v15, %s8249_s16  ;;  %1466 = vrot.lane.b32.xlu0 %v5349_v16, %s8249_s16  ;;  %v5317_v15 = vld [vmem:[%s6201_s25 + $0x7c] sm:$0xf]  ;;  %v5316_v16 = vld [vmem:[%s6201_s25 + $0x78] sm:$0xf] }
  0xd6   : > { %v898_v20 = vld [vmem:[#allocation2 + $0x4] sm:$0xf] }
  0xd7   : > { %v1089_v26 = vpop.permute.xlu1 %1088  ;;  %v1087_v27 = vpop.permute.xlu0 %1086 }
  0xd8   : > { %1103 = vst.msk [vmem:[#allocation2 + $0x3c] sm:$0xf] %vm8231_vm10, %v1089_v26  ;;  %1102 = vst.msk [vmem:[#allocation2 + $0x38] sm:$0xf] %vm8231_vm10, %v1087_v27  ;;  %v1778_v27 = vld [vmem:[#allocation2 + $0x48] sm:$0xf] }
  0xd9   : > { %1513 = vrot.lane.b32.xlu1 %v5356_v22, %s8241_s28  ;;  %1511 = vrot.lane.b32.xlu0 %v5355_v23, %s8241_s28  ;;  %v1782_v23 = vsel %vm6259_vm6, %v1735_v9, %v1781_v17  ;;  %v1779_v30 = vsel %vm6259_vm6, %v1728_v18, %v1778_v27  ;;  %v904_v12 = vld [vmem:[#allocation2 + $0xc] sm:$0xf] }
  0xda   : > { %1783 = vst [vmem:[#allocation2 + $0x4c] sm:$0xf] %v1782_v23  ;;  %1780 = vst [vmem:[#allocation2 + $0x48] sm:$0xf] %v1779_v30  ;;  %v5352_v30 = vld [vmem:[%s6201_s25 + $0x54] sm:$0xf] }
  0xdb   : > { %v1179_v38 = vpop.permute.xlu1 %1178  ;;  %v1177_v39 = vpop.permute.xlu0 %1176 }
  0xdc   : > { %v1205_v45 = vsel %vm6552_vm14, %v1179_v38, %v1204_v35  ;;  %v1202_v46 = vsel %vm6552_vm14, %v1177_v39, %v1201_v36  ;;  %v1364_v38 = vshll.u32 %v1320_v29, 16  ;;  %v1799_v39 = vld [vmem:[%s6201_s25 + $0xc] sm:$0xf] }
  0xdd   : > { %1206 = vst [vmem:[#allocation2 + $0x2c] sm:$0xf] %v1205_v45  ;;  %1203 = vst [vmem:[#allocation2 + $0x28] sm:$0xf] %v1202_v46  ;;  %949 = vrot.lane.b32.xlu1 %v5309_v28, %s8241_s28  ;;  %947 = vrot.lane.b32.xlu0 %v5308_v32, %s8241_s28  ;;  %v1321_v28 = vld [vmem:[%s6201_s25 + $0x14] sm:$0xf] }
  0xde   : > { %v1796_v32 = vld [vmem:[%s6201_s25] sm:$0xf]  ;;  %v1370_v35 = vshrl.u32 %v1321_v28, 16  ;;  %v1373_v36 = vshll.u32 %v1321_v28, 16 }
  0xdf   : > { %v1238_v56 = vpop.permute.xlu1 %1237  ;;  %v1236_v57 = vpop.permute.xlu0 %1235 }
  0xe0   : > { %1261 = vst.msk [vmem:[#allocation2 + $0x24] sm:$0xf] %vm8227_vm15, %v1238_v56  ;;  %1260 = vst.msk [vmem:[#allocation2 + $0x20] sm:$0xf] %vm8227_vm15, %v1236_v57  ;;  %v1372_v46 = vrot.slane %v1370_v35, 4  ;;  %v1375_v47 = vrot.slane %v1373_v36, 5 }
  0xe1   : > { %994 = vrot.lane.b32.xlu1 %v5315_v49, %s8253_s26  ;;  %992 = vrot.lane.b32.xlu0 %v5314_v51, %s8253_s26  ;;  %v1366_v49 = vrot.slane %v1364_v38, 5  ;;  %v1391_v51 = vshll.u32 %v1323_v41, 16  ;;  %v5354_v38 = vld [vmem:[%s6201_s25 + $0x5c] sm:$0xf]  ;;  %v5353_v41 = vld [vmem:[%s6201_s25 + $0x58] sm:$0xf] }
  0xe2   : > { %v1376_v58 = vor.u32 %v1375_v47, %v1372_v46 }
  0xe3   : > { %v734_v7 = vpop.permute.xlu1 %733  ;;  %v732_v8 = vpop.permute.xlu0 %731  ;;  %v1367_v59 = vor.u32 %v1366_v49, %v1363_v48  ;;  %v1393_v61 = vrot.slane %v1391_v51, 5 }
  0xe4   : > { %753 = vst.msk [vmem:[#allocation2 + $0x14] sm:$0xf] %vm8229_vm3, %v734_v7  ;;  %752 = vst.msk [vmem:[#allocation2 + $0x10] sm:$0xf] %vm8229_vm3, %v732_v8  ;;  %v1377_v5 = vrot.slane %v1376_v58, 4 }
  0xe5   : > { %1517 = vrot.lane.b32.xlu1 %v5358_v63, %s8241_s28  ;;  %1515 = vrot.lane.b32.xlu0 %v5357_v4, %s8241_s28  ;;  %v1384_v63 = vrot.slane %v1382_v53, 5  ;;  %v1368_v6 = vrot.slane %v1367_v59, 4  ;;  %v1394_v7 = vor.u32 %v1393_v61, %v1390_v60  ;;  %v5376_v53 = vld [vmem:[%s6201_s25 + $0x34] sm:$0xf]  ;;  %v5359_v60 = vld [vmem:[%s6201_s25 + $0x70] sm:$0xf] }
  0xe6   : > { %v5360_v59 = vld [vmem:[%s6201_s25 + $0x74] sm:$0xf] }
  0xe7   : > { %v872_v19 = vpop.permute.xlu1 %871  ;;  %v870_v22 = vpop.permute.xlu0 %869  ;;  %v1385_v8 = vor.u32 %v1384_v63, %v1381_v62 }
  0xe8   : > { %v899_v24 = vsel %vm6607_vm8, %v872_v19, %v898_v20  ;;  %v896_v26 = vsel %vm6607_vm8, %v870_v22, %v895_v21  ;;  %v5364_v19 = vld [vmem:[%s6201_s25 + $0x44] sm:$0xf]  ;;  %v1395_v20 = vrot.slane %v1394_v7, 4  ;;  %v5363_v22 = vld [vmem:[%s6201_s25 + $0x40] sm:$0xf] }
  0xe9   : > { %900 = vst [vmem:[#allocation2 + $0x4] sm:$0xf] %v899_v24  ;;  %897 = vst [vmem:[#allocation2] sm:$0xf] %v896_v26  ;;  %998 = vrot.lane.b32.xlu1 %v5317_v15, %s8253_s26  ;;  %996 = vrot.lane.b32.xlu0 %v5316_v16, %s8253_s26  ;;  %v901_v16 = vld [vmem:[#allocation2 + $0x8] sm:$0xf] }
  0xea   : > { %v1386_v21 = vrot.slane %v1385_v8, 4  ;;  %v1561_v26 = vshrl.u32 %v5364_v19, 16  ;;  %v1564_v27 = vshll.u32 %v5364_v19, 16  ;;  %v1552_v28 = vshrl.u32 %v5363_v22, 16 }
  0xeb   : > { %v1242_v33 = vpop.permute.xlu1 %1241  ;;  %v1240_v34 = vpop.permute.xlu0 %1239  ;;  %v1555_v29 = vshll.u32 %v5363_v22, 16 }
  0xec   : > { %1263 = vst.msk [vmem:[#allocation2 + $0x2c] sm:$0xf] %vm8227_vm15, %v1242_v33  ;;  %1262 = vst.msk [vmem:[#allocation2 + $0x28] sm:$0xf] %vm8227_vm15, %v1240_v34  ;;  %v1563_v34 = vrot.slane %v1561_v26, 4  ;;  %v1566_v35 = vrot.slane %v1564_v27, 5 }
  0xed   : > { %1814 = vrot.lane.b32.xlu1 %v1797_v31, %s8275_s17  ;;  %1812 = vrot.lane.b32.xlu0 %v1796_v32, %s8275_s17  ;;  %v5351_v31 = vld [vmem:[%s6201_s25 + $0x50] sm:$0xf]  ;;  %v1554_v36 = vrot.slane %v1552_v28, 4  ;;  %v1557_v37 = vrot.slane %v1555_v29, 5  ;;  %v5362_v26 = vld [vmem:[%s6201_s25 + $0x7c] sm:$0xf] }
  0xee   : > { %v1567_v47 = vor.u32 %v1566_v35, %v1563_v34  ;;  %v2290_v29 = vld [vmem:[#allocation2 + $0x64] sm:$0x8] }
  0xef   : > { %v1287_v44 = vpop.permute.xlu1 %1286  ;;  %v1285_v45 = vpop.permute.xlu0 %1284  ;;  %v1558_v50 = vor.u32 %v1557_v37, %v1554_v36 }
  0xf0   : > { %1309 = vst.msk [vmem:[#allocation2 + $0x24] sm:$0xf] %vm8229_vm3, %v1287_v44  ;;  %1308 = vst.msk [vmem:[#allocation2 + $0x20] sm:$0xf] %vm8229_vm3, %v1285_v45  ;;  %v1688_v44 = vld [vmem:[#allocation2 + $0x50] sm:$0x1] }
  0xf1   : > { %1818 = vrot.lane.b32.xlu1 %v1799_v39, %s8275_s17  ;;  %1816 = vrot.lane.b32.xlu0 %v1798_v40, %s8275_s17  ;;  %v5366_v39 = vld [vmem:[%s6201_s25 + $0x4c] sm:$0xf]  ;;  %v1691_v40 = vld [vmem:[#allocation2 + $0x54] sm:$0x1]  ;;  %v1689_v49 = vsel %vm6182_vm2, 0, %v1688_v44  ;;  %v1568_v63 = vrot.slane %v1567_v47, 4 }
  0xf2   : > { %v1692_v48 = vsel %vm6182_vm2, 0, %v1691_v40  ;;  %v1579_v51 = vshrl.u32 %v5366_v39, 16  ;;  %v1582_v52 = vshll.u32 %v5366_v39, 16  ;;  %1690 = vst [vmem:[#allocation2 + $0x50] sm:$0x1] %v1689_v49 }
  0xf3   : > { %v738_v56 = vpop.permute.xlu1 %737  ;;  %v736_v57 = vpop.permute.xlu0 %735  ;;  %1693 = vst [vmem:[#allocation2 + $0x54] sm:$0x1] %v1692_v48  ;;  %v1210_v44 = vld [vmem:[#allocation2 + $0x34] sm:$0xf] }
  0xf4   : > { %755 = vst.msk [vmem:[#allocation2 + $0x1c] sm:$0xf] %vm8229_vm3, %v738_v56  ;;  %754 = vst.msk [vmem:[#allocation2 + $0x18] sm:$0xf] %vm8229_vm3, %v736_v57  ;;  %v1573_v56 = vshll.u32 %v5365_v42, 16  ;;  %v1744_v57 = vshrl.u32 %v5376_v53, 16 }
  0xf5   : > { %1862 = vrot.lane.b32.xlu1 %v5380_v54, %s8245_s27  ;;  %1860 = vrot.lane.b32.xlu0 %v5379_v55, %s8245_s27  ;;  %v5375_v54 = vld [vmem:[%s6201_s25 + $0x30] sm:$0xf]  ;;  %v1570_v55 = vshrl.u32 %v5365_v42, 16  ;;  %v1584_v7 = vrot.slane %v1582_v52, 5 }
  0xf6   : > { %v1737_v58 = vshrl.u32 %v5375_v54, 16 }
  0xf7   : > { %v783_v3 = vpop.permute.xlu1 %782  ;;  %v781_v4 = vpop.permute.xlu0 %780  ;;  %v1572_v8 = vrot.slane %v1570_v55, 4  ;;  %v1801_v55 = vld [vmem:[%s6201_s25 + $0x14] sm:$0xf] }
  0xf8   : > { %802 = vst.msk [vmem:[#allocation2 + $0x14] sm:$0xf] %vm8228_vm7, %v783_v3  ;;  %801 = vst.msk [vmem:[#allocation2 + $0x10] sm:$0xf] %vm8228_vm7, %v781_v4  ;;  %v1559_v3 = vrot.slane %v1558_v50, 4  ;;  %v1581_v4 = vrot.slane %v1579_v51, 4 }
  0xf9   : > { %1866 = vrot.lane.b32.xlu1 %v5382_v1, %s8245_s27  ;;  %1864 = vrot.lane.b32.xlu0 %v5381_v2, %s8245_s27  ;;  %v1746_v1 = vrot.slane %v1744_v57, 7  ;;  %v1747_v2 = vshll.u32 %v5376_v53, 16  ;;  %v1216_v57 = vld [vmem:[#allocation2 + $0x3c] sm:$0xf] }
  0xfa   : > { %v1585_v27 = vor.u32 %v1584_v7, %v1581_v4  ;;  %v5432_v7 = vld [vmem:[%s6201_s25 + $0x20] sm:$0xf] }
  0xfb   : > { %v876_v9 = vpop.permute.xlu1 %875  ;;  %v874_v15 = vpop.permute.xlu0 %873 }
  0xfc   : > { %v905_v17 = vsel %vm6607_vm8, %v876_v9, %v904_v12  ;;  %v902_v18 = vsel %vm6607_vm8, %v874_v15, %v901_v16  ;;  %v1575_v9 = vrot.slane %v1573_v56, 5  ;;  %v1749_v12 = vor.u32 %v1747_v2, %v1746_v1  ;;  %v1694_v15 = vld [vmem:[#allocation2 + $0x58] sm:$0x1]  ;;  %v1800_v56 = vld [vmem:[%s6201_s25 + $0x10] sm:$0xf] }
  0xfd   : > { %906 = vst [vmem:[#allocation2 + $0xc] sm:$0xf] %v905_v17  ;;  %903 = vst [vmem:[#allocation2 + $0x8] sm:$0xf] %v902_v18  ;;  %1406 = vrot.lane.b32.xlu1 %v1377_v5, %s8243_s14  ;;  %1404 = vrot.lane.b32.xlu0 %v1368_v6, %s8243_s14  ;;  %v1739_v5 = vrot.slane %v1737_v58, 7  ;;  %v1740_v6 = vshll.u32 %v5375_v54, 16 }
  0xfe   : > { %v1695_v17 = vsel %vm6182_vm2, 0, %v1694_v15  ;;  %v1576_v28 = vor.u32 %v1575_v9, %v1572_v8  ;;  %v1213_v58 = vld [vmem:[#allocation2 + $0x38] sm:$0xf]  ;;  %v5388_v8 = vld [vmem:[%s6201_s25 + $0x64] sm:$0xf] }
  0xff   : > { %v1291_v23 = vpop.permute.xlu1 %1290  ;;  %v1289_v24 = vpop.permute.xlu0 %1288  ;;  %v1742_v16 = vor.u32 %v1740_v6, %v1739_v5  ;;  %1696 = vst [vmem:[#allocation2 + $0x58] sm:$0x1] %v1695_v17  ;;  %v2293_v5 = vld [vmem:[#allocation2 + $0x68] sm:$0x8] }
 0x100   : > { %1311 = vst.msk [vmem:[#allocation2 + $0x2c] sm:$0xf] %vm8229_vm3, %v1291_v23  ;;  %1310 = vst.msk [vmem:[#allocation2 + $0x28] sm:$0xf] %vm8229_vm3, %v1289_v24  ;;  %v5377_v24 = vld [vmem:[%s6201_s25 + $0x38] sm:$0xf] }
 0x101   : > { %1410 = vrot.lane.b32.xlu1 %v1395_v20, %s8243_s14  ;;  %1408 = vrot.lane.b32.xlu0 %v1386_v21, %s8243_s14  ;;  %v1787_v20 = vld [vmem:[#allocation2 + $0x54] sm:$0xf]  ;;  %v1784_v21 = vld [vmem:[#allocation2 + $0x50] sm:$0xf]  ;;  %v1751_v34 = vshrl.u32 %v5377_v24, 16  ;;  %v1754_v39 = vshll.u32 %v5377_v24, 16 }
 0x102   : > { %v1788_v22 = vsel %vm6259_vm6, %v1749_v12, %v1787_v20  ;;  %v1785_v23 = vsel %vm6259_vm6, %v1742_v16, %v1784_v21  ;;  %v1577_v42 = vrot.slane %v1576_v28, 4  ;;  %v2313_v6 = vld [vmem:[%s6201_s25 + $0x8] sm:$0xf]  ;;  %v2294_v9 = vsel %vm6306_vm9, 0, %v2293_v5  ;;  %v5383_v20 = vld [vmem:[%s6201_s25 + $0x30] sm:$0xf] }
 0x103   : > { %v787_v32 = vpop.permute.xlu1 %786  ;;  %v785_v33 = vpop.permute.xlu0 %784  ;;  %1789 = vst [vmem:[#allocation2 + $0x54] sm:$0xf] %v1788_v22  ;;  %1786 = vst [vmem:[#allocation2 + $0x50] sm:$0xf] %v1785_v23  ;;  %v1753_v40 = vrot.slane %v1751_v34, 7 }
 0x104   : > { %804 = vst.msk [vmem:[#allocation2 + $0x1c] sm:$0xf] %vm8228_vm7, %v787_v32  ;;  %803 = vst.msk [vmem:[#allocation2 + $0x18] sm:$0xf] %vm8228_vm7, %v785_v33  ;;  %v2291_v32 = vsel %vm6306_vm9, 0, %v2290_v29  ;;  %v1911_v29 = vshll.u32 %v5388_v8, 16 }
 0x105   : > { %1472 = vrot.lane.b32.xlu1 %v5352_v30, %s8249_s16  ;;  %1470 = vrot.lane.b32.xlu0 %v5351_v31, %s8249_s16  ;;  %v2312_v30 = vld [vmem:[%s6201_s25 + $0x4] sm:$0xf]  ;;  %v5361_v31 = vld [vmem:[%s6201_s25 + $0x78] sm:$0xf]  ;;  %v2287_v33 = vld [vmem:[#allocation2 + $0x60] sm:$0x8] }
 0x106   : > { %2292 = vst [vmem:[#allocation2 + $0x64] sm:$0x8] %v2291_v32  ;;  %v2288_v37 = vsel %vm6306_vm9, 0, %v2287_v33  ;;  %v1790_v47 = vld [vmem:[#allocation2 + $0x58] sm:$0xf] }
 0x107   : > { %v938_v45 = vpop.permute.xlu1 %937  ;;  %v936_v46 = vpop.permute.xlu0 %935  ;;  %2320 = vst.msk [vmem:[#allocation2 + $0x64] sm:$0xf] %vm8230_vm4, %v2312_v30  ;;  %2289 = vst [vmem:[#allocation2 + $0x60] sm:$0x8] %v2288_v37  ;;  %v1802_v21 = vld [vmem:[%s6201_s25 + $0x18] sm:$0xf] }
 0x108   : > { %961 = vst.msk [vmem:[#allocation2 + $0x4] sm:$0xf] %vm8235_vm5, %v938_v45  ;;  %960 = vst.msk [vmem:[#allocation2] sm:$0xf] %vm8235_vm5, %v936_v46  ;;  %v1207_v45 = vld [vmem:[#allocation2 + $0x30] sm:$0xf]  ;;  %v1756_v46 = vor.u32 %v1754_v39, %v1753_v40 }
 0x109   : > { %1476 = vrot.lane.b32.xlu1 %v5354_v38, %s8249_s16  ;;  %1474 = vrot.lane.b32.xlu0 %v5353_v41, %s8249_s16  ;;  %v2311_v38 = vld [vmem:[%s6201_s25] sm:$0xf]  ;;  %v1586_v41 = vrot.slane %v1585_v27, 4  ;;  %2295 = vst [vmem:[#allocation2 + $0x68] sm:$0x8] %v2294_v9 }
 0x10a   : > { %2319 = vst.msk [vmem:[#allocation2 + $0x60] sm:$0xf] %vm8230_vm4, %v2311_v38  ;;  %v1791_v54 = vsel %vm6259_vm6, %v1756_v46, %v1790_v47  ;;  %2321 = vst.msk [vmem:[#allocation2 + $0x68] sm:$0xf] %vm8230_vm4, %v2313_v6  ;;  %v5384_v30 = vld [vmem:[%s6201_s25 + $0x34] sm:$0xf] }
 0x10b   : > { %v942_v61 = vpop.permute.xlu1 %941  ;;  %v940_v62 = vpop.permute.xlu0 %939  ;;  %1792 = vst [vmem:[#allocation2 + $0x58] sm:$0xf] %v1791_v54  ;;  %v5389_v32 = vld [vmem:[%s6201_s25 + $0x68] sm:$0xf]  ;;  %v910_v54 = vld [vmem:[#allocation2 + $0x14] sm:$0xf] }
 0x10c   : > { %963 = vst.msk [vmem:[#allocation2 + $0xc] sm:$0xf] %vm8235_vm5, %v942_v61  ;;  %962 = vst.msk [vmem:[#allocation2 + $0x8] sm:$0xf] %vm8235_vm5, %v940_v62  ;;  %v1915_v38 = vshrl.u32 %v5389_v32, 16 }
 0x10d   : > { %1521 = vrot.lane.b32.xlu1 %v5360_v59, %s8241_s28  ;;  %1519 = vrot.lane.b32.xlu0 %v5359_v60, %s8241_s28  ;;  %v5387_v59 = vld [vmem:[%s6201_s25 + $0x60] sm:$0xf]  ;;  %v5434_v39 = vld [vmem:[%s6201_s25 + $0x28] sm:$0xf]  ;;  %v1431_v5 = vld [vmem:[#allocation2 + $0x2c] sm:$0xf] }
 0x10e   : > { %v1901_v4 = vshrl.u32 %v5387_v59, 16  ;;  %v1904_v17 = vshll.u32 %v5387_v59, 16  ;;  %v1428_v6 = vld [vmem:[#allocation2 + $0x28] sm:$0xf] }
 0x10f   : > { %v987_v18 = vpop.permute.xlu1 %986  ;;  %v985_v19 = vpop.permute.xlu0 %984 }
 0x110   : > { %1010 = vst.msk [vmem:[#allocation2 + $0x4] sm:$0xf] %vm8233_vm1, %v987_v18  ;;  %1009 = vst.msk [vmem:[#allocation2] sm:$0xf] %vm8233_vm1, %v985_v19  ;;  %v1903_v16 = vrot.slane %v1901_v4, 7  ;;  %v1908_v18 = vshrl.u32 %v5388_v8, 16 }
 0x111   : > { %1625 = vrot.lane.b32.xlu1 %v1568_v63, %s8253_s26  ;;  %1623 = vrot.lane.b32.xlu0 %v1559_v3, %s8253_s26  ;;  %v5433_v3 = vld [vmem:[%s6201_s25 + $0x24] sm:$0xf]  ;;  %v2296_v19 = vld [vmem:[#allocation2 + $0x6c] sm:$0x8] }
 0x112   : > { %v2297_v22 = vsel %vm6306_vm9, 0, %v2296_v19  ;;  %v1906_v27 = vor.u32 %v1904_v17, %v1903_v16  ;;  %v1910_v28 = vrot.slane %v1908_v18, 7  ;;  %v5398_v18 = vld [vmem:[%s6201_s25 + $0x4c] sm:$0xf]  ;;  %v5397_v19 = vld [vmem:[%s6201_s25 + $0x48] sm:$0xf] }
 0x113   : > { %v991_v35 = vpop.permute.xlu1 %990  ;;  %v989_v36 = vpop.permute.xlu0 %988  ;;  %2298 = vst [vmem:[#allocation2 + $0x6c] sm:$0x8] %v2297_v22 }
 0x114   : > { %1012 = vst.msk [vmem:[#allocation2 + $0xc] sm:$0xf] %vm8233_vm1, %v991_v35  ;;  %1011 = vst.msk [vmem:[#allocation2 + $0x8] sm:$0xf] %vm8233_vm1, %v989_v36  ;;  %v1913_v36 = vor.u32 %v1911_v29, %v1910_v28 }
 0x115   : > { %1525 = vrot.lane.b32.xlu1 %v5362_v26, %s8241_s28  ;;  %1523 = vrot.lane.b32.xlu0 %v5361_v31, %s8241_s28  ;;  %v2314_v26 = vld [vmem:[%s6201_s25 + $0xc] sm:$0xf] }
 0x116   : > { %2322 = vst.msk [vmem:[#allocation2 + $0x6c] sm:$0xf] %vm8230_vm4, %v2314_v26  ;;  %v5390_v31 = vld [vmem:[%s6201_s25 + $0x6c] sm:$0xf]  ;;  %v913_v26 = vld [vmem:[#allocation2 + $0x18] sm:$0xf] }
 0x117   : > { %v1183_v48 = vpop.permute.xlu1 %1182  ;;  %v1181_v49 = vpop.permute.xlu0 %1180  ;;  %v5954_v50 = vld [vmem:[#allocation2] sm:$0xff]   ;;  %v1922_v37 = vshrl.u32 %v5390_v31, 16 }
 0x118   : > { %v1211_v51 = vsel %vm6552_vm14, %v1183_v48, %v1210_v44  ;;  %v1208_v52 = vsel %vm6552_vm14, %v1181_v49, %v1207_v45  ;;  %v5956_v53 = vld [vmem:[#allocation2] sm:$0xff]   ;;  %5811 = vmatprep.mubr.msk.bf16.mxu0 %vm8232_vm11, %v5954_v50  ;;  %v1925_v48 = vshll.u32 %v5390_v31, 16  ;;  %v1917_v49 = vrot.slane %v1915_v38, 7 }
 0x119   : > { %1212 = vst [vmem:[#allocation2 + $0x34] sm:$0xf] %v1211_v51  ;;  %1209 = vst [vmem:[#allocation2 + $0x30] sm:$0xf] %v1208_v52  ;;  %1629 = vrot.lane.b32.xlu1 %v1586_v41, %s8253_s26  ;;  %1627 = vrot.lane.b32.xlu0 %v1577_v42, %s8253_s26  ;;  %v1425_v41 = vld [vmem:[#allocation2 + $0x24] sm:$0xf] }
 0x11a   : > { %5853 = vmatprep.mubr.msk.bf16.mxu1 %vm8232_vm11, %v5956_v53  ;;  %v1422_v42 = vld [vmem:[#allocation2 + $0x20] sm:$0xf]  ;;  %v1924_v47 = vrot.slane %v1922_v37, 7  ;;  %v1918_v50 = vshll.u32 %v5389_v32, 16  ;;  %v5385_v51 = vld [vmem:[%s6201_s25 + $0x38] sm:$0xf] }
 0x11b   : > { %v1187_v60 = vpop.permute.xlu1 %1186  ;;  %v1185_v61 = vpop.permute.xlu0 %1184  ;;  %v5957_v62 = vld [vmem:[#allocation2 + $0x8] sm:$0xff]   ;;  %v5404_v38 = vld [vmem:[%s6201_s25 + $0x64] sm:$0xf] }
 0x11c   : > { %v1217_v63 = vsel %vm6552_vm14, %v1187_v60, %v1216_v57  ;;  %v1214_v1 = vsel %vm6552_vm14, %v1185_v61, %v1213_v58  ;;  %v5958_v2 = vld [vmem:[#allocation2 + $0x8] sm:$0xff]   ;;  %5812 = vmatmul.mubr.msk.bf16.vlgmr.msra.gmra.mrb[0].mxu0 %vm8232_vm11, %v5957_v62  ;;  %v1927_v59 = vor.u32 %v1925_v48, %v1924_v47  ;;  %v1920_v60 = vor.u32 %v1918_v50, %v1917_v49  ;;  %v2375_v48 = vld [vmem:[%s6201_s25] sm:$0xf] }
 0x11d   : > { %1218 = vst [vmem:[#allocation2 + $0x3c] sm:$0xf] %v1217_v63  ;;  %1215 = vst [vmem:[#allocation2 + $0x38] sm:$0xf] %v1214_v1  ;;  %1822 = vrot.lane.b32.xlu1 %v1801_v55, %s8275_s17  ;;  %1820 = vrot.lane.b32.xlu0 %v1800_v56, %s8275_s17  ;;  %v5435_v52 = vld [vmem:[%s6201_s25 + $0x2c] sm:$0xf] }
 0x11e   : > { %5854 = vmatmul.mubr.msk.bf16.vlgmr.msra.gmra.mrb[0].mxu1 %vm8232_vm11, %v5958_v2  ;;  %v907_v56 = vld [vmem:[#allocation2 + $0x10] sm:$0xf]  ;;  %v5368_v63 = vld [vmem:[%s6201_s25 + $0x54] sm:$0xf]  ;;  %v5396_v2 = vld [vmem:[%s6201_s25 + $0x44] sm:$0xf] }
 0x11f   : > { %v1246_v12 = vpop.permute.xlu1 %1245  ;;  %v1244_v15 = vpop.permute.xlu0 %1243  ;;  %v5367_v1 = vld [vmem:[%s6201_s25 + $0x50] sm:$0xf]  ;;  %v1597_v8 = vshrl.u32 %v5368_v63, 16  ;;  %v1600_v9 = vshll.u32 %v5368_v63, 16 }
 0x120   : > { %1265 = vst.msk [vmem:[#allocation2 + $0x34] sm:$0xf] %vm8227_vm15, %v1246_v12  ;;  %1264 = vst.msk [vmem:[#allocation2 + $0x30] sm:$0xf] %vm8227_vm15, %v1244_v15  ;;  %v1588_v16 = vshrl.u32 %v5367_v1, 16  ;;  %v1591_v17 = vshll.u32 %v5367_v1, 16 }
 0x121   : > { %2345 = vrot.lane.b32.xlu1 %v5433_v3, %s8275_s17  ;;  %2343 = vrot.lane.b32.xlu0 %v5432_v7, %s8275_s17  ;;  %v5395_v3 = vld [vmem:[%s6201_s25 + $0x40] sm:$0xf]  ;;  %v1602_v28 = vrot.slane %v1600_v9, 5  ;;  %v2315_v1 = vld [vmem:[%s6201_s25 + $0x10] sm:$0xf] }
 0x122   : > { %v1590_v31 = vrot.slane %v1588_v16, 4  ;;  %v1593_v32 = vrot.slane %v1591_v17, 5 }
 0x123   : > { %v1250_v23 = vpop.permute.xlu1 %1249  ;;  %v1248_v24 = vpop.permute.xlu0 %1247 }
 0x124   : > { %1267 = vst.msk [vmem:[#allocation2 + $0x3c] sm:$0xf] %vm8227_vm15, %v1250_v23  ;;  %1266 = vst.msk [vmem:[#allocation2 + $0x38] sm:$0xf] %vm8227_vm15, %v1248_v24  ;;  %v916_v23 = vld [vmem:[#allocation2 + $0x1c] sm:$0xf]  ;;  %v1594_v47 = vor.u32 %v1593_v32, %v1590_v31 }
 0x125   : > { %1868 = vrot.lane.b32.xlu1 %v5383_v20, %s8245_s27  ;;  %1824 = vrot.lane.b32.xlu0 %v1802_v21, %s8275_s17  ;;  %vm6765_vm15 = vmand %vm8228_vm7, %vm8234_vm13  ;;  %v5370_v20 = vld [vmem:[%s6201_s25 + $0x5c] sm:$0xf]  ;;  %v5369_v21 = vld [vmem:[%s6201_s25 + $0x58] sm:$0xf]  ;;  %vm8278_vm7 = vcmask 191616   ;;  %vm3473_vm13 = vcmask 1043459  }
 0x126   : > { %v1609_v37 = vshll.u32 %v5369_v21, 16  ;;  %v2305_v31 = vld [vmem:[#allocation2 + $0x78] sm:$0x8]  ;;  %v5436_v32 = vld [vmem:[%s6201_s25 + $0x30] sm:$0xf] }
 0x127   : > { %v1295_v33 = vpop.permute.xlu1 %1294  ;;  %v1293_v34 = vpop.permute.xlu0 %1292 }
 0x128   : > { %1313 = vst.msk [vmem:[#allocation2 + $0x34] sm:$0xf] %vm8229_vm3, %v1295_v33  ;;  %1312 = vst.msk [vmem:[#allocation2 + $0x30] sm:$0xf] %vm8229_vm3, %v1293_v34  ;;  %v1615_v33 = vshrl.u32 %v5370_v20, 16  ;;  %v1618_v34 = vshll.u32 %v5370_v20, 16 }
 0x129   : > { %1956 = vrot.lane.b32.xlu1 %v1906_v27, %s8270_s24  ;;  %1870 = vrot.lane.b32.xlu0 %v5384_v30, %s8245_s27  ;;  %v1599_v27 = vrot.slane %v1597_v8, 4  ;;  %v2377_v20 = vld [vmem:[%s6201_s25 + $0x8] sm:$0xf] }
 0x12a   : > { %v1617_v49 = vrot.slane %v1615_v33, 4  ;;  %v1620_v50 = vrot.slane %v1618_v34, 5  ;;  %v2378_v33 = vld [vmem:[%s6201_s25 + $0xc] sm:$0xf]  ;;  %v2306_v34 = vsel %vm6306_vm9, 0, %v2305_v31 }
 0x12b   : > { %v1399_v40 = vpop.permute.xlu1 %1398  ;;  %v1397_v44 = vpop.permute.xlu0 %1396  ;;  %2307 = vst [vmem:[#allocation2 + $0x78] sm:$0x8] %v2306_v34  ;;  %v5443_v34 = vld [vmem:[%s6201_s25 + $0x4c] sm:$0xf] }
 0x12c   : > { %v1426_v45 = vsel %vm6765_vm15, %v1399_v40, %v1425_v41  ;;  %v1423_v46 = vsel %vm6765_vm15, %v1397_v44, %v1422_v42  ;;  %v2376_v42 = vld [vmem:[%s6201_s25 + $0x4] sm:$0xf]  ;;  %v5406_v44 = vld [vmem:[%s6201_s25 + $0x6c] sm:$0xf] }
 0x12d   : > { %1427 = vst [vmem:[#allocation2 + $0x24] sm:$0xf] %v1426_v45  ;;  %1424 = vst [vmem:[#allocation2 + $0x20] sm:$0xf] %v1423_v46  ;;  %2347 = vrot.lane.b32.xlu1 %v5434_v39, %s8275_s17  ;;  %1958 = vrot.lane.b32.xlu0 %v1913_v36, %s8270_s24  ;;  %v1606_v36 = vshrl.u32 %v5369_v21, 16  ;;  %v1603_v46 = vor.u32 %v1602_v28, %v1599_v27 }
 0x12e   : > { %v5403_v39 = vld [vmem:[%s6201_s25 + $0x60] sm:$0xf]  ;;  %v5405_v45 = vld [vmem:[%s6201_s25 + $0x68] sm:$0xf]  ;;  %v5437_v28 = vld [vmem:[%s6201_s25 + $0x34] sm:$0xf] }
 0x12f   : > { %v880_v53 = vpop.permute.xlu1 %879  ;;  %v878_v55 = vpop.permute.xlu0 %877 }
 0x130   : > { %v911_v57 = vsel %vm6607_vm8, %v880_v53, %v910_v54  ;;  %v908_v58 = vsel %vm6607_vm8, %v878_v55, %v907_v56  ;;  %v2302_v53 = vld [vmem:[#allocation2 + $0x74] sm:$0x8]  ;;  %v2393_v54 = vshrl.u32 %v2376_v42, 16 }
 0x131   : > { %912 = vst [vmem:[#allocation2 + $0x14] sm:$0xf] %v911_v57  ;;  %909 = vst [vmem:[#allocation2 + $0x10] sm:$0xf] %v908_v58  ;;  %1872 = vrot.lane.b32.xlu1 %v5385_v51, %s8245_s27  ;;  %2349 = vrot.lane.b32.xlu0 %v5435_v52, %s8275_s17  ;;  %v1608_v51 = vrot.slane %v1606_v36, 4  ;;  %v1611_v52 = vrot.slane %v1609_v37, 5 }
 0x132   : > { %v2303_v55 = vsel %vm6306_vm9, 0, %v2302_v53  ;;  %v2316_v56 = vld [vmem:[%s6201_s25 + $0x14] sm:$0xf]  ;;  %v2299_v57 = vld [vmem:[#allocation2 + $0x70] sm:$0x8]  ;;  %v2395_v8 = vrot.slane %v2393_v54, 4 }
 0x133   : > { %v1299_v61 = vpop.permute.xlu1 %1298  ;;  %v1297_v62 = vpop.permute.xlu0 %1296  ;;  %2304 = vst [vmem:[#allocation2 + $0x74] sm:$0x8] %v2303_v55  ;;  %v2300_v63 = vsel %vm6306_vm9, 0, %v2299_v57 }
 0x134   : > { %1315 = vst.msk [vmem:[#allocation2 + $0x3c] sm:$0xf] %vm8229_vm3, %v1299_v61  ;;  %1314 = vst.msk [vmem:[#allocation2 + $0x38] sm:$0xf] %vm8229_vm3, %v1297_v62  ;;  %v2384_v61 = vshrl.u32 %v2375_v48, 16  ;;  %v2387_v62 = vshll.u32 %v2375_v48, 16 }
 0x135   : > { %1962 = vrot.lane.b32.xlu1 %v1927_v59, %s8270_s24  ;;  %1960 = vrot.lane.b32.xlu0 %v1920_v60, %s8270_s24  ;;  %v2396_v60 = vshll.u32 %v2376_v42, 16  ;;  %2324 = vst.msk [vmem:[#allocation2 + $0x74] sm:$0xf] %vm8230_vm4, %v2316_v56  ;;  %2301 = vst [vmem:[#allocation2 + $0x70] sm:$0x8] %v2300_v63  ;;  %v2411_v48 = vshrl.u32 %v2378_v33, 16 }
 0x136   : > { %2323 = vst.msk [vmem:[#allocation2 + $0x70] sm:$0xf] %vm8230_vm4, %v2315_v1  ;;  %vm8279_vm3 = vmmov %vm8278_vm7 }
 0x137   : > { %v1403_v4 = vpop.permute.xlu1 %1402  ;;  %v1401_v7 = vpop.permute.xlu0 %1400  ;;  %v2398_v9 = vrot.slane %v2396_v60, 5  ;;  %v2413_v57 = vrot.slane %v2411_v48, 4 }
 0x138   : > { %v1432_v12 = vsel %vm6765_vm15, %v1403_v4, %v1431_v5  ;;  %v1429_v15 = vsel %vm6765_vm15, %v1401_v7, %v1428_v6  ;;  %v1621_v4 = vor.u32 %v1620_v50, %v1617_v49  ;;  %v1612_v5 = vor.u32 %v1611_v52, %v1608_v51  ;;  %v5393_v50 = vld [vmem:[%s6201_s25 + $0x78] sm:$0xf] }
 0x139   : > { %1433 = vst [vmem:[#allocation2 + $0x2c] sm:$0xf] %v1432_v12  ;;  %1430 = vst [vmem:[#allocation2 + $0x28] sm:$0xf] %v1429_v15  ;;  %2022 = vrot.lane.b32.xlu1 %v5396_v2, %s6072_s29  ;;  %2020 = vrot.lane.b32.xlu0 %v5395_v3, %s6072_s29  ;;  %v1604_v2 = vrot.slane %v1603_v46, 4  ;;  %v1595_v3 = vrot.slane %v1594_v47, 4 }
 0x13a   : > { %v2386_v12 = vrot.slane %v2384_v61, 4  ;;  %v2389_v15 = vrot.slane %v2387_v62, 5  ;;  %v1622_v16 = vrot.slane %v1621_v4, 4  ;;  %v1613_v17 = vrot.slane %v1612_v5, 4 }
 0x13b   : > { %v884_v22 = vpop.permute.xlu1 %883  ;;  %v882_v24 = vpop.permute.xlu0 %881  ;;  %v2414_v49 = vshll.u32 %v2378_v33, 16  ;;  %v1943_v56 = vshrl.u32 %v5393_v50, 16  ;;  %v1946_v63 = vshll.u32 %v5393_v50, 16 }
 0x13c   : > { %v917_v29 = vsel %vm6607_vm8, %v884_v22, %v916_v23  ;;  %v914_v30 = vsel %vm6607_vm8, %v882_v24, %v913_v26  ;;  %v2399_v23 = vor.u32 %v2398_v9, %v2395_v8  ;;  %v2390_v24 = vor.u32 %v2389_v15, %v2386_v12  ;;  %v1697_v15 = vld [vmem:[#allocation2 + $0x5c] sm:$0x1] }
 0x13d   : > { %918 = vst [vmem:[#allocation2 + $0x1c] sm:$0xf] %v917_v29  ;;  %915 = vst [vmem:[#allocation2 + $0x18] sm:$0xf] %v914_v30  ;;  %2026 = vrot.lane.b32.xlu1 %v5398_v18, %s6072_s29  ;;  %2024 = vrot.lane.b32.xlu0 %v5397_v19, %s6072_s29  ;;  %v5392_v18 = vld [vmem:[%s6201_s25 + $0x74] sm:$0xf] }
 0x13e   : > { %v5391_v19 = vld [vmem:[%s6201_s25 + $0x70] sm:$0xf]  ;;  %v1936_v26 = vshrl.u32 %v5392_v18, 16  ;;  %v2402_v29 = vshrl.u32 %v2377_v20, 16  ;;  %v2405_v30 = vshll.u32 %v2377_v20, 16  ;;  %v1939_v42 = vshll.u32 %v5392_v18, 16 }
 0x13f   : > { %v1465_v40 = vpop.permute.xlu1 %1464  ;;  %v1463_v41 = vpop.permute.xlu0 %1462  ;;  %v1929_v27 = vshrl.u32 %v5391_v19, 16  ;;  %v1945_v62 = vrot.slane %v1943_v56, 7  ;;  %v5441_v18 = vld [vmem:[%s6201_s25 + $0x44] sm:$0xf] }
 0x140   : > { %1488 = vst.msk [vmem:[#allocation2 + $0x24] sm:$0xf] %vm893_vm12, %v1465_v40  ;;  %1487 = vst.msk [vmem:[#allocation2 + $0x20] sm:$0xf] %vm893_vm12, %v1463_v41  ;;  %v2317_v40 = vld [vmem:[%s6201_s25 + $0x18] sm:$0xf] }
 0x141   : > { %2070 = vrot.lane.b32.xlu1 %v5404_v38, %s8243_s14  ;;  %2068 = vrot.lane.b32.xlu0 %v5403_v39, %s8243_s14  ;;  %v2400_v38 = vrot.slane %v2399_v23, 4  ;;  %v2391_v39 = vrot.slane %v2390_v24, 4  ;;  %v1938_v41 = vrot.slane %v1936_v26, 7  ;;  %2325 = vst.msk [vmem:[#allocation2 + $0x78] sm:$0xf] %vm8230_vm4, %v2317_v40  ;;  %v2404_v46 = vrot.slane %v2402_v29, 4  ;;  %vm8280_vm4 = vmmov %vm8279_vm3 }
 0x142   : > { %v2407_v47 = vrot.slane %v2405_v30, 5  ;;  %v5399_v29 = vld [vmem:[%s6201_s25 + $0x50] sm:$0xf]  ;;  %v5412_v40 = vld [vmem:[%s6201_s25 + $0x28] sm:$0xf] }
 0x143   : > { %v946_v58 = vpop.permute.xlu1 %945  ;;  %v944_v59 = vpop.permute.xlu0 %943  ;;  %v1941_v53 = vor.u32 %v1939_v42, %v1938_v41  ;;  %v5449_v41 = vld [vmem:[%s6201_s25 + $0x64] sm:$0xf]  ;;  %v5448_v42 = vld [vmem:[%s6201_s25 + $0x60] sm:$0xf] }
 0x144   : > { %965 = vst.msk [vmem:[#allocation2 + $0x14] sm:$0xf] %vm8235_vm5, %v946_v58  ;;  %964 = vst.msk [vmem:[#allocation2 + $0x10] sm:$0xf] %vm8235_vm5, %v944_v59  ;;  %v2408_v55 = vor.u32 %v2407_v47, %v2404_v46  ;;  %v2416_v58 = vrot.slane %v2414_v49, 5 }
 0x145   : > { %2074 = vrot.lane.b32.xlu1 %v5406_v44, %s8243_s14  ;;  %2072 = vrot.lane.b32.xlu0 %v5405_v45, %s8243_s14  ;;  %v1931_v44 = vrot.slane %v1929_v27, 7  ;;  %v1932_v45 = vshll.u32 %v5391_v19, 16  ;;  %v5440_v19 = vld [vmem:[%s6201_s25 + $0x40] sm:$0xf]  ;;  %v1437_v46 = vld [vmem:[#allocation2 + $0x34] sm:$0xf] }
 0x146   : > { %v2409_v61 = vrot.slane %v2408_v55, 4  ;;  %v2417_v1 = vor.u32 %v2416_v58, %v2413_v57  ;;  %v1434_v47 = vld [vmem:[#allocation2 + $0x30] sm:$0xf]  ;;  %v1443_v55 = vld [vmem:[#allocation2 + $0x3c] sm:$0xf] }
 0x147   : > { %v1469_v6 = vpop.permute.xlu1 %1468  ;;  %v1467_v7 = vpop.permute.xlu0 %1466  ;;  %v1934_v54 = vor.u32 %v1932_v45, %v1931_v44  ;;  %v5411_v44 = vld [vmem:[%s6201_s25 + $0x24] sm:$0xf]  ;;  %v1440_v57 = vld [vmem:[#allocation2 + $0x38] sm:$0xf] }
 0x148   : > { %1490 = vst.msk [vmem:[#allocation2 + $0x2c] sm:$0xf] %vm893_vm12, %v1469_v6  ;;  %1489 = vst.msk [vmem:[#allocation2 + $0x28] sm:$0xf] %vm893_vm12, %v1467_v7  ;;  %v1948_v7 = vor.u32 %v1946_v63, %v1945_v62  ;;  %v2418_v8 = vrot.slane %v2417_v1, 4  ;;  %v2119_v1 = vshll.u32 %v5412_v40, 16 }
 0x149   : > { %1633 = vrot.lane.b32.xlu1 %v1604_v2, %s8253_s26  ;;  %1631 = vrot.lane.b32.xlu0 %v1595_v3, %s8253_s26  ;;  %v5438_v2 = vld [vmem:[%s6201_s25 + $0x38] sm:$0xf] }
 0x14b   : > { %v1514_v21 = vpop.permute.xlu1 %1513  ;;  %v1512_v22 = vpop.permute.xlu0 %1511 }
 0x14c   : > { %1536 = vst.msk [vmem:[#allocation2 + $0x24] sm:$0xf] %vm8235_vm5, %v1514_v21  ;;  %1535 = vst.msk [vmem:[#allocation2 + $0x20] sm:$0xf] %vm8235_vm5, %v1512_v22 }
 0x14d   : > { %1637 = vrot.lane.b32.xlu1 %v1622_v16, %s8253_s26  ;;  %1635 = vrot.lane.b32.xlu0 %v1613_v17, %s8253_s26  ;;  %v1698_v16 = vsel %vm6182_vm2, 0, %v1697_v15  ;;  %v5378_v17 = vld [vmem:[%s6201_s25 + $0x3c] sm:$0xf]  ;;  %v6938_v15 = vld [vmem:[%s6201_s25 + $0x2c] sm:$0xf] }
 0x14e   : > { %1699 = vst [vmem:[#allocation2 + $0x5c] sm:$0x1] %v1698_v16  ;;  %v1758_v20 = vshrl.u32 %v5378_v17, 16  ;;  %v1761_v24 = vshll.u32 %v5378_v17, 16  ;;  %v3449_v16 = vld [vmem:[#allocation4] sm:$0x11] }
 0x14f   : > { %v950_v36 = vpop.permute.xlu1 %949  ;;  %v948_v37 = vpop.permute.xlu0 %947 }
 0x150   : > { %967 = vst.msk [vmem:[#allocation2 + $0x1c] sm:$0xf] %vm8235_vm5, %v950_v36  ;;  %966 = vst.msk [vmem:[#allocation2 + $0x18] sm:$0xf] %vm8235_vm5, %v948_v37  ;;  %v1760_v27 = vrot.slane %v1758_v20, 7 }
 0x151   : > { %2353 = vrot.lane.b32.xlu1 %v5437_v28, %s8275_s17  ;;  %2351 = vrot.lane.b32.xlu0 %v5436_v32, %s8275_s17  ;;  %v5400_v28 = vld [vmem:[%s6201_s25 + $0x54] sm:$0xf]  ;;  %v5442_v36 = vld [vmem:[%s6201_s25 + $0x48] sm:$0xf] }
 0x152   : > { %v1763_v32 = vor.u32 %v1761_v24, %v1760_v27  ;;  %v3452_v20 = vld [vmem:[#allocation4 + $0x8] sm:$0x11]  ;;  %v2123_v27 = vshrl.u32 %v6938_v15, 16 }
 0x153   : > { %v995_v51 = vpop.permute.xlu1 %994  ;;  %v993_v52 = vpop.permute.xlu0 %992 }
 0x154   : > { %1014 = vst.msk [vmem:[#allocation2 + $0x14] sm:$0xf] %vm8233_vm1, %v995_v51  ;;  %1013 = vst.msk [vmem:[#allocation2 + $0x10] sm:$0xf] %vm8233_vm1, %v993_v52  ;;  %v2116_v51 = vshrl.u32 %v5412_v40, 16  ;;  %v2109_v52 = vshrl.u32 %v5411_v44, 16 }
 0x155   : > { %2457 = vrot.lane.b32.xlu1 %v2400_v38, %s8245_s27  ;;  %2455 = vrot.lane.b32.xlu0 %v2391_v39, %s8245_s27  ;;  %v1793_v33 = vld [vmem:[#allocation2 + $0x5c] sm:$0xf] }
 0x156   : > { %v1794_v37 = vsel %vm6259_vm6, %v1763_v32, %v1793_v33  ;;  %v2118_v62 = vrot.slane %v2116_v51, 7  ;;  %vm8287_vm6 = vsmask.f32 7950  ;;  %v1652_v51 = vld [vmem:[#allocation2 + $0x24] sm:$0xf] }
 0x157   : > { %v1518_v59 = vpop.permute.xlu1 %1517  ;;  %v1516_v60 = vpop.permute.xlu0 %1515  ;;  %1795 = vst [vmem:[#allocation2 + $0x5c] sm:$0xf] %v1794_v37  ;;  %vm3474_vm2 = vmand %vm3473_vm13, %vm8287_vm6  ;;  %vm8293_vm13 = vcmask 585216  }
 0x158   : > { %1538 = vst.msk [vmem:[#allocation2 + $0x2c] sm:$0xf] %vm8235_vm5, %v1518_v59  ;;  %1537 = vst.msk [vmem:[#allocation2 + $0x28] sm:$0xf] %vm8235_vm5, %v1516_v60 }
 0x159   : > { %1966 = vrot.lane.b32.xlu1 %v1941_v53, %s8270_s24  ;;  %1964 = vrot.lane.b32.xlu0 %v1934_v54, %s8270_s24  ;;  %v5401_v53 = vld [vmem:[%s6201_s25 + $0x58] sm:$0xf]  ;;  %v1803_v54 = vld [vmem:[%s6201_s25 + $0x1c] sm:$0xf] }
 0x15b   : > { %v999_v3 = vpop.permute.xlu1 %998  ;;  %v997_v4 = vpop.permute.xlu0 %996  ;;  %v5959_v5 = vld [vmem:[#allocation2 + $0x10] sm:$0xff]  }
 0x15c   : > { %1016 = vst.msk [vmem:[#allocation2 + $0x1c] sm:$0xf] %vm8233_vm1, %v999_v3  ;;  %1015 = vst.msk [vmem:[#allocation2 + $0x18] sm:$0xf] %vm8233_vm1, %v997_v4  ;;  %v5960_v6 = vld [vmem:[#allocation2 + $0x10] sm:$0xff]   ;;  %5815 = vmatprep.mubr.msk.bf16.mxu0 %vm8232_vm11, %v5959_v5  ;;  %v2112_v3 = vshll.u32 %v5411_v44, 16 }
 0x15d   : > { %2459 = vrot.lane.b32.xlu1 %v2409_v61, %s8245_s27  ;;  %2355 = vrot.lane.b32.xlu0 %v5438_v2, %s8275_s17  ;;  %v5408_v61 = vld [vmem:[%s6201_s25 + $0x74] sm:$0xf]  ;;  %v2111_v2 = vrot.slane %v2109_v52, 7  ;;  %v5407_v4 = vld [vmem:[%s6201_s25 + $0x70] sm:$0xf] }
 0x15e   : > { %5857 = vmatprep.mubr.msk.bf16.mxu1 %vm8232_vm11, %v5960_v6  ;;  %v1649_v52 = vld [vmem:[#allocation2 + $0x20] sm:$0xf] }
 0x15f   : > { %v1815_v9 = vpop.permute.xlu1 %1814  ;;  %v1813_v12 = vpop.permute.xlu0 %1812 }
 0x160   : > { %1837 = vst.msk [vmem:[#allocation2 + $0x44] sm:$0xf] %vm8231_vm10, %v1815_v9  ;;  %1836 = vst.msk [vmem:[#allocation2 + $0x40] sm:$0xf] %vm8231_vm10, %v1813_v12  ;;  %v2121_v9 = vor.u32 %v2119_v1, %v2118_v62  ;;  %v2114_v12 = vor.u32 %v2112_v3, %v2111_v2  ;;  %v2380_v2 = vld [vmem:[%s6201_s25 + $0x14] sm:$0xf] }
 0x161   : > { %1968 = vrot.lane.b32.xlu1 %v1948_v7, %s8270_s24  ;;  %2461 = vrot.lane.b32.xlu0 %v2418_v8, %s8245_s27  ;;  %v6932_v8 = vld [vmem:[%s6201_s25 + $0x30] sm:$0xf]  ;;  %v5419_v3 = vld [vmem:[%s6201_s25 + $0x8] sm:$0xf] }
 0x162   : > { %v2130_v24 = vshrl.u32 %v6932_v8, 16  ;;  %v2133_v37 = vshll.u32 %v6932_v8, 16  ;;  %v1658_v8 = vld [vmem:[#allocation2 + $0x2c] sm:$0xf] }
 0x163   : > { %v1819_v21 = vpop.permute.xlu1 %1818  ;;  %v1817_v22 = vpop.permute.xlu0 %1816  ;;  %v5961_v23 = vld [vmem:[#allocation2 + $0x18] sm:$0xff]  }
 0x164   : > { %1839 = vst.msk [vmem:[#allocation2 + $0x4c] sm:$0xf] %vm8231_vm10, %v1819_v21  ;;  %1838 = vst.msk [vmem:[#allocation2 + $0x48] sm:$0xf] %vm8231_vm10, %v1817_v22  ;;  %v5962_v26 = vld [vmem:[#allocation2 + $0x18] sm:$0xff]   ;;  %5816 = vmatmul.mubr.msk.bf16.gmra.mrb[4].mxu0 %vm8232_vm11, %v5961_v23 }
 0x165   : > { %2521 = vrot.lane.b32.xlu1 %v5441_v18, %s8270_s24  ;;  %2519 = vrot.lane.b32.xlu0 %v5440_v19, %s8270_s24  ;;  %v3479_v19 = vld [vmem:[#allocation4] sm:$0x88] }
 0x166   : > { %5858 = vmatmul.mubr.msk.bf16.gmra.mrb[4].mxu1 %vm8232_vm11, %v5962_v26  ;;  %vm3446_vm11 = vsmask.f32 4352  ;;  %v5451_v26 = vld [vmem:[%s6201_s25 + $0x6c] sm:$0xf] }
 0x167   : > { %v1863_v30 = vpop.permute.xlu1 %1862  ;;  %v1861_v31 = vpop.permute.xlu0 %1860 }
 0x168   : > { %1885 = vst.msk [vmem:[#allocation2 + $0x44] sm:$0xf] %vm8278_vm7, %v1863_v30  ;;  %vm8281_vm7 = vmmov %vm8279_vm3  ;;  %v3482_v30 = vld [vmem:[#allocation4 + $0x8] sm:$0x88] }
 0x169   : > { %1884 = vst.msk [vmem:[#allocation2 + $0x40] sm:$0xf] %vm8279_vm3, %v1861_v31  ;;  %2030 = vrot.lane.b32.xlu1 %v5400_v28, %s6072_s29  ;;  %2028 = vrot.lane.b32.xlu0 %v5399_v29, %s6072_s29  ;;  %vm3445_vm3 = vcmask 126980   ;;  %v5450_v29 = vld [vmem:[%s6201_s25 + $0x68] sm:$0xf] }
 0x16a   : > { %vm3447_vm1 = vmand %vm3445_vm3, %vm3446_vm11  ;;  %v3455_v31 = vld [vmem:[#allocation4 + $0x10] sm:$0x11]  ;;  %vm8292_vm11 = vsmask.f32 3328 }
 0x16b   : > { %v1867_v38 = vpop.permute.xlu1 %1866  ;;  %v1865_v39 = vpop.permute.xlu0 %1864  ;;  %vm6967_vm3 = vmand %vm8293_vm13, %vm8292_vm11 }
 0x16c   : > { %1887 = vst.msk [vmem:[#allocation2 + $0x4c] sm:$0xf] %vm8280_vm4, %v1867_v38  ;;  %vm3443_vm4 = vcmask 1040384   ;;  %v3485_v38 = vld [vmem:[#allocation4 + $0x10] sm:$0x88] }
 0x16d   : > { %1886 = vst.msk [vmem:[#allocation2 + $0x48] sm:$0xf] %vm8281_vm7, %v1865_v39  ;;  %2525 = vrot.lane.b32.xlu1 %v5443_v34, %s8270_s24  ;;  %2523 = vrot.lane.b32.xlu0 %v5442_v36, %s8270_s24  ;;  %vm8282_vm7 = vsmask.f32 256  ;;  %v5409_v34 = vld [vmem:[%s6201_s25 + $0x78] sm:$0xf] }
 0x16e   : > { %vm6915_vm10 = vmand %vm3443_vm4, %vm8282_vm7  ;;  %vm3475_vm4 = vcmask 130055   ;;  %vm3476_vm7 = vsmask.f32 7966  ;;  %v2132_v36 = vrot.slane %v2130_v24, 7  ;;  %v3458_v39 = vld [vmem:[#allocation4 + $0x18] sm:$0x11] }
 0x16f   : > { %v1407_v45 = vpop.permute.xlu1 %1406  ;;  %v1405_v48 = vpop.permute.xlu0 %1404  ;;  %vm6925_vm5 = vmor %vm3447_vm1, %vm6915_vm10  ;;  %v5420_v24 = vld [vmem:[%s6201_s25 + $0xc] sm:$0xf] }
 0x170   : > { %v1438_v49 = vsel %vm6765_vm15, %v1407_v45, %v1437_v46  ;;  %v1435_v50 = vsel %vm6765_vm15, %v1405_v48, %v1434_v47  ;;  %vm3477_vm1 = vmand %vm3475_vm4, %vm3476_vm7  ;;  %v3450_v17 = vsel %vm6925_vm5, 0, %v3449_v16  ;;  %v3453_v28 = vsel %vm6925_vm5, 0, %v3452_v20  ;;  %v3488_v46 = vld [vmem:[#allocation4 + $0x18] sm:$0x88]  ;;  %v3461_v48 = vld [vmem:[#allocation4 + $0x20] sm:$0x11] }
 0x171   : > { %1439 = vst [vmem:[#allocation2 + $0x34] sm:$0xf] %v1438_v49  ;;  %1436 = vst [vmem:[#allocation2 + $0x30] sm:$0xf] %v1435_v50  ;;  %2569 = vrot.lane.b32.xlu1 %v5449_v41, %s6072_s29  ;;  %2567 = vrot.lane.b32.xlu0 %v5448_v42, %s6072_s29  ;;  %v2125_v41 = vrot.slane %v2123_v27, 7  ;;  %v2126_v42 = vshll.u32 %v6938_v15, 16 }
 0x172   : > { %vm6943_vm10 = vmor %vm3477_vm1, %vm3474_vm2  ;;  %3451 = vst [vmem:[#allocation4] sm:$0x11] %v3450_v17  ;;  %vm8290_vm2 = vcmask 519616   ;;  %v3456_v45 = vsel %vm6925_vm5, 0, %v3455_v31  ;;  %v5386_v47 = vld [vmem:[%s6201_s25 + $0x3c] sm:$0xf] }
 0x173   : > { %v1411_v56 = vpop.permute.xlu1 %1410  ;;  %v1409_v58 = vpop.permute.xlu0 %1408  ;;  %v3480_v23 = vsel %vm6943_vm10, 0, %v3479_v19  ;;  %3454 = vst [vmem:[#allocation4 + $0x8] sm:$0x11] %v3453_v28  ;;  %vm8291_vm6 = vmmov %vm8290_vm2  ;;  %v3483_v44 = vsel %vm6943_vm10, 0, %v3482_v30  ;;  %v3491_v49 = vld [vmem:[#allocation4 + $0x20] sm:$0x88] }
 0x174   : > { %v1444_v59 = vsel %vm6765_vm15, %v1411_v56, %v1443_v55  ;;  %v1441_v60 = vsel %vm6765_vm15, %v1409_v58, %v1440_v57  ;;  %3481 = vst [vmem:[#allocation4] sm:$0x88] %v3480_v23  ;;  %3484 = vst [vmem:[#allocation4 + $0x8] sm:$0x88] %v3483_v44  ;;  %v3459_v55 = vsel %vm6925_vm5, 0, %v3458_v39  ;;  %v3489_v58 = vsel %vm6943_vm10, 0, %v3488_v46 }
 0x175   : > { %1445 = vst [vmem:[#allocation2 + $0x3c] sm:$0xf] %v1444_v59  ;;  %1442 = vst [vmem:[#allocation2 + $0x38] sm:$0xf] %v1441_v60  ;;  %2032 = vrot.lane.b32.xlu1 %v5401_v53, %s6072_s29  ;;  %1826 = vrot.lane.b32.xlu0 %v1803_v54, %s8275_s17  ;;  %v3486_v54 = vsel %vm6943_vm10, 0, %v3485_v38  ;;  %v2135_v59 = vor.u32 %v2133_v37, %v2132_v36  ;;  %v2128_v60 = vor.u32 %v2126_v42, %v2125_v41  ;;  %vm8298_vm1 = vcmask 588800  }
 0x176   : > { %3457 = vst [vmem:[#allocation4 + $0x10] sm:$0x11] %v3456_v45  ;;  %3487 = vst [vmem:[#allocation4 + $0x10] sm:$0x88] %v3486_v54  ;;  %v3492_v62 = vsel %vm6943_vm10, 0, %v3491_v49  ;;  %v2429_v15 = vshrl.u32 %v2380_v2, 16 }
 0x177   : > { %v1473_v5 = vpop.permute.xlu1 %1472  ;;  %v1471_v6 = vpop.permute.xlu0 %1470  ;;  %3460 = vst [vmem:[#allocation4 + $0x18] sm:$0x11] %v3459_v55  ;;  %3490 = vst [vmem:[#allocation4 + $0x18] sm:$0x88] %v3489_v58  ;;  %v2432_v20 = vshll.u32 %v2380_v2, 16 }
 0x178   : > { %1492 = vst.msk [vmem:[#allocation2 + $0x34] sm:$0xf] %vm893_vm12, %v1473_v5  ;;  %1491 = vst.msk [vmem:[#allocation2 + $0x30] sm:$0xf] %vm893_vm12, %v1471_v6  ;;  %v2379_v5 = vld [vmem:[%s6201_s25 + $0x10] sm:$0xf] }
 0x179   : > { %2078 = vrot.lane.b32.xlu1 %v5408_v61, %s8243_s14  ;;  %2076 = vrot.lane.b32.xlu0 %v5407_v4, %s8243_s14  ;;  %v3462_v61 = vsel %vm6925_vm5, 0, %v3461_v48  ;;  %3493 = vst [vmem:[#allocation4 + $0x20] sm:$0x88] %v3492_v62  ;;  %vm8296_vm4 = vmmov %vm8290_vm2  ;;  %v5418_v4 = vld [vmem:[%s6201_s25 + $0x4] sm:$0xf]  ;;  %v2434_v30 = vrot.slane %v2432_v20, 5 }
 0x17a   : > { %3463 = vst [vmem:[#allocation4 + $0x20] sm:$0x11] %v3462_v61  ;;  %vm8297_vm7 = vmmov %vm8290_vm2  ;;  %v5421_v23 = vld [vmem:[%s6201_s25 + $0x10] sm:$0xf]  ;;  %v5426_v36 = vld [vmem:[%s6201_s25 + $0x28] sm:$0xf] }
 0x17b   : > { %v1477_v21 = vpop.permute.xlu1 %1476  ;;  %v1475_v22 = vpop.permute.xlu0 %1474  ;;  %v5425_v37 = vld [vmem:[%s6201_s25 + $0x24] sm:$0xf]  ;;  %v5427_v48 = vld [vmem:[%s6201_s25 + $0x2c] sm:$0xf]  ;;  %v1980_v61 = vld [vmem:[#allocation2 + $0x40] sm:$0xf] }
 0x17c   : > { %1494 = vst.msk [vmem:[#allocation2 + $0x3c] sm:$0xf] %vm893_vm12, %v1477_v21  ;;  %1493 = vst.msk [vmem:[#allocation2 + $0x38] sm:$0xf] %vm893_vm12, %v1475_v22  ;;  %v2420_v21 = vshrl.u32 %v2379_v5, 16  ;;  %v2423_v22 = vshll.u32 %v2379_v5, 16 }
 0x17d   : > { %2159 = vrot.lane.b32.xlu1 %v2121_v9, %s8249_s16  ;;  %2157 = vrot.lane.b32.xlu0 %v2114_v12, %s8249_s16  ;;  %v1655_v9 = vld [vmem:[#allocation2 + $0x28] sm:$0xf]  ;;  %v5457_v49 = vld [vmem:[%s6201_s25 + $0x44] sm:$0xf] }
 0x17e   : > { %v2422_v31 = vrot.slane %v2420_v21, 4  ;;  %v5416_v21 = vld [vmem:[%s6201_s25 + $0x38] sm:$0xf] }
 0x17f   : > { %v1522_v32 = vpop.permute.xlu1 %1521  ;;  %v1520_v33 = vpop.permute.xlu0 %1519 }
 0x180   : > { %1540 = vst.msk [vmem:[#allocation2 + $0x34] sm:$0xf] %vm8290_vm2, %v1522_v32  ;;  %vm8299_vm2 = vcmask 126016   ;;  %v2425_v32 = vrot.slane %v2423_v22, 5  ;;  %v5415_v22 = vld [vmem:[%s6201_s25 + $0x34] sm:$0xf] }
 0x181   : > { %1539 = vst.msk [vmem:[#allocation2 + $0x30] sm:$0xf] %vm8291_vm6, %v1520_v33  ;;  %2573 = vrot.lane.b32.xlu1 %v5451_v26, %s6072_s29  ;;  %2571 = vrot.lane.b32.xlu0 %v5450_v29, %s6072_s29  ;;  %v2381_v26 = vld [vmem:[%s6201_s25 + $0x18] sm:$0xf]  ;;  %vm8300_vm6 = vmmov %vm8299_vm2  ;;  %v2431_v29 = vrot.slane %v2429_v15, 4 }
 0x182   : > { %v2438_v33 = vshrl.u32 %v2381_v26, 16  ;;  %vm8301_vm11 = vmmov %vm8299_vm2  ;;  %v2426_v44 = vor.u32 %v2425_v32, %v2422_v31  ;;  %v2137_v31 = vshrl.u32 %v5415_v22, 16  ;;  %v5452_v32 = vld [vmem:[%s6201_s25 + $0x70] sm:$0xf] }
 0x183   : > { %v1626_v50 = vpop.permute.xlu1 %1625  ;;  %v1624_v53 = vpop.permute.xlu0 %1623  ;;  %vm8302_vm13 = vmmov %vm8299_vm2  ;;  %v2435_v42 = vor.u32 %v2434_v30, %v2431_v29  ;;  %v2144_v30 = vshrl.u32 %v5416_v21, 16 }
 0x184   : > { %v1653_v56 = vsel %vm6967_vm3, %v1626_v50, %v1652_v51  ;;  %v1650_v57 = vsel %vm6967_vm3, %v1624_v53, %v1649_v52  ;;  %v2440_v45 = vrot.slane %v2438_v33, 4  ;;  %v5456_v52 = vld [vmem:[%s6201_s25 + $0x40] sm:$0xf]  ;;  %v2427_v54 = vrot.slane %v2426_v44, 4  ;;  %v2308_v44 = vld [vmem:[#allocation2 + $0x7c] sm:$0x8] }
 0x185   : > { %1654 = vst [vmem:[#allocation2 + $0x24] sm:$0xf] %v1653_v56  ;;  %1651 = vst [vmem:[#allocation2 + $0x20] sm:$0xf] %v1650_v57  ;;  %2080 = vrot.lane.b32.xlu1 %v5409_v34, %s8243_s14  ;;  %1874 = vrot.lane.b32.xlu0 %v5386_v47, %s8245_s27  ;;  %v2441_v34 = vshll.u32 %v2381_v26, 16  ;;  %v2436_v53 = vrot.slane %v2435_v42, 4 }
 0x186   : > { %v5428_v47 = vld [vmem:[%s6201_s25 + $0x30] sm:$0xf]  ;;  %v2617_v56 = vshrl.u32 %v5457_v49, 16  ;;  %v2620_v57 = vshll.u32 %v5457_v49, 16  ;;  %v2608_v58 = vshrl.u32 %v5456_v52, 16 }
 0x187   : > { %v1526_v63 = vpop.permute.xlu1 %1525  ;;  %v1524_v1 = vpop.permute.xlu0 %1523  ;;  %v2443_v46 = vrot.slane %v2441_v34, 5  ;;  %v5459_v26 = vld [vmem:[%s6201_s25 + $0x4c] sm:$0xf]  ;;  %v2318_v49 = vld [vmem:[%s6201_s25 + $0x1c] sm:$0xf] }
 0x188   : > { %1542 = vst.msk [vmem:[#allocation2 + $0x3c] sm:$0xf] %vm8296_vm4, %v1526_v63  ;;  %vm8303_vm4 = vmmov %vm8298_vm1  ;;  %v2619_v2 = vrot.slane %v2617_v56, 4  ;;  %v2610_v5 = vrot.slane %v2608_v58, 4  ;;  %v2635_v34 = vshrl.u32 %v5459_v26, 16 }
 0x189   : > { %1541 = vst.msk [vmem:[#allocation2 + $0x38] sm:$0xf] %vm8297_vm7, %v1524_v1  ;;  %2163 = vrot.lane.b32.xlu1 %v2135_v59, %s8249_s16  ;;  %2161 = vrot.lane.b32.xlu0 %v2128_v60, %s8249_s16  ;;  %vm8304_vm7 = vcmask 191616   ;;  %v2444_v55 = vor.u32 %v2443_v46, %v2440_v45  ;;  %v2611_v59 = vshll.u32 %v5456_v52, 16  ;;  %v2139_v52 = vrot.slane %v2137_v31, 7 }
 0x18a   : > { %v2637_v10 = vrot.slane %v2635_v34, 4  ;;  %v5464_v34 = vld [vmem:[%s6201_s25 + $0x4] sm:$0xf] }
 0x18b   : > { %v1630_v6 = vpop.permute.xlu1 %1629  ;;  %v1628_v12 = vpop.permute.xlu0 %1627  ;;  %v2445_v1 = vrot.slane %v2444_v55, 4 }
 0x18c   : > { %v1659_v16 = vsel %vm6967_vm3, %v1630_v6, %v1658_v8  ;;  %v1656_v17 = vsel %vm6967_vm3, %v1628_v12, %v1655_v9  ;;  %v5963_v19 = vld [vmem:[#allocation2 + $0x20] sm:$0xff]   ;;  %v2613_v6 = vrot.slane %v2611_v59, 5 }
 0x18d   : > { %1660 = vst [vmem:[#allocation2 + $0x2c] sm:$0xf] %v1659_v16  ;;  %1657 = vst [vmem:[#allocation2 + $0x28] sm:$0xf] %v1656_v17  ;;  %2216 = vrot.lane.b32.xlu1 %v5419_v3, %s8241_s28  ;;  %2214 = vrot.lane.b32.xlu0 %v5418_v4, %s8241_s28  ;;  %v2622_v3 = vrot.slane %v2620_v57, 5 }
 0x18e   : > { %5819 = vmatprep.mubr.msk.bf16.mxu0 %vm8298_vm1, %v5963_v19  ;;  %vm8305_vm1 = vmmov %vm8299_vm2  ;;  %v5444_v4 = vld [vmem:[%s6201_s25 + $0x50] sm:$0xf]  ;;  %v1983_v9 = vld [vmem:[#allocation2 + $0x44] sm:$0xf]  ;;  %v2614_v20 = vor.u32 %v2613_v6, %v2610_v5 }
 0x18f   : > { %v1823_v27 = vpop.permute.xlu1 %1822  ;;  %v1821_v28 = vpop.permute.xlu0 %1820  ;;  %v5446_v16 = vld [vmem:[%s6201_s25 + $0x58] sm:$0xf]  ;;  %v2623_v17 = vor.u32 %v2622_v3, %v2619_v2  ;;  %v5445_v19 = vld [vmem:[%s6201_s25 + $0x54] sm:$0xf] }
 0x190   : > { %1841 = vst.msk [vmem:[#allocation2 + $0x54] sm:$0xf] %vm8299_vm2, %v1823_v27  ;;  %vm8306_vm2 = vmmov %vm8304_vm7  ;;  %v5458_v27 = vld [vmem:[%s6201_s25 + $0x48] sm:$0xf]  ;;  %v2615_v33 = vrot.slane %v2614_v20, 4 }
 0x191   : > { %1840 = vst.msk [vmem:[#allocation2 + $0x50] sm:$0xf] %vm8300_vm6, %v1821_v28  ;;  %2220 = vrot.lane.b32.xlu1 %v5421_v23, %s8241_s28  ;;  %2218 = vrot.lane.b32.xlu0 %v5420_v24, %s8241_s28  ;;  %vm8307_vm6 = vmmov %vm8305_vm1  ;;  %v5453_v28 = vld [vmem:[%s6201_s25 + $0x74] sm:$0xf]  ;;  %v2624_v29 = vrot.slane %v2623_v17, 4 }
 0x192   : > { %v5454_v6 = vld [vmem:[%s6201_s25 + $0x78] sm:$0xf] }
 0x193   : > { %v2346_v38 = vpop.permute.xlu1 %2345  ;;  %v2344_v39 = vpop.permute.xlu0 %2343 }
 0x194   : > { %2368 = vst.msk [vmem:[#allocation2 + $0x64] sm:$0xf] %vm8301_vm11, %v2346_v38  ;;  %v5964_v41 = vld [vmem:[#allocation2 + $0x28] sm:$0xff]   ;;  %vm8308_vm11 = vmmov %vm8306_vm2 }
 0x195   : > { %2367 = vst.msk [vmem:[#allocation2 + $0x60] sm:$0xf] %vm8302_vm13, %v2344_v39  ;;  %2258 = vrot.lane.b32.xlu1 %v5426_v36, %s8253_s26  ;;  %2256 = vrot.lane.b32.xlu0 %v5425_v37, %s8253_s26  ;;  %vm8309_vm13 = vmmov %vm8305_vm1  ;;  %v2638_v36 = vshll.u32 %v5459_v26, 16  ;;  %v2626_v37 = vshrl.u32 %v5458_v27, 16  ;;  %v1989_v38 = vld [vmem:[#allocation2 + $0x4c] sm:$0xf] }
 0x196   : > { %5820 = vmatmul.mubr.msk.bf16.gmra.mrb[8].mxu0 %vm8303_vm4, %v5964_v41  ;;  %v1986_v41 = vld [vmem:[#allocation2 + $0x48] sm:$0xf]  ;;  %vm8310_vm4 = vcmask 60416  }
 0x197   : > { %v1869_v50 = vpop.permute.xlu1 %1868  ;;  %v1825_v51 = vpop.permute.xlu0 %1824  ;;  %v2640_v56 = vrot.slane %v2638_v36, 5  ;;  %v2628_v57 = vrot.slane %v2626_v37, 4  ;;  %v1670_v36 = vld [vmem:[#allocation2 + $0x3c] sm:$0xf] }
 0x198   : > { %1888 = vst.msk [vmem:[#allocation2 + $0x50] sm:$0xf] %vm8304_vm7, %v1869_v50  ;;  %v2146_v50 = vrot.slane %v2144_v30, 7  ;;  %vm8311_vm7 = vcmask 322816  }
 0x199   : > { %1842 = vst.msk [vmem:[#allocation2 + $0x58] sm:$0xf] %vm8305_vm1, %v1825_v51  ;;  %2262 = vrot.lane.b32.xlu1 %v5428_v47, %s8253_s26  ;;  %2260 = vrot.lane.b32.xlu0 %v5427_v48, %s8253_s26  ;;  %v2629_v47 = vshll.u32 %v5458_v27, 16  ;;  %v2309_v48 = vsel %vm6306_vm9, 0, %v2308_v44  ;;  %v2147_v51 = vshll.u32 %v5416_v21, 16  ;;  %vm8312_vm9 = vmmov %vm8311_vm7  ;;  %v2641_v2 = vor.u32 %v2640_v56, %v2637_v10 }
 0x19a   : > { %2310 = vst [vmem:[#allocation2 + $0x7c] sm:$0x8] %v2309_v48  ;;  %vm8313_vm1 = vmmov %vm8311_vm7  ;;  %v3470_v44 = vld [vmem:[#allocation4 + $0x38] sm:$0x11]  ;;  %v3467_v10 = vld [vmem:[#allocation4 + $0x30] sm:$0x11] }
 0x19b   : > { %v1957_v60 = vpop.permute.xlu1 %1956  ;;  %v1871_v62 = vpop.permute.xlu0 %1870  ;;  %2326 = vst.msk [vmem:[#allocation2 + $0x7c] sm:$0xf] %vm8310_vm4, %v2318_v49  ;;  %v2631_v58 = vrot.slane %v2629_v47, 5  ;;  %v2149_v59 = vor.u32 %v2147_v51, %v2146_v50  ;;  %v3494_v47 = vld [vmem:[#allocation4 + $0x28] sm:$0x88]  ;;  %v3471_v48 = vsel %vm6925_vm5, 0, %v3470_v44 }
 0x19c   : > { %v1981_v63 = vsel %vm6480_vm0, %v1957_v60, %v1980_v61  ;;  %1889 = vst.msk [vmem:[#allocation2 + $0x54] sm:$0xf] %vm8306_vm2, %v1871_v62  ;;  %v5417_v61 = vld [vmem:[%s6201_s25 + $0x3c] sm:$0xf]  ;;  %vm8314_vm2 = vmmov %vm8313_vm1  ;;  %v5423_v50 = vld [vmem:[%s6201_s25 + $0x18] sm:$0xf] }
 0x19d   : > { %1982 = vst [vmem:[#allocation2 + $0x40] sm:$0xf] %v1981_v63  ;;  %2465 = vrot.lane.b32.xlu1 %v2436_v53, %s8245_s27  ;;  %2463 = vrot.lane.b32.xlu0 %v2427_v54, %s8245_s27  ;;  %v2140_v53 = vshll.u32 %v5415_v22, 16  ;;  %v5394_v62 = vld [vmem:[%s6201_s25 + $0x7c] sm:$0xf]  ;;  %v2632_v3 = vor.u32 %v2631_v58, %v2628_v57  ;;  %v3468_v58 = vsel %vm6925_vm5, 0, %v3467_v10 }
 0x19e   : > { %v1950_v5 = vshrl.u32 %v5394_v62, 16  ;;  %v1953_v21 = vshll.u32 %v5394_v62, 16  ;;  %v5422_v51 = vld [vmem:[%s6201_s25 + $0x14] sm:$0xf]  ;;  %3472 = vst [vmem:[#allocation4 + $0x38] sm:$0x11] %v3471_v48 }
 0x19f   : > { %v2348_v8 = vpop.permute.xlu1 %2347  ;;  %v1959_v12 = vpop.permute.xlu0 %1958  ;;  %v2142_v60 = vor.u32 %v2140_v53, %v2139_v52  ;;  %v3495_v53 = vsel %vm6943_vm10, 0, %v3494_v47  ;;  %v3497_v56 = vld [vmem:[#allocation4 + $0x30] sm:$0x88]  ;;  %3469 = vst [vmem:[#allocation4 + $0x30] sm:$0x11] %v3468_v58 }
 0x1a0   : > { %2369 = vst.msk [vmem:[#allocation2 + $0x68] sm:$0xf] %vm8307_vm6, %v2348_v8  ;;  %v1984_v15 = vsel %vm6480_vm0, %v1959_v12, %v1983_v9  ;;  %v5439_v8 = vld [vmem:[%s6201_s25 + $0x3c] sm:$0xf]  ;;  %vm8315_vm6 = vcmask 388416   ;;  %v1952_v20 = vrot.slane %v1950_v5, 7 }
 0x1a1   : > { %1985 = vst [vmem:[#allocation2 + $0x44] sm:$0xf] %v1984_v15  ;;  %2527 = vrot.lane.b32.xlu1 %v5444_v4, %s8270_s24  ;;  %2467 = vrot.lane.b32.xlu0 %v2445_v1, %s8245_s27  ;;  %v2151_v4 = vshrl.u32 %v5417_v61, 16  ;;  %v2642_v15 = vrot.slane %v2641_v2, 4  ;;  %vm8318_vm4 = vmmov %vm8315_vm6  ;;  %v2482_v62 = vld [vmem:[#allocation2 + $0x64] sm:$0xf] }
 0x1a2   : > { %v1955_v26 = vor.u32 %v1953_v21, %v1952_v20  ;;  %3496 = vst [vmem:[#allocation4 + $0x28] sm:$0x88] %v3495_v53  ;;  %v5471_v5 = vld [vmem:[%s6201_s25 + $0x24] sm:$0xf]  ;;  %v5424_v20 = vld [vmem:[%s6201_s25 + $0x1c] sm:$0xf] }
 0x1a3   : > { %v1873_v23 = vpop.permute.xlu1 %1872  ;;  %v2350_v24 = vpop.permute.xlu0 %2349  ;;  %v2153_v17 = vrot.slane %v2151_v4, 7  ;;  %v5472_v4 = vld [vmem:[%s6201_s25 + $0x28] sm:$0xf]  ;;  %v5402_v21 = vld [vmem:[%s6201_s25 + $0x5c] sm:$0xf] }
 0x1a4   : > { %1890 = vst.msk [vmem:[#allocation2 + $0x58] sm:$0xf] %vm8308_vm11, %v1873_v23  ;;  %vm8316_vm11 = vmmov %vm8315_vm6  ;;  %v5473_v53 = vld [vmem:[%s6201_s25 + $0x2c] sm:$0xf] }
 0x1a5   : > { %2370 = vst.msk [vmem:[#allocation2 + $0x6c] sm:$0xf] %vm8309_vm13, %v2350_v24  ;;  %2531 = vrot.lane.b32.xlu1 %v5446_v16, %s8270_s24  ;;  %2529 = vrot.lane.b32.xlu0 %v5445_v19, %s8270_s24  ;;  %v2633_v16 = vrot.slane %v2632_v3, 4  ;;  %v2154_v19 = vshll.u32 %v5417_v61, 16  ;;  %vm8317_vm13 = vmmov %vm8315_vm6  ;;  %v5466_v61 = vld [vmem:[%s6201_s25 + $0xc] sm:$0xf] }
 0x1a7   : > { %v1963_v39 = vpop.permute.xlu1 %1962  ;;  %v1961_v42 = vpop.permute.xlu0 %1960  ;;  %v2156_v24 = vor.u32 %v2154_v19, %v2153_v17  ;;  %v5461_v17 = vld [vmem:[%s6201_s25 + $0x54] sm:$0xf]  ;;  %v5460_v19 = vld [vmem:[%s6201_s25 + $0x50] sm:$0xf] }
 0x1a8   : > { %v1990_v45 = vsel %vm6480_vm0, %v1963_v39, %v1989_v38  ;;  %v1987_v46 = vsel %vm6480_vm0, %v1961_v42, %v1986_v41  ;;  %v1667_v38 = vld [vmem:[#allocation2 + $0x38] sm:$0xf] }
 0x1a9   : > { %1991 = vst [vmem:[#allocation2 + $0x4c] sm:$0xf] %v1990_v45  ;;  %1988 = vst [vmem:[#allocation2 + $0x48] sm:$0xf] %v1987_v46  ;;  %2577 = vrot.lane.b32.xlu1 %v5453_v28, %s6072_s29  ;;  %2575 = vrot.lane.b32.xlu0 %v5452_v32, %s6072_s29  ;;  %v1664_v28 = vld [vmem:[#allocation2 + $0x34] sm:$0xf] }
 0x1aa   : > { %v3500_v45 = vld [vmem:[#allocation4 + $0x38] sm:$0x88]  ;;  %v3464_v46 = vld [vmem:[#allocation4 + $0x28] sm:$0x11] }
 0x1ab   : > { %v2023_v54 = vpop.permute.xlu1 %2022  ;;  %v2021_v55 = vpop.permute.xlu0 %2020  ;;  %v3501_v49 = vsel %vm6943_vm10, 0, %v3500_v45  ;;  %v3465_v52 = vsel %vm6925_vm5, 0, %v3464_v46 }
 0x1ac   : > { %2045 = vst.msk [vmem:[#allocation2 + $0x44] sm:$0xf] %vm8311_vm7, %v2023_v54  ;;  %3502 = vst [vmem:[#allocation4 + $0x38] sm:$0x88] %v3501_v49  ;;  %vm8319_vm7 = vcmask 126016  }
 0x1ad   : > { %2044 = vst.msk [vmem:[#allocation2 + $0x40] sm:$0xf] %vm8312_vm9, %v2021_v55  ;;  %2681 = vrot.lane.b32.xlu1 %v2624_v29, %s8243_s14  ;;  %2679 = vrot.lane.b32.xlu0 %v2615_v33, %s8243_s14  ;;  %v1661_v29 = vld [vmem:[#allocation2 + $0x30] sm:$0xf]  ;;  %v5465_v33 = vld [vmem:[%s6201_s25 + $0x8] sm:$0xf]  ;;  %vm8320_vm9 = vmmov %vm8319_vm7 }
 0x1ae   : > { %3466 = vst [vmem:[#allocation4 + $0x28] sm:$0x11] %v3465_v52  ;;  %v5474_v52 = vld [vmem:[%s6201_s25 + $0x30] sm:$0xf] }
 0x1af   : > { %v2027_v63 = vpop.permute.xlu1 %2026  ;;  %v2025_v1 = vpop.permute.xlu0 %2024 }
 0x1b0   : > { %2047 = vst.msk [vmem:[#allocation2 + $0x4c] sm:$0xf] %vm8313_vm1, %v2027_v63  ;;  %vm8321_vm1 = vcmask 588800  }
 0x1b1   : > { %2046 = vst.msk [vmem:[#allocation2 + $0x48] sm:$0xf] %vm8314_vm2, %v2025_v1  ;;  %2167 = vrot.lane.b32.xlu1 %v2149_v59, %s8249_s16  ;;  %2165 = vrot.lane.b32.xlu0 %v2142_v60, %s8249_s16  ;;  %v3498_v59 = vsel %vm6943_vm10, 0, %v3497_v56  ;;  %v5467_v60 = vld [vmem:[%s6201_s25 + $0x10] sm:$0xf]  ;;  %vm8322_vm5 = vmmov %vm8321_vm1  ;;  %vm8324_vm2 = vcmask 257216  }
 0x1b2   : > { %3499 = vst [vmem:[#allocation4 + $0x30] sm:$0x88] %v3498_v59  ;;  %v2479_v1 = vld [vmem:[#allocation2 + $0x60] sm:$0xf]  ;;  %vm8323_vm10 = vmmov %vm8319_vm7 }
 0x1b3   : > { %v2071_v9 = vpop.permute.xlu1 %2070  ;;  %v2069_v12 = vpop.permute.xlu0 %2068 }
 0x1b4   : > { %2093 = vst.msk [vmem:[#allocation2 + $0x44] sm:$0xf] %vm8315_vm6, %v2071_v9  ;;  %v1992_v9 = vld [vmem:[#allocation2 + $0x50] sm:$0xf]  ;;  %vm8325_vm6 = vmmov %vm8324_vm2 }
 0x1b5   : > { %2092 = vst.msk [vmem:[#allocation2 + $0x40] sm:$0xf] %vm8316_vm11, %v2069_v12  ;;  %2579 = vrot.lane.b32.xlu1 %v5454_v6, %s6072_s29  ;;  %2357 = vrot.lane.b32.xlu0 %v5439_v8, %s8275_s17  ;;  %v1995_v8 = vld [vmem:[#allocation2 + $0x54] sm:$0xf]  ;;  %vm8326_vm11 = vcmask 322816  }
 0x1b7   : > { %v2075_v22 = vpop.permute.xlu1 %2074  ;;  %v2073_v23 = vpop.permute.xlu0 %2072 }
 0x1b8   : > { %2095 = vst.msk [vmem:[#allocation2 + $0x4c] sm:$0xf] %vm8317_vm13, %v2075_v22  ;;  %v2485_v22 = vld [vmem:[#allocation2 + $0x68] sm:$0xf]  ;;  %vm8327_vm13 = vmmov %vm8326_vm11 }
 0x1b9   : > { %2094 = vst.msk [vmem:[#allocation2 + $0x48] sm:$0xf] %vm8318_vm4, %v2073_v23  ;;  %2685 = vrot.lane.b32.xlu1 %v2642_v15, %s8243_s14  ;;  %2683 = vrot.lane.b32.xlu0 %v2633_v16, %s8243_s14  ;;  %vm8328_vm4 = vmmov %vm8324_vm2 }
 0x1bb   : > { %v1634_v27 = vpop.permute.xlu1 %1633  ;;  %v1632_v30 = vpop.permute.xlu0 %1631 }
 0x1bc   : > { %v1665_v31 = vsel %vm6967_vm3, %v1634_v27, %v1664_v28  ;;  %v1662_v32 = vsel %vm6967_vm3, %v1632_v30, %v1661_v29  ;;  %v2656_v27 = vshll.u32 %v5461_v17, 16  ;;  %v2644_v29 = vshrl.u32 %v5460_v19, 16 }
 0x1bd   : > { %1666 = vst [vmem:[#allocation2 + $0x34] sm:$0xf] %v1665_v31  ;;  %1663 = vst [vmem:[#allocation2 + $0x30] sm:$0xf] %v1662_v32  ;;  %2169 = vrot.lane.b32.xlu1 %v2156_v24, %s8249_s16  ;;  %1970 = vrot.lane.b32.xlu0 %v1955_v26, %s8270_s24  ;;  %v2653_v26 = vshrl.u32 %v5461_v17, 16  ;;  %v2647_v30 = vshll.u32 %v5460_v19, 16 }
 0x1be   : > { %v5462_v31 = vld [vmem:[%s6201_s25 + $0x58] sm:$0xf]  ;;  %v2646_v46 = vrot.slane %v2644_v29, 4 }
 0x1bf   : > { %v1638_v37 = vpop.permute.xlu1 %1637  ;;  %v1636_v39 = vpop.permute.xlu0 %1635  ;;  %v5430_v32 = vld [vmem:[%s6201_s25 + $0x38] sm:$0xf]  ;;  %v2662_v47 = vshrl.u32 %v5462_v31, 16  ;;  %v2649_v48 = vrot.slane %v2647_v30, 5  ;;  %v2665_v49 = vshll.u32 %v5462_v31, 16 }
 0x1c0   : > { %v1671_v41 = vsel %vm6967_vm3, %v1638_v37, %v1670_v36  ;;  %v1668_v42 = vsel %vm6967_vm3, %v1636_v39, %v1667_v38  ;;  %v1998_v37 = vld [vmem:[#allocation2 + $0x58] sm:$0xf]  ;;  %v2488_v38 = vld [vmem:[#allocation2 + $0x6c] sm:$0xf] }
 0x1c1   : > { %1672 = vst [vmem:[#allocation2 + $0x3c] sm:$0xf] %v1671_v41  ;;  %1669 = vst [vmem:[#allocation2 + $0x38] sm:$0xf] %v1668_v42  ;;  %2743 = vrot.lane.b32.xlu1 %v5465_v33, %s8249_s16  ;;  %2741 = vrot.lane.b32.xlu0 %v5464_v34, %s8249_s16  ;;  %v5429_v33 = vld [vmem:[%s6201_s25 + $0x34] sm:$0xf] }
 0x1c2   : > { %v2382_v34 = vld [vmem:[%s6201_s25 + $0x1c] sm:$0xf]  ;;  %v2655_v41 = vrot.slane %v2653_v26, 4  ;;  %v2658_v42 = vrot.slane %v2656_v27, 5  ;;  %v2664_v56 = vrot.slane %v2662_v47, 4  ;;  %v2667_v58 = vrot.slane %v2665_v49, 5 }
 0x1c3   : > { %v2354_v54 = vpop.permute.xlu1 %2353  ;;  %v2352_v55 = vpop.permute.xlu0 %2351 }
 0x1c4   : > { %2372 = vst.msk [vmem:[#allocation2 + $0x74] sm:$0xf] %vm8319_vm7, %v2354_v54  ;;  %v5965_v57 = vld [vmem:[#allocation2 + $0x30] sm:$0xff]   ;;  %v2659_v10 = vor.u32 %v2658_v42, %v2655_v41  ;;  %vm8329_vm7 = vmmov %vm8324_vm2  ;;  %v5447_v41 = vld [vmem:[%s6201_s25 + $0x5c] sm:$0xf] }
 0x1c5   : > { %2371 = vst.msk [vmem:[#allocation2 + $0x70] sm:$0xf] %vm8320_vm9, %v2352_v55  ;;  %2224 = vrot.lane.b32.xlu1 %v5423_v50, %s8241_s28  ;;  %2222 = vrot.lane.b32.xlu0 %v5422_v51, %s8241_s28  ;;  %v2447_v50 = vshrl.u32 %v2382_v34, 16  ;;  %v2450_v51 = vshll.u32 %v2382_v34, 16  ;;  %vm8330_vm9 = vmmov %vm8326_vm11  ;;  %v5482_v42 = vld [vmem:[%s6201_s25 + $0x14] sm:$0xf] }
 0x1c6   : > { %5823 = vmatprep.mubr.msk.bf16.mxu0 %vm8321_vm1, %v5965_v57  ;;  %v2650_v57 = vor.u32 %v2649_v48, %v2646_v46  ;;  %vm8331_vm1 = vmmov %vm8330_vm9 }
 0x1c7   : > { %v2458_v63 = vpop.permute.xlu1 %2457  ;;  %v2456_v7 = vpop.permute.xlu0 %2455  ;;  %v2449_v59 = vrot.slane %v2447_v50, 4 }
 0x1c8   : > { %v2483_v2 = vsel %vm6552_vm14, %v2458_v63, %v2482_v62  ;;  %v2480_v3 = vsel %vm6552_vm14, %v2456_v7, %v2479_v1  ;;  %v5966_v18 = vld [vmem:[#allocation2 + $0x38] sm:$0xff]   ;;  %v2660_v7 = vrot.slane %v2659_v10, 4  ;;  %v2858_v10 = vshll.u32 %v5482_v42, 16 }
 0x1c9   : > { %2484 = vst [vmem:[#allocation2 + $0x64] sm:$0xf] %v2483_v2  ;;  %2481 = vst [vmem:[#allocation2 + $0x60] sm:$0xf] %v2480_v3  ;;  %2747 = vrot.lane.b32.xlu1 %v5467_v60, %s8249_s16  ;;  %2745 = vrot.lane.b32.xlu0 %v5466_v61, %s8249_s16  ;;  %v2452_v60 = vrot.slane %v2450_v51, 5  ;;  %v2651_v2 = vrot.slane %v2650_v57, 4  ;;  %v2668_v3 = vor.u32 %v2667_v58, %v2664_v56 }
 0x1ca   : > { %5824 = vmatmul.mubr.msk.bf16.gmra.mrb[12].mxu0 %vm8322_vm5, %v5966_v18  ;;  %v5431_v61 = vld [vmem:[%s6201_s25 + $0x3c] sm:$0xf]  ;;  %vm8332_vm5 = vmmov %vm8331_vm1  ;;  %v5475_v56 = vld [vmem:[%s6201_s25 + $0x34] sm:$0xf] }
 0x1cb   : > { %v1967_v6 = vpop.permute.xlu1 %1966  ;;  %v1965_v12 = vpop.permute.xlu0 %1964  ;;  %v5410_v62 = vld [vmem:[%s6201_s25 + $0x7c] sm:$0xf]  ;;  %v2453_v18 = vor.u32 %v2452_v60, %v2449_v59  ;;  %v2181_v59 = vld [vmem:[#allocation2 + $0x44] sm:$0xf]  ;;  %v2178_v60 = vld [vmem:[#allocation2 + $0x40] sm:$0xf] }
 0x1cc   : > { %v1996_v15 = vsel %vm6480_vm0, %v1967_v6, %v1995_v8  ;;  %v1993_v16 = vsel %vm6480_vm0, %v1965_v12, %v1992_v9  ;;  %v5479_v6 = vld [vmem:[%s6201_s25 + $0x8] sm:$0xf]  ;;  %v5478_v8 = vld [vmem:[%s6201_s25 + $0x4] sm:$0xf]  ;;  %v2669_v9 = vrot.slane %v2668_v3, 4 }
 0x1cd   : > { %1997 = vst [vmem:[#allocation2 + $0x54] sm:$0xf] %v1996_v15  ;;  %1994 = vst [vmem:[#allocation2 + $0x50] sm:$0xf] %v1993_v16  ;;  %2785 = vrot.lane.b32.xlu1 %v5472_v4, %s8241_s28  ;;  %2783 = vrot.lane.b32.xlu0 %v5471_v5, %s8241_s28  ;;  %v2454_v12 = vrot.slane %v2453_v18, 4  ;;  %v2828_v15 = vshrl.u32 %v5479_v6, 16 }
 0x1ce   : > { %v2831_v16 = vshll.u32 %v5479_v6, 16  ;;  %v5484_v57 = vld [vmem:[%s6201_s25 + $0x1c] sm:$0xf] }
 0x1cf   : > { %v2460_v23 = vpop.permute.xlu1 %2459  ;;  %v2356_v24 = vpop.permute.xlu0 %2355  ;;  %v2830_v26 = vrot.slane %v2828_v15, 4  ;;  %v2873_v15 = vshrl.u32 %v5484_v57, 16 }
 0x1d0   : > { %v2486_v28 = vsel %vm6552_vm14, %v2460_v23, %v2485_v22  ;;  %2373 = vst.msk [vmem:[#allocation2 + $0x78] sm:$0xf] %vm8323_vm10, %v2356_v24  ;;  %v5481_v22 = vld [vmem:[%s6201_s25 + $0x10] sm:$0xf]  ;;  %v5469_v23 = vld [vmem:[%s6201_s25 + $0x18] sm:$0xf] }
 0x1d1   : > { %2487 = vst [vmem:[#allocation2 + $0x68] sm:$0xf] %v2486_v28  ;;  %2226 = vrot.lane.b32.xlu1 %v5424_v20, %s8241_s28  ;;  %2034 = vrot.lane.b32.xlu0 %v5402_v21, %s6072_s29  ;;  %v2819_v20 = vshrl.u32 %v5478_v8, 16  ;;  %v2822_v21 = vshll.u32 %v5478_v8, 16  ;;  %v5468_v24 = vld [vmem:[%s6201_s25 + $0x14] sm:$0xf] }
 0x1d2   : > { %v2833_v27 = vrot.slane %v2831_v16, 5  ;;  %v5480_v28 = vld [vmem:[%s6201_s25 + $0xc] sm:$0xf]  ;;  %v2849_v34 = vshll.u32 %v5481_v22, 16 }
 0x1d3   : > { %v1969_v36 = vpop.permute.xlu1 %1968  ;;  %v2462_v39 = vpop.permute.xlu0 %2461  ;;  %v2821_v31 = vrot.slane %v2819_v20, 4  ;;  %v2876_v20 = vshll.u32 %v5484_v57, 16  ;;  %v3591_v57 = vld [vmem:[#allocation4 + $0x8] sm:$0xf] }
 0x1d4   : > { %v1999_v44 = vsel %vm6480_vm0, %v1969_v36, %v1998_v37  ;;  %v2489_v45 = vsel %vm6552_vm14, %v2462_v39, %v2488_v38  ;;  %v2837_v36 = vshrl.u32 %v5480_v28, 16  ;;  %v2840_v37 = vshll.u32 %v5480_v28, 16  ;;  %v5483_v38 = vld [vmem:[%s6201_s25 + $0x18] sm:$0xf]  ;;  %v5470_v39 = vld [vmem:[%s6201_s25 + $0x1c] sm:$0xf] }
 0x1d5   : > { %2000 = vst [vmem:[#allocation2 + $0x58] sm:$0xf] %v1999_v44  ;;  %2490 = vst [vmem:[#allocation2 + $0x6c] sm:$0xf] %v2489_v45  ;;  %2266 = vrot.lane.b32.xlu1 %v5430_v32, %s8253_s26  ;;  %2264 = vrot.lane.b32.xlu0 %v5429_v33, %s8253_s26  ;;  %v2824_v32 = vrot.slane %v2822_v21, 5  ;;  %v2846_v33 = vshrl.u32 %v5481_v22, 16  ;;  %v2834_v46 = vor.u32 %v2833_v27, %v2830_v26 }
 0x1d6   : > { %v2851_v49 = vrot.slane %v2849_v34, 5  ;;  %v2864_v50 = vshrl.u32 %v5483_v38, 16  ;;  %v2867_v51 = vshll.u32 %v5483_v38, 16 }
 0x1d7   : > { %v2522_v54 = vpop.permute.xlu1 %2521  ;;  %v2520_v55 = vpop.permute.xlu0 %2519  ;;  %v2825_v47 = vor.u32 %v2824_v32, %v2821_v31  ;;  %v2848_v48 = vrot.slane %v2846_v33, 4 }
 0x1d8   : > { %2544 = vst.msk [vmem:[#allocation2 + $0x64] sm:$0xf] %vm8324_vm2, %v2522_v54  ;;  %vm8333_vm2 = vcmask 388416   ;;  %v2842_v54 = vrot.slane %v2840_v37, 5  ;;  %v2866_v3 = vrot.slane %v2864_v50, 4  ;;  %v2869_v18 = vrot.slane %v2867_v51, 5 }
 0x1d9   : > { %2543 = vst.msk [vmem:[#allocation2 + $0x60] sm:$0xf] %vm8325_vm6, %v2520_v55  ;;  %2789 = vrot.lane.b32.xlu1 %v5474_v52, %s8241_s28  ;;  %2787 = vrot.lane.b32.xlu0 %v5473_v53, %s8241_s28  ;;  %vm8334_vm6 = vmmov %vm8333_vm2  ;;  %v5476_v52 = vld [vmem:[%s6201_s25 + $0x38] sm:$0xf]  ;;  %v2839_v53 = vrot.slane %v2837_v36, 4  ;;  %v2855_v55 = vshrl.u32 %v5482_v42, 16 }
 0x1db   : > { %v2031_v63 = vpop.permute.xlu1 %2030  ;;  %v2029_v1 = vpop.permute.xlu0 %2028  ;;  %v2843_v8 = vor.u32 %v2842_v54, %v2839_v53 }
 0x1dc   : > { %2049 = vst.msk [vmem:[#allocation2 + $0x54] sm:$0xf] %vm8326_vm11, %v2031_v63  ;;  %vm3429_vm11 = vcmask 130048   ;;  %v2826_v63 = vrot.slane %v2825_v47, 4 }
 0x1dd   : > { %2048 = vst.msk [vmem:[#allocation2 + $0x50] sm:$0xf] %vm8327_vm13, %v2029_v1  ;;  %2268 = vrot.lane.b32.xlu1 %v5431_v61, %s8253_s26  ;;  %2082 = vrot.lane.b32.xlu0 %v5410_v62, %s8243_s14  ;;  %v2835_v62 = vrot.slane %v2834_v46, 4  ;;  %v2852_v1 = vor.u32 %v2851_v49, %v2848_v48  ;;  %vm3589_vm13 = vcmask 125952   ;;  %v2844_v37 = vrot.slane %v2843_v8, 4 }
 0x1de   : > { %v7243_v46 = vrot.slane %v2876_v20, 5 }
 0x1df   : > { %v2526_v4 = vpop.permute.xlu1 %2525  ;;  %v2524_v5 = vpop.permute.xlu0 %2523 }
 0x1e0   : > { %2546 = vst.msk [vmem:[#allocation2 + $0x6c] sm:$0xf] %vm8328_vm4, %v2526_v4  ;;  %v5463_v4 = vld [vmem:[%s6201_s25 + $0x5c] sm:$0xf]  ;;  %vm8335_vm4 = vmmov %vm8331_vm1 }
 0x1e1   : > { %2545 = vst.msk [vmem:[#allocation2 + $0x68] sm:$0xf] %vm8329_vm7, %v2524_v5  ;;  %2689 = vrot.lane.b32.xlu1 %v2660_v7, %s8243_s14  ;;  %2687 = vrot.lane.b32.xlu0 %v2651_v2, %s8243_s14  ;;  %v2674_v26 = vshll.u32 %v5463_v4, 16  ;;  %vm8336_vm7 = vmmov %vm8331_vm1 }
 0x1e3   : > { %v2570_v17 = vpop.permute.xlu1 %2569  ;;  %v2568_v19 = vpop.permute.xlu0 %2567 }
 0x1e4   : > { %2592 = vst.msk [vmem:[#allocation2 + $0x64] sm:$0xf] %vm8330_vm9, %v2570_v17  ;;  %vm8337_vm9 = vmmov %vm8333_vm2 }
 0x1e5   : > { %2591 = vst.msk [vmem:[#allocation2 + $0x60] sm:$0xf] %vm8331_vm1, %v2568_v19  ;;  %2691 = vrot.lane.b32.xlu1 %v2669_v9, %s8243_s14  ;;  %2469 = vrot.lane.b32.xlu0 %v2454_v12, %s8245_s27  ;;  %v2857_v9 = vrot.slane %v2855_v55, 4  ;;  %v2860_v12 = vrot.slane %v2858_v10, 5  ;;  %vm8338_vm1 = vcmask 191616  }
 0x1e7   : > { %v2033_v29 = vpop.permute.xlu1 %2032  ;;  %v1827_v30 = vpop.permute.xlu0 %1826  ;;  %v2861_v38 = vor.u32 %v2860_v12, %v2857_v9 }
 0x1e8   : > { %2050 = vst.msk [vmem:[#allocation2 + $0x58] sm:$0xf] %vm8332_vm5, %v2033_v29  ;;  %v2853_v29 = vrot.slane %v2852_v1, 4  ;;  %vm8339_vm5 = vsmask.f32 7938 }
 0x1e9   : > { %1843 = vst.msk [vmem:[#allocation2 + $0x5c] sm:$0xf] %vm8323_vm10, %v1827_v30  ;;  %2751 = vrot.lane.b32.xlu1 %v5469_v23, %s8249_s16  ;;  %2749 = vrot.lane.b32.xlu0 %v5468_v24, %s8249_s16  ;;  %v2671_v24 = vshrl.u32 %v5463_v4, 16  ;;  %v2870_v30 = vor.u32 %v2869_v18, %v2866_v3  ;;  %vm7260_vm10 = vmand %vm3589_vm13, %vm8339_vm5  ;;  %v2187_v18 = vld [vmem:[#allocation2 + $0x4c] sm:$0xf]  ;;  %vm8349_vm5 = vcmask 585216  }
 0x1eb   : > { %v2079_v44 = vpop.permute.xlu1 %2078  ;;  %v2077_v45 = vpop.permute.xlu0 %2076  ;;  %v7248_v51 = vrot.slane %v2671_v24, 4  ;;  %v2871_v54 = vrot.slane %v2870_v30, 4  ;;  %v3600_v30 = vld [vmem:[#allocation4 + $0x20] sm:$0xf] }
 0x1ec   : > { %2097 = vst.msk [vmem:[#allocation2 + $0x54] sm:$0xf] %vm8333_vm2, %v2079_v44  ;;  %v5477_v44 = vld [vmem:[%s6201_s25 + $0x3c] sm:$0xf]  ;;  %vm8342_vm2 = vsmask.f32 3328 }
 0x1ed   : > { %2096 = vst.msk [vmem:[#allocation2 + $0x50] sm:$0xf] %vm8334_vm6, %v2077_v45  ;;  %2753 = vrot.lane.b32.xlu1 %v5470_v39, %s8249_s16  ;;  %2533 = vrot.lane.b32.xlu0 %v5447_v41, %s8270_s24  ;;  %v7233_v39 = vrot.slane %v2873_v15, 4  ;;  %v5455_v45 = vld [vmem:[%s6201_s25 + $0x7c] sm:$0xf]  ;;  %vm7280_vm6 = vmand %vm3589_vm13, %vm8342_vm2  ;;  %s8368_s25 = sshll.u32 %s6187_s21, 7 }
 0x1ee   : > { %vm8350_vm2 = vmmov %vm8349_vm5 }
 0x1ef   : > { %v2160_v58 = vpop.permute.xlu1 %2159  ;;  %v2158_v61 = vpop.permute.xlu0 %2157  ;;  %v2879_v9 = vor.u32 %v7243_v46, %v7233_v39 }
 0x1f0   : > { %v2182_v7 = vsel %vm6607_vm8, %v2160_v58, %v2181_v59  ;;  %v2179_v2 = vsel %vm6607_vm8, %v2158_v61, %v2178_v60  ;;  %v7205_v5 = vpop.f32.mrb[0].mxu0  ;;  %v2862_v59 = vrot.slane %v2861_v38, 4 }
 0x1f1   : > { %2183 = vst [vmem:[#allocation2 + $0x44] sm:$0xf] %v2182_v7  ;;  %2180 = vst [vmem:[#allocation2 + $0x40] sm:$0xf] %v2179_v2  ;;  %2793 = vrot.lane.b32.xlu1 %v5476_v52, %s8241_s28  ;;  %2791 = vrot.lane.b32.xlu0 %v5475_v56, %s8241_s28  ;;  %v5855_v6 = vpop.f32.mrb[0].mxu1  ;;  %v7214_v17 = vpop.f32.mrb[1].mxu0 }
 0x1f2   : > { %3432 = vst.msk [vmem:[%s7208_s23 + $0x10] sm:$0xff] %vm3429_vm11, %v5855_v6  ;;  %v7212_v16 = vpack.c.bf16 %v5855_v6, %v5855_v6  ;;  %v3398_v19 = vpop.f32.mrb[1].mxu1  ;;  %v7222_v27 = vpop.f32.mrb[2].mxu0  ;;  %v7250_v52 = vrot.slane %v2674_v26, 5  ;;  %v3944_v2 = vld [vmem:[#allocation4 + $0xc] sm:$0xf] }
 0x1f3   : > { %3430 = vst.msk [vmem:[%s7208_s23] sm:$0xff] %vm3429_vm11, %v3398_v19  ;;  %v7218_v21 = vpack.c.bf16 %v3398_v19, %v3398_v19  ;;  %v2574_v22 = vpop.permute.xlu1 %2573  ;;  %v2572_v23 = vpop.permute.xlu0 %2571  ;;  %v2184_v6 = vld [vmem:[#allocation2 + $0x48] sm:$0xf] }
 0x1f4   : > { %2594 = vst.msk [vmem:[#allocation2 + $0x6c] sm:$0xf] %vm8335_vm4, %v2574_v22  ;;  %v5856_v28 = vpop.f32.mrb[2].mxu1  ;;  %v3547_v31 = vshrl.u32 %v7212_v16, 16  ;;  %v3550_v32 = vshll.u32 %v7212_v16, 16  ;;  %v7229_v34 = vpop.f32.mrb[3].mxu0  ;;  %v2677_v12 = vor.u32 %v7250_v52, %v7248_v51 }
 0x1f5   : > { %2593 = vst.msk [vmem:[#allocation2 + $0x68] sm:$0xf] %vm8336_vm7, %v2572_v23  ;;  %v3533_v33 = vshrl.u32 %v7218_v21, 16  ;;  %v3401_v36 = vpop.f32.mrb[3].mxu1  ;;  %2883 = vrot.lane.b32.xlu1 %v2835_v62, %s8253_s26  ;;  %2881 = vrot.lane.b32.xlu0 %v2826_v63, %s8253_s26  ;;  %v7235_v41 = vpack.c.bf16 %v5856_v28, %v5856_v28  ;;  %v3536_v48 = vshll.u32 %v7218_v21, 16  ;;  %vm8345_vm4 = vcmask 519616  }
 0x1f6   : > { %3433 = vst.msk [vmem:[%s7208_s23 + $0x18] sm:$0xff] %vm3429_vm11, %v5856_v28  ;;  %3431 = vst.msk [vmem:[%s7208_s23 + $0x8] sm:$0xff] %vm3429_vm11, %v3401_v36  ;;  %v7239_v42 = vpack.c.bf16 %v3401_v36, %v3401_v36  ;;  %v3649_v47 = vrot.slane %v3547_v31, 4  ;;  %v3650_v58 = vrot.slane %v3550_v32, 5  ;;  %v3594_v28 = vld [vmem:[#allocation4 + $0x10] sm:$0xf] }
 0x1f7   : > { %v2081_v49 = vpop.permute.xlu1 %2080  ;;  %v1875_v50 = vpop.permute.xlu0 %1874  ;;  %v3535_v53 = vrot.slane %v3533_v33, 7  ;;  %v3554_v61 = vshrl.u32 %v7235_v41, 16  ;;  %v3557_v62 = vshll.u32 %v7235_v41, 16  ;;  %v3941_v36 = vld [vmem:[#allocation4 + $0x4] sm:$0xf]  ;;  %vm8346_vm7 = vmmov %vm8345_vm4 }
 0x1f8   : > { %2098 = vst.msk [vmem:[#allocation2 + $0x58] sm:$0xf] %vm8337_vm9, %v2081_v49  ;;  %v3540_v55 = vshrl.u32 %v7239_v42, 16  ;;  %v3543_v10 = vshll.u32 %v7239_v42, 16  ;;  %v3651_v7 = vor.u32 %v3650_v58, %v3649_v47  ;;  %v3549_v49 = vrot.slane %v3547_v31, 7  ;;  %vm8347_vm9 = vmmov %vm8345_vm4 }
 0x1f9   : > { %1891 = vst.msk [vmem:[#allocation2 + $0x5c] sm:$0xf] %vm8338_vm1, %v1875_v50  ;;  %2795 = vrot.lane.b32.xlu1 %v5477_v44, %s8241_s28  ;;  %2581 = vrot.lane.b32.xlu0 %v5455_v45, %s6072_s29  ;;  %v7270_v60 = vor.u32 %v3536_v48, %v3535_v53  ;;  %v3556_v20 = vrot.slane %v3554_v61, 7  ;;  %v3653_v44 = vrot.slane %v3554_v61, 4  ;;  %v3654_v45 = vrot.slane %v3557_v62, 5  ;;  %vm8348_vm1 = vmmov %vm8345_vm4  ;;  %s8247_s28 = smov 80  }
 0x1fa   : > { %v3645_v63 = vrot.slane %v3540_v55, 4  ;;  %v3646_v1 = vrot.slane %v3543_v10, 5  ;;  %v3542_v3 = vrot.slane %v3540_v55, 7  ;;  %v7291_v26 = vrot.slane %v3651_v7, 4  ;;  %v3597_v53 = vld [vmem:[#allocation4 + $0x18] sm:$0xf] }
 0x1fb   : > { %v2164_v4 = vpop.permute.xlu1 %2163  ;;  %v2162_v8 = vpop.permute.xlu0 %2161  ;;  %v3592_v19 = vsel %vm7260_vm10, %v7270_v60, %v3591_v57  ;;  %v7297_v39 = vor.u32 %v3557_v62, %v3556_v20  ;;  %v3655_v52 = vor.u32 %v3654_v45, %v3653_v44  ;;  %v3947_v55 = vld [vmem:[#allocation4 + $0x14] sm:$0xf]  ;;  %v2880_v57 = vrot.slane %v2879_v9, 4 }
 0x1fc   : > { %v2188_v22 = vsel %vm6607_vm8, %v2164_v4, %v2187_v18  ;;  %v2185_v23 = vsel %vm6607_vm8, %v2162_v8, %v2184_v6  ;;  %v3647_v24 = vor.u32 %v3646_v1, %v3645_v63  ;;  %3593 = vst [vmem:[#allocation4 + $0x8] sm:$0xf] %v3592_v19  ;;  %v7295_v38 = vor.u32 %v3543_v10, %v3542_v3  ;;  %v2494_v4 = vld [vmem:[#allocation2 + $0x74] sm:$0xf]  ;;  %v2491_v6 = vld [vmem:[#allocation2 + $0x70] sm:$0xf] }
 0x1fd   : > { %2189 = vst [vmem:[#allocation2 + $0x4c] sm:$0xf] %v2188_v22  ;;  %2186 = vst [vmem:[#allocation2 + $0x48] sm:$0xf] %v2185_v23  ;;  %2887 = vrot.lane.b32.xlu1 %v2853_v29, %s8253_s26  ;;  %2885 = vrot.lane.b32.xlu0 %v2844_v37, %s8253_s26  ;;  %v3945_v47 = vsel %vm7280_vm6, %v7291_v26, %v3944_v2  ;;  %v3601_v51 = vsel %vm7260_vm10, %v7297_v39, %v3600_v30  ;;  %v2678_v58 = vrot.slane %v2677_v12, 4 }
 0x1fe   : > { %v7299_v46 = vrot.slane %v3647_v24, 4  ;;  %3946 = vst [vmem:[#allocation4 + $0xc] sm:$0xf] %v3945_v47  ;;  %v3595_v37 = vsel %vm7260_vm10, %v7295_v38, %v3594_v28  ;;  %3602 = vst [vmem:[#allocation4 + $0x20] sm:$0xf] %v3601_v51  ;;  %v7319_v10 = vor.u32 %v3550_v32, %v3549_v49  ;;  %v7323_v61 = vrot.slane %v3655_v52, 4 }
 0x1ff   : > { %v2217_v50 = vpop.permute.xlu1 %2216  ;;  %v2215_v29 = vpop.permute.xlu0 %2214  ;;  %3596 = vst [vmem:[#allocation4 + $0x10] sm:$0xf] %v3595_v37  ;;  %v3641_v7 = vrot.slane %v3533_v33, 4  ;;  %v3642_v32 = vrot.slane %v3536_v48, 5  ;;  %v2497_v22 = vld [vmem:[#allocation2 + $0x78] sm:$0xf] }
 0x200   : > { %2236 = vst.msk [vmem:[#allocation2 + $0x44] sm:$0xf] %vm8345_vm4, %v2217_v50  ;;  %v3942_v31 = vsel %vm7280_vm6, %v7299_v46, %v3941_v36  ;;  %v3598_v62 = vsel %vm7260_vm10, %v7319_v10, %v3597_v53  ;;  %vm8351_vm4 = vmmov %vm8350_vm2  ;;  %v2706_v49 = vld [vmem:[#allocation2 + $0x64] sm:$0xf]  ;;  %v2193_v53 = vld [vmem:[#allocation2 + $0x54] sm:$0xf] }
 0x201   : > { %2235 = vst.msk [vmem:[#allocation2 + $0x40] sm:$0xf] %vm8346_vm7, %v2215_v29  ;;  %2891 = vrot.lane.b32.xlu1 %v2871_v54, %s8253_s26  ;;  %2889 = vrot.lane.b32.xlu0 %v2862_v59, %s8253_s26  ;;  %3943 = vst [vmem:[#allocation4 + $0x4] sm:$0xf] %v3942_v31  ;;  %v3948_v54 = vsel %vm7280_vm6, %v7323_v61, %v3947_v55  ;;  %v3643_v33 = vor.u32 %v3642_v32, %v3641_v7  ;;  %v2703_v29 = vld [vmem:[#allocation2 + $0x60] sm:$0xf] }
 0x202   : > { %3599 = vst [vmem:[#allocation4 + $0x18] sm:$0xf] %v3598_v62  ;;  %3949 = vst [vmem:[#allocation4 + $0x14] sm:$0xf] %v3948_v54  ;;  %v2190_v31 = vld [vmem:[#allocation2 + $0x50] sm:$0xf] }
 0x203   : > { %v2221_v63 = vpop.permute.xlu1 %2220  ;;  %v2219_v1 = vpop.permute.xlu0 %2218  ;;  %v7345_v18 = vrot.slane %v3643_v33, 4  ;;  %vm8352_vm7 = vmmov %vm8350_vm2  ;;  %v2709_v7 = vld [vmem:[#allocation2 + $0x68] sm:$0xf]  ;;  %v2196_v33 = vld [vmem:[#allocation2 + $0x58] sm:$0xf] }
 0x204   : > { %2238 = vst.msk [vmem:[#allocation2 + $0x4c] sm:$0xf] %vm8347_vm9, %v2221_v63  ;;  %vm8353_vm9 = vcmask 588800  }
 0x205   : > { %2237 = vst.msk [vmem:[#allocation2 + $0x48] sm:$0xf] %vm8348_vm1, %v2219_v1  ;;  %2893 = vrot.lane.b32.xlu1 %v2880_v57, %s8253_s26  ;;  %2693 = vrot.lane.b32.xlu0 %v2678_v58, %s8243_s14  ;;  %vm8354_vm1 = vcmask 257216   ;;  %v2712_v1 = vld [vmem:[#allocation2 + $0x6c] sm:$0xf]  ;;  %s7463_s14 = scalar_lea.vmem %s8369_s1, %s8368_s25  ;;  %s8382_s25 = smov 80  }
 0x206   : > { %v7513_v15 = vld [vmem:[%s7463_s14] sm:$0xff]  }
 0x207   : > { %v2259_v59 = vpop.permute.xlu1 %2258  ;;  %v2257_v2 = vpop.permute.xlu0 %2256 }
 0x208   : > { %2278 = vst.msk [vmem:[#allocation2 + $0x44] sm:$0xf] %vm8349_vm5, %v2259_v59  ;;  %vm8355_vm5 = vmmov %vm8353_vm9 }
 0x209   : > { %2277 = vst.msk [vmem:[#allocation2 + $0x40] sm:$0xf] %vm8350_vm2, %v2257_v2  ;;  %3612 = vrot.lane.b32.xlu0 %v7218_v21, %s8245_s27  ;;  %3614 = vrot.lane.b32.xlu1 %v7239_v42, %s8245_s27  ;;  %vm8356_vm2 = vmmov %vm8354_vm1 }
 0x20b   : > { %v2263_v48 = vpop.permute.xlu1 %2262  ;;  %v2261_v3 = vpop.permute.xlu0 %2260 }
 0x20c   : > { %2280 = vst.msk [vmem:[#allocation2 + $0x4c] sm:$0xf] %vm8351_vm4, %v2263_v48  ;;  %vm8357_vm4 = vmmov %vm8354_vm1  ;;  %v2001_v48 = vld [vmem:[#allocation2 + $0x5c] sm:$0xf] }
 0x20d   : > { %2279 = vst.msk [vmem:[#allocation2 + $0x48] sm:$0xf] %vm8352_vm7, %v2261_v3  ;;  %3616 = vrot.lane.b32.xlu0 %v7212_v16, %s8245_s27  ;;  %3669 = vrot.lane.b32.xlu1 %v7345_v18, %s6072_s29  ;;  %vm8358_vm7 = vcmask 322816  }
 0x20f   : > { %v2466_v8 = vpop.permute.xlu1 %2465  ;;  %v2464_v9 = vpop.permute.xlu0 %2463 }
 0x210   : > { %v5967_v12 = vld [vmem:[#allocation2 + $0x40] sm:$0xff]   ;;  %v2495_v19 = vsel %vm6552_vm14, %v2466_v8, %v2494_v4  ;;  %v2492_v20 = vsel %vm6552_vm14, %v2464_v9, %v2491_v6 }
 0x211   : > { %2496 = vst [vmem:[#allocation2 + $0x74] sm:$0xf] %v2495_v19  ;;  %2493 = vst [vmem:[#allocation2 + $0x70] sm:$0xf] %v2492_v20  ;;  %3618 = vrot.lane.b32.xlu0 %v7235_v41, %s8245_s27  ;;  %5827 = vmatprep.mubr.msk.bf16.mxu0 %vm8353_vm9, %v5967_v12 }
 0x212   : > { %vm8359_vm9 = vmmov %vm8358_vm7 }
 0x213   : > { %v2528_v23 = vpop.permute.xlu1 %2527  ;;  %v2468_v24 = vpop.permute.xlu0 %2467 }
 0x214   : > { %v5968_v28 = vld [vmem:[#allocation2 + $0x48] sm:$0xff]   ;;  %2547 = vst.msk [vmem:[#allocation2 + $0x70] sm:$0xf] %vm8354_vm1, %v2528_v23  ;;  %v2498_v30 = vsel %vm6552_vm14, %v2468_v24, %v2497_v22  ;;  %vm8360_vm1 = vmmov %vm8358_vm7 }
 0x215   : > { %2499 = vst [vmem:[#allocation2 + $0x78] sm:$0xf] %v2498_v30  ;;  %3671 = vrot.lane.b32.xlu0 %v7299_v46, %s6072_s29  ;;  %5828 = vmatmul.mubr.msk.bf16.gmra.mrb[16].mxu0 %vm8355_vm5, %v5968_v28  ;;  %vm8361_vm5 = vcmask 126016  }
 0x217   : > { %v2532_v36 = vpop.permute.xlu1 %2531  ;;  %v2530_v44 = vpop.permute.xlu0 %2529 }
 0x218   : > { %2549 = vst.msk [vmem:[#allocation2 + $0x78] sm:$0xf] %vm8356_vm2, %v2532_v36  ;;  %vm8362_vm2 = vcmask 519616  }
 0x219   : > { %2548 = vst.msk [vmem:[#allocation2 + $0x74] sm:$0xf] %vm8357_vm4, %v2530_v44  ;;  %3723 = vrot.lane.b32.xlu0 %v7270_v60, %s8249_s16  ;;  %vm8363_vm4 = vmmov %vm8362_vm2 }
 0x21b   : > { %v2578_v45 = vpop.permute.xlu1 %2577  ;;  %v2576_v47 = vpop.permute.xlu0 %2575 }
 0x21c   : > { %2596 = vst.msk [vmem:[#allocation2 + $0x74] sm:$0xf] %vm8358_vm7, %v2578_v45  ;;  %vm8364_vm7 = vmmov %vm8362_vm2 }
 0x21d   : > { %2595 = vst.msk [vmem:[#allocation2 + $0x70] sm:$0xf] %vm8359_vm9, %v2576_v47  ;;  %3773 = vrot.lane.b32.xlu0 %v7218_v21, %s8253_s26  ;;  %vm8365_vm9 = vmmov %vm8362_vm2 }
 0x21f   : > { %v2682_v50 = vpop.permute.xlu1 %2681  ;;  %v2680_v37 = vpop.permute.xlu0 %2679 }
 0x220   : > { %v2707_v51 = vsel %vm6765_vm15, %v2682_v50, %v2706_v49  ;;  %v2704_v52 = vsel %vm6765_vm15, %v2680_v37, %v2703_v29 }
 0x221   : > { %2708 = vst [vmem:[#allocation2 + $0x64] sm:$0xf] %v2707_v51  ;;  %2705 = vst [vmem:[#allocation2 + $0x60] sm:$0xf] %v2704_v52 }
 0x223   : > { %v2168_v60 = vpop.permute.xlu1 %2167  ;;  %v2166_v55 = vpop.permute.xlu0 %2165 }
 0x224   : > { %v2194_v57 = vsel %vm6607_vm8, %v2168_v60, %v2193_v53  ;;  %v2191_v21 = vsel %vm6607_vm8, %v2166_v55, %v2190_v31 }
 0x225   : > { %2195 = vst [vmem:[#allocation2 + $0x54] sm:$0xf] %v2194_v57  ;;  %2192 = vst [vmem:[#allocation2 + $0x50] sm:$0xf] %v2191_v21 }
 0x227   : > { %v2580_v58 = vpop.permute.xlu1 %2579  ;;  %v2358_v62 = vpop.permute.xlu0 %2357 }
 0x228   : > { %2597 = vst.msk [vmem:[#allocation2 + $0x78] sm:$0xf] %vm8360_vm1, %v2580_v58  ;;  %vm8366_vm1 = vmmov %vm8362_vm2 }
 0x229   : > { %2374 = vst.msk [vmem:[#allocation2 + $0x7c] sm:$0xf] %vm8361_vm5, %v2358_v62  ;;  %vm8367_vm5 = vcmask 322816  }
 0x22b   : > { %v2686_v63 = vpop.permute.xlu1 %2685  ;;  %v2684_v32 = vpop.permute.xlu0 %2683 }
 0x22c   : > { %v2713_v54 = vsel %vm6765_vm15, %v2686_v63, %v2712_v1  ;;  %v2710_v59 = vsel %vm6765_vm15, %v2684_v32, %v2709_v7  ;;  %v3609_v63 = vld [vmem:[#allocation4 + $0x38] sm:$0xf] }
 0x22d   : > { %2714 = vst [vmem:[#allocation2 + $0x6c] sm:$0xf] %v2713_v54  ;;  %2711 = vst [vmem:[#allocation2 + $0x68] sm:$0xf] %v2710_v59  ;;  %v3603_v54 = vld [vmem:[#allocation4 + $0x28] sm:$0xf] }
 0x22f   : > { %v2170_v2 = vpop.permute.xlu1 %2169  ;;  %v1971_v3 = vpop.permute.xlu0 %1970 }
 0x230   : > { %v2197_v4 = vsel %vm6607_vm8, %v2170_v2, %v2196_v33  ;;  %v2002_v6 = vsel %vm6480_vm0, %v1971_v3, %v2001_v48 }
 0x231   : > { %2198 = vst [vmem:[#allocation2 + $0x58] sm:$0xf] %v2197_v4  ;;  %2003 = vst [vmem:[#allocation2 + $0x5c] sm:$0xf] %v2002_v6 }
 0x233   : > { %v2744_v8 = vpop.permute.xlu1 %2743  ;;  %v2742_v9 = vpop.permute.xlu0 %2741 }
 0x234   : > { %2763 = vst.msk [vmem:[#allocation2 + $0x64] sm:$0xf] %vm893_vm12, %v2744_v8  ;;  %2762 = vst.msk [vmem:[#allocation2 + $0x60] sm:$0xf] %vm893_vm12, %v2742_v9 }
 0x237   : > { %v2225_v12 = vpop.permute.xlu1 %2224  ;;  %v2223_v19 = vpop.permute.xlu0 %2222 }
 0x238   : > { %2240 = vst.msk [vmem:[#allocation2 + $0x54] sm:$0xf] %vm8362_vm2, %v2225_v12  ;;  %v7396_v20 = vpop.f32.mrb[4].mxu0  ;;  %vm8370_vm2 = vcmask 585216  }
 0x239   : > { %2239 = vst.msk [vmem:[#allocation2 + $0x50] sm:$0xf] %vm8363_vm4, %v2223_v19  ;;  %v5859_v22 = vpop.f32.mrb[4].mxu1  ;;  %v7402_v24 = vpop.f32.mrb[5].mxu0  ;;  %v3950_v19 = vld [vmem:[#allocation4 + $0x1c] sm:$0xf]  ;;  %vm8371_vm4 = vmmov %vm8370_vm2 }
 0x23a   : > { %3436 = vst.msk [vmem:[%s7208_s23 + $0x30] sm:$0xff] %vm3429_vm11, %v5859_v22  ;;  %v7400_v23 = vpack.c.bf16 %v5859_v22, %v5859_v22  ;;  %v3414_v28 = vpop.f32.mrb[5].mxu1  ;;  %v7410_v45 = vpop.f32.mrb[6].mxu0  ;;  %v3606_v22 = vld [vmem:[#allocation4 + $0x30] sm:$0xf] }
 0x23b   : > { %3434 = vst.msk [vmem:[%s7208_s23 + $0x20] sm:$0xff] %vm3429_vm11, %v3414_v28  ;;  %v7406_v30 = vpack.c.bf16 %v3414_v28, %v3414_v28  ;;  %v2748_v36 = vpop.permute.xlu1 %2747  ;;  %v2746_v44 = vpop.permute.xlu0 %2745 }
 0x23c   : > { %2765 = vst.msk [vmem:[#allocation2 + $0x6c] sm:$0xf] %vm893_vm12, %v2748_v36  ;;  %2764 = vst.msk [vmem:[#allocation2 + $0x68] sm:$0xf] %vm893_vm12, %v2746_v44  ;;  %v5860_v47 = vpop.f32.mrb[6].mxu1  ;;  %v3575_v49 = vshrl.u32 %v7400_v23, 16 }
 0x23d   : > { %3437 = vst.msk [vmem:[%s7208_s23 + $0x38] sm:$0xff] %vm3429_vm11, %v5860_v47  ;;  %v7415_v50 = vpack.c.bf16 %v5860_v47, %v5860_v47  ;;  %v7417_v29 = vpop.f32.mrb[7].mxu0  ;;  %v3417_v37 = vpop.f32.mrb[7].mxu1  ;;  %3620 = vrot.lane.b32.xlu1 %v7406_v30, %s8245_s27  ;;  %v3561_v51 = vshrl.u32 %v7406_v30, 16  ;;  %v3578_v52 = vshll.u32 %v7400_v23, 16  ;;  %v3564_v53 = vshll.u32 %v7406_v30, 16 }
 0x23e   : > { %3435 = vst.msk [vmem:[%s7208_s23 + $0x28] sm:$0xff] %vm3429_vm11, %v3417_v37  ;;  %v7425_v60 = vpack.c.bf16 %v3417_v37, %v3417_v37  ;;  %v3577_v31 = vrot.slane %v3575_v49, 7  ;;  %v3665_v33 = vrot.slane %v3575_v49, 4 }
 0x23f   : > { %v3717_v55 = vshrl.u32 %v7415_v50, 16  ;;  %v2786_v57 = vpop.permute.xlu1 %2785  ;;  %v2784_v21 = vpop.permute.xlu0 %2783  ;;  %v3657_v58 = vrot.slane %v3561_v51, 4  ;;  %v3563_v62 = vrot.slane %v3561_v51, 7  ;;  %v3658_v1 = vrot.slane %v3564_v53, 5 }
 0x240   : > { %2805 = vst.msk [vmem:[#allocation2 + $0x64] sm:$0xf] %vm8364_vm7, %v2786_v57  ;;  %3622 = vrot.lane.b32.xlu0 %v7425_v60, %s8245_s27  ;;  %v3568_v7 = vshrl.u32 %v7425_v60, 16  ;;  %v3571_v32 = vshll.u32 %v7425_v60, 16  ;;  %v7439_v2 = vor.u32 %v3578_v52, %v3577_v31  ;;  %v3666_v48 = vrot.slane %v3578_v52, 5  ;;  %vm8373_vm7 = vmmov %vm8366_vm1  ;;  %s8255_s27 = smov 112  }
 0x241   : > { %2804 = vst.msk [vmem:[#allocation2 + $0x60] sm:$0xf] %vm8365_vm9, %v2784_v21  ;;  %3673 = vrot.lane.b32.xlu1 %v7291_v26, %s6072_s29  ;;  %v7437_v59 = vor.u32 %v3564_v53, %v3563_v62  ;;  %v3659_v3 = vor.u32 %v3658_v1, %v3657_v58  ;;  %v3719_v47 = vrot.slane %v3717_v55, 7  ;;  %v3956_v52 = vld [vmem:[#allocation4 + $0x2c] sm:$0xf]  ;;  %v3720_v53 = vshll.u32 %v7415_v50, 16  ;;  %vm8374_vm9 = vmmov %vm8366_vm1 }
 0x242   : > { %v3661_v4 = vrot.slane %v3568_v7, 4  ;;  %v3662_v6 = vrot.slane %v3571_v32, 5  ;;  %v3570_v8 = vrot.slane %v3568_v7, 7  ;;  %v3610_v36 = vsel %vm7260_vm10, %v7439_v2, %v3609_v63  ;;  %v3953_v31 = vld [vmem:[#allocation4 + $0x24] sm:$0xf] }
 0x243   : > { %v2227_v9 = vpop.permute.xlu1 %2226  ;;  %v2035_v12 = vpop.permute.xlu0 %2034  ;;  %v3604_v28 = vsel %vm7260_vm10, %v7437_v59, %v3603_v54  ;;  %v3667_v44 = vor.u32 %v3666_v48, %v3665_v33  ;;  %v7449_v49 = vrot.slane %v3659_v3, 4  ;;  %3611 = vst [vmem:[#allocation4 + $0x38] sm:$0xf] %v3610_v36  ;;  %v3806_v21 = vrot.slane %v3717_v55, 4  ;;  %v4179_v33 = vld [vmem:[#allocation3 + $0x8] sm:$0x1] }
 0x244   : > { %2241 = vst.msk [vmem:[#allocation2 + $0x58] sm:$0xf] %vm8366_vm1, %v2227_v9  ;;  %v3663_v37 = vor.u32 %v3662_v6, %v3661_v4  ;;  %v7451_v51 = vor.u32 %v3571_v32, %v3570_v8  ;;  %3605 = vst [vmem:[#allocation4 + $0x28] sm:$0xf] %v3604_v28  ;;  %v7475_v63 = vor.u32 %v3720_v53, %v3719_v47  ;;  %v3807_v54 = vrot.slane %v3720_v53, 5  ;;  %v7486_v48 = vld [vmem:[%s7463_s14 + $0x8] sm:$0xff]  }
 0x245   : > { %2051 = vst.msk [vmem:[#allocation2 + $0x5c] sm:$0xf] %vm8367_vm5, %v2035_v12  ;;  %3725 = vrot.lane.b32.xlu1 %v7295_v38, %s8249_s16  ;;  %v7456_v57 = vrot.slane %v3667_v44, 4  ;;  %v3951_v58 = vsel %vm7280_vm6, %v7449_v49, %v3950_v19  ;;  %3677 = vrot.lane.b32.xlu0 %v7449_v49, %s6072_s29  ;;  %v3959_v6 = vld [vmem:[#allocation4 + $0x34] sm:$0xf]  ;;  %v5689_v19 = vunpack.c.l.bf16 %v7486_v48  ;;  %vm8375_vm1 = vmmov %vm8370_vm2  ;;  %vm8376_vm5 = vcmask 388416  }
 0x246   : > { %v7470_v62 = vrot.slane %v3663_v37, 4  ;;  %v3607_v55 = vsel %vm7260_vm10, %v7451_v51, %v3606_v22  ;;  %3952 = vst [vmem:[#allocation4 + $0x1c] sm:$0xf] %v3951_v58  ;;  %vm8372_vm10 = vnez %v8262_v0  ;;  %v3808_v4 = vor.u32 %v3807_v54, %v3806_v21  ;;  %v4176_v37 = vld [vmem:[#allocation3 + $0x4] sm:$0x1] }
 0x247   : > { %v2267_v1 = vpop.permute.xlu1 %2266  ;;  %v2265_v7 = vpop.permute.xlu0 %2264  ;;  %3608 = vst [vmem:[#allocation4 + $0x30] sm:$0xf] %v3607_v55  ;;  %v3957_v32 = vsel %vm7280_vm6, %v7456_v57, %v3956_v52  ;;  %v4180_v3 = vsel %vm8372_vm10, 0, %v4179_v33  ;;  %v4215_v47 = vsub.f32 %v5689_v19, %v7205_v5  ;;  %v5686_v52 = vunpack.c.h.bf16 %v7513_v15  ;;  %v2718_v5 = vld [vmem:[#allocation2 + $0x74] sm:$0xf] }
 0x248   : > { %2282 = vst.msk [vmem:[#allocation2 + $0x54] sm:$0xf] %vm8370_vm2, %v2267_v1  ;;  %v3954_v56 = vsel %vm7280_vm6, %v7470_v62, %v3953_v31  ;;  %3958 = vst [vmem:[#allocation4 + $0x2c] sm:$0xf] %v3957_v32  ;;  %v7494_v12 = vrot.slane %v3808_v4, 4  ;;  %vm8377_vm2 = vcmask 588800   ;;  %v5685_v0 = vunpack.c.l.bf16 %v7513_v15 }
 0x249   : > { %2281 = vst.msk [vmem:[#allocation2 + $0x50] sm:$0xf] %vm8371_vm4, %v2265_v7  ;;  %3775 = vrot.lane.b32.xlu1 %v7239_v42, %s8253_s26  ;;  %3955 = vst [vmem:[#allocation4 + $0x24] sm:$0xf] %v3954_v56  ;;  %3729 = vrot.lane.b32.xlu0 %v7297_v39, %s8249_s16  ;;  %v2715_v31 = vld [vmem:[#allocation2 + $0x70] sm:$0xf]  ;;  %v5652_v55 = vpack.c.bf16 %v4215_v47, %v4215_v47  ;;  %v4214_v4 = vsub.f32 %v5686_v52, %v7229_v34 }
 0x24a   : > { %4181 = vst [vmem:[#allocation3 + $0x8] sm:$0x1] %v4180_v3  ;;  %v3960_v22 = vsel %vm7280_vm6, %v7494_v12, %v3959_v6  ;;  %v4177_v58 = vsel %vm8372_vm10, 0, %v4176_v37  ;;  %v4182_v32 = vld [vmem:[#allocation3 + $0xc] sm:$0x1]  ;;  %v5690_v3 = vunpack.c.h.bf16 %v7486_v48  ;;  %vm8378_vm6 = vmmov %vm8377_vm2  ;;  %v5978_v37 = vld [vmem:[%s8212_s5 + $0x18] sm:$0xff]  }
 0x24b   : > { %v2790_v8 = vpop.permute.xlu1 %2789  ;;  %v2788_v9 = vpop.permute.xlu0 %2787  ;;  %3961 = vst [vmem:[#allocation4 + $0x34] sm:$0xf] %v3960_v22  ;;  %4178 = vst [vmem:[#allocation3 + $0x4] sm:$0x1] %v4177_v58  ;;  %v4183_v54 = vsel %vm8372_vm10, 0, %v4182_v32  ;;  %v5976_v34 = vld [vmem:[%s8212_s5 + $0x8] sm:$0xff]  }
 0x24c   : > { %2807 = vst.msk [vmem:[#allocation2 + $0x6c] sm:$0xf] %vm8373_vm7, %v2790_v8  ;;  %v2721_v56 = vld [vmem:[#allocation2 + $0x78] sm:$0xf]  ;;  %v2500_v33 = vld [vmem:[#allocation2 + $0x7c] sm:$0xf]  ;;  %v4216_v48 = vsub.f32 %v5690_v3, %v7222_v27  ;;  %vm8380_vm4 = vmmov %vm8373_vm7 }
 0x24d   : > { %2806 = vst.msk [vmem:[#allocation2 + $0x68] sm:$0xf] %vm8374_vm9, %v2788_v9  ;;  %3675 = vrot.lane.b32.xlu1 %v7323_v61, %s6072_s29  ;;  %3779 = vrot.lane.b32.xlu0 %v7235_v41, %s8253_s26  ;;  %4184 = vst [vmem:[#allocation3 + $0xc] sm:$0x1] %v4183_v54  ;;  %v5977_v27 = vld [vmem:[%s8212_s5 + $0x10] sm:$0xff]   ;;  %v5979_v58 = vld [vmem:[%s8212_s5 + $0x20] sm:$0xff]  }
 0x24e   : > { %vm8381_vm7 = vmmov %vm8380_vm4  ;;  %v2902_v32 = vld [vmem:[#allocation2 + $0x60] sm:$0xf]  ;;  %vm8385_vm9 = vcmask 322816  }
 0x24f   : > { %v2269_v28 = vpop.permute.xlu1 %2268  ;;  %v2083_v36 = vpop.permute.xlu0 %2082 }
 0x250   : > { %v5969_v44 = vld [vmem:[#allocation2 + $0x50] sm:$0xff]   ;;  %2283 = vst.msk [vmem:[#allocation2 + $0x58] sm:$0xf] %vm8375_vm1, %v2269_v28  ;;  %v5651_v28 = vpack.c.bf16 %v4214_v4, %v4214_v4  ;;  %v5751_v4 = vld [vmem:[%s7463_s14 + $0x28] sm:$0xff]   ;;  %vm8386_vm1 = vmmov %vm8377_vm2 }
 0x251   : > { %2099 = vst.msk [vmem:[#allocation2 + $0x5c] sm:$0xf] %vm8376_vm5, %v2083_v36  ;;  %3727 = vrot.lane.b32.xlu1 %v7319_v10, %s8249_s16  ;;  %5831 = vmatprep.mubr.msk.bf16.mxu0 %vm8377_vm2, %v5969_v44  ;;  %vm3633_vm5 = vcmask 257152   ;;  %vm8388_vm2 = vmmov %vm8386_vm1 }
 0x252   : > { %3812 = vrot.lane.b32.xlu0 %v7299_v46, %s8247_s28  ;;  %v5975_v46 = vld [vmem:[%s8212_s5] sm:$0xff]  }
 0x253   : > { %v2690_v53 = vpop.permute.xlu1 %2689  ;;  %v2688_v21 = vpop.permute.xlu0 %2687  ;;  %4091 = vmatpush1.bf16.msra.mxu1 %v5975_v46 }
 0x254   : > { %v2719_v1 = vsel %vm6765_vm15, %v2690_v53, %v2718_v5  ;;  %v2716_v7 = vsel %vm6765_vm15, %v2688_v21, %v2715_v31  ;;  %4092 = vmatprep.subr.bf16.mxu1 %v6070_v25  ;;  %v5750_v5 = vld [vmem:[%s7463_s14 + $0x20] sm:$0xff]   ;;  %v7570_v31 = vld [vmem:[%s7463_s14 + $0x10] sm:$0xff]  }
 0x255   : > { %2720 = vst [vmem:[#allocation2 + $0x74] sm:$0xf] %v2719_v1  ;;  %2717 = vst [vmem:[#allocation2 + $0x70] sm:$0xf] %v2716_v7  ;;  %3777 = vrot.lane.b32.xlu1 %v7212_v16, %s8253_s26  ;;  %v4185_v21 = vld [vmem:[#allocation3 + $0x10] sm:$0x1]  ;;  %v5701_v54 = vunpack.c.l.bf16 %v5750_v5 }
 0x256   : > { %4257 = vrot.lane.b32.xlu0 %v5652_v55, %s6072_s29  ;;  %v4186_v55 = vsel %vm8372_vm10, 0, %v4185_v21  ;;  %v2905_v1 = vld [vmem:[#allocation2 + $0x64] sm:$0xf]  ;;  %v4188_v21 = vld [vmem:[#allocation3 + $0x14] sm:$0x1] }
 0x257   : > { %v2692_v6 = vpop.permute.xlu1 %2691  ;;  %v2470_v8 = vpop.permute.xlu0 %2469  ;;  %4093 = vmatpush1.bf16.msra.mxu1 %v5976_v34  ;;  %4187 = vst [vmem:[#allocation3 + $0x10] sm:$0x1] %v4186_v55 }
 0x258   : > { %v5970_v9 = vld [vmem:[#allocation2 + $0x58] sm:$0xff]   ;;  %v2722_v19 = vsel %vm6765_vm15, %v2692_v6, %v2721_v56  ;;  %v2501_v22 = vsel %vm6552_vm14, %v2470_v8, %v2500_v33  ;;  %4094 = vmatprep.subr.bf16.mxu1 %v6070_v25  ;;  %vm8379_vm14 = vcmask 257216   ;;  %v5693_v56 = vunpack.c.l.bf16 %v7570_v31  ;;  %v5980_v6 = vld [vmem:[%s8212_s5 + $0x28] sm:$0xff]  }
 0x259   : > { %2723 = vst [vmem:[#allocation2 + $0x78] sm:$0xf] %v2722_v19  ;;  %2502 = vst [vmem:[#allocation2 + $0x7c] sm:$0xf] %v2501_v22  ;;  %3810 = vrot.lane.b32.xlu1 %v7345_v18, %s8247_s28  ;;  %5832 = vmatmul.mubr.msk.bf16.gmra.mrb[20].mxu0 %vm8378_vm6, %v5970_v9  ;;  %v5653_v18 = vpack.c.bf16 %v4216_v48, %v4216_v48  ;;  %v5706_v9 = vunpack.c.h.bf16 %v5751_v4  ;;  %v5702_v19 = vunpack.c.h.bf16 %v5750_v5  ;;  %vm8390_vm6 = vsmask.f32 3328 }
 0x25a   : > { %3679 = vrot.lane.b32.xlu0 %v7470_v62, %s6072_s29  ;;  %s8395_s28 = smov 40  }
 0x25b   : > { %v2752_v36 = vpop.permute.xlu1 %2751  ;;  %v2750_v14 = vpop.permute.xlu0 %2749  ;;  %4095 = vmatpush1.bf16.msra.mxu1 %v5977_v27 }
 0x25c   : > { %2767 = vst.msk [vmem:[#allocation2 + $0x74] sm:$0xf] %vm893_vm12, %v2752_v36  ;;  %2766 = vst.msk [vmem:[#allocation2 + $0x70] sm:$0xf] %vm893_vm12, %v2750_v14  ;;  %4096 = vmatprep.subr.bf16.mxu1 %v6070_v25 }
 0x25d   : > { %4255 = vrot.lane.b32.xlu1 %v5651_v28, %s6072_s29  ;;  %v4217_v28 = vsub.f32 %v5693_v56, %v7402_v24  ;;  %v5981_v24 = vld [vmem:[%s8212_s5 + $0x30] sm:$0xff]  }
 0x25e   : > { %3733 = vrot.lane.b32.xlu0 %v7451_v51, %s8249_s16 }
 0x25f   : > { %v2754_v44 = vpop.permute.xlu1 %2753  ;;  %v2534_v47 = vpop.permute.xlu0 %2533  ;;  %4097 = vmatpush1.bf16.msra.mxu1 %v5978_v37 }
 0x260   : > { %2768 = vst.msk [vmem:[#allocation2 + $0x78] sm:$0xf] %vm893_vm12, %v2754_v44  ;;  %4098 = vmatprep.subr.bf16.mxu1 %v6070_v25  ;;  %vm8384_vm12 = vmmov %vm8380_vm4  ;;  %v4194_v44 = vld [vmem:[#allocation3 + $0x1c] sm:$0x1] }
 0x261   : > { %2550 = vst.msk [vmem:[#allocation2 + $0x7c] sm:$0xf] %vm8379_vm14, %v2534_v47  ;;  %4259 = vrot.lane.b32.xlu1 %v5653_v18, %s6072_s29  ;;  %v2911_v18 = vld [vmem:[#allocation2 + $0x6c] sm:$0xf]  ;;  %v5705_v47 = vunpack.c.l.bf16 %v5751_v4  ;;  %v4195_v5 = vsel %vm8372_vm10, 0, %v4194_v44 }
 0x262   : > { %3781 = vrot.lane.b32.xlu0 %v7406_v30, %s8253_s26  ;;  %4196 = vst [vmem:[#allocation3 + $0x1c] sm:$0x1] %v4195_v5 }
 0x263   : > { %v2794_v52 = vpop.permute.xlu1 %2793  ;;  %v2792_v53 = vpop.permute.xlu0 %2791  ;;  %4099 = vmatpush1.bf16.msra.mxu1 %v5979_v58  ;;  %v5654_v58 = vpack.c.bf16 %v4217_v28, %v4217_v28 }
 0x264   : > { %2809 = vst.msk [vmem:[#allocation2 + $0x74] sm:$0xf] %vm8380_vm4, %v2794_v52  ;;  %4100 = vmatprep.subr.bf16.mxu1 %v6070_v25  ;;  %v2908_v52 = vld [vmem:[#allocation2 + $0x68] sm:$0xf]  ;;  %vm8393_vm4 = vmmov %vm8386_vm1 }
 0x265   : > { %2808 = vst.msk [vmem:[#allocation2 + $0x70] sm:$0xf] %vm8381_vm7, %v2792_v53  ;;  %3731 = vrot.lane.b32.xlu1 %v7437_v59, %s8249_s16  ;;  %s8251_s16 = smov 96   ;;  %vm8396_vm7 = vsmask.f32 7938 }
 0x266   : > { %3814 = vrot.lane.b32.xlu0 %v7291_v26, %s8382_s25 }
 0x267   : > { %v2884_v7 = vpop.permute.xlu1 %2883  ;;  %v2882_v46 = vpop.permute.xlu0 %2881  ;;  %4101 = vmatpush1.bf16.msra.mxu1 %v5980_v6 }
 0x268   : > { %v2906_v33 = vsel %vm6967_vm3, %v2884_v7, %v2905_v1  ;;  %v2903_v3 = vsel %vm6967_vm3, %v2882_v46, %v2902_v32  ;;  %4102 = vmatprep.subr.bf16.mxu1 %v6070_v25  ;;  %v5749_v32 = vld [vmem:[%s7463_s14 + $0x18] sm:$0xff]   ;;  %v4189_v46 = vsel %vm8372_vm10, 0, %v4188_v21 }
 0x269   : > { %2907 = vst [vmem:[#allocation2 + $0x64] sm:$0xf] %v2906_v33  ;;  %2904 = vst [vmem:[#allocation2 + $0x60] sm:$0xf] %v2903_v3  ;;  %3624 = vrot.lane.b32.xlu1 %v7400_v23, %s8383_s22  ;;  %v5821_v26 = vpop.f32.mrb[8].mxu0  ;;  %v5698_v56 = vunpack.c.h.bf16 %v5749_v32 }
 0x26a   : > { %3860 = vrot.lane.b32.xlu0 %v7295_v38, %s8251_s16  ;;  %v3190_v8 = vpop.f32.mrb[9].mxu0  ;;  %4190 = vst [vmem:[#allocation3 + $0x14] sm:$0x1] %v4189_v46  ;;  %v4304_v4 = vsub.f32 %v5705_v47, %v5821_v26  ;;  %s8394_s16 = smov 48  }
 0x26b   : > { %v2796_v22 = vpop.permute.xlu1 %2795  ;;  %v2582_v34 = vpop.permute.xlu0 %2581  ;;  %v7596_v48 = vsub.f32 %v5701_v54, %v3190_v8  ;;  %4103 = vmatpush1.bf16.msra.mxu1 %v5981_v24  ;;  %v5982_v54 = vld [vmem:[%s8212_s5 + $0x38] sm:$0xff]   ;;  %v2917_v8 = vld [vmem:[#allocation2 + $0x74] sm:$0xf]  ;;  %v5697_v24 = vunpack.c.l.bf16 %v5749_v32  ;;  %v4173_v32 = vld [vmem:[#allocation3] sm:$0x1] }
 0x26c   : > { %2810 = vst.msk [vmem:[#allocation2 + $0x78] sm:$0xf] %vm8384_vm12, %v2796_v22  ;;  %v5822_v36 = vpop.f32.mrb[10].mxu0  ;;  %4104 = vmatprep.subr.bf16.mxu1 %v6070_v25  ;;  %v5660_v47 = vpack.c.bf16 %v4304_v4, %v4304_v4  ;;  %v4174_v46 = vsel %vm8372_vm10, 0, %v4173_v32 }
 0x26d   : > { %2598 = vst.msk [vmem:[#allocation2 + $0x7c] sm:$0xf] %vm8385_vm9, %v2582_v34  ;;  %3783 = vrot.lane.b32.xlu1 %v7425_v60, %s8253_s26  ;;  %v3193_v14 = vpop.f32.mrb[11].mxu0  ;;  %v4305_v38 = vsub.f32 %v5706_v9, %v5822_v36  ;;  %v2914_v9 = vld [vmem:[#allocation2 + $0x70] sm:$0xf]  ;;  %s8387_s26 = smov 96   ;;  %v4219_v40 = vsub.f32 %v5697_v24, %v7396_v20 }
 0x26e   : > { %3904 = vrot.lane.b32.xlu0 %v7239_v42, %s8255_s27  ;;  %v4303_v27 = vsub.f32 %v5702_v19, %v3193_v14  ;;  %v4191_v14 = vld [vmem:[#allocation3 + $0x18] sm:$0x1]  ;;  %4175 = vst [vmem:[#allocation3] sm:$0x1] %v4174_v46  ;;  %v4360_v4 = vshll.u32 %v5660_v47, 16  ;;  %vm3797_vm9 = vcmask 650752  }
 0x26f   : > { %v2888_v37 = vpop.permute.xlu1 %2887  ;;  %v2886_v53 = vpop.permute.xlu0 %2885  ;;  %v7626_v33 = vpack.c.bf16 %v4305_v38, %v4305_v38  ;;  %4105 = vmatpush1.bf16.msra.mxu1 %v5982_v54  ;;  %v4192_v26 = vsel %vm8372_vm10, 0, %v4191_v14  ;;  %v4220_v38 = vsub.f32 %v5698_v56, %v7410_v45  ;;  %v5656_v54 = vpack.c.bf16 %v4219_v40, %v4219_v40 }
 0x270   : > { %v7611_v55 = vpack.c.bf16 %v4303_v27, %v4303_v27  ;;  %v2912_v42 = vsel %vm6967_vm3, %v2888_v37, %v2911_v18  ;;  %v2909_v1 = vsel %vm6967_vm3, %v2886_v53, %v2908_v52  ;;  %v5971_v7 = vld [vmem:[#allocation2 + $0x60] sm:$0xff]   ;;  %4106 = vmatprep.subr.bf16.mxu1 %v6070_v25  ;;  %4193 = vst [vmem:[#allocation3 + $0x18] sm:$0x1] %v4192_v26  ;;  %vm3747_vm10 = vcmask 519552  }
 0x271   : > { %2913 = vst [vmem:[#allocation2 + $0x6c] sm:$0xf] %v2912_v42  ;;  %2910 = vst [vmem:[#allocation2 + $0x68] sm:$0xf] %v2909_v1  ;;  %3816 = vrot.lane.b32.xlu1 %v7323_v61, %s8382_s25  ;;  %5835 = vmatprep.mubr.msk.bf16.mxu0 %vm8386_vm1, %v5971_v7  ;;  %v5694_v61 = vunpack.c.h.bf16 %v7570_v31  ;;  %v5983_v31 = vld [vmem:[%s8212_s5 + $0x40] sm:$0xff]   ;;  %v4364_v27 = vshrl.u32 %v7626_v33, 16 }
 0x272   : > { %v4350_v3 = vshrl.u32 %v7611_v55, 16  ;;  %4261 = vrot.lane.b32.xlu0 %v5654_v58, %s6072_s29  ;;  %v4353_v34 = vshll.u32 %v7611_v55, 16  ;;  %v4357_v42 = vshrl.u32 %v5660_v47, 16  ;;  %v4367_v7 = vshll.u32 %v7626_v33, 16  ;;  %vm7688_vm12 = vmand %vm3747_vm10, %vm8396_vm7  ;;  %v3749_v26 = vld [vmem:[#allocation4] sm:$0xf] }
 0x273   : > { %v2892_v6 = vpop.permute.xlu1 %2891  ;;  %v2890_v19 = vpop.permute.xlu0 %2889  ;;  %v4218_v44 = vsub.f32 %v5694_v61, %v7417_v29  ;;  %v2920_v52 = vld [vmem:[#allocation2 + $0x78] sm:$0xf]  ;;  %4107 = vmatpush1.bf16.msra.mxu1 %v5983_v31  ;;  %v5657_v29 = vpack.c.bf16 %v4220_v38, %v4220_v38  ;;  %v4366_v21 = vrot.slane %v4364_v27, 7  ;;  %vm3881_vm10 = vcmask 913152  }
 0x274   : > { %v4352_v22 = vrot.slane %v4350_v3, 7  ;;  %v2918_v28 = vsel %vm6967_vm3, %v2892_v6, %v2917_v8  ;;  %v2915_v36 = vsel %vm6967_vm3, %v2890_v19, %v2914_v9  ;;  %v2724_v53 = vld [vmem:[#allocation2 + $0x7c] sm:$0xf]  ;;  %v4359_v56 = vrot.slane %v4357_v42, 7 }
 0x275   : > { %2919 = vst [vmem:[#allocation2 + $0x74] sm:$0xf] %v2918_v28  ;;  %2916 = vst [vmem:[#allocation2 + $0x70] sm:$0xf] %v2915_v36  ;;  %3862 = vrot.lane.b32.xlu1 %v7319_v10, %s8387_s26  ;;  %v5655_v58 = vpack.c.bf16 %v4218_v44, %v4218_v44  ;;  %v4369_v20 = vor.u32 %v4367_v7, %v4366_v21  ;;  %v4213_v28 = vsub.f32 %v5685_v0, %v7214_v17 }
 0x276   : > { %v4355_v18 = vor.u32 %v4353_v34, %v4352_v22  ;;  %v4362_v22 = vor.u32 %v4360_v4, %v4359_v56 }
 0x277   : > { %v2894_v37 = vpop.permute.xlu1 %2893  ;;  %v2694_v5 = vpop.permute.xlu0 %2693  ;;  %v5650_v38 = vpack.c.bf16 %v4213_v28, %v4213_v28 }
 0x278   : > { %v2921_v25 = vsel %vm6967_vm3, %v2894_v37, %v2920_v52  ;;  %v2725_v10 = vsel %vm6765_vm15, %v2694_v5, %v2724_v53  ;;  %4400 = vrot.lane.b32.xlu0 %v4355_v18, %s8270_s24  ;;  %v5972_v45 = vld [vmem:[#allocation2 + $0x68] sm:$0xff]   ;;  %vm3690_vm15 = vcmask 388352   ;;  %vm8389_vm3 = vmmov %vm8386_vm1  ;;  %vm3834_vm1 = vcmask 781952  }
 0x279   : > { %2922 = vst [vmem:[#allocation2 + $0x78] sm:$0xf] %v2921_v25  ;;  %2726 = vst [vmem:[#allocation2 + $0x7c] sm:$0xf] %v2725_v10  ;;  %3906 = vrot.lane.b32.xlu1 %v7212_v16, %s8255_s27  ;;  %5836 = vmatmul.mubr.msk.bf16.gmra.mrb[24].mxu0 %vm8388_vm2, %v5972_v45  ;;  %s8411_s27 = smov 56  }
 0x27a   : > { %vm7668_vm14 = vmand %vm3690_vm15, %vm8390_vm6 }
 0x27b   : > { %v3613_v35 = vpop.permute.xlu0 %3612  ;;  %v3615_v1 = vpop.permute.xlu1 %3614  ;;  %vm8399_vm2 = vmmov %vm8390_vm6 }
 0x27c   : > { %3634 = vst.msk [vmem:[#allocation4 + $0x8] sm:$0xf] %vm3633_vm5, %v3613_v35  ;;  %3635 = vst.msk [vmem:[#allocation4 + $0x10] sm:$0xf] %vm3633_vm5, %v3615_v1  ;;  %4267 = vrot.lane.b32.xlu0 %v5657_v29, %s6072_s29  ;;  %v5973_v16 = vld [vmem:[#allocation2 + $0x70] sm:$0xff]  }
 0x27d   : > { %4263 = vrot.lane.b32.xlu1 %v5655_v58, %s6072_s29  ;;  %5839 = vmatprep.mubr.msk.bf16.mxu0 %vm8389_vm3, %v5973_v16  ;;  %vm7723_vm15 = vmand %vm3834_vm1, %vm8399_vm2  ;;  %vm8402_vm3 = vcmask 322816   ;;  %vm3925_vm2 = vcmask 1044352  }
 0x27e   : > { %vm8403_vm6 = vmmov %vm8402_vm3 }
 0x27f   : > { %v3617_v3 = vpop.permute.xlu0 %3616  ;;  %v3670_v9 = vpop.permute.xlu1 %3669  ;;  %vm7747_vm1 = vmand %vm3881_vm10, %vm8396_vm7  ;;  %vm8412_vm10 = vcmask 388416  }
 0x280   : > { %3636 = vst.msk [vmem:[#allocation4 + $0x18] sm:$0xf] %vm3633_vm5, %v3617_v3  ;;  %4404 = vrot.lane.b32.xlu0 %v4369_v20, %s8270_s24  ;;  %v5974_v61 = vld [vmem:[#allocation2 + $0x78] sm:$0xff]   ;;  %vm8413_vm7 = vmmov %vm8412_vm10 }
 0x281   : > { %4265 = vrot.lane.b32.xlu1 %v5656_v54, %s6072_s29  ;;  %5840 = vmatmul.mubr.msk.bf16.gmra.mrb[28].mxu0 %vm8393_vm4, %v5974_v61  ;;  %vm8404_vm4 = vmmov %vm8402_vm3 }
 0x283   : > { %v3692_v8 = vld [vmem:[#allocation4 + $0x8] sm:$0xf]  ;;  %v3619_v19 = vpop.permute.xlu0 %3618  ;;  %v3695_v15 = vld [vmem:[#allocation4 + $0x10] sm:$0xf] }
 0x284   : > { %v3693_v34 = vsel %vm7668_vm14, %v3670_v9, %v3692_v8  ;;  %3637 = vst.msk [vmem:[#allocation4 + $0x20] sm:$0xf] %vm3633_vm5, %v3619_v19  ;;  %3735 = vrot.lane.b32.xlu0 %v7439_v2, %s8394_s16 }
 0x285   : > { %3694 = vst [vmem:[#allocation4 + $0x8] sm:$0xf] %v3693_v34  ;;  %4402 = vrot.lane.b32.xlu1 %v4362_v22, %s8270_s24 }
 0x287   : > { %v3672_v36 = vpop.permute.xlu0 %3671  ;;  %v3698_v53 = vld [vmem:[#allocation4 + $0x18] sm:$0xf] }
 0x288   : > { %v3696_v14 = vsel %vm7668_vm14, %v3672_v36, %v3695_v15  ;;  %4450 = vrot.lane.b32.xlu0 %v5660_v47, %s8395_s28 }
 0x289   : > { %3697 = vst [vmem:[#allocation4 + $0x10] sm:$0xf] %v3696_v14  ;;  %4448 = vrot.lane.b32.xlu1 %v7611_v55, %s8395_s28 }
 0x28b   : > { %v3724_v27 = vpop.permute.xlu0 %3723  ;;  %v3701_v7 = vld [vmem:[#allocation4 + $0x20] sm:$0xf] }
 0x28c   : > { %v3750_v17 = vsel %vm7688_vm12, %v3724_v27, %v3749_v26  ;;  %v3752_v25 = vld [vmem:[#allocation4 + $0x8] sm:$0xf] }
 0x28d   : > { %3751 = vst [vmem:[#allocation4] sm:$0xf] %v3750_v17  ;;  %4253 = vrot.lane.b32.xlu1 %v5650_v38, %s6072_s29 }
 0x28f   : > { %v3774_v18 = vpop.permute.xlu0 %3773 }
 0x290   : > { %3798 = vst.msk [vmem:[#allocation4] sm:$0xf] %vm3797_vm9, %v3774_v18  ;;  %v3755_v54 = vld [vmem:[#allocation4 + $0x10] sm:$0xf] }
 0x291   : > { %4452 = vrot.lane.b32.xlu1 %v7626_v33, %s8395_s28 }
 0x295   : > { %3681 = vrot.lane.b32.xlu1 %v7456_v57, %s6072_s29  ;;  %s8409_s29 = smov 64  }
 0x297   : > { %v3836_v19 = vld [vmem:[#allocation4] sm:$0xf] }
 0x29d   : > { %v7700_v55 = vpop.f32.mrb[12].mxu0 }
 0x29e   : > { %v7702_v24 = vpop.f32.mrb[13].mxu0 }
 0x29f   : > { %v7704_v44 = vpop.f32.mrb[14].mxu0 }
 0x2a0   : > { %v7706_v47 = vpop.f32.mrb[15].mxu0 }
 0x2af   : > { %v3621_v37 = vpop.permute.xlu1 %3620 }
 0x2b0   : > { %3638 = vst.msk [vmem:[#allocation4 + $0x28] sm:$0xf] %vm3633_vm5, %v3621_v37 }
 0x2b2   : > { %v3623_v52 = vpop.permute.xlu0 %3622 }
 0x2b3   : > { %3639 = vst.msk [vmem:[#allocation4 + $0x30] sm:$0xf] %vm3633_vm5, %v3623_v52  ;;  %v3674_v5 = vpop.permute.xlu1 %3673 }
 0x2b4   : > { %v3699_v33 = vsel %vm7668_vm14, %v3674_v5, %v3698_v53 }
 0x2b5   : > { %3700 = vst [vmem:[#allocation4 + $0x18] sm:$0xf] %v3699_v33 }
 0x2b7   : > { %v3726_v10 = vpop.permute.xlu1 %3725  ;;  %v3704_v45 = vld [vmem:[#allocation4 + $0x28] sm:$0xf]  ;;  %v3678_v21 = vpop.permute.xlu0 %3677 }
 0x2b8   : > { %v3753_v29 = vsel %vm7688_vm12, %v3726_v10, %v3752_v25  ;;  %v3705_v40 = vsel %vm7668_vm14, %v3678_v21, %v3704_v45 }
 0x2b9   : > { %3754 = vst [vmem:[#allocation4 + $0x8] sm:$0xf] %v3753_v29  ;;  %3706 = vst [vmem:[#allocation4 + $0x28] sm:$0xf] %v3705_v40 }
 0x2ba   : > { %v3707_v28 = vld [vmem:[#allocation4 + $0x30] sm:$0xf] }
 0x2bb   : > { %v3776_v58 = vpop.permute.xlu1 %3775  ;;  %v3730_v35 = vpop.permute.xlu0 %3729 }
 0x2bc   : > { %3799 = vst.msk [vmem:[#allocation4 + $0x8] sm:$0xf] %vm3797_vm9, %v3776_v58  ;;  %v3758_v42 = vld [vmem:[#allocation4 + $0x18] sm:$0xf] }
 0x2bd   : > { %v3759_v1 = vsel %vm7688_vm12, %v3730_v35, %v3758_v42  ;;  %v5755_v35 = vld [vmem:[%s7463_s14 + $0x48] sm:$0xff]  }
 0x2be   : > { %3760 = vst [vmem:[#allocation4 + $0x18] sm:$0xf] %v3759_v1 }
 0x2bf   : > { %v3676_v16 = vpop.permute.xlu1 %3675  ;;  %v3780_v20 = vpop.permute.xlu0 %3779 }
 0x2c0   : > { %v3702_v32 = vsel %vm7668_vm14, %v3676_v16, %v3701_v7  ;;  %3801 = vst.msk [vmem:[#allocation4 + $0x18] sm:$0xf] %vm3797_vm9, %v3780_v20  ;;  %v3764_v26 = vld [vmem:[#allocation4 + $0x28] sm:$0xf]  ;;  %v5754_v16 = vld [vmem:[%s7463_s14 + $0x40] sm:$0xff]  }
 0x2c1   : > { %3703 = vst [vmem:[#allocation4 + $0x20] sm:$0xf] %v3702_v32 }
 0x2c3   : > { %v3728_v56 = vpop.permute.xlu1 %3727  ;;  %v3839_v3 = vld [vmem:[#allocation4 + $0x8] sm:$0xf] }
 0x2c4   : > { %v3756_v61 = vsel %vm7688_vm12, %v3728_v56, %v3755_v54  ;;  %v3813_v4 = vpop.permute.xlu0 %3812  ;;  %v5721_v54 = vunpack.c.l.bf16 %v5755_v35  ;;  %v5717_v56 = vunpack.c.l.bf16 %v5754_v16 }
 0x2c5   : > { %3757 = vst [vmem:[#allocation4 + $0x10] sm:$0xf] %v3756_v61  ;;  %v3840_v0 = vsel %vm7723_vm15, %v3813_v4, %v3839_v3 }
 0x2c6   : > { %3841 = vst [vmem:[#allocation4 + $0x8] sm:$0xf] %v3840_v0 }
 0x2c7   : > { %v3778_v8 = vpop.permute.xlu1 %3777  ;;  %v3845_v1 = vld [vmem:[#allocation4 + $0x18] sm:$0xf] }
 0x2c8   : > { %3800 = vst.msk [vmem:[#allocation4 + $0x10] sm:$0xf] %vm3797_vm9, %v3778_v8  ;;  %v4258_v9 = vpop.permute.xlu0 %4257  ;;  %v3761_v37 = vld [vmem:[#allocation4 + $0x20] sm:$0xf]  ;;  %v5718_v8 = vunpack.c.h.bf16 %v5754_v16 }
 0x2c9   : > { %4279 = vst.msk [vmem:[#allocation3 + $0x8] sm:$0xf] %vm8402_vm3, %v4258_v9 }
 0x2cb   : > { %v3811_v22 = vpop.permute.xlu1 %3810 }
 0x2cc   : > { %v3837_v34 = vsel %vm7723_vm15, %v3811_v22, %v3836_v19  ;;  %v3680_v36 = vpop.permute.xlu0 %3679 }
 0x2cd   : > { %3838 = vst [vmem:[#allocation4] sm:$0xf] %v3837_v34  ;;  %v3708_v15 = vsel %vm7668_vm14, %v3680_v36, %v3707_v28  ;;  %v3886_v3 = vld [vmem:[#allocation4 + $0x8] sm:$0xf] }
 0x2ce   : > { %3709 = vst [vmem:[#allocation4 + $0x30] sm:$0xf] %v3708_v15 }
 0x2cf   : > { %v4256_v14 = vpop.permute.xlu1 %4255  ;;  %v3842_v53 = vld [vmem:[#allocation4 + $0x10] sm:$0xf] }
 0x2d0   : > { %v3734_v38 = vpop.permute.xlu0 %3733  ;;  %4278 = vst.msk [vmem:[#allocation3 + $0x4] sm:$0xf] %vm8403_vm6, %v4256_v14  ;;  %vm8408_vm6 = vmmov %vm8402_vm3 }
 0x2d1   : > { %v3765_v27 = vsel %vm7688_vm12, %v3734_v38, %v3764_v26 }
 0x2d2   : > { %3766 = vst [vmem:[#allocation4 + $0x28] sm:$0xf] %v3765_v27 }
 0x2d3   : > { %v4260_v17 = vpop.permute.xlu1 %4259 }
 0x2d4   : > { %v3782_v18 = vpop.permute.xlu0 %3781  ;;  %4280 = vst.msk [vmem:[#allocation3 + $0xc] sm:$0xf] %vm8404_vm4, %v4260_v17  ;;  %v3883_v29 = vld [vmem:[#allocation4] sm:$0xf]  ;;  %vm8410_vm4 = vmmov %vm8402_vm3 }
 0x2d7   : > { %v3732_v52 = vpop.permute.xlu1 %3731  ;;  %v4425_v22 = vld [vmem:[#allocation3 + $0x4] sm:$0xf] }
 0x2d8   : > { %v3815_v5 = vpop.permute.xlu0 %3814  ;;  %v3762_v33 = vsel %vm7688_vm12, %v3732_v52, %v3761_v37 }
 0x2d9   : > { %v3843_v25 = vsel %vm7723_vm15, %v3815_v5, %v3842_v53  ;;  %3763 = vst [vmem:[#allocation4 + $0x20] sm:$0xf] %v3762_v33  ;;  %v5722_v53 = vunpack.c.h.bf16 %v5755_v35 }
 0x2da   : > { %3844 = vst [vmem:[#allocation4 + $0x10] sm:$0xf] %v3843_v25  ;;  %3802 = vst.msk [vmem:[#allocation4 + $0x20] sm:$0xf] %vm3797_vm9, %v3782_v18  ;;  %v5752_v18 = vld [vmem:[%s7463_s14 + $0x30] sm:$0xff]   ;;  %v5753_v25 = vld [vmem:[%s7463_s14 + $0x38] sm:$0xff]  }
 0x2db   : > { %v3625_v45 = vpop.permute.xlu1 %3624  ;;  %v5710_v52 = vunpack.c.h.bf16 %v5752_v18  ;;  %v5709_v16 = vunpack.c.l.bf16 %v5752_v18 }
 0x2dc   : > { %v3861_v21 = vpop.permute.xlu0 %3860  ;;  %3640 = vst.msk [vmem:[#allocation4 + $0x38] sm:$0xf] %vm3633_vm5, %v3625_v45  ;;  %vm8407_vm5 = vmmov %vm8402_vm3  ;;  %v4431_v45 = vld [vmem:[#allocation3 + $0xc] sm:$0xf] }
 0x2dd   : > { %v3884_v40 = vsel %vm7747_vm1, %v3861_v21, %v3883_v29  ;;  %v5714_v21 = vunpack.c.h.bf16 %v5753_v25 }
 0x2de   : > { %3885 = vst [vmem:[#allocation4] sm:$0xf] %v3884_v40  ;;  %v4307_v40 = vsub.f32 %v5710_v52, %v7706_v47 }
 0x2df   : > { %v3784_v58 = vpop.permute.xlu1 %3783  ;;  %v4309_v47 = vsub.f32 %v5714_v21, %v7704_v44 }
 0x2e0   : > { %v3905_v42 = vpop.permute.xlu0 %3904  ;;  %3803 = vst.msk [vmem:[#allocation4 + $0x28] sm:$0xf] %vm3797_vm9, %v3784_v58 }
 0x2e1   : > { %3926 = vst.msk [vmem:[#allocation4] sm:$0xf] %vm3925_vm2, %v3905_v42  ;;  %v5665_v44 = vpack.c.bf16 %v4309_v47, %v4309_v47 }
 0x2e3   : > { %v3817_v7 = vpop.permute.xlu1 %3816 }
 0x2e4   : > { %v3846_v32 = vsel %vm7723_vm15, %v3817_v7, %v3845_v1  ;;  %v4262_v20 = vpop.permute.xlu0 %4261  ;;  %v5986_v7 = vld [vmem:[#allocation4 + $0x4] ss:$8 sps:$4 sm:$0xff]  }
 0x2e5   : > { %3847 = vst [vmem:[#allocation4 + $0x18] sm:$0xf] %v3846_v32  ;;  %4281 = vst.msk [vmem:[#allocation3 + $0x10] sm:$0xf] %vm8407_vm5, %v4262_v20  ;;  %5560 = vmatprep.mubr.msk.bf16.mxu1 %vm3429_vm11, %v5986_v7  ;;  %v3767_v32 = vld [vmem:[#allocation4 + $0x30] sm:$0xf] }
 0x2e6   : > { %vm8414_vm5 = vmmov %vm8402_vm3 }
 0x2e7   : > { %v3863_v61 = vpop.permute.xlu1 %3862 }
 0x2e8   : > { %v3887_v4 = vsel %vm7747_vm1, %v3863_v61, %v3886_v3  ;;  %v5829_v0 = vpop.f32.mrb[16].mxu0  ;;  %v4428_v61 = vld [vmem:[#allocation3 + $0x8] sm:$0xf] }
 0x2e9   : > { %3888 = vst [vmem:[#allocation4 + $0x8] sm:$0xf] %v3887_v4  ;;  %v4497_v9 = vsub.f32 %v5721_v54, %v5829_v0  ;;  %v3222_v19 = vpop.f32.mrb[17].mxu0  ;;  %v5663_v54 = vpack.c.bf16 %v4307_v40, %v4307_v40  ;;  %v5713_v0 = vunpack.c.l.bf16 %v5753_v25 }
 0x2ea   : > { %v4401_v34 = vpop.permute.xlu0 %4400  ;;  %v4495_v28 = vsub.f32 %v5717_v56, %v3222_v19  ;;  %v5830_v36 = vpop.f32.mrb[18].mxu0 }
 0x2eb   : > { %v5668_v15 = vpack.c.bf16 %v4497_v9, %v4497_v9  ;;  %v4426_v14 = vsel %vm6480_vm0, %v4401_v34, %v4425_v22  ;;  %v3907_v26 = vpop.permute.xlu1 %3906  ;;  %v3225_v38 = vpop.f32.mrb[19].mxu0  ;;  %v4498_v58 = vsub.f32 %v5722_v53, %v5830_v36  ;;  %v4378_v19 = vshrl.u32 %v5663_v54, 16  ;;  %v3710_v53 = vld [vmem:[#allocation4 + $0x38] sm:$0xf] }
 0x2ec   : > { %4427 = vst [vmem:[#allocation3 + $0x4] sm:$0xf] %v4426_v14  ;;  %v7765_v27 = vpack.c.bf16 %v4495_v28, %v4495_v28  ;;  %3927 = vst.msk [vmem:[#allocation4 + $0x8] sm:$0xf] %vm3925_vm2, %v3907_v26  ;;  %v4496_v17 = vsub.f32 %v5718_v8, %v3225_v38  ;;  %v4306_v8 = vsub.f32 %v5709_v16, %v7702_v24  ;;  %v4392_v24 = vshrl.u32 %v5665_v44, 16 }
 0x2ed   : > { %4536 = vrot.lane.b32.xlu1 %v5668_v15, %s8275_s17  ;;  %v5669_v56 = vpack.c.bf16 %v4498_v58, %v4498_v58  ;;  %v4308_v34 = vsub.f32 %v5713_v0, %v7700_v55  ;;  %v4380_v36 = vrot.slane %v4378_v19, 7  ;;  %v4381_v38 = vshll.u32 %v5663_v54, 16  ;;  %v5756_v58 = vld [vmem:[%s7463_s14 + $0x50] sm:$0xff]   ;;  %v5759_v19 = vld [vmem:[%s7463_s14 + $0x68] sm:$0xff]  }
 0x2ee   : > { %v4268_v37 = vpop.permute.xlu0 %4267  ;;  %4532 = vrot.lane.b32.xlu0 %v7765_v27, %s8275_s17  ;;  %v5667_v33 = vpack.c.bf16 %v4496_v17, %v4496_v17  ;;  %v5662_v28 = vpack.c.bf16 %v4306_v8, %v4306_v8  ;;  %v4394_v55 = vrot.slane %v4392_v24, 7  ;;  %v5726_v16 = vunpack.c.h.bf16 %v5756_v58 }
 0x2ef   : > { %4284 = vst.msk [vmem:[#allocation3 + $0x1c] sm:$0xf] %vm8402_vm3, %v4268_v37  ;;  %v4264_v5 = vpop.permute.xlu1 %4263  ;;  %v5664_v26 = vpack.c.bf16 %v4308_v34, %v4308_v34  ;;  %v4383_v18 = vor.u32 %v4381_v38, %v4380_v36  ;;  %vm8416_vm3 = vmmov %vm8413_vm7  ;;  %v5738_v38 = vunpack.c.h.bf16 %v5759_v19 }
 0x2f0   : > { %4282 = vst.msk [vmem:[#allocation3 + $0x14] sm:$0xf] %vm8408_vm6, %v4264_v5  ;;  %v4374_v52 = vshll.u32 %v5662_v28, 16 }
 0x2f1   : > { %3785 = vrot.lane.b32.xlu1 %v7400_v23, %s8409_s29 }
 0x2f2   : > { %v4405_v29 = vpop.permute.xlu0 %4404  ;;  %4534 = vrot.lane.b32.xlu0 %v5667_v33, %s8275_s17 }
 0x2f3   : > { %v4432_v42 = vsel %vm6480_vm0, %v4405_v29, %v4431_v45  ;;  %v4266_v35 = vpop.permute.xlu1 %4265  ;;  %v5984_v1 = vld [vmem:[#allocation4] ss:$8 sps:$4 sm:$0xff]   ;;  %v4388_v29 = vshll.u32 %v5664_v26, 16 }
 0x2f4   : > { %4433 = vst [vmem:[#allocation3 + $0xc] sm:$0xf] %v4432_v42  ;;  %4283 = vst.msk [vmem:[#allocation3 + $0x18] sm:$0xf] %vm8410_vm4, %v4266_v35  ;;  %4123 = vmatmul.mubr.bf16.vlgmr.msra.gmra.mrb[8].mxu1 %v5984_v1  ;;  %v5757_v42 = vld [vmem:[%s7463_s14 + $0x58] sm:$0xff]   ;;  %v5725_v35 = vunpack.c.l.bf16 %v5756_v58 }
 0x2f5   : > { %3820 = vrot.lane.b32.xlu1 %v7470_v62, %s8382_s25  ;;  %v5729_v7 = vunpack.c.l.bf16 %v5757_v42  ;;  %v5730_v8 = vunpack.c.h.bf16 %v5757_v42 }
 0x2f6   : > { %v3736_v20 = vpop.permute.xlu0 %3735  ;;  %4566 = vrot.lane.b32.xlu0 %v5667_v33, %s8411_s27 }
 0x2f7   : > { %v3768_v3 = vsel %vm7688_vm12, %v3736_v20, %v3767_v32  ;;  %v4403_v4 = vpop.permute.xlu1 %4402 }
 0x2f8   : > { %3769 = vst [vmem:[#allocation4 + $0x30] sm:$0xf] %v3768_v3  ;;  %v4429_v62 = vsel %vm6480_vm0, %v4403_v4, %v4428_v61 }
 0x2f9   : > { %4430 = vst [vmem:[#allocation3 + $0x8] sm:$0xf] %v4429_v62  ;;  %4570 = vrot.lane.b32.xlu1 %v5669_v56, %s8411_s27 }
 0x2fa   : > { %v4451_v9 = vpop.permute.xlu0 %4450  ;;  %3818 = vrot.lane.b32.xlu0 %v7449_v49, %s8382_s25  ;;  %v4371_v49 = vshrl.u32 %v5662_v28, 16 }
 0x2fb   : > { %4472 = vst.msk [vmem:[#allocation3 + $0x8] sm:$0xf] %vm8412_vm10, %v4451_v9  ;;  %v4449_v22 = vpop.permute.xlu1 %4448  ;;  %v5990_v9 = vld [vmem:[%s8211_s4] sm:$0xff]   ;;  %vm8420_vm10 = vcmask 519616  }
 0x2fc   : > { %4471 = vst.msk [vmem:[#allocation3 + $0x4] sm:$0xf] %vm8413_vm7, %v4449_v22  ;;  %v4373_v37 = vrot.slane %v4371_v49, 7  ;;  %5861 = vmatprep.subr.bf16.mxu0 %v5990_v9  ;;  %5879 = vmatprep.subr.bf16.mxu1 %v5990_v9  ;;  %v5737_v22 = vunpack.c.l.bf16 %v5759_v19  ;;  %vm8421_vm7 = vmmov %vm8420_vm10 }
 0x2fd   : > { %3866 = vrot.lane.b32.xlu1 %v7437_v59, %s8387_s26  ;;  %v4385_v59 = vshrl.u32 %v5664_v26, 16  ;;  %5862 = vmatpush3.bf16.msra.mxu0 %v5990_v9 }
 0x2fe   : > { %4568 = vrot.lane.b32.xlu0 %v5668_v15, %s8411_s27  ;;  %v4395_v15 = vshll.u32 %v5665_v44, 16  ;;  %v4376_v45 = vor.u32 %v4374_v52, %v4373_v37  ;;  %5884 = vmatpush3.bf16.msra.mxu1 %v5990_v9 }
 0x2ff   : > { %v4254_v14 = vpop.permute.xlu1 %4253  ;;  %v4387_v33 = vrot.slane %v4385_v59, 7 }
 0x300   : > { %4277 = vst.msk [vmem:[#allocation3] sm:$0xf] %vm8414_vm5, %v4254_v14  ;;  %vm8422_vm5 = vnez %v8265_v11 }
 0x301   : > { %3910 = vrot.lane.b32.xlu1 %v7406_v30, %s8415_s0  ;;  %v4397_v30 = vor.u32 %v4395_v15, %v4394_v55  ;;  %v4390_v21 = vor.u32 %v4388_v29, %v4387_v33  ;;  %v5994_v29 = vld [vmem:[%s8211_s4 + $0x10] sm:$0xff]  }
 0x302   : > { %3864 = vrot.lane.b32.xlu0 %v7297_v39, %s8387_s26  ;;  %v5658_v39 = vpack.c.bf16 %v7596_v48, %v7596_v48 }
 0x303   : > { %v4453_v17 = vpop.permute.xlu1 %4452 }
 0x304   : > { %4473 = vst.msk [vmem:[#allocation3 + $0xc] sm:$0xf] %vm8416_vm3, %v4453_v17  ;;  %v4346_v6 = vshll.u32 %v5658_v39, 16  ;;  %vm8423_vm3 = vmmov %vm8421_vm7 }
 0x305   : > { %4408 = vrot.lane.b32.xlu1 %v4383_v18, %s8270_s24 }
 0x306   : > { %3908 = vrot.lane.b32.xlu0 %v7235_v41, %s8415_s0  ;;  %v4343_v41 = vshrl.u32 %v5658_v39, 16 }
 0x307   : > { %v3682_v5 = vpop.permute.xlu1 %3681 }
 0x308   : > { %v3711_v25 = vsel %vm7668_vm14, %v3682_v5, %v3710_v53  ;;  %v4345_v48 = vrot.slane %v4343_v41, 7  ;;  %v5760_v53 = vld [vmem:[%s7463_s14 + $0x70] sm:$0xff]   ;;  %vm8417_vm14 = vcmask 126016  }
 0x309   : > { %3712 = vst [vmem:[#allocation4 + $0x38] sm:$0xf] %v3711_v25  ;;  %4412 = vrot.lane.b32.xlu1 %v4397_v30, %s8270_s24  ;;  %v7874_v25 = vld [vmem:[%s7463_s14 + $0x78] sm:$0xff]   ;;  %vm8418_vm6 = vmmov %vm8417_vm14 }
 0x30a   : > { %4406 = vrot.lane.b32.xlu0 %v4376_v45, %s8270_s24  ;;  %v4348_v40 = vor.u32 %v4346_v6, %v4345_v48  ;;  %v5741_v45 = vunpack.c.l.bf16 %v5760_v53  ;;  %v5745_v41 = vunpack.c.l.bf16 %v7874_v25  ;;  %vm8419_vm4 = vmmov %vm8418_vm6 }
 0x30d   : > { %4456 = vrot.lane.b32.xlu1 %v5663_v54, %s8395_s28 }
 0x30e   : > { %4410 = vrot.lane.b32.xlu0 %v4390_v21, %s8270_s24 }
 0x311   : > { %4458 = vrot.lane.b32.xlu1 %v5664_v26, %s8395_s28 }
 0x312   : > { %4454 = vrot.lane.b32.xlu0 %v5662_v28, %s8395_s28 }
 0x315   : > { %4538 = vrot.lane.b32.xlu1 %v5669_v56, %s8275_s17 }
 0x316   : > { %4398 = vrot.lane.b32.xlu0 %v4348_v40, %s8270_s24 }
 0x31a   : > { %4460 = vrot.lane.b32.xlu0 %v5665_v44, %s8395_s28 }
 0x32c   : > { %v5833_v1 = vpop.f32.mrb[20].mxu0 }
 0x32d   : > { %v3238_v32 = vpop.f32.mrb[21].mxu0  ;;  %v4501_v3 = vsub.f32 %v5729_v7, %v5833_v1  ;;  %v5742_v1 = vunpack.c.h.bf16 %v5760_v53 }
 0x32e   : > { %v4499_v20 = vsub.f32 %v5725_v35, %v3238_v32  ;;  %v5834_v47 = vpop.f32.mrb[22].mxu0 }
 0x32f   : > { %v3241_v54 = vpop.f32.mrb[23].mxu0  ;;  %v5672_v56 = vpack.c.bf16 %v4501_v3, %v4501_v3  ;;  %v4502_v62 = vsub.f32 %v5730_v8, %v5834_v47 }
 0x330   : > { %v5670_v61 = vpack.c.bf16 %v4499_v20, %v4499_v20  ;;  %v4500_v4 = vsub.f32 %v5726_v16, %v3241_v54 }
 0x331   : > { %v5673_v44 = vpack.c.bf16 %v4502_v62, %v4502_v62 }
 0x332   : > { %v5671_v0 = vpack.c.bf16 %v4500_v4, %v4500_v4  ;;  %4540 = vrot.lane.b32.xlu0 %v5670_v61, %s8275_s17  ;;  %v5995_v4 = vld [vmem:[%s8211_s4 + $0x18] sm:$0xff]  }
 0x334   : > { %4542 = vrot.lane.b32.xlu1 %v5671_v0, %s8275_s17 }
 0x336   : > { %4544 = vrot.lane.b32.xlu0 %v5672_v56, %s8275_s17 }
 0x338   : > { %4572 = vrot.lane.b32.xlu1 %v5670_v61, %s8411_s27 }
 0x33a   : > { %4574 = vrot.lane.b32.xlu0 %v5671_v0, %s8411_s27  ;;  %v3851_v0 = vld [vmem:[#allocation4 + $0x28] sm:$0xf] }
 0x33c   : > { %3737 = vrot.lane.b32.xlu1 %v7475_v63, %s8394_s16 }
 0x33e   : > { %3822 = vrot.lane.b32.xlu0 %v7456_v57, %s8382_s25  ;;  %v5758_v57 = vld [vmem:[%s7463_s14 + $0x60] sm:$0xff]  }
 0x33f   : > { %v5733_v34 = vunpack.c.l.bf16 %v5758_v57  ;;  %v5734_v24 = vunpack.c.h.bf16 %v5758_v57 }
 0x340   : > { %4446 = vrot.lane.b32.xlu1 %v5658_v39, %s8395_s28  ;;  %s5682_s28 = sshll.u32 %s6153_s13, 10  ;;  %s6080_s13 = smov [#allocation5]  }
 0x342   : > { %4576 = vrot.lane.b32.xlu0 %v5672_v56, %s8411_s27 }
 0x344   : > { %4578 = vrot.lane.b32.xlu1 %v5673_v44, %s8411_s27 }
 0x346   : > { %3868 = vrot.lane.b32.xlu0 %v7451_v51, %s8387_s26  ;;  %v5991_v51 = vld [vmem:[%s8211_s4 + $0x8] sm:$0xff]  }
 0x347   : > { %5863 = vmatprep.subr.bf16.mxu0 %v5991_v51  ;;  %5880 = vmatprep.subr.bf16.mxu1 %v5991_v51 }
 0x348   : > { %3870 = vrot.lane.b32.xlu1 %v7439_v2, %s8387_s26  ;;  %5864 = vmatpush3.bf16.msra.mxu0 %v5991_v51 }
 0x349   : > { %5885 = vmatpush3.bf16.msra.mxu1 %v5991_v51  ;;  %5865 = vmatprep.subr.bf16.mxu0 %v5994_v29 }
 0x34a   : > { %4564 = vrot.lane.b32.xlu0 %v7765_v27, %s8411_s27  ;;  %5881 = vmatprep.subr.bf16.mxu1 %v5994_v29  ;;  %s5086_s27 = sshll.u32 %s7208_s23, 4  ;;  %s6008_s23 = sshll.u32 %s6080_s13, 4  ;;  %s8110_s27 = int_to_ptr.vmem [resolvable:$true] %s5086_s27  ;;  %s6009_s23 = int_to_ptr.vmem [resolvable:$false] %s6008_s23 }
 0x34b   : > { %p6011_p0 = scmp.lt.s32.totalorder %s8110_s27, %s6009_s23 }
 0x34c   : > { %v5837_v28 = vpop.f32.mrb[24].mxu0  ;;  %5866 = vmatpush3.bf16.msra.mxu0 %v5994_v29 }
 0x34d   : > { %v4615_v36 = vsub.f32 %v5737_v22, %v5837_v28  ;;  %v3254_v14 = vpop.f32.mrb[25].mxu0  ;;  %5886 = vmatpush3.bf16.msra.mxu1 %v5994_v29  ;;  %5867 = vmatprep.subr.bf16.mxu0 %v5995_v4  ;;  %v3848_v28 = vld [vmem:[#allocation4 + $0x20] sm:$0xf] }
 0x34e   : > { %3787 = vrot.lane.b32.xlu0 %v7415_v50, %s8409_s29  ;;  %v4613_v26 = vsub.f32 %v5733_v34, %v3254_v14  ;;  %v5838_v49 = vpop.f32.mrb[26].mxu0  ;;  %5882 = vmatprep.subr.bf16.mxu1 %v5995_v4 }
 0x34f   : > { %v7853_v2 = vpack.c.bf16 %v4615_v36, %v4615_v36  ;;  %v3257_v27 = vpop.f32.mrb[27].mxu0  ;;  %v4616_v59 = vsub.f32 %v5738_v38, %v5838_v49  ;;  %v5746_v36 = vunpack.c.h.bf16 %v7874_v25  ;;  %v3889_v25 = vld [vmem:[#allocation4 + $0x10] sm:$0xf] }
 0x350   : > { %v7855_v55 = vpack.c.bf16 %v4613_v26, %v4613_v26  ;;  %v4614_v17 = vsub.f32 %v5734_v24, %v3257_v27  ;;  %5868 = vmatpush3.bf16.msra.mxu0 %v5995_v4  ;;  %v3892_v26 = vld [vmem:[#allocation4 + $0x18] sm:$0xf] }
 0x351   : > { %v7871_v30 = vpack.c.bf16 %v4616_v59, %v4616_v59  ;;  %v4665_v54 = vshrl.u32 %v7853_v2, 16  ;;  %5887 = vmatpush3.bf16.msra.mxu1 %v5995_v4  ;;  %v4668_v57 = vshll.u32 %v7853_v2, 16 }
 0x352   : > { %4731 = vrot.lane.b32.xlu0 %v7853_v2, %s8383_s22  ;;  %4727 = vrot.lane.b32.xlu1 %v7855_v55, %s8383_s22  ;;  %v4651_v18 = vshrl.u32 %v7855_v55, 16  ;;  %v7862_v37 = vpack.c.bf16 %v4614_v17, %v4614_v17 }
 0x353   : > { %v4667_v19 = vrot.slane %v4665_v54, 7 }
 0x354   : > { %v5841_v15 = vpop.f32.mrb[28].mxu0  ;;  %v4653_v33 = vrot.slane %v4651_v18, 7  ;;  %v4658_v48 = vshrl.u32 %v7862_v37, 16  ;;  %v4661_v16 = vshll.u32 %v7862_v37, 16 }
 0x355   : > { %v3270_v52 = vpop.f32.mrb[29].mxu0  ;;  %v4619_v58 = vsub.f32 %v5745_v41, %v5841_v15  ;;  %v4670_v51 = vor.u32 %v4668_v57, %v4667_v19  ;;  %v5987_v19 = vld [vmem:[#allocation4 + $0x14] ss:$8 sps:$4 sm:$0xff]  }
 0x356   : > { %3914 = vrot.lane.b32.xlu0 %v7400_v23, %s8415_s0  ;;  %4729 = vrot.lane.b32.xlu1 %v7862_v37, %s8383_s22  ;;  %v7869_v5 = vpop.f32.mrb[30].mxu0  ;;  %v4654_v23 = vshll.u32 %v7855_v55, 16  ;;  %v4617_v6 = vsub.f32 %v5741_v45, %v3270_v52  ;;  %v4660_v7 = vrot.slane %v4658_v48, 7 }
 0x357   : > { %v3273_v39 = vpop.f32.mrb[31].mxu0  ;;  %v4620_v15 = vsub.f32 %v5746_v36, %v7869_v5  ;;  %v5999_v5 = vld [vmem:[%s8211_s4 + $0x20] ss:$0 sps:$4 sm:$0xff]   ;;  %5561 = vmatprep.mubr.msk.bf16.mxu1 %vm3429_vm11, %v5987_v19 }
 0x358   : > { %v7885_v21 = vor.u32 %v4654_v23, %v4653_v33  ;;  %v7894_v35 = vpack.c.bf16 %v4617_v6, %v4617_v6  ;;  %v4618_v3 = vsub.f32 %v5742_v1, %v3273_v39  ;;  %v7907_v61 = vor.u32 %v4661_v16, %v4660_v7  ;;  %v4437_v6 = vld [vmem:[#allocation3 + $0x14] sm:$0xf]  ;;  %v4422_v36 = vld [vmem:[#allocation3] sm:$0xf] }
 0x35a   : > { %4733 = vrot.lane.b32.xlu0 %v7871_v30, %s8383_s22  ;;  %3912 = vrot.lane.b32.xlu1 %v7425_v60, %s8415_s0  ;;  %v4672_v60 = vshrl.u32 %v7871_v30, 16  ;;  %v7921_v44 = vpack.c.bf16 %v4618_v3, %v4618_v3  ;;  %v4679_v34 = vshrl.u32 %v7894_v35, 16  ;;  %v4434_v3 = vld [vmem:[#allocation3 + $0x10] sm:$0xf] }
 0x35c   : > { %v4674_v47 = vrot.slane %v4672_v60, 7  ;;  %v4681_v59 = vrot.slane %v4679_v34, 7  ;;  %v4686_v41 = vshrl.u32 %v7921_v44, 16 }
 0x35e   : > { %4765 = vrot.lane.b32.xlu0 %v7885_v21, %s8394_s16  ;;  %3872 = vrot.lane.b32.xlu1 %v7475_v63, %s8387_s26  ;;  %v7902_v63 = vpack.c.bf16 %v4619_v58, %v4619_v58  ;;  %s8108_s26 = scalar_lea.hbm %s8213_s6, %s5682_s28 }
 0x35f   : > { %v4537_v40 = vpop.permute.xlu1 %4536 }
 0x360   : > { %4556 = vst.msk [vmem:[#allocation3 + $0xc] sm:$0xf] %vm8417_vm14, %v4537_v40  ;;  %v4533_v42 = vpop.permute.xlu0 %4532  ;;  %v4693_v38 = vshrl.u32 %v7902_v63, 16  ;;  %vm8424_vm14 = vcmask 1043456   ;;  %v4696_v48 = vshll.u32 %v7902_v63, 16 }
 0x361   : > { %4554 = vst.msk [vmem:[#allocation3 + $0x4] sm:$0xf] %vm8418_vm6, %v4533_v42  ;;  %5891 = vmatprep.subr.msk.bf16.mxu0 %vm8424_vm14, %v5999_v5  ;;  %vm8425_vm6 = vmmov %vm8424_vm14  ;;  %vm8430_vm14 = vcmask 126016  }
 0x362   : > { %3824 = vrot.lane.b32.xlu0 %v7494_v12, %s8382_s25  ;;  %4735 = vrot.lane.b32.xlu1 %v7894_v35, %s8383_s22  ;;  %v4675_v12 = vshll.u32 %v7871_v30, 16  ;;  %v4695_v23 = vrot.slane %v4693_v38, 7  ;;  %s8460_s25 = sand.u32 1, %s6058_s10  }
 0x363   : > { %v3786_v32 = vpop.permute.xlu1 %3785 }
 0x364   : > { %3804 = vst.msk [vmem:[#allocation4 + $0x30] sm:$0xf] %vm3797_vm9, %v3786_v32  ;;  %v4535_v20 = vpop.permute.xlu0 %4534  ;;  %v7919_v9 = vor.u32 %v4675_v12, %v4674_v47  ;;  %v7973_v1 = vor.u32 %v4696_v48, %v4695_v23  ;;  %v4688_v32 = vrot.slane %v4686_v41, 7 }
 0x365   : > { %4555 = vst.msk [vmem:[#allocation3 + $0x8] sm:$0xf] %vm8419_vm4, %v4535_v20  ;;  %vm8426_vm4 = vmmov %vm8425_vm6  ;;  %v4443_v20 = vld [vmem:[#allocation3 + $0x1c] sm:$0xf] }
 0x366   : > { %4739 = vrot.lane.b32.xlu0 %v7902_v63, %s8383_s22  ;;  %4767 = vrot.lane.b32.xlu1 %v7907_v61, %s8394_s16 }
 0x367   : > { %v3821_v56 = vpop.permute.xlu1 %3820  ;;  %5892 = vmatprep.subr.msk.bf16.mxu1 %vm8426_vm4, %v5999_v5  ;;  %vm8432_vm4 = vmmov %vm8430_vm14 }
 0x368   : > { %v3852_v8 = vsel %vm7723_vm15, %v3821_v56, %v3851_v0  ;;  %v4567_v62 = vpop.permute.xlu0 %4566 }
 0x369   : > { %3853 = vst [vmem:[#allocation4 + $0x28] sm:$0xf] %v3852_v8  ;;  %4589 = vst.msk [vmem:[#allocation3 + $0x4] sm:$0xf] %vm8420_vm10, %v4567_v62  ;;  %vm8427_vm10 = vcmask 388416  }
 0x36a   : > { %4771 = vrot.lane.b32.xlu0 %v7919_v9, %s8394_s16  ;;  %4737 = vrot.lane.b32.xlu1 %v7921_v44, %s8383_s22  ;;  %s8114_s22 = scalar_lea.sflag [#allocation6], %s8460_s25 }
 0x36b   : > { %v4571_v22 = vpop.permute.xlu1 %4570 }
 0x36c   : > { %4591 = vst.msk [vmem:[#allocation3 + $0xc] sm:$0xf] %vm8421_vm7, %v4571_v22  ;;  %v3819_v24 = vpop.permute.xlu0 %3818  ;;  %vm8428_vm7 = vmmov %vm8427_vm10 }
 0x36d   : > { %v3849_v14 = vsel %vm7723_vm15, %v3819_v24, %v3848_v28 }
 0x36e   : > { %3850 = vst [vmem:[#allocation4 + $0x20] sm:$0xf] %v3849_v14  ;;  %4813 = vrot.lane.b32.xlu0 %v7855_v55, %s8409_s29  ;;  %4769 = vrot.lane.b32.xlu1 %v4670_v51, %s8394_s16  ;;  %v4682_v55 = vshll.u32 %v7894_v35, 16 }
 0x36f   : > { %v3867_v49 = vpop.permute.xlu1 %3866 }
 0x370   : > { %v4706_v27 = vld [vmem:[#allocation3 + $0x4] sm:$0xf]  ;;  %v3893_v17 = vsel %vm7747_vm1, %v3867_v49, %v3892_v26  ;;  %v4569_v18 = vpop.permute.xlu0 %4568  ;;  %v7956_v29 = vor.u32 %v4682_v55, %v4681_v59  ;;  %v3854_v59 = vld [vmem:[#allocation4 + $0x30] sm:$0xf] }
 0x371   : > { %v4707_v52 = vsel %vm8422_vm5, %v7885_v21, %v4706_v27  ;;  %3894 = vst [vmem:[#allocation4 + $0x18] sm:$0xf] %v3893_v17  ;;  %4590 = vst.msk [vmem:[#allocation3 + $0x8] sm:$0xf] %vm8423_vm3, %v4569_v18  ;;  %v4922_v21 = vsel %vm8425_vm6, %v5999_v5, 0 }
 0x372   : > { %4708 = vst [vmem:[#allocation3 + $0x4] sm:$0xf] %v4707_v52  ;;  %4817 = vrot.lane.b32.xlu0 %v7853_v2, %s8409_s29  ;;  %3916 = vrot.lane.b32.xlu1 %v7415_v50, %s8415_s0  ;;  %v7958_v2 = vpack.c.bf16 %v4620_v15, %v4620_v15  ;;  %vm8429_vm3 = vmmov %vm8428_vm7  ;;  %v3770_v27 = vld [vmem:[#allocation4 + $0x38] sm:$0xf]  ;;  %s5640_s0 = sshll.u32 %s6187_s21, 5 }
 0x373   : > { %v4712_v53 = vld [vmem:[#allocation3 + $0xc] sm:$0xf]  ;;  %v3911_v39 = vpop.permute.xlu1 %3910  ;;  %5870 = vmatpush3.bf16.msra.mxu0 %v4922_v21  ;;  %5888 = vmatpush3.bf16.msra.mxu1 %v4922_v21  ;;  %vm8431_vm6 = vmmov %vm8429_vm3  ;;  %s8052_s1 = scalar_lea.vmem %s8215_s8, %s5640_s0 }
 0x374   : > { %v4713_v33 = vsel %vm8422_vm5, %v4670_v51, %v4712_v53  ;;  %3929 = vst.msk [vmem:[#allocation4 + $0x18] sm:$0xf] %vm3925_vm2, %v3911_v39  ;;  %v3865_v45 = vpop.permute.xlu0 %3864  ;;  %v4759_v7 = vshrl.u32 %v7958_v2, 16  ;;  %v4762_v56 = vshll.u32 %v7958_v2, 16 }
 0x375   : > { %4714 = vst [vmem:[#allocation3 + $0xc] sm:$0xf] %v4713_v33  ;;  %v3890_v50 = vsel %vm7747_vm1, %v3865_v45, %v3889_v25  ;;  %v3895_v45 = vld [vmem:[#allocation4 + $0x20] sm:$0xf] }
 0x376   : > { %3891 = vst [vmem:[#allocation4 + $0x10] sm:$0xf] %v3890_v50  ;;  %4773 = vrot.lane.b32.xlu0 %v7956_v29, %s8394_s16  ;;  %4815 = vrot.lane.b32.xlu1 %v7862_v37, %s8409_s29  ;;  %v4689_v37 = vshll.u32 %v7921_v44, 16  ;;  %v4761_v12 = vrot.slane %v4759_v7, 7 }
 0x377   : > { %v4409_v40 = vpop.permute.xlu1 %4408 }
 0x378   : > { %v4709_v60 = vld [vmem:[#allocation3 + $0x8] sm:$0xf]  ;;  %v4438_v58 = vsel %vm6480_vm0, %v4409_v40, %v4437_v6  ;;  %v3909_v42 = vpop.permute.xlu0 %3908  ;;  %v7989_v0 = vor.u32 %v4689_v37, %v4688_v32  ;;  %v4764_v34 = vor.u32 %v4762_v56, %v4761_v12 }
 0x379   : > { %v4710_v16 = vsel %vm8422_vm5, %v7907_v61, %v4709_v60  ;;  %4439 = vst [vmem:[#allocation3 + $0x14] sm:$0xf] %v4438_v58  ;;  %3928 = vst.msk [vmem:[#allocation4 + $0x10] sm:$0xf] %vm3925_vm2, %v3909_v42 }
 0x37a   : > { %4711 = vst [vmem:[#allocation3 + $0x8] sm:$0xf] %v4710_v16  ;;  %4777 = vrot.lane.b32.xlu0 %v7973_v1, %s8394_s16  ;;  %4819 = vrot.lane.b32.xlu1 %v7871_v30, %s8409_s29  ;;  %v4440_v30 = vld [vmem:[#allocation3 + $0x18] sm:$0xf] }
 0x37b   : > { %v4413_v47 = vpop.permute.xlu1 %4412 }
 0x37c   : > { %v4444_v54 = vsel %vm6480_vm0, %v4413_v47, %v4443_v20  ;;  %v4407_v61 = vpop.permute.xlu0 %4406 }
 0x37d   : > { %4445 = vst [vmem:[#allocation3 + $0x1c] sm:$0xf] %v4444_v54  ;;  %v4435_v4 = vsel %vm6480_vm0, %v4407_v61, %v4434_v3 }
 0x37e   : > { %4436 = vst [vmem:[#allocation3 + $0x10] sm:$0xf] %v4435_v4  ;;  %4821 = vrot.lane.b32.xlu0 %v7894_v35, %s8409_s29  ;;  %4775 = vrot.lane.b32.xlu1 %v7989_v0, %s8394_s16 }
 0x37f   : > { %v4457_v8 = vpop.permute.xlu1 %4456 }
 0x380   : > { %4475 = vst.msk [vmem:[#allocation3 + $0x14] sm:$0xf] %vm8427_vm10, %v4457_v8  ;;  %v4411_v62 = vpop.permute.xlu0 %4410  ;;  %v5989_v57 = vld [vmem:[#allocation4 + $0x10] ss:$8 sps:$4 sm:$0xff]   ;;  %vm8433_vm10 = vmmov %vm8432_vm4 }
 0x381   : > { %v4441_v22 = vsel %vm6480_vm0, %v4411_v62, %v4440_v30  ;;  %4131 = vmatmul.mubr.bf16.gmra.mrb[12].mxu1 %v5989_v57 }
 0x382   : > { %4442 = vst [vmem:[#allocation3 + $0x18] sm:$0xf] %v4441_v22  ;;  %4825 = vrot.lane.b32.xlu0 %v7902_v63, %s8409_s29  ;;  %4779 = vrot.lane.b32.xlu1 %v4764_v34, %s8394_s16  ;;  %s6004_s16 = scalar_lea.vmem %s8110_s27, 1024 }
 0x383   : > { %v4459_v35 = vpop.permute.xlu1 %4458  ;;  %p6005_p11 = scmp.ne.s32.totalorder %s8110_s27, %s6004_s16 }
 0x384   : > { %4476 = vst.msk [vmem:[#allocation3 + $0x18] sm:$0xf] %vm8428_vm7, %v4459_v35  ;;  %v4455_v28 = vpop.permute.xlu0 %4454  ;;  %vm8434_vm7 = vmmov %vm8432_vm4  ;;  %v5992_v35 = vld [vmem:[#allocation4 + $0x24] ss:$8 sps:$4 sm:$0xff]  }
 0x385   : > { %4474 = vst.msk [vmem:[#allocation3 + $0x10] sm:$0xf] %vm8429_vm3, %v4455_v28  ;;  %vm8435_vm3 = vcmask 519616   ;;  %5562 = vmatprep.mubr.msk.bf16.mxu1 %vm3429_vm11, %v5992_v35  ;;  %p6006_p12 = pnand %p6005_p11, %p6170_p5 }
 0x386   : > { %4823 = vrot.lane.b32.xlu1 %v7921_v44, %s8409_s29 }
 0x387   : > { %v4539_v24 = vpop.permute.xlu1 %4538  ;;  %p6007_p13 = pneg %p6006_p12 }
 0x388   : > { %4557 = vst.msk [vmem:[#allocation3 + $0x10] sm:$0xf] %vm8430_vm14, %v4539_v24  ;;  %v4399_v14 = vpop.permute.xlu0 %4398  ;;  %vm8437_vm14 = vmmov %vm8431_vm6 }
 0x389   : > { %v4423_v63 = vsel %vm6480_vm0, %v4399_v14, %v4422_v36  ;;  %vm8436_vm0 = vmmov %vm8435_vm3 }
 0x38a   : > { %4424 = vst [vmem:[#allocation3] sm:$0xf] %v4423_v63  ;;  %4827 = vrot.lane.b32.xlu1 %v7958_v2, %s8409_s29  ;;  %v3898_v2 = vld [vmem:[#allocation4 + $0x28] sm:$0xf]  ;;  %s6010_s29 = scalar_lea.vmem %s6009_s23, 2048 }
 0x38b   : > { %p6012_p1 = scmp.lt.s32.totalorder %s6010_s29, %s6004_s16 }
 0x38c   : > { %v4461_v51 = vpop.permute.xlu0 %4460 }
 0x38d   : > { %4477 = vst.msk [vmem:[#allocation3 + $0x1c] sm:$0xf] %vm8431_vm6, %v4461_v51  ;;  %vm8439_vm6 = vmmov %vm8436_vm0  ;;  %p6013_p2 = por %p6012_p1, %p6011_p0 }
 0x38f   : > { %p6014_p3 = pnand %p6013_p2, %p6007_p13 }
 0x3a4   : > { %v4541_v26 = vpop.permute.xlu0 %4540 }
 0x3a5   : > { %4558 = vst.msk [vmem:[#allocation3 + $0x14] sm:$0xf] %vm8432_vm4, %v4541_v26  ;;  %vm8440_vm4 = vmmov %vm8436_vm0 }
 0x3a6   : > { %v4543_v49 = vpop.permute.xlu1 %4542 }
 0x3a7   : > { %4559 = vst.msk [vmem:[#allocation3 + $0x18] sm:$0xf] %vm8433_vm10, %v4543_v49  ;;  %vm8441_vm10 = vcmask 191616  }
 0x3a8   : > { %v4545_v44 = vpop.permute.xlu0 %4544 }
 0x3a9   : > { %4560 = vst.msk [vmem:[#allocation3 + $0x1c] sm:$0xf] %vm8434_vm7, %v4545_v44  ;;  %vm8442_vm7 = vmmov %vm8441_vm10 }
 0x3aa   : > { %v4573_v38 = vpop.permute.xlu1 %4572 }
 0x3ab   : > { %4592 = vst.msk [vmem:[#allocation3 + $0x10] sm:$0xf] %vm8435_vm3, %v4573_v38 }
 0x3ac   : > { %v4575_v43 = vpop.permute.xlu0 %4574 }
 0x3ad   : > { %4593 = vst.msk [vmem:[#allocation3 + $0x14] sm:$0xf] %vm8436_vm0, %v4575_v43 }
 0x3ae   : > { %v3738_v17 = vpop.permute.xlu1 %3737 }
 0x3af   : > { %v3771_v18 = vsel %vm7688_vm12, %v3738_v17, %v3770_v27  ;;  %vm8438_vm12 = vmmov %vm8436_vm0 }
 0x3b0   : > { %3772 = vst [vmem:[#allocation4 + $0x38] sm:$0xf] %v3771_v18  ;;  %v3823_v15 = vpop.permute.xlu0 %3822 }
 0x3b1   : > { %v3855_v52 = vsel %vm7723_vm15, %v3823_v15, %v3854_v59 }
 0x3b2   : > { %v4715_v55 = vld [vmem:[#allocation3 + $0x10] sm:$0xf]  ;;  %3856 = vst [vmem:[#allocation4 + $0x30] sm:$0xf] %v3855_v52  ;;  %v4447_v53 = vpop.permute.xlu1 %4446 }
 0x3b3   : > { %v4716_v39 = vsel %vm8422_vm5, %v7919_v9, %v4715_v55  ;;  %4470 = vst.msk [vmem:[#allocation3] sm:$0xf] %vm8437_vm14, %v4447_v53 }
 0x3b4   : > { %4717 = vst [vmem:[#allocation3 + $0x10] sm:$0xf] %v4716_v39  ;;  %v4718_v5 = vld [vmem:[#allocation3 + $0x14] sm:$0xf]  ;;  %v4577_v33 = vpop.permute.xlu0 %4576 }
 0x3b5   : > { %v4719_v31 = vsel %vm8422_vm5, %v7956_v29, %v4718_v5  ;;  %4594 = vst.msk [vmem:[#allocation3 + $0x18] sm:$0xf] %vm8438_vm12, %v4577_v33  ;;  %v5996_v33 = vld [vmem:[#allocation4 + $0x34] ss:$8 sps:$4 sm:$0xff]  }
 0x3b6   : > { %4720 = vst [vmem:[#allocation3 + $0x14] sm:$0xf] %v4719_v31  ;;  %v4579_v25 = vpop.permute.xlu1 %4578 }
 0x3b7   : > { %4595 = vst.msk [vmem:[#allocation3 + $0x1c] sm:$0xf] %vm8439_vm6, %v4579_v25 }
 0x3b8   : > { %v3869_v23 = vpop.permute.xlu0 %3868 }
 0x3b9   : > { %v3896_v9 = vsel %vm7747_vm1, %v3869_v23, %v3895_v45 }
 0x3ba   : > { %3897 = vst [vmem:[#allocation4 + $0x20] sm:$0xf] %v3896_v9  ;;  %v3871_v41 = vpop.permute.xlu1 %3870 }
 0x3bb   : > { %v3899_v50 = vsel %vm7747_vm1, %v3871_v41, %v3898_v2 }
 0x3bc   : > { %v4721_v21 = vld [vmem:[#allocation3 + $0x18] sm:$0xf]  ;;  %3900 = vst [vmem:[#allocation4 + $0x28] sm:$0xf] %v3899_v50  ;;  %v4565_v29 = vpop.permute.xlu0 %4564 }
 0x3bd   : > { %v4722_v48 = vsel %vm8422_vm5, %v7989_v0, %v4721_v21  ;;  %4588 = vst.msk [vmem:[#allocation3] sm:$0xf] %vm8440_vm4, %v4565_v29  ;;  %v3901_v0 = vld [vmem:[#allocation4 + $0x30] sm:$0xf]  ;;  %vm8453_vm4 = vcmask 588800  }
 0x3be   : > { %4723 = vst [vmem:[#allocation3 + $0x18] sm:$0xf] %v4722_v48  ;;  %v4724_v6 = vld [vmem:[#allocation3 + $0x1c] sm:$0xf] }
 0x3bf   : > { %v4725_v40 = vsel %vm8422_vm5, %v7973_v1, %v4724_v6  ;;  %vm8444_vm5 = vmmov %vm8442_vm7 }
 0x3c0   : > { %4726 = vst [vmem:[#allocation3 + $0x1c] sm:$0xf] %v4725_v40  ;;  %v3788_v60 = vpop.permute.xlu0 %3787  ;;  %vm8445_vm3 = vmmov %vm8444_vm5 }
 0x3c1   : > { %3805 = vst.msk [vmem:[#allocation4 + $0x38] sm:$0xf] %vm3797_vm9, %v3788_v60  ;;  %vm8443_vm9 = vmmov %vm8442_vm7 }
 0x3c2   : > { %vm8446_vm0 = vmmov %vm8445_vm3 }
 0x3c4   : > { %v4732_v58 = vpop.permute.xlu0 %4731  ;;  %v4728_v42 = vpop.permute.xlu1 %4727  ;;  %v4789_v61 = vld [vmem:[#allocation3] sm:$0xf] }
 0x3c5   : > { %4750 = vst.msk [vmem:[#allocation3 + $0xc] sm:$0xf] %vm8441_vm10, %v4732_v58 }
 0x3c6   : > { %4748 = vst.msk [vmem:[#allocation3 + $0x4] sm:$0xf] %vm8442_vm7, %v4728_v42  ;;  %vm8455_vm7 = vmmov %vm8453_vm4 }
 0x3c7   : > { %v4124_v11 = vpop.f32.mrb[8].mxu1 }
 0x3c8   : > { %v3915_v7 = vpop.permute.xlu0 %3914  ;;  %v4730_v1 = vpop.permute.xlu1 %4729  ;;  %v4155_v16 = vpack.c.bf16 %v4124_v11, %v4124_v11  ;;  %v3857_v30 = vld [vmem:[#allocation4 + $0x38] sm:$0xf] }
 0x3c9   : > { %3931 = vst.msk [vmem:[#allocation4 + $0x28] sm:$0xf] %vm3925_vm2, %v3915_v7  ;;  %v4126_v32 = vpop.f32.mrb[9].mxu1 }
 0x3ca   : > { %4749 = vst.msk [vmem:[#allocation3 + $0x8] sm:$0xf] %vm8443_vm9, %v4730_v1  ;;  %v4127_v37 = vpop.f32.mrb[10].mxu1 }
 0x3cb   : > { %4164 = vst.msk [vmem:[%s8052_s1] sm:$0xf] %vm3589_vm13, %v4155_v16  ;;  %v4156_v20 = vpack.c.bf16 %v4127_v37, %v4127_v37  ;;  %v4129_v47 = vpop.f32.mrb[11].mxu1 }
 0x3cc   : > { %v4734_v54 = vpop.permute.xlu0 %4733  ;;  %v3913_v3 = vpop.permute.xlu1 %3912  ;;  %v4798_v14 = vld [vmem:[#allocation3 + $0xc] sm:$0xf] }
 0x3cd   : > { %4751 = vst.msk [vmem:[#allocation3 + $0x10] sm:$0xf] %vm8444_vm5, %v4734_v54  ;;  %v4792_v10 = vld [vmem:[#allocation3 + $0x4] sm:$0xf] }
 0x3ce   : > { %4165 = vst.msk [vmem:[%s8052_s1 + $0x4] sm:$0xf] %vm3589_vm13, %v4156_v20 }
 0x3cf   : > { %3930 = vst.msk [vmem:[#allocation4 + $0x20] sm:$0xf] %vm3925_vm2, %v3913_v3 }
 0x3d0   : > { %v4766_v12 = vpop.permute.xlu0 %4765  ;;  %v3873_v56 = vpop.permute.xlu1 %3872  ;;  %v3967_v34 = vld [vmem:[#allocation4 + $0x28] sm:$0xff] }
 0x3d1   : > { %v4790_v4 = vsel %vm6607_vm8, %v4766_v12, %v4789_v61  ;;  %v3902_v8 = vsel %vm7747_vm1, %v3873_v56, %v3901_v0  ;;  %vm8448_vm1 = vcmask 585216   ;;  %v4795_v44 = vld [vmem:[#allocation3 + $0x8] sm:$0xf] }
 0x3d2   : > { %4791 = vst [vmem:[#allocation3] sm:$0xf] %v4790_v4  ;;  %3903 = vst [vmem:[#allocation4 + $0x30] sm:$0xf] %v3902_v8 }
 0x3d3   : > { %vm8449_vm14 = vmmov %vm8448_vm1 }
 0x3d4   : > { %v3825_v62 = vpop.permute.xlu0 %3824  ;;  %v4736_v57 = vpop.permute.xlu1 %4735  ;;  %v4801_v18 = vld [vmem:[#allocation3 + $0x10] sm:$0xf]  ;;  %vm8450_vm12 = vmmov %vm8448_vm1 }
 0x3d5   : > { %v3858_v19 = vsel %vm7723_vm15, %v3825_v62, %v3857_v30  ;;  %4752 = vst.msk [vmem:[#allocation3 + $0x14] sm:$0xf] %vm8445_vm3, %v4736_v57  ;;  %vm8447_vm15 = vmmov %vm8446_vm0 }
 0x3d6   : > { %v3966_v22 = vld [vmem:[#allocation4 + $0x20] sm:$0xff]  ;;  %3859 = vst [vmem:[#allocation4 + $0x38] sm:$0xf] %v3858_v19  ;;  %vm8451_vm6 = vmmov %vm8448_vm1 }
 0x3d7   : > { %v5547_v28 = vcombine.low %v3966_v22, %v3967_v34  ;;  %vm8454_vm10 = vmmov %vm8448_vm1 }
 0x3d8   : > { %v4740_v24 = vpop.permute.xlu0 %4739  ;;  %v4768_v36 = vpop.permute.xlu1 %4767  ;;  %vm8456_vm9 = vmmov %vm8448_vm1 }
 0x3d9   : > { %4139 = vmatmul.mubr.bf16.gmra.mrb[16].mxu1 %v5547_v28  ;;  %4754 = vst.msk [vmem:[#allocation3 + $0x1c] sm:$0xf] %vm8446_vm0, %v4740_v24  ;;  %v4793_v46 = vsel %vm6607_vm8, %v4768_v36, %v4792_v10  ;;  %vm8457_vm5 = vmmov %vm8448_vm1 }
 0x3da   : > { %4794 = vst [vmem:[#allocation3 + $0x4] sm:$0xf] %v4793_v46  ;;  %5563 = vmatprep.mubr.msk.bf16.mxu1 %vm3429_vm11, %v5996_v33  ;;  %vm8458_vm3 = vmmov %vm8453_vm4 }
 0x3db   : > { %vm8459_vm0 = vmmov %vm8458_vm3 }
 0x3dc   : > { %v4772_v63 = vpop.permute.xlu0 %4771  ;;  %v4738_v26 = vpop.permute.xlu1 %4737  ;;  %v4804_v45 = vld [vmem:[#allocation3 + $0x14] sm:$0xf] }
 0x3dd   : > { %v4799_v51 = vsel %vm6607_vm8, %v4772_v63, %v4798_v14  ;;  %4753 = vst.msk [vmem:[#allocation3 + $0x18] sm:$0xf] %vm8447_vm15, %v4738_v26 }
 0x3de   : > { %4800 = vst [vmem:[#allocation3 + $0xc] sm:$0xf] %v4799_v51 }
 0x3e0   : > { %v4814_v49 = vpop.permute.xlu0 %4813  ;;  %v4770_v38 = vpop.permute.xlu1 %4769  ;;  %v4810_v50 = vld [vmem:[#allocation3 + $0x1c] sm:$0xf] }
 0x3e1   : > { %4837 = vst.msk [vmem:[#allocation3] sm:$0xf] %vm8448_vm1, %v4814_v49  ;;  %v4796_v43 = vsel %vm6607_vm8, %v4770_v38, %v4795_v44 }
 0x3e2   : > { %4797 = vst [vmem:[#allocation3 + $0x8] sm:$0xf] %v4796_v43 }
 0x3e4   : > { %v4818_v27 = vpop.permute.xlu0 %4817  ;;  %v3917_v17 = vpop.permute.xlu1 %3916  ;;  %v4807_v53 = vld [vmem:[#allocation3 + $0x18] sm:$0xf] }
 0x3e5   : > { %4839 = vst.msk [vmem:[#allocation3 + $0x8] sm:$0xf] %vm8449_vm14, %v4818_v27 }
 0x3e6   : > { %3932 = vst.msk [vmem:[#allocation4 + $0x30] sm:$0xf] %vm3925_vm2, %v3917_v17  ;;  %vm8452_vm2 = vmmov %vm8448_vm1 }
 0x3e8   : > { %v4774_v59 = vpop.permute.xlu0 %4773  ;;  %v4816_v52 = vpop.permute.xlu1 %4815 }
 0x3e9   : > { %v4802_v15 = vsel %vm6607_vm8, %v4774_v59, %v4801_v18  ;;  %4838 = vst.msk [vmem:[#allocation3 + $0x4] sm:$0xf] %vm8450_vm12, %v4816_v52 }
 0x3ea   : > { %4803 = vst [vmem:[#allocation3 + $0x10] sm:$0xf] %v4802_v15 }
 0x3ec   : > { %v4778_v55 = vpop.permute.xlu0 %4777  ;;  %v4820_v5 = vpop.permute.xlu1 %4819 }
 0x3ed   : > { %v4808_v39 = vsel %vm6607_vm8, %v4778_v55, %v4807_v53  ;;  %v5998_v31 = vld [vmem:[#allocation4 + $0x30] ss:$8 sps:$4 sm:$0xff]   ;;  %4840 = vst.msk [vmem:[#allocation3 + $0xc] sm:$0xf] %vm8451_vm6, %v4820_v5 }
 0x3ee   : > { %4809 = vst [vmem:[#allocation3 + $0x18] sm:$0xf] %v4808_v39  ;;  %4147 = vmatmul.mubr.bf16.gmra.mrb[20].mxu1 %v5998_v31 }
 0x3f0   : > { %v4822_v25 = vpop.permute.xlu0 %4821  ;;  %v4776_v23 = vpop.permute.xlu1 %4775  ;;  %v6000_v9 = vld [vmem:[#allocation3] sm:$0xff]  }
 0x3f1   : > { %4841 = vst.msk [vmem:[#allocation3 + $0x10] sm:$0xf] %vm8452_vm2, %v4822_v25  ;;  %v4805_v2 = vsel %vm6607_vm8, %v4776_v23, %v4804_v45  ;;  %5871 = vmatprep.mubr.msk.bf16.mxu0 %vm8453_vm4, %v6000_v9 }
 0x3f2   : > { %4806 = vst [vmem:[#allocation3 + $0x14] sm:$0xf] %v4805_v2 }
 0x3f4   : > { %v4826_v41 = vpop.permute.xlu0 %4825  ;;  %v4780_v21 = vpop.permute.xlu1 %4779  ;;  %v6001_v29 = vld [vmem:[#allocation3 + $0x8] sm:$0xff]  }
 0x3f5   : > { %4843 = vst.msk [vmem:[#allocation3 + $0x18] sm:$0xf] %vm8454_vm10, %v4826_v41  ;;  %v4811_v48 = vsel %vm6607_vm8, %v4780_v21, %v4810_v50  ;;  %5872 = vmatmul.mubr.msk.bf16.vlgmr.msra.gmra.mrb[32].mxu0 %vm8455_vm7, %v6001_v29 }
 0x3f6   : > { %4812 = vst [vmem:[#allocation3 + $0x1c] sm:$0xf] %v4811_v48 }
 0x3f8   : > { %v4824_v6 = vpop.permute.xlu1 %4823 }
 0x3f9   : > { %4842 = vst.msk [vmem:[#allocation3 + $0x14] sm:$0xf] %vm8456_vm9, %v4824_v6 }
 0x3fc   : > { %v4828_v40 = vpop.permute.xlu1 %4827 }
 0x3fd   : > { %4844 = vst.msk [vmem:[#allocation3 + $0x1c] sm:$0xf] %vm8457_vm5, %v4828_v40 }
 0x400   : > { %v6002_v60 = vld [vmem:[#allocation3 + $0x10] sm:$0xff]  }
 0x401   : > { %5875 = vmatprep.mubr.msk.bf16.mxu1 %vm8458_vm3, %v6002_v60 }
 0x404   : > { %v6003_v58 = vld [vmem:[#allocation3 + $0x18] sm:$0xff]  }
 0x405   : > { %5876 = vmatmul.mubr.msk.bf16.vlgmr.msra.gmra.mrb[24].mxu1 %vm8459_vm0, %v6003_v58 }
 0x454   : > { %v4132_v13 = vpop.f32.mrb[12].mxu1 }
 0x455   : > { %v4157_v42 = vpack.c.bf16 %v4132_v13, %v4132_v13  ;;  %v4134_v7 = vpop.f32.mrb[13].mxu1 }
 0x456   : > { %v4135_v11 = vpop.f32.mrb[14].mxu1 }
 0x457   : > { %4166 = vst.msk [vmem:[%s8052_s1 + $0x8] sm:$0xf] %vm3589_vm13, %v4157_v42  ;;  %v4158_v1 = vpack.c.bf16 %v4135_v11, %v4135_v11  ;;  %v4137_v16 = vpop.f32.mrb[15].mxu1 }
 0x459   : > { %4167 = vst.msk [vmem:[%s8052_s1 + $0xc] sm:$0xf] %vm3589_vm13, %v4158_v1 }
 0x45a   : > { %6017 = shalt.err (!%p6014_p3)
}
 0x45b   : > { %s6018_s28 = scalar_lea.hbm %s8108_s26, 1024  ;;  %s6022_s25 = scalar_lea.hbm %s8213_s6, 2048 }
 0x45c   : > { %p6019_p4 = scmp.ne.s32.totalorder %s8108_s26, %s6018_s28  ;;  %p6023_p9 = scmp.lt.u32.totalorder %s8108_s26, %s8213_s6 }
 0x45d   : > { %p6024_p10 = scmp.lt.u32.totalorder %s6022_s25, %s6018_s28  ;;  %p6026_p12 = scmp.lt.u32.totalorder %s6018_s28, %s8108_s26 }
 0x45e   : > { %p6020_p7 = pnand %p6019_p4, %p6170_p5 }
 0x45f   : > { %p6025_p11 = por %p6024_p10, %p6023_p9 }
 0x460   : > { %p6021_p8 = pneg %p6020_p7 }
 0x461   : > { %p6027_p13 = por %p6026_p12, %p6025_p11 }
 0x463   : > { %p6028_p0 = pnand %p6027_p13, %p6021_p8 }
 0x465   : > { %6031 = shalt.err (!%p6028_p0)
}
 0x466   : > { %s6081_s16 = smov 128   ;;  %vm5026_vm8 = vcmask 122880  }
 0x467   : > { %5893 = dma.vmem_to_hbm [thread:$0]  (%p6170_p5), %s8110_s27, 1024, %s8108_s26, %s8114_s22, %s6081_s16, %s6081_s16, %s8275_s17  }
 0x468   : > { %s8152_s27 = scalar_lea.vmem %s8214_s7, %s5640_s0  ;;  %s5256_s0 = sshll.u32 %s6187_s21, 1 }
 0x469   : > { %s385_s22 = scalar_lea.vmem %s8216_s9, %s5256_s0 }
 0x4ac   : > { %v4140_v32 = vpop.f32.mrb[16].mxu1 }
 0x4ad   : > { %v4159_v37 = vpack.c.bf16 %v4140_v32, %v4140_v32  ;;  %v4142_v20 = vpop.f32.mrb[17].mxu1 }
 0x4ae   : > { %v4143_v47 = vpop.f32.mrb[18].mxu1 }
 0x4af   : > { %4168 = vst.msk [vmem:[%s8052_s1 + $0x10] sm:$0xf] %vm3589_vm13, %v4159_v37  ;;  %v4160_v54 = vpack.c.bf16 %v4143_v47, %v4143_v47  ;;  %v4145_v3 = vpop.f32.mrb[19].mxu1 }
 0x4b1   : > { %4169 = vst.msk [vmem:[%s8052_s1 + $0x14] sm:$0xf] %vm3589_vm13, %v4160_v54 }
 0x4c1   : > { %v4148_v61 = vpop.f32.mrb[20].mxu1 }
 0x4c2   : > { %v4161_v12 = vpack.c.bf16 %v4148_v61, %v4148_v61  ;;  %v4150_v4 = vpop.f32.mrb[21].mxu1 }
 0x4c3   : > { %v4151_v0 = vpop.f32.mrb[22].mxu1 }
 0x4c4   : > { %4170 = vst.msk [vmem:[%s8052_s1 + $0x18] sm:$0xf] %vm3589_vm13, %v4161_v12  ;;  %v4162_v56 = vpack.c.bf16 %v4151_v0, %v4151_v0  ;;  %v4153_v8 = vpop.f32.mrb[23].mxu1 }
 0x4c6   : > { %4171 = vst.msk [vmem:[%s8052_s1 + $0x1c] sm:$0xf] %vm3589_vm13, %v4162_v56 }
 0x4c8   : > { %v5873_v30 = vpop.f32.mrb[32].mxu0 }
 0x4c9   : > { %v4991_v62 = vpack.c.bf16 %v5873_v30, %v5873_v30  ;;  %v4958_v19 = vpop.f32.mrb[33].mxu0  ;;  %v5030_v35 = vmul.f32 %v5873_v30, %v5873_v30  ;;  %v5008_v51 = vsel %vm3429_vm11, %v5873_v30, 0.0 }
 0x4ca   : > { %v4989_v57 = vpack.c.bf16 %v4958_v19, %v4958_v19  ;;  %v5028_v22 = vmul.f32 %v4958_v19, %v4958_v19  ;;  %v5874_v34 = vpop.f32.mrb[34].mxu0  ;;  %v5005_v10 = vsel %vm3429_vm11, %v4958_v19, 0.0 }
 0x4cb   : > { %4999 = vst.msk [vmem:[%s8152_s27 + $0x8] sm:$0xf] %vm3589_vm13, %v4991_v62  ;;  %v4992_v28 = vpack.c.bf16 %v5874_v34, %v5874_v34  ;;  %v4961_v24 = vpop.f32.mrb[35].mxu0  ;;  %v5031_v49 = vmul.f32 %v5874_v34, %v5874_v34  ;;  %v5039_v27 = vsel %vm3429_vm11, %v5030_v35, 0.0  ;;  %v5010_v17 = vsel %vm3429_vm11, %v5874_v34, 0.0 }
 0x4cc   : > { %4997 = vst.msk [vmem:[%s8152_s27] sm:$0xf] %vm3589_vm13, %v4989_v57  ;;  %v4990_v36 = vpack.c.bf16 %v4961_v24, %v4961_v24  ;;  %v5006_v46 = vsel %vm3429_vm11, %v4961_v24, 0.0  ;;  %v5029_v14 = vmul.f32 %v4961_v24, %v4961_v24  ;;  %v5036_v26 = vsel %vm3429_vm11, %v5028_v22, 0.0 }
 0x4cd   : > { %5000 = vst.msk [vmem:[%s8152_s27 + $0xc] sm:$0xf] %vm3589_vm13, %v4992_v28  ;;  %v5007_v63 = vadd.f32 %v5006_v46, %v5005_v10  ;;  %v5041_v15 = vsel %vm3429_vm11, %v5031_v49, 0.0 }
 0x4ce   : > { %4998 = vst.msk [vmem:[%s8152_s27 + $0x4] sm:$0xf] %vm3589_vm13, %v4990_v36  ;;  %v5037_v44 = vsel %vm3429_vm11, %v5029_v14, 0.0 }
 0x4cf   : > { %v5009_v38 = vadd.f32 %v5008_v51, %v5007_v63  ;;  %v5038_v43 = vadd.f32 %v5037_v44, %v5036_v26 }
 0x4d1   : > { %v5040_v18 = vadd.f32 %v5039_v27, %v5038_v43  ;;  %v5011_v59 = vadd.f32 %v5010_v17, %v5009_v38 }
 0x4d3   : > { %v5042_v52 = vadd.f32 %v5041_v15, %v5040_v18 }
 0x4d8   : > { %v5877_v55 = vpop.f32.mrb[24].mxu1 }
 0x4d9   : > { %v4995_v53 = vpack.c.bf16 %v5877_v55, %v5877_v55  ;;  %v4974_v39 = vpop.f32.mrb[25].mxu1  ;;  %v5034_v21 = vmul.f32 %v5877_v55, %v5877_v55  ;;  %v5016_v40 = vsel %vm3429_vm11, %v5877_v55, 0.0 }
 0x4da   : > { %v4993_v5 = vpack.c.bf16 %v4974_v39, %v4974_v39  ;;  %v5012_v33 = vsel %vm3429_vm11, %v4974_v39, 0.0  ;;  %v5032_v31 = vmul.f32 %v4974_v39, %v4974_v39  ;;  %v5878_v25 = vpop.f32.mrb[26].mxu1 }
 0x4db   : > { %5003 = vst.msk [vmem:[%s8152_s27 + $0x18] sm:$0xf] %vm3589_vm13, %v4995_v53  ;;  %v5013_v45 = vadd.f32 %v5012_v33, %v5011_v59  ;;  %v4996_v23 = vpack.c.bf16 %v5878_v25, %v5878_v25  ;;  %v4977_v9 = vpop.f32.mrb[27].mxu1  ;;  %v5035_v60 = vmul.f32 %v5878_v25, %v5878_v25  ;;  %v5018_v42 = vsel %vm3429_vm11, %v5878_v25, 0.0 }
 0x4dc   : > { %5001 = vst.msk [vmem:[%s8152_s27 + $0x10] sm:$0xf] %vm3589_vm13, %v4993_v5  ;;  %v5043_v2 = vsel %vm3429_vm11, %v5032_v31, 0.0  ;;  %v4994_v41 = vpack.c.bf16 %v4977_v9, %v4977_v9  ;;  %v5014_v50 = vsel %vm3429_vm11, %v4977_v9, 0.0  ;;  %v5033_v6 = vmul.f32 %v4977_v9, %v4977_v9 }
 0x4dd   : > { %v5044_v29 = vadd.f32 %v5043_v2, %v5042_v52  ;;  %5004 = vst.msk [vmem:[%s8152_s27 + $0x1c] sm:$0xf] %vm3589_vm13, %v4996_v23  ;;  %v5015_v48 = vadd.f32 %v5014_v50, %v5013_v45  ;;  %v5047_v11 = vsel %vm3429_vm11, %v5034_v21, 0.0  ;;  %v5049_v32 = vsel %vm3429_vm11, %v5035_v60, 0.0 }
 0x4de   : > { %5002 = vst.msk [vmem:[%s8152_s27 + $0x14] sm:$0xf] %vm3589_vm13, %v4994_v41  ;;  %v5045_v13 = vsel %vm3429_vm11, %v5033_v6, 0.0 }
 0x4df   : > { %v5017_v58 = vadd.f32 %v5016_v40, %v5015_v48  ;;  %v5046_v7 = vadd.f32 %v5045_v13, %v5044_v29 }
 0x4e1   : > { %v5019_v1 = vadd.f32 %v5018_v42, %v5017_v58  ;;  %v5048_v16 = vadd.f32 %v5047_v11, %v5046_v7 }
 0x4e3   : > { %v5020_v37 = vrot.slane %v5019_v1, 4  ;;  %v5050_v20 = vadd.f32 %v5049_v32, %v5048_v16 }
 0x4e5   : > { %v5021_v47 = vadd.f32 %v5020_v37, %v5019_v1  ;;  %v5051_v54 = vrot.slane %v5050_v20, 4 }
 0x4e7   : > { %v5022_v3 = vrot.slane %v5021_v47, 2  ;;  %v5052_v61 = vadd.f32 %v5051_v54, %v5050_v20 }
 0x4e9   : > { %v5023_v12 = vadd.f32 %v5022_v3, %v5021_v47  ;;  %v5053_v4 = vrot.slane %v5052_v61, 2 }
 0x4eb   : > { %v5024_v0 = vrot.slane %v5023_v12, 1  ;;  %v5054_v56 = vadd.f32 %v5053_v4, %v5052_v61 }
 0x4ed   : > { %v5025_v8 = vadd.f32 %v5024_v0, %v5023_v12  ;;  %v5055_v30 = vrot.slane %v5054_v56, 1 }
 0x4ef   : > { %5027 = vst.msk [vmem:[%s385_s22] sm:$0x1] %vm5026_vm8, %v5025_v8  ;;  %v5056_v62 = vadd.f32 %v5055_v30, %v5054_v56 }
 0x4f1   : > { %5057 = vst.msk [vmem:[%s385_s22 + $0x1] sm:$0x1] %vm5026_vm8, %v5056_v62 }
 0x4f2 PF: > { %p5899_p5 = scmp.ge.s32.totalorder %s6066_s12, 2  ;;  %s5110_s21 = sand.u32 1, %s6054_s30  }
 0x4f3   : > { %s5111_s29 = scalar_lea.sflag [#allocation6], %s5110_s21 }
 0x4f4   : > { %p5896_p1 = pnand %p5899_p5, %p6174_p6 }
 0x4f6   : > { %6049 = dma.done.wait (!%p5896_p1), %s5111_s29, 1024  }
 0x4f7   : > { %6051 = vsyncadd (!%p5896_p1), %s5111_s29, 4294966272  ;;  %p20_p2 = scmp.ge.s32.totalorder %s6157_s15, 4   ;;  %s8461_s30 = smov %s6058_s10 }
 0x4f8   : > { %s8462_s10 = smov %s6062_s11  ;;  %s8463_s11 = smov %s6168_s18 }
 0x4f9   : > { %s8464_s12 = smov %s6157_s15  ;;  %22 = sbr.rel (!%p20_p2) target bundleno = 6 (0x6), region = 136 }
 0x500   :  { %5139 = vsyncpa [#allocation6], 1 }
 0x501   :  { %5141 = vsyncpa [#allocation6 + $0x1], 1 }

</bundles_post_ra>
